<compile_context>
chip_gen: v7x
topology: tpu7x:2x2x1
jax: 0.10.0
libtpu: 0.0.40
codegen_flags: <defaults>
</compile_context>

<pallas_src>
import functools

import jax
import jax.numpy as jnp
import numpy as np
from jax.experimental import pallas as pl
from jax.experimental.pallas import tpu as pltpu


# ---------------------------------------------------------------------------
# Fused kernel: one batch element per grid step, everything VMEM-resident.
# ---------------------------------------------------------------------------
def _bp_kernel(x_ref, wbn_ref, bbn_ref, w1_ref, b1_ref, w2_ref, b2_ref,
               w3_ref, b3_ref, o_ref, col_s_ref, col_b_ref, *, H, W, Cp):
    """Fused BackProjection block (scale=2) in sub-pixel phase form.

    Every convolution is a 3x3 / stride-1 / pad-1 conv on the low-res HxW grid
    (the 2x2 high-res phases are packed into channels).  Each conv is one
    big-K MXU dot: a bf16 im2col scratch [H, W, 9*Cin] is filled with 9
    shifted copies (out-of-bounds stripes zeroed per tap), then a single
    [HW, 9*Cin] @ [9*Cin, Cout] bf16 matmul with f32 accumulation.
    Bias / ReLU / residual / final a0+a1 sum are fused; output stored once.
    """
    HW = H * W
    f32 = jnp.float32
    bf16 = jnp.bfloat16

    def fill(col_ref, act, c):
        """im2col fill: `act` is [H, W, c] bf16; one shifted store per tap.

        Out-of-bounds stripes (<=1 boundary row + <=1 boundary col per tap)
        are zeroed explicitly, so no full-buffer clear and no reliance on
        scratch persistence across (possibly core-sharded) grid steps.
        """
        zrow = jnp.zeros((1, W, c), bf16)
        zcol = jnp.zeros((H, 1, c), bf16)
        for jy in range(3):
            dy = jy - 1
            y0, y1 = max(0, -dy), H - max(0, dy)
            for jx in range(3):
                dx = jx - 1
                x0, x1 = max(0, -dx), W - max(0, dx)
                t = jy * 3 + jx
                lanes = slice(t * c, (t + 1) * c)
                if dy != 0:
                    yz = 0 if dy < 0 else H - 1
                    col_ref[yz:yz + 1, :, lanes] = zrow
                if dx != 0:
                    xz = 0 if dx < 0 else W - 1
                    col_ref[:, xz:xz + 1, lanes] = zcol
                col_ref[y0:y1, x0:x1, lanes] = act[y0 + dy:y1 + dy,
                                                   x0 + dx:x1 + dx, :]

    def conv(col_ref, w_ref, b_ref):
        """One big-K MXU dot over the fused im2col buffer (bf16, f32 acc)."""
        k = col_ref.shape[2]
        patches = col_ref[...].reshape(HW, k)          # free when W % 8 == 0
        return jnp.maximum(
            jnp.dot(patches, w_ref[...], preferred_element_type=f32)
            + b_ref[...], 0.0)

    # bottleneck: 1x1 conv + ReLU                       [HW, Cin] -> [HW, Cp]
    # (K=Cin is tiny at toy shapes -- see review note; fine at real model Cin)
    x_bn = jnp.maximum(
        jnp.dot(x_ref[0].astype(bf16), wbn_ref[...],
                preferred_element_type=f32) + bbn_ref[...], 0.0)

    # conv_1 (up, ConvTranspose2d in phase form):  a0  [HW, 4*Cp]
    fill(col_s_ref, x_bn.astype(bf16).reshape(H, W, Cp), Cp)
    a0 = conv(col_s_ref, w1_ref, b1_ref)

    # conv_2 (down, strided Conv2d in phase form) + residual  e = relu(.) - x_bn
    fill(col_b_ref, a0.astype(bf16).reshape(H, W, 4 * Cp), 4 * Cp)
    b0 = conv(col_b_ref, w2_ref, b2_ref)
    # Re-load x_bn (bf16) from the still-valid center tap of col_s instead of
    # keeping the f32 map live across both convs (bounds VMEM/vreg pressure).
    x_bn_c = col_s_ref[:, :, 4 * Cp:5 * Cp].reshape(HW, Cp).astype(f32)
    e = b0 - x_bn_c

    # conv_3 (up):  a1 ; single f32 output store  out = a0 + a1
    fill(col_s_ref, e.astype(bf16).reshape(H, W, Cp), Cp)
    a1 = conv(col_s_ref, w3_ref, b3_ref)
    o_ref[0] = a0 + a1


# ---------------------------------------------------------------------------
# Host-side, one-time weight preparation (hoisted out of the forward path).
# ---------------------------------------------------------------------------
def prepare_params(params):
    """Phase-decompose + lane-pad + im2col-pack + bf16-cast the weights.

    * Cp = ceil(nr / 32) * 32 so the output block last dim (4*Cp) is a
      multiple of 128 (lane-dense stores).  Padded channels stay exact zeros.
    * ConvTranspose2d(k=6,s=2,p=2) -> [9*Cp, 4*Cp] with row = tap*Cp + cin,
      col = (py*2+px)*Cp + cout, value = w[cin, cout, 4+py-2*jy, 4+px-2*jx].
    * Conv2d(k=6,s=2,p=2) on the upsampled map -> [36*Cp, Cp] with
      row = tap*4*Cp + (py*2+px)*Cp + cin, value = w[cout, cin, 2*jy+py, 2*jx+px].
    Row ordering matches the kernel's im2col lane ordering (tap-major).
    """
    w_bn = np.asarray(params["w_bn"], np.float32)      # [nr, Cin, 1, 1]
    nr, cin = w_bn.shape[0], w_bn.shape[1]
    Cp = -(-nr // 32) * 32                             # 4*Cp % 128 == 0

    def pad_oi(w):                                     # pad first two dims to Cp
        out = np.zeros((Cp, Cp) + w.shape[2:], np.float32)
        out[:w.shape[0], :w.shape[1]] = w
        return out

    def pad_vec(b):
        out = np.zeros((Cp,), np.float32)
        out[:b.shape[0]] = np.asarray(b, np.float32)
        return out

    # bottleneck 1x1:  [Cin, Cp]
    wbn2d = np.zeros((cin, Cp), np.float32)
    wbn2d[:, :nr] = w_bn[:, :, 0, 0].T
    bbn = pad_vec(params["b_bn"])[None, :]

    def convT_phase(w, b):
        # ConvTranspose2d weight [Cin, Cout, 6, 6] -> [9*Cp, 4*Cp]
        wp = pad_oi(np.asarray(w, np.float32))
        out = np.zeros((9, Cp, 4 * Cp), np.float32)
        for jy in range(3):
            for jx in range(3):
                for py in range(2):
                    for px in range(2):
                        ph = py * 2 + px
                        out[jy * 3 + jx, :, ph * Cp:(ph + 1) * Cp] = \
                            wp[:, :, 4 + py - 2 * jy, 4 + px - 2 * jx]
        return out.reshape(9 * Cp, 4 * Cp), np.tile(pad_vec(b), 4)[None, :]

    def conv_down_phase(w, b):
        # Conv2d weight [Cout, Cin, 6, 6] -> [36*Cp, Cp]
        wp = pad_oi(np.asarray(w, np.float32))
        out = np.zeros((9, 4 * Cp, Cp), np.float32)
        for jy in range(3):
            for jx in range(3):
                for py in range(2):
                    for px in range(2):
                        ph = py * 2 + px
                        out[jy * 3 + jx, ph * Cp:(ph + 1) * Cp, :] = \
                            wp[:, :, 2 * jy + py, 2 * jx + px].T
        return out.reshape(9 * 4 * Cp, Cp), pad_vec(b)[None, :]

    w1, b1 = convT_phase(params["w1"], params["b1"])
    w2, b2 = conv_down_phase(params["w2"], params["b2"])
    w3, b3 = convT_phase(params["w3"], params["b3"])

    # TODO(synk): optional fp8 weight quantization for v7x (keep bf16 activations).
    return {
        "nr": nr, "cin": cin, "Cp": Cp,
        "w_bn": jnp.asarray(wbn2d, jnp.bfloat16), "b_bn": jnp.asarray(bbn),
        "w1": jnp.asarray(w1, jnp.bfloat16), "b1": jnp.asarray(b1),
        "w2": jnp.asarray(w2, jnp.bfloat16), "b2": jnp.asarray(b2),
        "w3": jnp.asarray(w3, jnp.bfloat16), "b3": jnp.asarray(b3),
    }


# ---------------------------------------------------------------------------
# Wrappers (NHWC core + thin NCHW adapter matching the PyTorch interface)
# ---------------------------------------------------------------------------
def _vmem_limit_bytes():
    # ~75% of physical VMEM: ~96 MiB on v5e/v6e (128 MiB), 48 MiB on v7x
    # (64 MiB).  Falls back to the conservative 48 MiB if the query fails.
    cap = 64 * 1024 * 1024
    try:
        cap = int(pltpu.get_tpu_info().vmem_capacity_bytes)
    except Exception:
        pass
    return int(min(cap * 3 // 4, 100 * 1024 * 1024))


def back_projection_nhwc(x_nhwc, prep):
    N, H, W, Cin = x_nhwc.shape
    Cp = prep["Cp"]
    nr = prep["nr"]
    HW = H * W
    x2d = x_nhwc.reshape(N, HW, Cin)

    const2 = lambda n: (0, 0)

    # TODO(synk): spatial band tiling over H (3 low-res-row halo) for large
    # H*W so the im2col scratch stays within v7x's 64 MiB VMEM and batch-1
    # inputs can still use both TensorCores.
    out_ph = pl.pallas_call(
        functools.partial(_bp_kernel, H=H, W=W, Cp=Cp),
        grid=(N,),
        in_specs=[
            pl.BlockSpec((1, HW, Cin), lambda n: (n, 0, 0)),
            pl.BlockSpec((Cin, Cp), const2),
            pl.BlockSpec((1, Cp), const2),
            pl.BlockSpec((9 * Cp, 4 * Cp), const2),
            pl.BlockSpec((1, 4 * Cp), const2),
            pl.BlockSpec((36 * Cp, Cp), const2),
            pl.BlockSpec((1, Cp), const2),
            pl.BlockSpec((9 * Cp, 4 * Cp), const2),
            pl.BlockSpec((1, 4 * Cp), const2),
        ],
        out_specs=pl.BlockSpec((1, HW, 4 * Cp), lambda n: (n, 0, 0)),
        out_shape=jax.ShapeDtypeStruct((N, HW, 4 * Cp), jnp.float32),
        scratch_shapes=[
            pltpu.VMEM((H, W, 9 * Cp), jnp.bfloat16),    # im2col for conv_1/3
            pltpu.VMEM((H, W, 36 * Cp), jnp.bfloat16),   # im2col for conv_2
        ],
        compiler_params=pltpu.CompilerParams(
            dimension_semantics=("parallel",),   # batch shards across v7x TCs
            vmem_limit_bytes=_vmem_limit_bytes(),
        ),
    )(x2d, prep["w_bn"], prep["b_bn"], prep["w1"], prep["b1"],
      prep["w2"], prep["b2"], prep["w3"], prep["b3"])

    # un-pack phases (pixel shuffle) and drop the lane padding; stays NHWC.
    out = out_ph.reshape(N, H, W, 2, 2, Cp)[..., :nr]
    out = jnp.transpose(out, (0, 1, 3, 2, 4, 5)).reshape(N, 2 * H, 2 * W, nr)
    return out


def back_projection(x_nchw, prep, scale=2):
    assert scale == 2, "phase decomposition implemented for scale=2"
    # TODO(synk): generalize the phase decomposition to scale 4 (k=8,s=4) / 8 (k=12,s=8).
    x_nhwc = jnp.transpose(x_nchw, (0, 2, 3, 1))     # NCHW -> NHWC (boundary only)
    out = back_projection_nhwc(x_nhwc, prep)
    return jnp.transpose(out, (0, 3, 1, 2))          # NHWC -> NCHW


# ---------------------------------------------------------------------------
# Pure-JAX f32 reference (lax convolutions) for correctness check
# ---------------------------------------------------------------------------
def _ref_conv(x, w, b, stride, pad):
    y = jax.lax.conv_general_dilated(
        x, w, (stride, stride), ((pad, pad), (pad, pad)),
        dimension_numbers=("NCHW", "OIHW", "NCHW"))
    return jnp.maximum(y + b[None, :, None, None], 0.0)


def _ref_convT(x, w, b, stride, pad):
    k = w.shape[-1]
    w_eff = jnp.transpose(w, (1, 0, 2, 3))[:, :, ::-1, ::-1]
    y = jax.lax.conv_general_dilated(
        x, w_eff, (1, 1), ((k - 1 - pad, k - 1 - pad),) * 2,
        lhs_dilation=(stride, stride),
        dimension_numbers=("NCHW", "OIHW", "NCHW"))
    return jnp.maximum(y + b[None, :, None, None], 0.0)


def back_projection_ref(x, params, scale=2):
    k, s, p = {2: (6, 2, 2), 4: (8, 4, 2), 8: (12, 8, 2)}[scale]
    x = _ref_conv(x, params["w_bn"], params["b_bn"], 1, 0)
    a0 = _ref_convT(x, params["w1"], params["b1"], s, p)
    b0 = _ref_conv(a0, params["w2"], params["b2"], s, p)
    e = b0 - x
    a1 = _ref_convT(e, params["w3"], params["b3"], s, p)
    return a0 + a1


# ---------------------------------------------------------------------------
# Deterministic parameter init (synthetic; shapes follow the module __init__)
# ---------------------------------------------------------------------------
def init_params(key, in_channels, nr, k):
    ks = jax.random.split(key, 8)
    std = 0.1
    return {
        # bottleneck Conv2d(in_channels, nr, 1): weight [nr, C_in, 1, 1]
        "w_bn": std * jax.random.normal(ks[0], (nr, in_channels, 1, 1), jnp.float32),
        "b_bn": std * jax.random.normal(ks[1], (nr,), jnp.float32),
        # conv_1 ConvTranspose2d(nr, nr, k, s, p): weight [C_in, C_out, k, k]
        "w1": std * jax.random.normal(ks[2], (nr, nr, k, k), jnp.float32),
        "b1": std * jax.random.normal(ks[3], (nr,), jnp.float32),
        # conv_2 Conv2d(nr, nr, k, s, p): weight [C_out, C_in, k, k]
        "w2": std * jax.random.normal(ks[4], (nr, nr, k, k), jnp.float32),
        "b2": std * jax.random.normal(ks[5], (nr,), jnp.float32),
        # conv_3 ConvTranspose2d(nr, nr, k, s, p)
        "w3": std * jax.random.normal(ks[6], (nr, nr, k, k), jnp.float32),
        "b3": std * jax.random.normal(ks[7], (nr,), jnp.float32),
    }


if __name__ == "__main__":
    key = jax.random.PRNGKey(0)
    k_x, k_p = jax.random.split(key)

    N, C_in, H, W = 2, 4, 16, 16
    nr, scale = 8, 2

    x = jax.random.normal(k_x, (N, C_in, H, W), jnp.float32)
    params = init_params(k_p, C_in, nr, 6)
    prep = prepare_params(params)        # one-time, host-side weight prep

    out = back_projection(x, prep, scale=scale)
    out = jax.block_until_ready(out)
    assert out.shape == (N, nr, scale * H, scale * W), out.shape

    ref = back_projection_ref(x, params, scale=scale)
    # bf16 MXU inputs (f32 accumulation) vs. the pure-f32 lax reference.
    np.testing.assert_allclose(np.asarray(out), np.asarray(ref),
                               rtol=2e-2, atol=2e-2)

    print("KERNEL_OK")
</pallas_src>

<mosaic_0001>
module attributes {stable_mosaic.version = 11 : i64} {
  func.func @_bp_kernel(%arg0: i32, %arg1: memref<1x256x4xf32, #tpu.memory_space<vmem>>, %arg2: memref<4x32xbf16, #tpu.memory_space<vmem>>, %arg3: memref<1x32xf32, #tpu.memory_space<vmem>>, %arg4: memref<288x128xbf16, #tpu.memory_space<vmem>>, %arg5: memref<1x128xf32, #tpu.memory_space<vmem>>, %arg6: memref<1152x32xbf16, #tpu.memory_space<vmem>>, %arg7: memref<1x32xf32, #tpu.memory_space<vmem>>, %arg8: memref<288x128xbf16, #tpu.memory_space<vmem>>, %arg9: memref<1x128xf32, #tpu.memory_space<vmem>>, %arg10: memref<1x256x128xf32, #tpu.memory_space<vmem>>, %arg11: memref<16x16x288xbf16, #tpu.memory_space<vmem>>, %arg12: memref<16x16x1152xbf16, #tpu.memory_space<vmem>>) attributes {dimension_semantics = [#tpu.dimension_semantics<parallel>], iteration_bounds = array<i64: 2>, scalar_prefetch = 0 : i64, scratch_operands = 2 : i64, tpu.core_type = #tpu.core_type<tc>, window_params = [{transform_indices = @transform_0, window_bounds = array<i64: 1, 256, 4>}, {pipeline_mode = #tpu.pipeline_mode<synchronous>, transform_indices = @transform_1, window_bounds = array<i64: 4, 32>}, {pipeline_mode = #tpu.pipeline_mode<synchronous>, transform_indices = @transform_2, window_bounds = array<i64: 1, 32>}, {pipeline_mode = #tpu.pipeline_mode<synchronous>, transform_indices = @transform_3, window_bounds = array<i64: 288, 128>}, {pipeline_mode = #tpu.pipeline_mode<synchronous>, transform_indices = @transform_4, window_bounds = array<i64: 1, 128>}, {pipeline_mode = #tpu.pipeline_mode<synchronous>, transform_indices = @transform_5, window_bounds = array<i64: 1152, 32>}, {pipeline_mode = #tpu.pipeline_mode<synchronous>, transform_indices = @transform_6, window_bounds = array<i64: 1, 32>}, {pipeline_mode = #tpu.pipeline_mode<synchronous>, transform_indices = @transform_7, window_bounds = array<i64: 288, 128>}, {pipeline_mode = #tpu.pipeline_mode<synchronous>, transform_indices = @transform_8, window_bounds = array<i64: 1, 128>}, {transform_indices = @transform_9, window_bounds = array<i64: 1, 256, 128>}]} {
    %c0 = arith.constant 0 : index
    %c0_0 = arith.constant 0 : index
    %c0_1 = arith.constant 0 : index
    %0 = vector.load %arg1[%c0, %c0_0, %c0_1] : memref<1x256x4xf32, #tpu.memory_space<vmem>>, vector<1x256x4xf32>
    %1 = vector.shape_cast %0 : vector<1x256x4xf32> to vector<256x4xf32>
    %2 = arith.truncf %1 : vector<256x4xf32> to vector<256x4xbf16>
    %c0_2 = arith.constant 0 : index
    %c0_3 = arith.constant 0 : index
    %3 = vector.load %arg2[%c0_2, %c0_3] : memref<4x32xbf16, #tpu.memory_space<vmem>>, vector<4x32xbf16>
    %cst = arith.constant dense<0.000000e+00> : vector<256x32xf32>
    %4 = tpu.matmul %2, %3, %cst {dimension_numbers = #tpu.dot_dimension_numbers<[1], [0], [0], [1], [0, 0, 1, 1], [], []>} : vector<256x4xbf16>, vector<4x32xbf16>, vector<256x32xf32> -> vector<256x32xf32>
    %c0_4 = arith.constant 0 : index
    %c0_5 = arith.constant 0 : index
    %5 = vector.load %arg3[%c0_4, %c0_5] : memref<1x32xf32, #tpu.memory_space<vmem>>, vector<1x32xf32>
    %6 = vector.broadcast %5 : vector<1x32xf32> to vector<256x32xf32>
    %7 = arith.addf %4, %6 : vector<256x32xf32>
    %cst_6 = arith.constant 0.000000e+00 : f32
    %8 = vector.broadcast %cst_6 : f32 to vector<256x32xf32>
    %9 = arith.maximumf %7, %8 : vector<256x32xf32>
    %10 = arith.truncf %9 : vector<256x32xf32> to vector<256x32xbf16>
    %11 = vector.shape_cast %10 : vector<256x32xbf16> to vector<16x16x32xbf16>
    %cst_7 = arith.constant 0.000000e+00 : bf16
    %12 = vector.broadcast %cst_7 : bf16 to vector<1x16x32xbf16>
    %cst_8 = arith.constant 0.000000e+00 : bf16
    %13 = vector.broadcast %cst_8 : bf16 to vector<16x1x32xbf16>
    %c0_9 = arith.constant 0 : index
    %c0_10 = arith.constant 0 : index
    %c0_11 = arith.constant 0 : index
    %14 = vector.load %arg11[%c0_9, %c0_10, %c0_11] : memref<16x16x288xbf16, #tpu.memory_space<vmem>>, vector<1x16x32xbf16>
    tpu.vector_store %arg11[%c0_9, %c0_10, %c0_11], %12 {strides = array<i32>} : memref<16x16x288xbf16, #tpu.memory_space<vmem>>, vector<1x16x32xbf16>,
    %c0_12 = arith.constant 0 : index
    %c0_13 = arith.constant 0 : index
    %c0_14 = arith.constant 0 : index
    %15 = vector.load %arg11[%c0_12, %c0_13, %c0_14] : memref<16x16x288xbf16, #tpu.memory_space<vmem>>, vector<16x1x32xbf16>
    tpu.vector_store %arg11[%c0_12, %c0_13, %c0_14], %13 {strides = array<i32>} : memref<16x16x288xbf16, #tpu.memory_space<vmem>>, vector<16x1x32xbf16>,
    %16 = vector.extract_strided_slice %11 {offsets = [0, 0, 0], sizes = [15, 15, 32], strides = [1, 1, 1]} : vector<16x16x32xbf16> to vector<15x15x32xbf16>
    %c1 = arith.constant 1 : index
    %c1_15 = arith.constant 1 : index
    %c0_16 = arith.constant 0 : index
    %17 = vector.load %arg11[%c1, %c1_15, %c0_16] : memref<16x16x288xbf16, #tpu.memory_space<vmem>>, vector<15x15x32xbf16>
    tpu.vector_store %arg11[%c1, %c1_15, %c0_16], %16 {strides = array<i32>} : memref<16x16x288xbf16, #tpu.memory_space<vmem>>, vector<15x15x32xbf16>,
    %c0_17 = arith.constant 0 : index
    %c0_18 = arith.constant 0 : index
    %c32 = arith.constant 32 : index
    %18 = vector.load %arg11[%c0_17, %c0_18, %c32] : memref<16x16x288xbf16, #tpu.memory_space<vmem>>, vector<1x16x32xbf16>
    tpu.vector_store %arg11[%c0_17, %c0_18, %c32], %12 {strides = array<i32>} : memref<16x16x288xbf16, #tpu.memory_space<vmem>>, vector<1x16x32xbf16>,
    %19 = vector.extract_strided_slice %11 {offsets = [0, 0, 0], sizes = [15, 16, 32], strides = [1, 1, 1]} : vector<16x16x32xbf16> to vector<15x16x32xbf16>
    %c1_19 = arith.constant 1 : index
    %c0_20 = arith.constant 0 : index
    %c32_21 = arith.constant 32 : index
    %20 = vector.load %arg11[%c1_19, %c0_20, %c32_21] : memref<16x16x288xbf16, #tpu.memory_space<vmem>>, vector<15x16x32xbf16>
    tpu.vector_store %arg11[%c1_19, %c0_20, %c32_21], %19 {strides = array<i32>} : memref<16x16x288xbf16, #tpu.memory_space<vmem>>, vector<15x16x32xbf16>,
    %c0_22 = arith.constant 0 : index
    %c0_23 = arith.constant 0 : index
    %c64 = arith.constant 64 : index
    %21 = vector.load %arg11[%c0_22, %c0_23, %c64] : memref<16x16x288xbf16, #tpu.memory_space<vmem>>, vector<1x16x32xbf16>
    tpu.vector_store %arg11[%c0_22, %c0_23, %c64], %12 {strides = array<i32>} : memref<16x16x288xbf16, #tpu.memory_space<vmem>>, vector<1x16x32xbf16>,
    %c0_24 = arith.constant 0 : index
    %c15 = arith.constant 15 : index
    %c64_25 = arith.constant 64 : index
    %22 = vector.load %arg11[%c0_24, %c15, %c64_25] : memref<16x16x288xbf16, #tpu.memory_space<vmem>>, vector<16x1x32xbf16>
    tpu.vector_store %arg11[%c0_24, %c15, %c64_25], %13 {strides = array<i32>} : memref<16x16x288xbf16, #tpu.memory_space<vmem>>, vector<16x1x32xbf16>,
    %23 = vector.extract_strided_slice %11 {offsets = [0, 1, 0], sizes = [15, 15, 32], strides = [1, 1, 1]} : vector<16x16x32xbf16> to vector<15x15x32xbf16>
    %c1_26 = arith.constant 1 : index
    %c0_27 = arith.constant 0 : index
    %c64_28 = arith.constant 64 : index
    %24 = vector.load %arg11[%c1_26, %c0_27, %c64_28] : memref<16x16x288xbf16, #tpu.memory_space<vmem>>, vector<15x15x32xbf16>
    tpu.vector_store %arg11[%c1_26, %c0_27, %c64_28], %23 {strides = array<i32>} : memref<16x16x288xbf16, #tpu.memory_space<vmem>>, vector<15x15x32xbf16>,
    %c0_29 = arith.constant 0 : index
    %c0_30 = arith.constant 0 : index
    %c96 = arith.constant 96 : index
    %25 = vector.load %arg11[%c0_29, %c0_30, %c96] : memref<16x16x288xbf16, #tpu.memory_space<vmem>>, vector<16x1x32xbf16>
    tpu.vector_store %arg11[%c0_29, %c0_30, %c96], %13 {strides = array<i32>} : memref<16x16x288xbf16, #tpu.memory_space<vmem>>, vector<16x1x32xbf16>,
    %26 = vector.extract_strided_slice %11 {offsets = [0, 0, 0], sizes = [16, 15, 32], strides = [1, 1, 1]} : vector<16x16x32xbf16> to vector<16x15x32xbf16>
    %c0_31 = arith.constant 0 : index
    %c1_32 = arith.constant 1 : index
    %c96_33 = arith.constant 96 : index
    %27 = vector.load %arg11[%c0_31, %c1_32, %c96_33] : memref<16x16x288xbf16, #tpu.memory_space<vmem>>, vector<16x15x32xbf16>
    tpu.vector_store %arg11[%c0_31, %c1_32, %c96_33], %26 {strides = array<i32>} : memref<16x16x288xbf16, #tpu.memory_space<vmem>>, vector<16x15x32xbf16>,
    %c0_34 = arith.constant 0 : index
    %c0_35 = arith.constant 0 : index
    %c128 = arith.constant 128 : index
    %28 = vector.load %arg11[%c0_34, %c0_35, %c128] : memref<16x16x288xbf16, #tpu.memory_space<vmem>>, vector<16x16x32xbf16>
    tpu.vector_store %arg11[%c0_34, %c0_35, %c128], %11 {strides = array<i32>} : memref<16x16x288xbf16, #tpu.memory_space<vmem>>, vector<16x16x32xbf16>,
    %c0_36 = arith.constant 0 : index
    %c15_37 = arith.constant 15 : index
    %c160 = arith.constant 160 : index
    %29 = vector.load %arg11[%c0_36, %c15_37, %c160] : memref<16x16x288xbf16, #tpu.memory_space<vmem>>, vector<16x1x32xbf16>
    tpu.vector_store %arg11[%c0_36, %c15_37, %c160], %13 {strides = array<i32>} : memref<16x16x288xbf16, #tpu.memory_space<vmem>>, vector<16x1x32xbf16>,
    %30 = vector.extract_strided_slice %11 {offsets = [0, 1, 0], sizes = [16, 15, 32], strides = [1, 1, 1]} : vector<16x16x32xbf16> to vector<16x15x32xbf16>
    %c0_38 = arith.constant 0 : index
    %c0_39 = arith.constant 0 : index
    %c160_40 = arith.constant 160 : index
    %31 = vector.load %arg11[%c0_38, %c0_39, %c160_40] : memref<16x16x288xbf16, #tpu.memory_space<vmem>>, vector<16x15x32xbf16>
    tpu.vector_store %arg11[%c0_38, %c0_39, %c160_40], %30 {strides = array<i32>} : memref<16x16x288xbf16, #tpu.memory_space<vmem>>, vector<16x15x32xbf16>,
    %c15_41 = arith.constant 15 : index
    %c0_42 = arith.constant 0 : index
    %c192 = arith.constant 192 : index
    %32 = vector.load %arg11[%c15_41, %c0_42, %c192] : memref<16x16x288xbf16, #tpu.memory_space<vmem>>, vector<1x16x32xbf16>
    tpu.vector_store %arg11[%c15_41, %c0_42, %c192], %12 {strides = array<i32>} : memref<16x16x288xbf16, #tpu.memory_space<vmem>>, vector<1x16x32xbf16>,
    %c0_43 = arith.constant 0 : index
    %c0_44 = arith.constant 0 : index
    %c192_45 = arith.constant 192 : index
    %33 = vector.load %arg11[%c0_43, %c0_44, %c192_45] : memref<16x16x288xbf16, #tpu.memory_space<vmem>>, vector<16x1x32xbf16>
    tpu.vector_store %arg11[%c0_43, %c0_44, %c192_45], %13 {strides = array<i32>} : memref<16x16x288xbf16, #tpu.memory_space<vmem>>, vector<16x1x32xbf16>,
    %34 = vector.extract_strided_slice %11 {offsets = [1, 0, 0], sizes = [15, 15, 32], strides = [1, 1, 1]} : vector<16x16x32xbf16> to vector<15x15x32xbf16>
    %c0_46 = arith.constant 0 : index
    %c1_47 = arith.constant 1 : index
    %c192_48 = arith.constant 192 : index
    %35 = vector.load %arg11[%c0_46, %c1_47, %c192_48] : memref<16x16x288xbf16, #tpu.memory_space<vmem>>, vector<15x15x32xbf16>
    tpu.vector_store %arg11[%c0_46, %c1_47, %c192_48], %34 {strides = array<i32>} : memref<16x16x288xbf16, #tpu.memory_space<vmem>>, vector<15x15x32xbf16>,
    %c15_49 = arith.constant 15 : index
    %c0_50 = arith.constant 0 : index
    %c224 = arith.constant 224 : index
    %36 = vector.load %arg11[%c15_49, %c0_50, %c224] : memref<16x16x288xbf16, #tpu.memory_space<vmem>>, vector<1x16x32xbf16>
    tpu.vector_store %arg11[%c15_49, %c0_50, %c224], %12 {strides = array<i32>} : memref<16x16x288xbf16, #tpu.memory_space<vmem>>, vector<1x16x32xbf16>,
    %37 = vector.extract_strided_slice %11 {offsets = [1, 0, 0], sizes = [15, 16, 32], strides = [1, 1, 1]} : vector<16x16x32xbf16> to vector<15x16x32xbf16>
    %c0_51 = arith.constant 0 : index
    %c0_52 = arith.constant 0 : index
    %c224_53 = arith.constant 224 : index
    %38 = vector.load %arg11[%c0_51, %c0_52, %c224_53] : memref<16x16x288xbf16, #tpu.memory_space<vmem>>, vector<15x16x32xbf16>
    tpu.vector_store %arg11[%c0_51, %c0_52, %c224_53], %37 {strides = array<i32>} : memref<16x16x288xbf16, #tpu.memory_space<vmem>>, vector<15x16x32xbf16>,
    %c15_54 = arith.constant 15 : index
    %c0_55 = arith.constant 0 : index
    %c256 = arith.constant 256 : index
    %39 = vector.load %arg11[%c15_54, %c0_55, %c256] : memref<16x16x288xbf16, #tpu.memory_space<vmem>>, vector<1x16x32xbf16>
    tpu.vector_store %arg11[%c15_54, %c0_55, %c256], %12 {strides = array<i32>} : memref<16x16x288xbf16, #tpu.memory_space<vmem>>, vector<1x16x32xbf16>,
    %c0_56 = arith.constant 0 : index
    %c15_57 = arith.constant 15 : index
    %c256_58 = arith.constant 256 : index
    %40 = vector.load %arg11[%c0_56, %c15_57, %c256_58] : memref<16x16x288xbf16, #tpu.memory_space<vmem>>, vector<16x1x32xbf16>
    tpu.vector_store %arg11[%c0_56, %c15_57, %c256_58], %13 {strides = array<i32>} : memref<16x16x288xbf16, #tpu.memory_space<vmem>>, vector<16x1x32xbf16>,
    %41 = vector.extract_strided_slice %11 {offsets = [1, 1, 0], sizes = [15, 15, 32], strides = [1, 1, 1]} : vector<16x16x32xbf16> to vector<15x15x32xbf16>
    %c0_59 = arith.constant 0 : index
    %c0_60 = arith.constant 0 : index
    %c256_61 = arith.constant 256 : index
    %42 = vector.load %arg11[%c0_59, %c0_60, %c256_61] : memref<16x16x288xbf16, #tpu.memory_space<vmem>>, vector<15x15x32xbf16>
    tpu.vector_store %arg11[%c0_59, %c0_60, %c256_61], %41 {strides = array<i32>} : memref<16x16x288xbf16, #tpu.memory_space<vmem>>, vector<15x15x32xbf16>,
    %c0_62 = arith.constant 0 : index
    %c0_63 = arith.constant 0 : index
    %c0_64 = arith.constant 0 : index
    %43 = vector.load %arg11[%c0_62, %c0_63, %c0_64] : memref<16x16x288xbf16, #tpu.memory_space<vmem>>, vector<16x16x288xbf16>
    %44 = vector.shape_cast %43 : vector<16x16x288xbf16> to vector<256x288xbf16>
    %c0_65 = arith.constant 0 : index
    %c0_66 = arith.constant 0 : index
    %45 = vector.load %arg4[%c0_65, %c0_66] : memref<288x128xbf16, #tpu.memory_space<vmem>>, vector<288x128xbf16>
    %cst_67 = arith.constant dense<0.000000e+00> : vector<256x128xf32>
    %46 = tpu.matmul %44, %45, %cst_67 {dimension_numbers = #tpu.dot_dimension_numbers<[1], [0], [0], [1], [0, 0, 1, 1], [], []>} : vector<256x288xbf16>, vector<288x128xbf16>, vector<256x128xf32> -> vector<256x128xf32>
    %c0_68 = arith.constant 0 : index
    %c0_69 = arith.constant 0 : index
    %47 = vector.load %arg5[%c0_68, %c0_69] : memref<1x128xf32, #tpu.memory_space<vmem>>, vector<1x128xf32>
    %48 = vector.broadcast %47 : vector<1x128xf32> to vector<256x128xf32>
    %49 = arith.addf %46, %48 : vector<256x128xf32>
    %cst_70 = arith.constant 0.000000e+00 : f32
    %50 = vector.broadcast %cst_70 : f32 to vector<256x128xf32>
    %51 = arith.maximumf %49, %50 : vector<256x128xf32>
    %52 = arith.truncf %51 : vector<256x128xf32> to vector<256x128xbf16>
    %53 = vector.shape_cast %52 : vector<256x128xbf16> to vector<16x16x128xbf16>
    %cst_71 = arith.constant 0.000000e+00 : bf16
    %54 = vector.broadcast %cst_71 : bf16 to vector<1x16x128xbf16>
    %cst_72 = arith.constant 0.000000e+00 : bf16
    %55 = vector.broadcast %cst_72 : bf16 to vector<16x1x128xbf16>
    %c0_73 = arith.constant 0 : index
    %c0_74 = arith.constant 0 : index
    %c0_75 = arith.constant 0 : index
    %56 = vector.load %arg12[%c0_73, %c0_74, %c0_75] : memref<16x16x1152xbf16, #tpu.memory_space<vmem>>, vector<1x16x128xbf16>
    tpu.vector_store %arg12[%c0_73, %c0_74, %c0_75], %54 {strides = array<i32>} : memref<16x16x1152xbf16, #tpu.memory_space<vmem>>, vector<1x16x128xbf16>,
    %c0_76 = arith.constant 0 : index
    %c0_77 = arith.constant 0 : index
    %c0_78 = arith.constant 0 : index
    %57 = vector.load %arg12[%c0_76, %c0_77, %c0_78] : memref<16x16x1152xbf16, #tpu.memory_space<vmem>>, vector<16x1x128xbf16>
    tpu.vector_store %arg12[%c0_76, %c0_77, %c0_78], %55 {strides = array<i32>} : memref<16x16x1152xbf16, #tpu.memory_space<vmem>>, vector<16x1x128xbf16>,
    %58 = vector.extract_strided_slice %53 {offsets = [0, 0, 0], sizes = [15, 15, 128], strides = [1, 1, 1]} : vector<16x16x128xbf16> to vector<15x15x128xbf16>
    %c1_79 = arith.constant 1 : index
    %c1_80 = arith.constant 1 : index
    %c0_81 = arith.constant 0 : index
    %59 = vector.load %arg12[%c1_79, %c1_80, %c0_81] : memref<16x16x1152xbf16, #tpu.memory_space<vmem>>, vector<15x15x128xbf16>
    tpu.vector_store %arg12[%c1_79, %c1_80, %c0_81], %58 {strides = array<i32>} : memref<16x16x1152xbf16, #tpu.memory_space<vmem>>, vector<15x15x128xbf16>,
    %c0_82 = arith.constant 0 : index
    %c0_83 = arith.constant 0 : index
    %c128_84 = arith.constant 128 : index
    %60 = vector.load %arg12[%c0_82, %c0_83, %c128_84] : memref<16x16x1152xbf16, #tpu.memory_space<vmem>>, vector<1x16x128xbf16>
    tpu.vector_store %arg12[%c0_82, %c0_83, %c128_84], %54 {strides = array<i32>} : memref<16x16x1152xbf16, #tpu.memory_space<vmem>>, vector<1x16x128xbf16>,
    %61 = vector.extract_strided_slice %53 {offsets = [0, 0, 0], sizes = [15, 16, 128], strides = [1, 1, 1]} : vector<16x16x128xbf16> to vector<15x16x128xbf16>
    %c1_85 = arith.constant 1 : index
    %c0_86 = arith.constant 0 : index
    %c128_87 = arith.constant 128 : index
    %62 = vector.load %arg12[%c1_85, %c0_86, %c128_87] : memref<16x16x1152xbf16, #tpu.memory_space<vmem>>, vector<15x16x128xbf16>
    tpu.vector_store %arg12[%c1_85, %c0_86, %c128_87], %61 {strides = array<i32>} : memref<16x16x1152xbf16, #tpu.memory_space<vmem>>, vector<15x16x128xbf16>,
    %c0_88 = arith.constant 0 : index
    %c0_89 = arith.constant 0 : index
    %c256_90 = arith.constant 256 : index
    %63 = vector.load %arg12[%c0_88, %c0_89, %c256_90] : memref<16x16x1152xbf16, #tpu.memory_space<vmem>>, vector<1x16x128xbf16>
    tpu.vector_store %arg12[%c0_88, %c0_89, %c256_90], %54 {strides = array<i32>} : memref<16x16x1152xbf16, #tpu.memory_space<vmem>>, vector<1x16x128xbf16>,
    %c0_91 = arith.constant 0 : index
    %c15_92 = arith.constant 15 : index
    %c256_93 = arith.constant 256 : index
    %64 = vector.load %arg12[%c0_91, %c15_92, %c256_93] : memref<16x16x1152xbf16, #tpu.memory_space<vmem>>, vector<16x1x128xbf16>
    tpu.vector_store %arg12[%c0_91, %c15_92, %c256_93], %55 {strides = array<i32>} : memref<16x16x1152xbf16, #tpu.memory_space<vmem>>, vector<16x1x128xbf16>,
    %65 = vector.extract_strided_slice %53 {offsets = [0, 1, 0], sizes = [15, 15, 128], strides = [1, 1, 1]} : vector<16x16x128xbf16> to vector<15x15x128xbf16>
    %c1_94 = arith.constant 1 : index
    %c0_95 = arith.constant 0 : index
    %c256_96 = arith.constant 256 : index
    %66 = vector.load %arg12[%c1_94, %c0_95, %c256_96] : memref<16x16x1152xbf16, #tpu.memory_space<vmem>>, vector<15x15x128xbf16>
    tpu.vector_store %arg12[%c1_94, %c0_95, %c256_96], %65 {strides = array<i32>} : memref<16x16x1152xbf16, #tpu.memory_space<vmem>>, vector<15x15x128xbf16>,
    %c0_97 = arith.constant 0 : index
    %c0_98 = arith.constant 0 : index
    %c384 = arith.constant 384 : index
    %67 = vector.load %arg12[%c0_97, %c0_98, %c384] : memref<16x16x1152xbf16, #tpu.memory_space<vmem>>, vector<16x1x128xbf16>
    tpu.vector_store %arg12[%c0_97, %c0_98, %c384], %55 {strides = array<i32>} : memref<16x16x1152xbf16, #tpu.memory_space<vmem>>, vector<16x1x128xbf16>,
    %68 = vector.extract_strided_slice %53 {offsets = [0, 0, 0], sizes = [16, 15, 128], strides = [1, 1, 1]} : vector<16x16x128xbf16> to vector<16x15x128xbf16>
    %c0_99 = arith.constant 0 : index
    %c1_100 = arith.constant 1 : index
    %c384_101 = arith.constant 384 : index
    %69 = vector.load %arg12[%c0_99, %c1_100, %c384_101] : memref<16x16x1152xbf16, #tpu.memory_space<vmem>>, vector<16x15x128xbf16>
    tpu.vector_store %arg12[%c0_99, %c1_100, %c384_101], %68 {strides = array<i32>} : memref<16x16x1152xbf16, #tpu.memory_space<vmem>>, vector<16x15x128xbf16>,
    %c0_102 = arith.constant 0 : index
    %c0_103 = arith.constant 0 : index
    %c512 = arith.constant 512 : index
    %70 = vector.load %arg12[%c0_102, %c0_103, %c512] : memref<16x16x1152xbf16, #tpu.memory_space<vmem>>, vector<16x16x128xbf16>
    tpu.vector_store %arg12[%c0_102, %c0_103, %c512], %53 {strides = array<i32>} : memref<16x16x1152xbf16, #tpu.memory_space<vmem>>, vector<16x16x128xbf16>,
    %c0_104 = arith.constant 0 : index
    %c15_105 = arith.constant 15 : index
    %c640 = arith.constant 640 : index
    %71 = vector.load %arg12[%c0_104, %c15_105, %c640] : memref<16x16x1152xbf16, #tpu.memory_space<vmem>>, vector<16x1x128xbf16>
    tpu.vector_store %arg12[%c0_104, %c15_105, %c640], %55 {strides = array<i32>} : memref<16x16x1152xbf16, #tpu.memory_space<vmem>>, vector<16x1x128xbf16>,
    %72 = vector.extract_strided_slice %53 {offsets = [0, 1, 0], sizes = [16, 15, 128], strides = [1, 1, 1]} : vector<16x16x128xbf16> to vector<16x15x128xbf16>
    %c0_106 = arith.constant 0 : index
    %c0_107 = arith.constant 0 : index
    %c640_108 = arith.constant 640 : index
    %73 = vector.load %arg12[%c0_106, %c0_107, %c640_108] : memref<16x16x1152xbf16, #tpu.memory_space<vmem>>, vector<16x15x128xbf16>
    tpu.vector_store %arg12[%c0_106, %c0_107, %c640_108], %72 {strides = array<i32>} : memref<16x16x1152xbf16, #tpu.memory_space<vmem>>, vector<16x15x128xbf16>,
    %c15_109 = arith.constant 15 : index
    %c0_110 = arith.constant 0 : index
    %c768 = arith.constant 768 : index
    %74 = vector.load %arg12[%c15_109, %c0_110, %c768] : memref<16x16x1152xbf16, #tpu.memory_space<vmem>>, vector<1x16x128xbf16>
    tpu.vector_store %arg12[%c15_109, %c0_110, %c768], %54 {strides = array<i32>} : memref<16x16x1152xbf16, #tpu.memory_space<vmem>>, vector<1x16x128xbf16>,
    %c0_111 = arith.constant 0 : index
    %c0_112 = arith.constant 0 : index
    %c768_113 = arith.constant 768 : index
    %75 = vector.load %arg12[%c0_111, %c0_112, %c768_113] : memref<16x16x1152xbf16, #tpu.memory_space<vmem>>, vector<16x1x128xbf16>
    tpu.vector_store %arg12[%c0_111, %c0_112, %c768_113], %55 {strides = array<i32>} : memref<16x16x1152xbf16, #tpu.memory_space<vmem>>, vector<16x1x128xbf16>,
    %76 = vector.extract_strided_slice %53 {offsets = [1, 0, 0], sizes = [15, 15, 128], strides = [1, 1, 1]} : vector<16x16x128xbf16> to vector<15x15x128xbf16>
    %c0_114 = arith.constant 0 : index
    %c1_115 = arith.constant 1 : index
    %c768_116 = arith.constant 768 : index
    %77 = vector.load %arg12[%c0_114, %c1_115, %c768_116] : memref<16x16x1152xbf16, #tpu.memory_space<vmem>>, vector<15x15x128xbf16>
    tpu.vector_store %arg12[%c0_114, %c1_115, %c768_116], %76 {strides = array<i32>} : memref<16x16x1152xbf16, #tpu.memory_space<vmem>>, vector<15x15x128xbf16>,
    %c15_117 = arith.constant 15 : index
    %c0_118 = arith.constant 0 : index
    %c896 = arith.constant 896 : index
    %78 = vector.load %arg12[%c15_117, %c0_118, %c896] : memref<16x16x1152xbf16, #tpu.memory_space<vmem>>, vector<1x16x128xbf16>
    tpu.vector_store %arg12[%c15_117, %c0_118, %c896], %54 {strides = array<i32>} : memref<16x16x1152xbf16, #tpu.memory_space<vmem>>, vector<1x16x128xbf16>,
    %79 = vector.extract_strided_slice %53 {offsets = [1, 0, 0], sizes = [15, 16, 128], strides = [1, 1, 1]} : vector<16x16x128xbf16> to vector<15x16x128xbf16>
    %c0_119 = arith.constant 0 : index
    %c0_120 = arith.constant 0 : index
    %c896_121 = arith.constant 896 : index
    %80 = vector.load %arg12[%c0_119, %c0_120, %c896_121] : memref<16x16x1152xbf16, #tpu.memory_space<vmem>>, vector<15x16x128xbf16>
    tpu.vector_store %arg12[%c0_119, %c0_120, %c896_121], %79 {strides = array<i32>} : memref<16x16x1152xbf16, #tpu.memory_space<vmem>>, vector<15x16x128xbf16>,
    %c15_122 = arith.constant 15 : index
    %c0_123 = arith.constant 0 : index
    %c1024 = arith.constant 1024 : index
    %81 = vector.load %arg12[%c15_122, %c0_123, %c1024] : memref<16x16x1152xbf16, #tpu.memory_space<vmem>>, vector<1x16x128xbf16>
    tpu.vector_store %arg12[%c15_122, %c0_123, %c1024], %54 {strides = array<i32>} : memref<16x16x1152xbf16, #tpu.memory_space<vmem>>, vector<1x16x128xbf16>,
    %c0_124 = arith.constant 0 : index
    %c15_125 = arith.constant 15 : index
    %c1024_126 = arith.constant 1024 : index
    %82 = vector.load %arg12[%c0_124, %c15_125, %c1024_126] : memref<16x16x1152xbf16, #tpu.memory_space<vmem>>, vector<16x1x128xbf16>
    tpu.vector_store %arg12[%c0_124, %c15_125, %c1024_126], %55 {strides = array<i32>} : memref<16x16x1152xbf16, #tpu.memory_space<vmem>>, vector<16x1x128xbf16>,
    %83 = vector.extract_strided_slice %53 {offsets = [1, 1, 0], sizes = [15, 15, 128], strides = [1, 1, 1]} : vector<16x16x128xbf16> to vector<15x15x128xbf16>
    %c0_127 = arith.constant 0 : index
    %c0_128 = arith.constant 0 : index
    %c1024_129 = arith.constant 1024 : index
    %84 = vector.load %arg12[%c0_127, %c0_128, %c1024_129] : memref<16x16x1152xbf16, #tpu.memory_space<vmem>>, vector<15x15x128xbf16>
    tpu.vector_store %arg12[%c0_127, %c0_128, %c1024_129], %83 {strides = array<i32>} : memref<16x16x1152xbf16, #tpu.memory_space<vmem>>, vector<15x15x128xbf16>,
    %c0_130 = arith.constant 0 : index
    %c0_131 = arith.constant 0 : index
    %c0_132 = arith.constant 0 : index
    %85 = vector.load %arg12[%c0_130, %c0_131, %c0_132] : memref<16x16x1152xbf16, #tpu.memory_space<vmem>>, vector<16x16x1152xbf16>
    %86 = vector.shape_cast %85 : vector<16x16x1152xbf16> to vector<256x1152xbf16>
    %c0_133 = arith.constant 0 : index
    %c0_134 = arith.constant 0 : index
    %87 = vector.load %arg6[%c0_133, %c0_134] : memref<1152x32xbf16, #tpu.memory_space<vmem>>, vector<1152x32xbf16>
    %cst_135 = arith.constant dense<0.000000e+00> : vector<256x32xf32>
    %88 = tpu.matmul %86, %87, %cst_135 {dimension_numbers = #tpu.dot_dimension_numbers<[1], [0], [0], [1], [0, 0, 1, 1], [], []>} : vector<256x1152xbf16>, vector<1152x32xbf16>, vector<256x32xf32> -> vector<256x32xf32>
    %c0_136 = arith.constant 0 : index
    %c0_137 = arith.constant 0 : index
    %89 = vector.load %arg7[%c0_136, %c0_137] : memref<1x32xf32, #tpu.memory_space<vmem>>, vector<1x32xf32>
    %90 = vector.broadcast %89 : vector<1x32xf32> to vector<256x32xf32>
    %91 = arith.addf %88, %90 : vector<256x32xf32>
    %cst_138 = arith.constant 0.000000e+00 : f32
    %92 = vector.broadcast %cst_138 : f32 to vector<256x32xf32>
    %93 = arith.maximumf %91, %92 : vector<256x32xf32>
    %c0_139 = arith.constant 0 : index
    %c0_140 = arith.constant 0 : index
    %c128_141 = arith.constant 128 : index
    %94 = vector.load %arg11[%c0_139, %c0_140, %c128_141] : memref<16x16x288xbf16, #tpu.memory_space<vmem>>, vector<16x16x32xbf16>
    %95 = vector.shape_cast %94 : vector<16x16x32xbf16> to vector<256x32xbf16>
    %96 = arith.extf %95 : vector<256x32xbf16> to vector<256x32xf32>
    %97 = arith.subf %93, %96 : vector<256x32xf32>
    %98 = arith.truncf %97 : vector<256x32xf32> to vector<256x32xbf16>
    %99 = vector.shape_cast %98 : vector<256x32xbf16> to vector<16x16x32xbf16>
    %cst_142 = arith.constant 0.000000e+00 : bf16
    %100 = vector.broadcast %cst_142 : bf16 to vector<1x16x32xbf16>
    %cst_143 = arith.constant 0.000000e+00 : bf16
    %101 = vector.broadcast %cst_143 : bf16 to vector<16x1x32xbf16>
    %c0_144 = arith.constant 0 : index
    %c0_145 = arith.constant 0 : index
    %c0_146 = arith.constant 0 : index
    %102 = vector.load %arg11[%c0_144, %c0_145, %c0_146] : memref<16x16x288xbf16, #tpu.memory_space<vmem>>, vector<1x16x32xbf16>
    tpu.vector_store %arg11[%c0_144, %c0_145, %c0_146], %100 {strides = array<i32>} : memref<16x16x288xbf16, #tpu.memory_space<vmem>>, vector<1x16x32xbf16>,
    %c0_147 = arith.constant 0 : index
    %c0_148 = arith.constant 0 : index
    %c0_149 = arith.constant 0 : index
    %103 = vector.load %arg11[%c0_147, %c0_148, %c0_149] : memref<16x16x288xbf16, #tpu.memory_space<vmem>>, vector<16x1x32xbf16>
    tpu.vector_store %arg11[%c0_147, %c0_148, %c0_149], %101 {strides = array<i32>} : memref<16x16x288xbf16, #tpu.memory_space<vmem>>, vector<16x1x32xbf16>,
    %104 = vector.extract_strided_slice %99 {offsets = [0, 0, 0], sizes = [15, 15, 32], strides = [1, 1, 1]} : vector<16x16x32xbf16> to vector<15x15x32xbf16>
    %c1_150 = arith.constant 1 : index
    %c1_151 = arith.constant 1 : index
    %c0_152 = arith.constant 0 : index
    %105 = vector.load %arg11[%c1_150, %c1_151, %c0_152] : memref<16x16x288xbf16, #tpu.memory_space<vmem>>, vector<15x15x32xbf16>
    tpu.vector_store %arg11[%c1_150, %c1_151, %c0_152], %104 {strides = array<i32>} : memref<16x16x288xbf16, #tpu.memory_space<vmem>>, vector<15x15x32xbf16>,
    %c0_153 = arith.constant 0 : index
    %c0_154 = arith.constant 0 : index
    %c32_155 = arith.constant 32 : index
    %106 = vector.load %arg11[%c0_153, %c0_154, %c32_155] : memref<16x16x288xbf16, #tpu.memory_space<vmem>>, vector<1x16x32xbf16>
    tpu.vector_store %arg11[%c0_153, %c0_154, %c32_155], %100 {strides = array<i32>} : memref<16x16x288xbf16, #tpu.memory_space<vmem>>, vector<1x16x32xbf16>,
    %107 = vector.extract_strided_slice %99 {offsets = [0, 0, 0], sizes = [15, 16, 32], strides = [1, 1, 1]} : vector<16x16x32xbf16> to vector<15x16x32xbf16>
    %c1_156 = arith.constant 1 : index
    %c0_157 = arith.constant 0 : index
    %c32_158 = arith.constant 32 : index
    %108 = vector.load %arg11[%c1_156, %c0_157, %c32_158] : memref<16x16x288xbf16, #tpu.memory_space<vmem>>, vector<15x16x32xbf16>
    tpu.vector_store %arg11[%c1_156, %c0_157, %c32_158], %107 {strides = array<i32>} : memref<16x16x288xbf16, #tpu.memory_space<vmem>>, vector<15x16x32xbf16>,
    %c0_159 = arith.constant 0 : index
    %c0_160 = arith.constant 0 : index
    %c64_161 = arith.constant 64 : index
    %109 = vector.load %arg11[%c0_159, %c0_160, %c64_161] : memref<16x16x288xbf16, #tpu.memory_space<vmem>>, vector<1x16x32xbf16>
    tpu.vector_store %arg11[%c0_159, %c0_160, %c64_161], %100 {strides = array<i32>} : memref<16x16x288xbf16, #tpu.memory_space<vmem>>, vector<1x16x32xbf16>,
    %c0_162 = arith.constant 0 : index
    %c15_163 = arith.constant 15 : index
    %c64_164 = arith.constant 64 : index
    %110 = vector.load %arg11[%c0_162, %c15_163, %c64_164] : memref<16x16x288xbf16, #tpu.memory_space<vmem>>, vector<16x1x32xbf16>
    tpu.vector_store %arg11[%c0_162, %c15_163, %c64_164], %101 {strides = array<i32>} : memref<16x16x288xbf16, #tpu.memory_space<vmem>>, vector<16x1x32xbf16>,
    %111 = vector.extract_strided_slice %99 {offsets = [0, 1, 0], sizes = [15, 15, 32], strides = [1, 1, 1]} : vector<16x16x32xbf16> to vector<15x15x32xbf16>
    %c1_165 = arith.constant 1 : index
    %c0_166 = arith.constant 0 : index
    %c64_167 = arith.constant 64 : index
    %112 = vector.load %arg11[%c1_165, %c0_166, %c64_167] : memref<16x16x288xbf16, #tpu.memory_space<vmem>>, vector<15x15x32xbf16>
    tpu.vector_store %arg11[%c1_165, %c0_166, %c64_167], %111 {strides = array<i32>} : memref<16x16x288xbf16, #tpu.memory_space<vmem>>, vector<15x15x32xbf16>,
    %c0_168 = arith.constant 0 : index
    %c0_169 = arith.constant 0 : index
    %c96_170 = arith.constant 96 : index
    %113 = vector.load %arg11[%c0_168, %c0_169, %c96_170] : memref<16x16x288xbf16, #tpu.memory_space<vmem>>, vector<16x1x32xbf16>
    tpu.vector_store %arg11[%c0_168, %c0_169, %c96_170], %101 {strides = array<i32>} : memref<16x16x288xbf16, #tpu.memory_space<vmem>>, vector<16x1x32xbf16>,
    %114 = vector.extract_strided_slice %99 {offsets = [0, 0, 0], sizes = [16, 15, 32], strides = [1, 1, 1]} : vector<16x16x32xbf16> to vector<16x15x32xbf16>
    %c0_171 = arith.constant 0 : index
    %c1_172 = arith.constant 1 : index
    %c96_173 = arith.constant 96 : index
    %115 = vector.load %arg11[%c0_171, %c1_172, %c96_173] : memref<16x16x288xbf16, #tpu.memory_space<vmem>>, vector<16x15x32xbf16>
    tpu.vector_store %arg11[%c0_171, %c1_172, %c96_173], %114 {strides = array<i32>} : memref<16x16x288xbf16, #tpu.memory_space<vmem>>, vector<16x15x32xbf16>,
    %c0_174 = arith.constant 0 : index
    %c0_175 = arith.constant 0 : index
    %c128_176 = arith.constant 128 : index
    %116 = vector.load %arg11[%c0_174, %c0_175, %c128_176] : memref<16x16x288xbf16, #tpu.memory_space<vmem>>, vector<16x16x32xbf16>
    tpu.vector_store %arg11[%c0_174, %c0_175, %c128_176], %99 {strides = array<i32>} : memref<16x16x288xbf16, #tpu.memory_space<vmem>>, vector<16x16x32xbf16>,
    %c0_177 = arith.constant 0 : index
    %c15_178 = arith.constant 15 : index
    %c160_179 = arith.constant 160 : index
    %117 = vector.load %arg11[%c0_177, %c15_178, %c160_179] : memref<16x16x288xbf16, #tpu.memory_space<vmem>>, vector<16x1x32xbf16>
    tpu.vector_store %arg11[%c0_177, %c15_178, %c160_179], %101 {strides = array<i32>} : memref<16x16x288xbf16, #tpu.memory_space<vmem>>, vector<16x1x32xbf16>,
    %118 = vector.extract_strided_slice %99 {offsets = [0, 1, 0], sizes = [16, 15, 32], strides = [1, 1, 1]} : vector<16x16x32xbf16> to vector<16x15x32xbf16>
    %c0_180 = arith.constant 0 : index
    %c0_181 = arith.constant 0 : index
    %c160_182 = arith.constant 160 : index
    %119 = vector.load %arg11[%c0_180, %c0_181, %c160_182] : memref<16x16x288xbf16, #tpu.memory_space<vmem>>, vector<16x15x32xbf16>
    tpu.vector_store %arg11[%c0_180, %c0_181, %c160_182], %118 {strides = array<i32>} : memref<16x16x288xbf16, #tpu.memory_space<vmem>>, vector<16x15x32xbf16>,
    %c15_183 = arith.constant 15 : index
    %c0_184 = arith.constant 0 : index
    %c192_185 = arith.constant 192 : index
    %120 = vector.load %arg11[%c15_183, %c0_184, %c192_185] : memref<16x16x288xbf16, #tpu.memory_space<vmem>>, vector<1x16x32xbf16>
    tpu.vector_store %arg11[%c15_183, %c0_184, %c192_185], %100 {strides = array<i32>} : memref<16x16x288xbf16, #tpu.memory_space<vmem>>, vector<1x16x32xbf16>,
    %c0_186 = arith.constant 0 : index
    %c0_187 = arith.constant 0 : index
    %c192_188 = arith.constant 192 : index
    %121 = vector.load %arg11[%c0_186, %c0_187, %c192_188] : memref<16x16x288xbf16, #tpu.memory_space<vmem>>, vector<16x1x32xbf16>
    tpu.vector_store %arg11[%c0_186, %c0_187, %c192_188], %101 {strides = array<i32>} : memref<16x16x288xbf16, #tpu.memory_space<vmem>>, vector<16x1x32xbf16>,
    %122 = vector.extract_strided_slice %99 {offsets = [1, 0, 0], sizes = [15, 15, 32], strides = [1, 1, 1]} : vector<16x16x32xbf16> to vector<15x15x32xbf16>
    %c0_189 = arith.constant 0 : index
    %c1_190 = arith.constant 1 : index
    %c192_191 = arith.constant 192 : index
    %123 = vector.load %arg11[%c0_189, %c1_190, %c192_191] : memref<16x16x288xbf16, #tpu.memory_space<vmem>>, vector<15x15x32xbf16>
    tpu.vector_store %arg11[%c0_189, %c1_190, %c192_191], %122 {strides = array<i32>} : memref<16x16x288xbf16, #tpu.memory_space<vmem>>, vector<15x15x32xbf16>,
    %c15_192 = arith.constant 15 : index
    %c0_193 = arith.constant 0 : index
    %c224_194 = arith.constant 224 : index
    %124 = vector.load %arg11[%c15_192, %c0_193, %c224_194] : memref<16x16x288xbf16, #tpu.memory_space<vmem>>, vector<1x16x32xbf16>
    tpu.vector_store %arg11[%c15_192, %c0_193, %c224_194], %100 {strides = array<i32>} : memref<16x16x288xbf16, #tpu.memory_space<vmem>>, vector<1x16x32xbf16>,
    %125 = vector.extract_strided_slice %99 {offsets = [1, 0, 0], sizes = [15, 16, 32], strides = [1, 1, 1]} : vector<16x16x32xbf16> to vector<15x16x32xbf16>
    %c0_195 = arith.constant 0 : index
    %c0_196 = arith.constant 0 : index
    %c224_197 = arith.constant 224 : index
    %126 = vector.load %arg11[%c0_195, %c0_196, %c224_197] : memref<16x16x288xbf16, #tpu.memory_space<vmem>>, vector<15x16x32xbf16>
    tpu.vector_store %arg11[%c0_195, %c0_196, %c224_197], %125 {strides = array<i32>} : memref<16x16x288xbf16, #tpu.memory_space<vmem>>, vector<15x16x32xbf16>,
    %c15_198 = arith.constant 15 : index
    %c0_199 = arith.constant 0 : index
    %c256_200 = arith.constant 256 : index
    %127 = vector.load %arg11[%c15_198, %c0_199, %c256_200] : memref<16x16x288xbf16, #tpu.memory_space<vmem>>, vector<1x16x32xbf16>
    tpu.vector_store %arg11[%c15_198, %c0_199, %c256_200], %100 {strides = array<i32>} : memref<16x16x288xbf16, #tpu.memory_space<vmem>>, vector<1x16x32xbf16>,
    %c0_201 = arith.constant 0 : index
    %c15_202 = arith.constant 15 : index
    %c256_203 = arith.constant 256 : index
    %128 = vector.load %arg11[%c0_201, %c15_202, %c256_203] : memref<16x16x288xbf16, #tpu.memory_space<vmem>>, vector<16x1x32xbf16>
    tpu.vector_store %arg11[%c0_201, %c15_202, %c256_203], %101 {strides = array<i32>} : memref<16x16x288xbf16, #tpu.memory_space<vmem>>, vector<16x1x32xbf16>,
    %129 = vector.extract_strided_slice %99 {offsets = [1, 1, 0], sizes = [15, 15, 32], strides = [1, 1, 1]} : vector<16x16x32xbf16> to vector<15x15x32xbf16>
    %c0_204 = arith.constant 0 : index
    %c0_205 = arith.constant 0 : index
    %c256_206 = arith.constant 256 : index
    %130 = vector.load %arg11[%c0_204, %c0_205, %c256_206] : memref<16x16x288xbf16, #tpu.memory_space<vmem>>, vector<15x15x32xbf16>
    tpu.vector_store %arg11[%c0_204, %c0_205, %c256_206], %129 {strides = array<i32>} : memref<16x16x288xbf16, #tpu.memory_space<vmem>>, vector<15x15x32xbf16>,
    %c0_207 = arith.constant 0 : index
    %c0_208 = arith.constant 0 : index
    %c0_209 = arith.constant 0 : index
    %131 = vector.load %arg11[%c0_207, %c0_208, %c0_209] : memref<16x16x288xbf16, #tpu.memory_space<vmem>>, vector<16x16x288xbf16>
    %132 = vector.shape_cast %131 : vector<16x16x288xbf16> to vector<256x288xbf16>
    %c0_210 = arith.constant 0 : index
    %c0_211 = arith.constant 0 : index
    %133 = vector.load %arg8[%c0_210, %c0_211] : memref<288x128xbf16, #tpu.memory_space<vmem>>, vector<288x128xbf16>
    %cst_212 = arith.constant dense<0.000000e+00> : vector<256x128xf32>
    %134 = tpu.matmul %132, %133, %cst_212 {dimension_numbers = #tpu.dot_dimension_numbers<[1], [0], [0], [1], [0, 0, 1, 1], [], []>} : vector<256x288xbf16>, vector<288x128xbf16>, vector<256x128xf32> -> vector<256x128xf32>
    %c0_213 = arith.constant 0 : index
    %c0_214 = arith.constant 0 : index
    %135 = vector.load %arg9[%c0_213, %c0_214] : memref<1x128xf32, #tpu.memory_space<vmem>>, vector<1x128xf32>
    %136 = vector.broadcast %135 : vector<1x128xf32> to vector<256x128xf32>
    %137 = arith.addf %134, %136 : vector<256x128xf32>
    %cst_215 = arith.constant 0.000000e+00 : f32
    %138 = vector.broadcast %cst_215 : f32 to vector<256x128xf32>
    %139 = arith.maximumf %137, %138 : vector<256x128xf32>
    %140 = arith.addf %51, %139 : vector<256x128xf32>
    %c0_216 = arith.constant 0 : index
    %c0_217 = arith.constant 0 : index
    %c0_218 = arith.constant 0 : index
    %141 = vector.load %arg10[%c0_216, %c0_217, %c0_218] : memref<1x256x128xf32, #tpu.memory_space<vmem>>, vector<1x256x128xf32>
    %142 = vector.shape_cast %141 : vector<1x256x128xf32> to vector<256x128xf32>
    %143 = vector.shape_cast %140 : vector<256x128xf32> to vector<1x256x128xf32>
    tpu.vector_store %arg10[%c0_216, %c0_217, %c0_218], %143 {strides = array<i32>} : memref<1x256x128xf32, #tpu.memory_space<vmem>>, vector<1x256x128xf32>,
    return
  }
  func.func @transform_0(%arg0: i32) -> (i32, i32, i32) {
    %c0_i32 = arith.constant 0 : i32
    %c0_i32_0 = arith.constant 0 : i32
    %c0_i32_1 = arith.constant 0 : i32
    return %arg0, %c0_i32, %c0_i32_0 : i32, i32, i32
  }
  func.func @transform_1(%arg0: i32) -> (i32, i32) {
    %c0_i32 = arith.constant 0 : i32
    %c0_i32_0 = arith.constant 0 : i32
    %c0_i32_1 = arith.constant 0 : i32
    return %c0_i32, %c0_i32_0 : i32, i32
  }
  func.func @transform_2(%arg0: i32) -> (i32, i32) {
    %c0_i32 = arith.constant 0 : i32
    %c0_i32_0 = arith.constant 0 : i32
    %c0_i32_1 = arith.constant 0 : i32
    return %c0_i32, %c0_i32_0 : i32, i32
  }
  func.func @transform_3(%arg0: i32) -> (i32, i32) {
    %c0_i32 = arith.constant 0 : i32
    %c0_i32_0 = arith.constant 0 : i32
    %c0_i32_1 = arith.constant 0 : i32
    return %c0_i32, %c0_i32_0 : i32, i32
  }
  func.func @transform_4(%arg0: i32) -> (i32, i32) {
    %c0_i32 = arith.constant 0 : i32
    %c0_i32_0 = arith.constant 0 : i32
    %c0_i32_1 = arith.constant 0 : i32
    return %c0_i32, %c0_i32_0 : i32, i32
  }
  func.func @transform_5(%arg0: i32) -> (i32, i32) {
    %c0_i32 = arith.constant 0 : i32
    %c0_i32_0 = arith.constant 0 : i32
    %c0_i32_1 = arith.constant 0 : i32
    return %c0_i32, %c0_i32_0 : i32, i32
  }
  func.func @transform_6(%arg0: i32) -> (i32, i32) {
    %c0_i32 = arith.constant 0 : i32
    %c0_i32_0 = arith.constant 0 : i32
    %c0_i32_1 = arith.constant 0 : i32
    return %c0_i32, %c0_i32_0 : i32, i32
  }
  func.func @transform_7(%arg0: i32) -> (i32, i32) {
    %c0_i32 = arith.constant 0 : i32
    %c0_i32_0 = arith.constant 0 : i32
    %c0_i32_1 = arith.constant 0 : i32
    return %c0_i32, %c0_i32_0 : i32, i32
  }
  func.func @transform_8(%arg0: i32) -> (i32, i32) {
    %c0_i32 = arith.constant 0 : i32
    %c0_i32_0 = arith.constant 0 : i32
    %c0_i32_1 = arith.constant 0 : i32
    return %c0_i32, %c0_i32_0 : i32, i32
  }
  func.func @transform_9(%arg0: i32) -> (i32, i32, i32) {
    %c0_i32 = arith.constant 0 : i32
    %c0_i32_0 = arith.constant 0 : i32
    %c0_i32_1 = arith.constant 0 : i32
    return %arg0, %c0_i32, %c0_i32_0 : i32, i32, i32
  }
}

</mosaic_0001>

<bundles_post_ra>
// kernel: tpu_custom_call.1
= control target key start
LH: loop header
LB: loop body
LE: loop exit
PB: predicated region body
PF: predicated region fallthrough
CT: control target
= control target key end

     0   :  { %14 = vsyncpa [#allocation5], 0  ;;  %s11795_s0 = inlined_call_operand.vmem [shape: f32[2,256,4], index: 0, kind: input, shape index: {}]   ;;  %s11796_s1 = inlined_call_operand.vmem [shape: bf16[4,32], index: 1, kind: input, shape index: {}]   ;;  %s11797_s2 = inlined_call_operand.vmem [shape: f32[1,32], index: 2, kind: input, shape index: {}]   ;;  %s11798_s3 = inlined_call_operand.vmem [shape: bf16[288,128], index: 3, kind: input, shape index: {}]   ;;  %s11799_s4 = inlined_call_operand.vmem [shape: f32[1,128], index: 4, kind: input, shape index: {}]   ;;  %s11800_s5 = inlined_call_operand.vmem [shape: bf16[1152,32], index: 5, kind: input, shape index: {}]   ;;  %s11801_s6 = inlined_call_operand.vmem [shape: f32[1,32], index: 6, kind: input, shape index: {}]   ;;  %s11802_s7 = inlined_call_operand.vmem [shape: bf16[288,128], index: 7, kind: input, shape index: {}]   ;;  %s11803_s8 = inlined_call_operand.vmem [shape: f32[1,128], index: 8, kind: input, shape index: {}]   ;;  %s11804_s9 = inlined_call_operand.hbm [shape: f32[2,256,128], index: 9, kind: output, shape index: {}]  }
   0x1   :  { %16 = vsyncpa [#allocation5 + $0x1], 0  ;;  %s8039_s30 = smov 0   ;;  %s8041_s10 = smov 0  }
   0x2   :  { %s8043_s11 = smov 0   ;;  %s8045_s12 = smov 0  }
   0x3 LB: > { %s8060_s13 = sadd.s32 4294967295, %s7980_s12   ;;  %s6665_s14 = sadd.s32 4294967294, %s7980_s12   ;;  %s7980_s12 = sphi %s8045_s12, %s12187_s12   ;;  %s7976_s11 = sphi %s8043_s11, %s12186_s11   ;;  %s7972_s10 = sphi %s8041_s10, %s12185_s10   ;;  %s7968_s30 = sphi %s8039_s30, %s12184_s30  }
   0x4   : > { %s8064_s15 = sadd.s32 1, %s7980_s12   ;;  %s223_s16 = sadd.s32 1, %s7976_s11 }
   0x5   : > { %s220_s17 = ssub.s32 %s7980_s12, %s8064_s15  ;;  %p233_p0 = scmp.ne.s32.totalorder %s7976_s11, %s7972_s10 }
   0x6   : > { %p221_p1 = scmp.eq.s32.totalorder %s220_s17, 0  ;;  %p234_p2 = scmp.eq.s32.totalorder %s8060_s13, 1 }
   0x7   : > { %p239_p3 = scmp.ne.s32.totalorder %s7972_s10, %s7968_s30  ;;  %p240_p4 = scmp.eq.s32.totalorder %s6665_s14, 1 }
   0x8   : > { %s8075_s18 = scalar_select %p221_p1, %s7976_s11, %s223_s16  }
   0x9   : > { %p8077_p5 = por %p234_p2, %p233_p0  ;;  %p8081_p6 = por %p240_p4, %p239_p3 }
   0xa   : > { %p6668_p7 = scmp.ge.s32.totalorder %s7980_s12, 1  ;;  %p290_p8 = scmp.lt.s32.totalorder %s7980_s12, 3 }
   0xc   : > { %p291_p9 = pnand %p6668_p7, %p290_p8 }
   0xe   : > { %294 = sbr.rel (%p291_p9) target bundleno = 1701 (0x6a5), region = 56 }
  0x15   : > { %v380_v0 = vld [vmem:[%s11796_s1] sm:$0x3]  ;;  %vm437_vm0 = vcmask 1041408   ;;  %p326_p10 = scmp.lt.s32.totalorder %s8060_s13, 1  ;;  %vm388_vm1 = vcmask 31744   ;;  %vm1653_vm3 = vcmask 261127  }
  0x16   : > { %7758 = vmatprep.subr.msk.bf16.mxu0 %vm437_vm0, %v380_v0  ;;  %v439_v1 = vsel %vm437_vm0, %v380_v0, 0  ;;  %vm11806_vm2 = vsmask.f32 7966  ;;  %vm652_vm4 = vcmask 253952   ;;  %vm11810_vm5 = vsmask.f32 256 }
  0x17   : > { %7589 = vmatpush3.bf16.msra.mxu0 %v439_v1  ;;  %s327_s23 = scalar_select %p326_p10, %s8060_s13, 1  ;;  %vm8146_vm6 = vmand %vm1653_vm3, %vm11806_vm2  ;;  %v1655_v51 = vld [vmem:[#allocation2 + $0x10] sm:$0x80]  ;;  %v661_v52 = vld [vmem:[#allocation2 + $0x30] sm:$0x1]  ;;  %vm11807_vm8 = vcmask 261120  }
  0x18   : > { %v1656_v53 = vsel %vm8146_vm6, 0, %v1655_v51  ;;  %vm8153_vm7 = vmand %vm652_vm4, %vm11810_vm5  ;;  %v658_v55 = vld [vmem:[#allocation2 + $0x18] sm:$0x1]  ;;  %v1661_v58 = vld [vmem:[#allocation2 + $0x40] sm:$0x80]  ;;  %vm11808_vm9 = vcmask 523520  }
  0x19   : > { %s6837_s24 = sshll.u32 %s327_s23, 8  ;;  %1657 = vst [vmem:[#allocation2 + $0x10] sm:$0x80] %v1656_v53  ;;  %v662_v56 = vsel %vm8153_vm7, 0, %v661_v52  ;;  %v659_v57 = vsel %vm8153_vm7, 0, %v658_v55  ;;  %v1662_v59 = vsel %vm8146_vm6, 0, %v1661_v58 }
  0x1a   : > { %s8095_s27 = scalar_lea.vmem %s11795_s0, %s6837_s24  ;;  %663 = vst [vmem:[#allocation2 + $0x30] sm:$0x1] %v662_v56  ;;  %660 = vst [vmem:[#allocation2 + $0x18] sm:$0x1] %v659_v57  ;;  %v1658_v60 = vld [vmem:[#allocation2 + $0x28] sm:$0x80] }
  0x1b   : > { %v332_v2 = vld [vmem:[%s8095_s27] sm:$0xff]  ;;  %v333_v3 = vld [vmem:[%s8095_s27 + $0x8] sm:$0xff]  ;;  %v334_v4 = vld [vmem:[%s8095_s27 + $0x10] sm:$0xff]  ;;  %1663 = vst [vmem:[#allocation2 + $0x40] sm:$0x80] %v1662_v59  ;;  %v1659_v61 = vsel %vm8146_vm6, 0, %v1658_v60 }
  0x1c   : > { %v364_v5 = vpack.c.bf16 %v333_v3, %v332_v2  ;;  %v335_v6 = vld [vmem:[%s8095_s27 + $0x18] sm:$0xff]  ;;  %v336_v7 = vld [vmem:[%s8095_s27 + $0x20] sm:$0xff]  ;;  %v337_v8 = vld [vmem:[%s8095_s27 + $0x28] sm:$0xff]  ;;  %1660 = vst [vmem:[#allocation2 + $0x28] sm:$0x80] %v1659_v61  ;;  %vm11812_vm10 = vcmask 785920  }
  0x1d   : > { %v365_v9 = vpack.c.bf16 %v335_v6, %v334_v4  ;;  %v366_v10 = vpack.c.bf16 %v337_v8, %v336_v7  ;;  %v338_v11 = vld [vmem:[%s8095_s27 + $0x30] sm:$0xff]  ;;  %v339_v12 = vld [vmem:[%s8095_s27 + $0x38] sm:$0xff]  ;;  %v340_v13 = vld [vmem:[%s8095_s27 + $0x40] sm:$0xff]  ;;  %vm951_vm11 = vcmask 785927   ;;  %vm11809_vm12 = vsmask.f32 7424 }
  0x1e   : > { %7590 = vmatprep.mubr.msk.bf16.mxu0 %vm388_vm1, %v364_v5  ;;  %v341_v14 = vld [vmem:[%s8095_s27 + $0x48] sm:$0xff]  ;;  %v367_v15 = vpack.c.bf16 %v339_v12, %v338_v11  ;;  %v342_v17 = vld [vmem:[%s8095_s27 + $0x50] sm:$0xff]  ;;  %v343_v18 = vld [vmem:[%s8095_s27 + $0x58] sm:$0xff]  ;;  %vm1125_vm14 = vcmask 1041152   ;;  %v11908_v59 = vmov 0  ;;  %s7983_s22 = smov 32  }
  0x1f   : > { %7591 = vmatmul.mubr.msk.bf16.vlgmr.msra.gmra.mrb[0].mxu0 %vm388_vm1, %v365_v9  ;;  %v368_v16 = vpack.c.bf16 %v341_v14, %v340_v13  ;;  %v344_v19 = vld [vmem:[%s8095_s27 + $0x60] sm:$0xff]  ;;  %v345_v20 = vld [vmem:[%s8095_s27 + $0x68] sm:$0xff]  ;;  %v369_v21 = vpack.c.bf16 %v343_v18, %v342_v17  ;;  %v346_v23 = vld [vmem:[%s8095_s27 + $0x70] sm:$0xff]  ;;  %vm11811_vm0 = vsmask.f32 7938  ;;  %s7985_s17 = smov 64  }
  0x20   : > { %7594 = vmatprep.mubr.msk.bf16.mxu0 %vm388_vm1, %v366_v10  ;;  %v370_v22 = vpack.c.bf16 %v345_v20, %v344_v19  ;;  %v347_v24 = vld [vmem:[%s8095_s27 + $0x78] sm:$0xff]  ;;  %v348_v25 = vld [vmem:[%s8095_s27 + $0x80] sm:$0xff]  ;;  %v349_v26 = vld [vmem:[%s8095_s27 + $0x88] sm:$0xff]  ;;  %s6838_s14 = sshll.u32 %s8060_s13, 12  ;;  %s7986_s26 = smov [#allocation4]  }
  0x21   : > { %v371_v27 = vpack.c.bf16 %v347_v24, %v346_v23  ;;  %v372_v28 = vpack.c.bf16 %v349_v26, %v348_v25  ;;  %v350_v29 = vld [vmem:[%s8095_s27 + $0x90] sm:$0xff]  ;;  %v351_v30 = vld [vmem:[%s8095_s27 + $0x98] sm:$0xff]  ;;  %v352_v31 = vld [vmem:[%s8095_s27 + $0xa0] sm:$0xff]  ;;  %s11744_s24 = scalar_lea.hbm %s11804_s9, %s6838_s14 }
  0x22   : > { %v353_v32 = vld [vmem:[%s8095_s27 + $0xa8] sm:$0xff]  ;;  %v373_v33 = vpack.c.bf16 %v351_v30, %v350_v29  ;;  %v354_v35 = vld [vmem:[%s8095_s27 + $0xb0] sm:$0xff]  ;;  %v355_v36 = vld [vmem:[%s8095_s27 + $0xb8] sm:$0xff]  ;;  %v7982_v30 = vmov 0  }
  0x23   : > { %v374_v34 = vpack.c.bf16 %v353_v32, %v352_v31  ;;  %v356_v37 = vld [vmem:[%s8095_s27 + $0xc0] sm:$0xff]  ;;  %v357_v38 = vld [vmem:[%s8095_s27 + $0xc8] sm:$0xff]  ;;  %v375_v39 = vpack.c.bf16 %v355_v36, %v354_v35  ;;  %v358_v41 = vld [vmem:[%s8095_s27 + $0xd0] sm:$0xff]  ;;  %651 = vst.msk [vmem:[#allocation2] sm:$0xff] %vm11807_vm8, %v7982_v30 }
  0x24   : > { %v376_v40 = vpack.c.bf16 %v357_v38, %v356_v37  ;;  %v359_v42 = vld [vmem:[%s8095_s27 + $0xd8] sm:$0xff]  ;;  %v360_v43 = vld [vmem:[%s8095_s27 + $0xe0] sm:$0xff]  ;;  %v361_v44 = vld [vmem:[%s8095_s27 + $0xe8] sm:$0xff]  ;;  %1652 = vst.msk [vmem:[#allocation2 + $0x178] sm:$0xff] %vm11807_vm8, %v7982_v30 }
  0x25   : > { %v377_v45 = vpack.c.bf16 %v359_v42, %v358_v41  ;;  %v378_v46 = vpack.c.bf16 %v361_v44, %v360_v43  ;;  %v362_v47 = vld [vmem:[%s8095_s27 + $0xf0] sm:$0xff]  ;;  %v363_v48 = vld [vmem:[%s8095_s27 + $0xf8] sm:$0xff]  ;;  %v667_v62 = vld [vmem:[#allocation2 + $0x60] sm:$0x1]  ;;  %2381 = vst [vmem:[#allocation3] sm:$0xff] %v7982_v30  ;;  %s7984_s27 = smov 96  }
  0x26   : > { %v379_v49 = vpack.c.bf16 %v363_v48, %v362_v47  ;;  %v664_v63 = vld [vmem:[#allocation2 + $0x48] sm:$0x1]  ;;  %v668_v0 = vsel %vm8153_vm7, 0, %v667_v62  ;;  %v1667_v2 = vld [vmem:[#allocation2 + $0x70] sm:$0x80]  ;;  %2600 = vst [vmem:[#allocation3 + $0x8] sm:$0xff] %v7982_v30  ;;  %vm8221_vm13 = vmand %vm951_vm11, %vm11806_vm2 }
  0x27   : > { %7595 = vmatmul.mubr.msk.bf16.gmra.mrb[4].mxu0 %vm388_vm1, %v367_v15  ;;  %v665_v1 = vsel %vm8153_vm7, 0, %v664_v63  ;;  %669 = vst [vmem:[#allocation2 + $0x60] sm:$0x1] %v668_v0  ;;  %v1664_v3 = vld [vmem:[#allocation2 + $0x58] sm:$0x80]  ;;  %v1668_v4 = vsel %vm8146_vm6, 0, %v1667_v2  ;;  %vm8232_vm15 = vmand %vm1125_vm14, %vm11810_vm5 }
  0x28   : > { %7598 = vmatprep.mubr.msk.bf16.mxu0 %vm388_vm1, %v368_v16  ;;  %666 = vst [vmem:[#allocation2 + $0x48] sm:$0x1] %v665_v1  ;;  %v1665_v5 = vsel %vm8146_vm6, 0, %v1664_v3  ;;  %1669 = vst [vmem:[#allocation2 + $0x70] sm:$0x80] %v1668_v4  ;;  %v7804_v55 = vld [vmem:[%s11798_s3 + $0x40] sm:$0xff]  }
  0x29   : > { %1666 = vst [vmem:[#allocation2 + $0x58] sm:$0x80] %v1665_v5  ;;  %v673_v6 = vld [vmem:[#allocation2 + $0x90] sm:$0x1]  ;;  %v670_v7 = vld [vmem:[#allocation2 + $0x78] sm:$0x1]  ;;  %6856 = vmatprep.subr.bf16.mxu0 %v7804_v55  ;;  %7742 = vmatprep.subr.bf16.mxu1 %v7804_v55  ;;  %vm8265_vm3 = vmand %vm11807_vm8, %vm11809_vm12 }
  0x2a   : > { %v674_v8 = vsel %vm8153_vm7, 0, %v673_v6  ;;  %v671_v9 = vsel %vm8153_vm7, 0, %v670_v7  ;;  %v1673_v10 = vld [vmem:[#allocation2 + $0xa0] sm:$0x80]  ;;  %v1670_v11 = vld [vmem:[#allocation2 + $0x88] sm:$0x80]  ;;  %vm8272_vm4 = vmand %vm11807_vm8, %vm11811_vm0 }
  0x2b   : > { %675 = vst [vmem:[#allocation2 + $0x90] sm:$0x1] %v674_v8  ;;  %672 = vst [vmem:[#allocation2 + $0x78] sm:$0x1] %v671_v9  ;;  %v1674_v12 = vsel %vm8146_vm6, 0, %v1673_v10  ;;  %v1671_v13 = vsel %vm8146_vm6, 0, %v1670_v11 }
  0x2c   : > { %1675 = vst [vmem:[#allocation2 + $0xa0] sm:$0x80] %v1674_v12  ;;  %1672 = vst [vmem:[#allocation2 + $0x88] sm:$0x80] %v1671_v13  ;;  %v679_v14 = vld [vmem:[#allocation2 + $0xc0] sm:$0x1] }
  0x2d   : > { %v676_v15 = vld [vmem:[#allocation2 + $0xa8] sm:$0x1]  ;;  %v680_v16 = vsel %vm8153_vm7, 0, %v679_v14  ;;  %v1679_v18 = vld [vmem:[#allocation2 + $0xd0] sm:$0x80]  ;;  %2616 = vst [vmem:[#allocation3 + $0x10] sm:$0xff] %v7982_v30  ;;  %vm8804_vm14 = vmand %vm11808_vm9, %vm11809_vm12 }
  0x2e   : > { %v677_v17 = vsel %vm8153_vm7, 0, %v676_v15  ;;  %681 = vst [vmem:[#allocation2 + $0xc0] sm:$0x1] %v680_v16  ;;  %v1676_v19 = vld [vmem:[#allocation2 + $0xb8] sm:$0x80]  ;;  %v1680_v20 = vsel %vm8146_vm6, 0, %v1679_v18 }
  0x2f   : > { %7599 = vmatmul.mubr.msk.bf16.gmra.mrb[8].mxu0 %vm388_vm1, %v369_v21  ;;  %678 = vst [vmem:[#allocation2 + $0xa8] sm:$0x1] %v677_v17  ;;  %v1677_v21 = vsel %vm8146_vm6, 0, %v1676_v19  ;;  %1681 = vst [vmem:[#allocation2 + $0xd0] sm:$0x80] %v1680_v20  ;;  %v7805_v58 = vld [vmem:[%s11798_s3] sm:$0xff]  }
  0x30   : > { %7602 = vmatprep.mubr.msk.bf16.mxu0 %vm388_vm1, %v370_v22  ;;  %1678 = vst [vmem:[#allocation2 + $0xb8] sm:$0x80] %v1677_v21  ;;  %v685_v22 = vld [vmem:[#allocation2 + $0xf0] sm:$0x1]  ;;  %v682_v23 = vld [vmem:[#allocation2 + $0xd8] sm:$0x1]  ;;  %6857 = vmatpush3.bf16.msra.mxu0 %v7805_v58 }
  0x31   : > { %v686_v24 = vsel %vm8153_vm7, 0, %v685_v22  ;;  %v683_v25 = vsel %vm8153_vm7, 0, %v682_v23  ;;  %v1685_v26 = vld [vmem:[#allocation2 + $0x100] sm:$0x80]  ;;  %2978 = vst [vmem:[#allocation3 + $0x468] sm:$0xff] %v7982_v30  ;;  %3088 = vst [vmem:[#allocation3 + $0x478] sm:$0xff] %v7982_v30  ;;  %7750 = vmatpush3.bf16.msra.mxu1 %v7805_v58 }
  0x32   : > { %687 = vst [vmem:[#allocation2 + $0xf0] sm:$0x1] %v686_v24  ;;  %684 = vst [vmem:[#allocation2 + $0xd8] sm:$0x1] %v683_v25  ;;  %v691_v31 = vld [vmem:[#allocation2 + $0x120] sm:$0x1] }
  0x33   : > { %v688_v32 = vld [vmem:[#allocation2 + $0x108] sm:$0x1]  ;;  %v1688_v35 = vld [vmem:[#allocation2 + $0x118] sm:$0x80]  ;;  %v1691_v36 = vld [vmem:[#allocation2 + $0x130] sm:$0x80] }
  0x34   : > { %v655_v37 = vld [vmem:[#allocation2] sm:$0x1]  ;;  %v1689_v38 = vsel %vm8146_vm6, 0, %v1688_v35  ;;  %v11909_v59 = vsel %vm8232_vm15, 4294967295, %v11908_v59  ;;  %v697_v3 = vld [vmem:[#allocation2 + $0x150] sm:$0x1] }
  0x35   : > { %1690 = vst [vmem:[#allocation2 + $0x118] sm:$0x80] %v1689_v38  ;;  %v8212_v41 = vld [vmem:[%s11797_s2] ss:$0 sm:$0xff]  ;;  %11910 = vst [vmem:[#allocation7_spill] sm:$0xff] %v11909_v59  ;;  %v7806_v9 = vld [vmem:[%s11798_s3 + $0x48] sm:$0xff]  }
  0x36   : > { %v694_v4 = vld [vmem:[#allocation2 + $0x138] sm:$0x1]  ;;  %v698_v10 = vsel %vm8153_vm7, 0, %v697_v3  ;;  %v7807_v15 = vld [vmem:[%s11798_s3 + $0x8] sm:$0xff]   ;;  %6858 = vmatprep.subr.bf16.mxu0 %v7806_v9  ;;  %7743 = vmatprep.subr.bf16.mxu1 %v7806_v9  ;;  %v1719_v25 = vld [vmem:[#allocation2 + $0x10] sm:$0xff] }
  0x37   : > { %7603 = vmatmul.mubr.msk.bf16.gmra.mrb[12].mxu0 %vm388_vm1, %v371_v27  ;;  %v1682_v27 = vld [vmem:[#allocation2 + $0xe8] sm:$0x80]  ;;  %699 = vst [vmem:[#allocation2 + $0x150] sm:$0x1] %v698_v10  ;;  %v695_v16 = vsel %vm8153_vm7, 0, %v694_v4  ;;  %7751 = vmatpush3.bf16.msra.mxu1 %v7807_v15  ;;  %v7809_v38 = vld [vmem:[%s11798_s3 + $0x10] sm:$0xff]  }
  0x38   : > { %7606 = vmatprep.mubr.msk.bf16.mxu0 %vm388_vm1, %v372_v28  ;;  %v1686_v28 = vsel %vm8146_vm6, 0, %v1685_v26  ;;  %v1683_v29 = vsel %vm8146_vm6, 0, %v1682_v27  ;;  %696 = vst [vmem:[#allocation2 + $0x138] sm:$0x1] %v695_v16  ;;  %6859 = vmatpush3.bf16.msra.mxu0 %v7807_v15 }
  0x39   : > { %1687 = vst [vmem:[#allocation2 + $0x100] sm:$0x80] %v1686_v28  ;;  %1684 = vst [vmem:[#allocation2 + $0xe8] sm:$0x80] %v1683_v29  ;;  %v830_v29 = vld [vmem:[#allocation2 + $0x30] sm:$0xff] }
  0x3f   : > { %7607 = vmatmul.mubr.msk.bf16.gmra.mrb[16].mxu0 %vm388_vm1, %v373_v33  ;;  %v692_v33 = vsel %vm8153_vm7, 0, %v691_v31 }
  0x40   : > { %7610 = vmatprep.mubr.msk.bf16.mxu0 %vm388_vm1, %v374_v34  ;;  %v689_v34 = vsel %vm8153_vm7, 0, %v688_v32  ;;  %693 = vst [vmem:[#allocation2 + $0x120] sm:$0x1] %v692_v33  ;;  %v827_v33 = vld [vmem:[#allocation2 + $0x18] sm:$0xff] }
  0x41   : > { %690 = vst [vmem:[#allocation2 + $0x108] sm:$0x1] %v689_v34  ;;  %v7808_v34 = vld [vmem:[%s11798_s3 + $0x50] sm:$0xff]  }
  0x42   : > { %6860 = vmatprep.subr.bf16.mxu0 %v7808_v34  ;;  %7744 = vmatprep.subr.bf16.mxu1 %v7808_v34 }
  0x43   : > { %6861 = vmatpush3.bf16.msra.mxu0 %v7809_v38  ;;  %7752 = vmatpush3.bf16.msra.mxu1 %v7809_v38 }
  0x47   : > { %7611 = vmatmul.mubr.msk.bf16.gmra.mrb[20].mxu0 %vm388_vm1, %v375_v39  ;;  %v1692_v39 = vsel %vm8146_vm6, 0, %v1691_v36 }
  0x48   : > { %7614 = vmatprep.mubr.msk.bf16.mxu0 %vm388_vm1, %v376_v40  ;;  %v656_v40 = vsel %vm8153_vm7, 0, %v655_v37  ;;  %1693 = vst [vmem:[#allocation2 + $0x130] sm:$0x80] %v1692_v39 }
  0x49   : > { %657 = vst [vmem:[#allocation2] sm:$0x1] %v656_v40 }
  0x4a   : > { %873 = vst.msk [vmem:[#allocation2] sm:$0xff] %vm11808_vm9, %v7982_v30 }
  0x4b   : > { %950 = vst.msk [vmem:[#allocation2] sm:$0xff] %vm11812_vm10, %v7982_v30 }
  0x4f   : > { %7615 = vmatmul.mubr.msk.bf16.gmra.mrb[24].mxu0 %vm388_vm1, %v377_v45 }
  0x50   : > { %7618 = vmatprep.mubr.msk.bf16.mxu0 %vm388_vm1, %v378_v46 }
  0x52   : > { %v954_v60 = vld [vmem:[#allocation2] sm:$0x80]  ;;  %v1127_v63 = vld [vmem:[#allocation2] sm:$0x1] }
  0x53   : > { %v955_v62 = vsel %vm8221_vm13, 0, %v954_v60  ;;  %v1128_v2 = vsel %vm8232_vm15, 0, %v1127_v63  ;;  %v1725_v60 = vld [vmem:[#allocation2 + $0x40] sm:$0xff] }
  0x54   : > { %956 = vst [vmem:[#allocation2] sm:$0x80] %v955_v62  ;;  %1129 = vst [vmem:[#allocation2] sm:$0x1] %v1128_v2 }
  0x57   : > { %7619 = vmatmul.mubr.msk.bf16.gmra.mrb[28].mxu0 %vm388_vm1, %v379_v49  ;;  %vm1296_vm1 = vcmask 523527  }
  0x58   : > { %vm8284_vm11 = vmand %vm1296_vm1, %vm11806_vm2  ;;  %vm1448_vm1 = vcmask 778752  }
  0x59   : > { %vm8823_vm2 = vmand %vm1448_vm1, %vm11810_vm5 }
  0xf2   : > { %v7592_v42 = vpop.f32.mrb[0].mxu0 }
  0xf3   : > { %v484_v43 = vadd.f32 %v7592_v42, %v8212_v41  ;;  %v475_v44 = vpop.f32.mrb[1].mxu0 }
  0xf4   : > { %v476_v45 = vadd.f32 %v8212_v41, %v475_v44  ;;  %v7593_v46 = vpop.f32.mrb[2].mxu0 }
  0xf5   : > { %v487_v47 = vadd.f32 %v7593_v46, %v8212_v41  ;;  %v478_v48 = vpop.f32.mrb[3].mxu0  ;;  %v604_v51 = vmax.f32 %v484_v43, 0.0 }
  0xf6   : > { %v479_v49 = vadd.f32 %v8212_v41, %v478_v48  ;;  %v602_v56 = vmax.f32 %v476_v45, 0.0 }
  0xf7   : > { %v605_v52 = vmax.f32 %v487_v47, 0.0 }
  0xf8   : > { %v603_v57 = vmax.f32 %v479_v49, 0.0 }
  0xf9   : > { %v635_v61 = vpack.c.bf16 %v605_v52, %v604_v51 }
  0xfa   : > { %v8238_v0 = vpack.c.bf16 %v603_v57, %v602_v56  ;;  %v7596_v1 = vpop.f32.mrb[4].mxu0 }
  0xfb   : > { %1281 = vst.msk [vmem:[#allocation2 + $0x20] sm:$0xff] %vm11807_vm8, %v635_v61  ;;  %v500_v5 = vadd.f32 %v7596_v1, %v8212_v41  ;;  %891 = vrot.lane.b32.xlu1 %v635_v61, %s7983_s22  ;;  %v491_v6 = vpop.f32.mrb[5].mxu0  ;;  %v711_v7 = vshrl.u32 %v635_v61, 16  ;;  %v714_v8 = vshll.u32 %v635_v61, 16  ;;  %v7811_v1 = vld [vmem:[%s11798_s3 + $0x18] sm:$0xff]  }
  0xfc   : > { %1280 = vst.msk [vmem:[#allocation2 + $0x8] sm:$0xff] %vm11807_vm8, %v8238_v0  ;;  %v492_v11 = vadd.f32 %v8212_v41, %v491_v6  ;;  %v7597_v12 = vpop.f32.mrb[6].mxu0  ;;  %889 = vrot.lane.b32.xlu0 %v8238_v0, %s7983_s22  ;;  %v704_v13 = vshrl.u32 %v8238_v0, 16  ;;  %v707_v14 = vshll.u32 %v8238_v0, 16  ;;  %v7810_v0 = vld [vmem:[%s11798_s3 + $0x58] sm:$0xff]  }
  0xfd   : > { %v608_v17 = vmax.f32 %v500_v5, 0.0  ;;  %v503_v18 = vadd.f32 %v7597_v12, %v8212_v41  ;;  %v494_v19 = vpop.f32.mrb[7].mxu0  ;;  %v713_v20 = vrot.slane %v711_v7, 7  ;;  %v1004_v21 = vrot.slane %v714_v8, 1  ;;  %v836_v12 = vld [vmem:[#allocation2 + $0x60] sm:$0xff]  ;;  %6862 = vmatprep.subr.bf16.mxu0 %v7810_v0  ;;  %7745 = vmatprep.subr.bf16.mxu1 %v7810_v0 }
  0xfe   : > { %v606_v23 = vmax.f32 %v492_v11, 0.0  ;;  %v495_v24 = vadd.f32 %v8212_v41, %v494_v19  ;;  %v1002_v26 = vrot.slane %v707_v14, 1  ;;  %v706_v27 = vrot.slane %v704_v13, 7  ;;  %6863 = vmatpush3.bf16.msra.mxu0 %v7811_v1  ;;  %v7812_v19 = vld [vmem:[%s11798_s3 + $0x60] sm:$0xff]   ;;  %7753 = vmatpush3.bf16.msra.mxu1 %v7811_v1 }
  0xff   : > { %v609_v30 = vmax.f32 %v503_v18, 0.0  ;;  %1592 = vrot.lane.b32.xlu1 %v635_v61, %s7984_s27  ;;  %v716_v31 = vor.u32 %v714_v8, %v713_v20  ;;  %v1005_v32 = vor.u32 %v1004_v21, %v711_v7  ;;  %v1694_v7 = vld [vmem:[#allocation2 + $0x148] sm:$0x80]  ;;  %6864 = vmatprep.subr.bf16.mxu0 %v7812_v19 }
 0x100   : > { %v607_v35 = vmax.f32 %v495_v24, 0.0  ;;  %v8280_v36 = vor.u32 %v707_v14, %v706_v27  ;;  %v8300_v44 = vor.u32 %v1002_v26, %v704_v13  ;;  %v1697_v13 = vld [vmem:[#allocation2 + $0x160] sm:$0x80]  ;;  %v833_v18 = vld [vmem:[#allocation2 + $0x48] sm:$0xff]  ;;  %v1695_v20 = vsel %vm8146_vm6, 0, %v1694_v7  ;;  %7746 = vmatprep.subr.bf16.mxu1 %v7812_v19  ;;  %v842_v7 = vld [vmem:[#allocation2 + $0x90] sm:$0xff] }
 0x101   : > { %v8291_v39 = vpack.c.bf16 %v609_v30, %v608_v17  ;;  %1498 = vrot.lane.b32.xlu0 %v716_v31, %s7985_s17  ;;  %v1720_v40 = vsel %vm8265_vm3, %v1005_v32, %v1719_v25  ;;  %v831_v42 = vsel %vm8272_vm4, %v716_v31, %v830_v29  ;;  %v1722_v17 = vld [vmem:[#allocation2 + $0x28] sm:$0xff]  ;;  %v7813_v25 = vld [vmem:[%s11798_s3 + $0x20] sm:$0xff]   ;;  %1696 = vst [vmem:[#allocation2 + $0x148] sm:$0x80] %v1695_v20  ;;  %v1698_v26 = vsel %vm8146_vm6, 0, %v1697_v13  ;;  %v839_v13 = vld [vmem:[#allocation2 + $0x78] sm:$0xff] }
 0x102   : > { %v8298_v43 = vpack.c.bf16 %v607_v35, %v606_v23  ;;  %1721 = vst [vmem:[#allocation2 + $0x10] sm:$0xff] %v1720_v40  ;;  %v7600_v45 = vpop.f32.mrb[8].mxu0  ;;  %832 = vst [vmem:[#allocation2 + $0x30] sm:$0xff] %v831_v42  ;;  %v828_v46 = vsel %vm8272_vm4, %v8280_v36, %v827_v33  ;;  %v1301_v47 = vld [vmem:[#allocation2 + $0x20] sm:$0x80]  ;;  %6865 = vmatpush3.bf16.msra.mxu0 %v7813_v25  ;;  %7754 = vmatpush3.bf16.msra.mxu1 %v7813_v25 }
 0x103   : > { %1283 = vst.msk [vmem:[#allocation2 + $0x50] sm:$0xff] %vm11807_vm8, %v8291_v39  ;;  %1350 = vrot.lane.b32.xlu1 %v1005_v32, %s7983_s22  ;;  %v516_v48 = vadd.f32 %v7600_v45, %v8212_v41  ;;  %v507_v49 = vpop.f32.mrb[9].mxu0  ;;  %v725_v51 = vshrl.u32 %v8291_v39, 16  ;;  %v728_v52 = vshll.u32 %v8291_v39, 16  ;;  %829 = vst [vmem:[#allocation2 + $0x18] sm:$0xff] %v828_v46  ;;  %v1302_v55 = vsel %vm8284_vm11, 0, %v1301_v47 }
 0x104   : > { %v1298_v56 = vld [vmem:[#allocation2 + $0x8] sm:$0x80]  ;;  %1282 = vst.msk [vmem:[#allocation2 + $0x38] sm:$0xff] %vm11807_vm8, %v8298_v43  ;;  %v508_v57 = vadd.f32 %v8212_v41, %v507_v49  ;;  %v7601_v58 = vpop.f32.mrb[10].mxu0  ;;  %v718_v61 = vshrl.u32 %v8298_v43, 16  ;;  %v721_v62 = vshll.u32 %v8298_v43, 16 }
 0x105   : > { %1303 = vst [vmem:[#allocation2 + $0x20] sm:$0x80] %v1302_v55  ;;  %v1299_v63 = vsel %vm8284_vm11, 0, %v1298_v56  ;;  %1184 = vrot.lane.b32.xlu0 %v716_v31, %s7984_s27  ;;  %v612_v2 = vmax.f32 %v516_v48, 0.0  ;;  %v519_v3 = vadd.f32 %v7601_v58, %v8212_v41  ;;  %v510_v4 = vpop.f32.mrb[11].mxu0  ;;  %v1008_v5 = vrot.slane %v728_v52, 1 }
 0x106   : > { %v727_v6 = vrot.slane %v725_v51, 7  ;;  %1300 = vst [vmem:[#allocation2 + $0x8] sm:$0x80] %v1299_v63  ;;  %v610_v8 = vmax.f32 %v508_v57, 0.0  ;;  %v511_v9 = vadd.f32 %v8212_v41, %v510_v4  ;;  %v720_v10 = vrot.slane %v718_v61, 7  ;;  %v7815_v57 = vld [vmem:[%s11798_s3 + $0x28] sm:$0xff]  }
 0x107   : > { %v1006_v11 = vrot.slane %v721_v62, 1  ;;  %1034 = vrot.lane.b32.xlu1 %v1005_v32, %s7985_s17  ;;  %v613_v14 = vmax.f32 %v519_v3, 0.0  ;;  %v8330_v15 = vor.u32 %v1008_v5, %v725_v51  ;;  %1699 = vst [vmem:[#allocation2 + $0x160] sm:$0x80] %v1698_v26  ;;  %v1731_v3 = vld [vmem:[#allocation2 + $0x70] sm:$0xff] }
 0x108   : > { %v8332_v16 = vor.u32 %v728_v52, %v727_v6  ;;  %v611_v21 = vmax.f32 %v511_v9, 0.0  ;;  %v8339_v23 = vor.u32 %v721_v62, %v720_v10  ;;  %v1728_v6 = vld [vmem:[#allocation2 + $0x58] sm:$0xff] }
 0x109   : > { %v8341_v24 = vor.u32 %v1006_v11, %v718_v61  ;;  %1348 = vrot.lane.b32.xlu0 %v8300_v44, %s7983_s22  ;;  %v8350_v27 = vpack.c.bf16 %v613_v14, %v612_v2  ;;  %v1726_v29 = vsel %vm8265_vm3, %v8330_v15, %v1725_v60  ;;  %v8358_v31 = vld [vmem:[#allocation2 + $0x10] sm:$0xff]  ;;  %v700_v14 = vld [vmem:[#allocation2 + $0x168] sm:$0x1] }
 0x10a   : > { %v837_v30 = vsel %vm8272_vm4, %v8332_v16, %v836_v12  ;;  %v5816_v32 = vld [vmem:[#allocation2 + $0x10] sm:$0x80]  ;;  %v8360_v33 = vpack.c.bf16 %v611_v21, %v610_v8  ;;  %1727 = vst [vmem:[#allocation2 + $0x40] sm:$0xff] %v1726_v29  ;;  %v7604_v35 = vpop.f32.mrb[12].mxu0  ;;  %v834_v38 = vsel %vm8272_vm4, %v8339_v23, %v833_v18  ;;  %v701_v20 = vsel %vm8153_vm7, 0, %v700_v14 }
 0x10b   : > { %v1723_v34 = vsel %vm8265_vm3, %v8341_v24, %v1722_v17  ;;  %838 = vst [vmem:[#allocation2 + $0x60] sm:$0xff] %v837_v30  ;;  %v1307_v40 = vld [vmem:[#allocation2 + $0x50] sm:$0x80]  ;;  %v5817_v42 = vsel %vm8146_vm6, 0, %v5816_v32  ;;  %1032 = vrot.lane.b32.xlu1 %v8300_v44, %s7985_s17  ;;  %1285 = vst.msk [vmem:[#allocation2 + $0x80] sm:$0xff] %vm11807_vm8, %v8350_v27  ;;  %v532_v45 = vadd.f32 %v7604_v35, %v8212_v41  ;;  %v523_v46 = vpop.f32.mrb[13].mxu0 }
 0x10c   : > { %1724 = vst [vmem:[#allocation2 + $0x28] sm:$0xff] %v1723_v34  ;;  %v739_v47 = vshrl.u32 %v8350_v27, 16  ;;  %v742_v48 = vshll.u32 %v8350_v27, 16  ;;  %835 = vst [vmem:[#allocation2 + $0x48] sm:$0xff] %v834_v38  ;;  %v1308_v49 = vsel %vm8284_vm11, 0, %v1307_v40  ;;  %v7814_v44 = vld [vmem:[%s11798_s3 + $0x68] sm:$0xff]   ;;  %v524_v51 = vadd.f32 %v8212_v41, %v523_v46 }
 0x10d   : > { %5818 = vst [vmem:[#allocation2 + $0x10] sm:$0x80] %v5817_v42  ;;  %1284 = vst.msk [vmem:[#allocation2 + $0x68] sm:$0xff] %vm11807_vm8, %v8360_v33  ;;  %v7605_v52 = vpop.f32.mrb[14].mxu0  ;;  %v732_v55 = vshrl.u32 %v8360_v33, 16  ;;  %v735_v56 = vshll.u32 %v8360_v33, 16  ;;  %895 = vrot.lane.b32.xlu0 %v8291_v39, %s7983_s22  ;;  %6866 = vmatprep.subr.bf16.mxu0 %v7814_v44 }
 0x10e   : > { %1309 = vst [vmem:[#allocation2 + $0x50] sm:$0x80] %v1308_v49  ;;  %v616_v58 = vmax.f32 %v532_v45, 0.0  ;;  %v535_v60 = vadd.f32 %v7605_v52, %v8212_v41  ;;  %v526_v61 = vpop.f32.mrb[15].mxu0  ;;  %v1012_v62 = vrot.slane %v742_v48, 1  ;;  %v741_v63 = vrot.slane %v739_v47, 7  ;;  %7747 = vmatprep.subr.bf16.mxu1 %v7814_v44  ;;  %6867 = vmatpush3.bf16.msra.mxu0 %v7815_v57 }
 0x10f   : > { %v1304_v0 = vld [vmem:[#allocation2 + $0x38] sm:$0x80]  ;;  %v614_v1 = vmax.f32 %v524_v51, 0.0  ;;  %v527_v2 = vadd.f32 %v8212_v41, %v526_v61  ;;  %v734_v4 = vrot.slane %v732_v55, 7  ;;  %v1010_v5 = vrot.slane %v735_v56, 1  ;;  %1182 = vrot.lane.b32.xlu1 %v8280_v36, %s7984_s27  ;;  %v7816_v11 = vld [vmem:[%s11798_s3 + $0x70] sm:$0xff]   ;;  %7755 = vmatpush3.bf16.msra.mxu1 %v7815_v57 }
 0x110   : > { %v617_v8 = vmax.f32 %v535_v60, 0.0  ;;  %v8396_v9 = vor.u32 %v1012_v62, %v739_v47  ;;  %v8398_v10 = vor.u32 %v742_v48, %v741_v63  ;;  %v1305_v12 = vsel %vm8284_vm11, 0, %v1304_v0  ;;  %v7817_v36 = vld [vmem:[%s11798_s3 + $0x30] sm:$0xff]   ;;  %6868 = vmatprep.subr.bf16.mxu0 %v7816_v11  ;;  %702 = vst [vmem:[#allocation2 + $0x168] sm:$0x1] %v701_v20  ;;  %7748 = vmatprep.subr.bf16.mxu1 %v7816_v11 }
 0x111   : > { %v615_v17 = vmax.f32 %v527_v2, 0.0  ;;  %v8405_v18 = vor.u32 %v735_v56, %v734_v4  ;;  %v8407_v19 = vor.u32 %v1010_v5, %v732_v55  ;;  %1306 = vst [vmem:[#allocation2 + $0x38] sm:$0x80] %v1305_v12  ;;  %893 = vrot.lane.b32.xlu0 %v8298_v43, %s7983_s22  ;;  %v8443_v49 = vld [vmem:[#allocation2 + $0x40] sm:$0xff]  ;;  %v7818_v5 = vld [vmem:[%s11798_s3 + $0x78] sm:$0xff]   ;;  %v1734_v12 = vld [vmem:[#allocation2 + $0x88] sm:$0xff] }
 0x112   : > { %v8416_v21 = vpack.c.bf16 %v617_v8, %v616_v58  ;;  %v1732_v25 = vsel %vm8265_vm3, %v8396_v9, %v1731_v3  ;;  %v843_v26 = vsel %vm8272_vm4, %v8398_v10, %v842_v7  ;;  %v7608_v32 = vpop.f32.mrb[16].mxu0  ;;  %v1313_v35 = vld [vmem:[#allocation2 + $0x80] sm:$0x80]  ;;  %6869 = vmatpush3.bf16.msra.mxu0 %v7817_v36 }
 0x113   : > { %v8424_v29 = vpack.c.bf16 %v615_v17, %v614_v1  ;;  %1733 = vst [vmem:[#allocation2 + $0x70] sm:$0xff] %v1732_v25  ;;  %v1729_v30 = vsel %vm8265_vm3, %v8407_v19, %v1728_v6  ;;  %844 = vst [vmem:[#allocation2 + $0x90] sm:$0xff] %v843_v26  ;;  %v840_v34 = vsel %vm8272_vm4, %v8405_v18, %v839_v13  ;;  %v8432_v38 = vld [vmem:[#allocation2 + $0x28] sm:$0xff]  ;;  %1596 = vrot.lane.b32.xlu1 %v8291_v39, %s7984_s27  ;;  %v539_v45 = vpop.f32.mrb[17].mxu0  ;;  %v5822_v56 = vld [vmem:[#allocation2 + $0x40] sm:$0x80] }
 0x114   : > { %v5819_v40 = vld [vmem:[#allocation2 + $0x28] sm:$0x80]  ;;  %1287 = vst.msk [vmem:[#allocation2 + $0xb0] sm:$0xff] %vm11807_vm8, %v8416_v21  ;;  %1730 = vst [vmem:[#allocation2 + $0x58] sm:$0xff] %v1729_v30  ;;  %v548_v42 = vadd.f32 %v7608_v32, %v8212_v41  ;;  %v753_v46 = vshrl.u32 %v8416_v21, 16  ;;  %v756_v47 = vshll.u32 %v8416_v21, 16  ;;  %v540_v39 = vadd.f32 %v8212_v41, %v539_v45  ;;  %7756 = vmatpush3.bf16.msra.mxu1 %v7817_v36 }
 0x115   : > { %841 = vst [vmem:[#allocation2 + $0x78] sm:$0xff] %v840_v34  ;;  %v1314_v48 = vsel %vm8284_vm11, 0, %v1313_v35  ;;  %1286 = vst.msk [vmem:[#allocation2 + $0x98] sm:$0xff] %vm11807_vm8, %v8424_v29  ;;  %v7609_v44 = vpop.f32.mrb[18].mxu0  ;;  %v746_v51 = vshrl.u32 %v8424_v29, 16  ;;  %v749_v52 = vshll.u32 %v8424_v29, 16  ;;  %1354 = vrot.lane.b32.xlu0 %v8330_v15, %s7983_s22  ;;  %6870 = vmatprep.subr.bf16.mxu0 %v7818_v5 }
 0x116   : > { %1315 = vst [vmem:[#allocation2 + $0x80] sm:$0x80] %v1314_v48  ;;  %v5820_v55 = vsel %vm8146_vm6, 0, %v5819_v40  ;;  %v620_v57 = vmax.f32 %v548_v42, 0.0  ;;  %v551_v58 = vadd.f32 %v7609_v44, %v8212_v41  ;;  %v542_v60 = vpop.f32.mrb[19].mxu0  ;;  %v1016_v61 = vrot.slane %v756_v47, 1  ;;  %7749 = vmatprep.subr.bf16.mxu1 %v7818_v5 }
 0x117   : > { %v755_v62 = vrot.slane %v753_v46, 7  ;;  %5821 = vst [vmem:[#allocation2 + $0x28] sm:$0x80] %v5820_v55  ;;  %v1310_v63 = vld [vmem:[#allocation2 + $0x68] sm:$0x80]  ;;  %v618_v0 = vmax.f32 %v540_v39, 0.0  ;;  %v543_v1 = vadd.f32 %v8212_v41, %v542_v60  ;;  %1594 = vrot.lane.b32.xlu1 %v8298_v43, %s7984_s27 }
 0x118   : > { %v1737_v2 = vld [vmem:[#allocation2 + $0xa0] sm:$0xff]  ;;  %v748_v3 = vrot.slane %v746_v51, 7  ;;  %v1014_v4 = vrot.slane %v749_v52, 1  ;;  %v621_v7 = vmax.f32 %v551_v58, 0.0  ;;  %v8461_v8 = vor.u32 %v1016_v61, %v753_v46  ;;  %v7819_v13 = vld [vmem:[%s11798_s3 + $0x38] sm:$0xff]   ;;  %v845_v17 = vld [vmem:[#allocation2 + $0xa8] sm:$0xff] }
 0x119   : > { %v848_v6 = vld [vmem:[#allocation2 + $0xc0] sm:$0xff]  ;;  %v8463_v11 = vor.u32 %v756_v47, %v755_v62  ;;  %v5823_v14 = vsel %vm8146_vm6, 0, %v5822_v56  ;;  %v619_v36 = vmax.f32 %v543_v1, 0.0  ;;  %v1311_v43 = vsel %vm8284_vm11, 0, %v1310_v63  ;;  %1038 = vrot.lane.b32.xlu0 %v8330_v15, %s7985_s17  ;;  %6871 = vmatpush3.bf16.msra.mxu0 %v7819_v13 }
 0x11a   : > { %v8470_v20 = vor.u32 %v749_v52, %v748_v3  ;;  %v8472_v25 = vor.u32 %v1014_v4, %v746_v51  ;;  %5824 = vst [vmem:[#allocation2 + $0x40] sm:$0x80] %v5823_v14  ;;  %v8478_v26 = vpack.c.bf16 %v621_v7, %v620_v57  ;;  %v1738_v30 = vsel %vm8265_vm3, %v8461_v8, %v1737_v2  ;;  %v8483_v32 = vld [vmem:[#allocation2 + $0x70] sm:$0xff]  ;;  %v7612_v42 = vpop.f32.mrb[20].mxu0  ;;  %v8496_v45 = vld [vmem:[%s11798_s3 + $0x80] sm:$0xff]  }
 0x11b   : > { %v5828_v34 = vld [vmem:[#allocation2 + $0x70] sm:$0x80]  ;;  %1312 = vst [vmem:[#allocation2 + $0x68] sm:$0x80] %v1311_v43  ;;  %v849_v35 = vsel %vm8272_vm4, %v8463_v11, %v848_v6  ;;  %v8488_v40 = vpack.c.bf16 %v619_v36, %v618_v0  ;;  %1739 = vst [vmem:[#allocation2 + $0xa0] sm:$0xff] %v1738_v30  ;;  %7757 = vmatpush3.bf16.msra.mxu1 %v7819_v13  ;;  %v8498_v46 = vld [vmem:[#allocation2 + $0x58] sm:$0xff]  ;;  %1502 = vrot.lane.b32.xlu1 %v8332_v16, %s7985_s17 }
 0x11c   : > { %v1735_v15 = vsel %vm8265_vm3, %v8472_v25, %v1734_v12  ;;  %v5825_v47 = vld [vmem:[#allocation2 + $0x58] sm:$0x80]  ;;  %v5829_v48 = vsel %vm8146_vm6, 0, %v5828_v34  ;;  %850 = vst [vmem:[#allocation2 + $0xc0] sm:$0xff] %v849_v35  ;;  %v846_v39 = vsel %vm8272_vm4, %v8470_v20, %v845_v17  ;;  %1289 = vst.msk [vmem:[#allocation2 + $0xe0] sm:$0xff] %vm11807_vm8, %v8478_v26  ;;  %v564_v44 = vadd.f32 %v7612_v42, %v8212_v41  ;;  %v555_v51 = vpop.f32.mrb[21].mxu0 }
 0x11d   : > { %1736 = vst [vmem:[#allocation2 + $0x88] sm:$0xff] %v1735_v15  ;;  %v767_v52 = vshrl.u32 %v8478_v26, 16  ;;  %v770_v55 = vshll.u32 %v8478_v26, 16  ;;  %v5826_v56 = vsel %vm8146_vm6, 0, %v5825_v47  ;;  %5830 = vst [vmem:[#allocation2 + $0x70] sm:$0x80] %v5829_v48  ;;  %v556_v57 = vadd.f32 %v8212_v41, %v555_v51  ;;  %7622 = vmatprep.subr.bf16.mxu0 %v8496_v45  ;;  %1188 = vrot.lane.b32.xlu0 %v8332_v16, %s7984_s27 }
 0x11e   : > { %847 = vst [vmem:[#allocation2 + $0xa8] sm:$0xff] %v846_v39  ;;  %1288 = vst.msk [vmem:[#allocation2 + $0xc8] sm:$0xff] %vm11807_vm8, %v8488_v40  ;;  %v7613_v58 = vpop.f32.mrb[22].mxu0  ;;  %v760_v60 = vshrl.u32 %v8488_v40, 16  ;;  %v763_v61 = vshll.u32 %v8488_v40, 16  ;;  %v624_v63 = vmax.f32 %v564_v44, 0.0 }
 0x11f   : > { %5827 = vst [vmem:[#allocation2 + $0x58] sm:$0x80] %v5826_v56  ;;  %v1319_v62 = vld [vmem:[#allocation2 + $0xb0] sm:$0x80]  ;;  %v567_v0 = vadd.f32 %v7613_v58, %v8212_v41  ;;  %v558_v1 = vpop.f32.mrb[23].mxu0  ;;  %v1020_v2 = vrot.slane %v770_v55, 1  ;;  %1500 = vrot.lane.b32.xlu1 %v8339_v23, %s7985_s17 }
 0x120   : > { %v769_v3 = vrot.slane %v767_v52, 7  ;;  %v1316_v4 = vld [vmem:[#allocation2 + $0x98] sm:$0x80]  ;;  %v622_v5 = vmax.f32 %v556_v57, 0.0  ;;  %v559_v6 = vadd.f32 %v8212_v41, %v558_v1  ;;  %v1743_v7 = vld [vmem:[#allocation2 + $0xd0] sm:$0xff]  ;;  %v762_v12 = vrot.slane %v760_v60, 7 }
 0x121   : > { %v1018_v13 = vrot.slane %v763_v61, 1  ;;  %v854_v14 = vld [vmem:[#allocation2 + $0xf0] sm:$0xff]  ;;  %v625_v17 = vmax.f32 %v567_v0, 0.0  ;;  %v8526_v36 = vor.u32 %v1020_v2, %v767_v52  ;;  %v1740_v43 = vld [vmem:[#allocation2 + $0xb8] sm:$0xff]  ;;  %v1320_v30 = vsel %vm8284_vm11, 0, %v1319_v62  ;;  %1352 = vrot.lane.b32.xlu0 %v8341_v24, %s7983_s22 }
 0x122   : > { %v8528_v16 = vor.u32 %v770_v55, %v769_v3  ;;  %v851_v34 = vld [vmem:[#allocation2 + $0xd8] sm:$0xff]  ;;  %v623_v35 = vmax.f32 %v559_v6, 0.0  ;;  %v8532_v15 = vor.u32 %v763_v61, %v762_v12  ;;  %1321 = vst [vmem:[#allocation2 + $0xb0] sm:$0x80] %v1320_v30  ;;  %v1317_v47 = vsel %vm8284_vm11, 0, %v1316_v4  ;;  %v8545_v44 = vld [vmem:[#allocation2 + $0xa0] sm:$0xff] }
 0x123   : > { %v8534_v42 = vor.u32 %v1018_v13, %v760_v60  ;;  %v8540_v48 = vpack.c.bf16 %v625_v17, %v624_v63  ;;  %v1744_v39 = vsel %vm8265_vm3, %v8526_v36, %v1743_v7  ;;  %11917 = vst [vmem:[#allocation8_spill] sm:$0xff] %v8545_v44  ;;  %v5834_v51 = vld [vmem:[#allocation2 + $0xa0] sm:$0x80]  ;;  %1318 = vst [vmem:[#allocation2 + $0x98] sm:$0x80] %v1317_v47  ;;  %v7616_v56 = vpop.f32.mrb[24].mxu0  ;;  %899 = vrot.lane.b32.xlu1 %v8350_v27, %s7983_s22 }
 0x124   : > { %v855_v52 = vsel %vm8272_vm4, %v8528_v16, %v854_v14  ;;  %v8550_v55 = vpack.c.bf16 %v623_v35, %v622_v5  ;;  %1745 = vst [vmem:[#allocation2 + $0xd0] sm:$0xff] %v1744_v39  ;;  %v8555_v58 = vld [vmem:[#allocation2 + $0x88] sm:$0xff]  ;;  %v5835_v61 = vsel %vm8146_vm6, 0, %v5834_v51  ;;  %v852_v62 = vsel %vm8272_vm4, %v8532_v15, %v851_v34  ;;  %v571_v0 = vpop.f32.mrb[25].mxu0  ;;  %v1325_v4 = vld [vmem:[#allocation2 + $0xe0] sm:$0x80] }
 0x125   : > { %v1741_v57 = vsel %vm8265_vm3, %v8534_v42, %v1740_v43  ;;  %11918 = vst [vmem:[#allocation9_spill] sm:$0xff] %v8555_v58  ;;  %v5831_v60 = vld [vmem:[#allocation2 + $0x88] sm:$0x80]  ;;  %856 = vst [vmem:[#allocation2 + $0xf0] sm:$0xff] %v855_v52  ;;  %v580_v63 = vadd.f32 %v7616_v56, %v8212_v41  ;;  %v781_v1 = vshrl.u32 %v8540_v48, 16  ;;  %v784_v2 = vshll.u32 %v8540_v48, 16  ;;  %1036 = vrot.lane.b32.xlu0 %v8341_v24, %s7985_s17 }
 0x126   : > { %1291 = vst.msk [vmem:[#allocation2 + $0x110] sm:$0xff] %vm11807_vm8, %v8540_v48  ;;  %1742 = vst [vmem:[#allocation2 + $0xb8] sm:$0xff] %v1741_v57  ;;  %v5832_v3 = vsel %vm8146_vm6, 0, %v5831_v60  ;;  %v572_v5 = vadd.f32 %v8212_v41, %v571_v0  ;;  %v7617_v6 = vpop.f32.mrb[26].mxu0  ;;  %v774_v7 = vshrl.u32 %v8550_v55, 16  ;;  %v777_v12 = vshll.u32 %v8550_v55, 16 }
 0x127   : > { %5836 = vst [vmem:[#allocation2 + $0xa0] sm:$0x80] %v5835_v61  ;;  %853 = vst [vmem:[#allocation2 + $0xd8] sm:$0xff] %v852_v62  ;;  %v1326_v13 = vsel %vm8284_vm11, 0, %v1325_v4  ;;  %v1322_v14 = vld [vmem:[#allocation2 + $0xc8] sm:$0x80]  ;;  %v583_v43 = vadd.f32 %v7617_v6, %v8212_v41  ;;  %1600 = vrot.lane.b32.xlu1 %v8350_v27, %s7984_s27 }
 0x128   : > { %1290 = vst.msk [vmem:[#allocation2 + $0xf8] sm:$0xff] %vm11807_vm8, %v8550_v55  ;;  %5833 = vst [vmem:[#allocation2 + $0x88] sm:$0x80] %v5832_v3  ;;  %v628_v17 = vmax.f32 %v580_v63, 0.0  ;;  %v574_v30 = vpop.f32.mrb[27].mxu0  ;;  %v1024_v34 = vrot.slane %v784_v2, 1 }
 0x129   : > { %v783_v35 = vrot.slane %v781_v1, 7  ;;  %1327 = vst [vmem:[#allocation2 + $0xe0] sm:$0x80] %v1326_v13  ;;  %v626_v47 = vmax.f32 %v572_v5, 0.0  ;;  %v575_v39 = vadd.f32 %v8212_v41, %v574_v30  ;;  %v1749_v51 = vld [vmem:[#allocation2 + $0x100] sm:$0xff]  ;;  %v776_v52 = vrot.slane %v774_v7, 7  ;;  %1186 = vrot.lane.b32.xlu0 %v8339_v23, %s7984_s27 }
 0x12a   : > { %v1022_v56 = vrot.slane %v777_v12, 1  ;;  %v629_v57 = vmax.f32 %v583_v43, 0.0  ;;  %v8584_v60 = vor.u32 %v1024_v34, %v781_v1  ;;  %v1746_v24 = vld [vmem:[#allocation2 + $0xe8] sm:$0xff]  ;;  %v1323_v62 = vsel %vm8284_vm11, 0, %v1322_v14  ;;  %v860_v63 = vld [vmem:[#allocation2 + $0x120] sm:$0xff]  ;;  %v863_v44 = vld [vmem:[#allocation2 + $0x138] sm:$0xff] }
 0x12b   : > { %v8586_v61 = vor.u32 %v784_v2, %v783_v35  ;;  %v627_v0 = vmax.f32 %v575_v39, 0.0  ;;  %v8590_v3 = vor.u32 %v777_v12, %v776_v52  ;;  %1324 = vst [vmem:[#allocation2 + $0xc8] sm:$0x80] %v1323_v62  ;;  %v8601_v2 = vld [vmem:[#allocation2 + $0xd0] sm:$0xff]  ;;  %v857_v6 = vld [vmem:[#allocation2 + $0x108] sm:$0xff]  ;;  %v7620_v12 = vpop.f32.mrb[28].mxu0  ;;  %897 = vrot.lane.b32.xlu1 %v8360_v33, %s7983_s22 }
 0x12c   : > { %v8592_v4 = vor.u32 %v1022_v56, %v774_v7  ;;  %v8596_v27 = vpack.c.bf16 %v629_v57, %v628_v17  ;;  %v1750_v1 = vsel %vm8265_vm3, %v8584_v60, %v1749_v51  ;;  %11919 = vst [vmem:[#allocation10_spill] sm:$0xff] %v8601_v2  ;;  %v5840_v5 = vld [vmem:[#allocation2 + $0xd0] sm:$0x80]  ;;  %v596_v30 = vadd.f32 %v7620_v12, %v8212_v41  ;;  %v587_v34 = vpop.f32.mrb[29].mxu0 }
 0x12d   : > { %v8603_v13 = vpack.c.bf16 %v627_v0, %v626_v47  ;;  %1751 = vst [vmem:[#allocation2 + $0x100] sm:$0xff] %v1750_v1  ;;  %v8610_v23 = vld [vmem:[#allocation2 + $0xb8] sm:$0xff]  ;;  %v5841_v17 = vsel %vm8146_vm6, 0, %v5840_v5  ;;  %v861_v43 = vsel %vm8272_vm4, %v8586_v61, %v860_v63  ;;  %v588_v51 = vadd.f32 %v8212_v41, %v587_v34  ;;  %v7621_v52 = vpop.f32.mrb[30].mxu0  ;;  %v1331_v62 = vld [vmem:[#allocation2 + $0x110] sm:$0x80]  ;;  %1358 = vrot.lane.b32.xlu0 %v8396_v9, %s7983_s22 }
 0x12e   : > { %v8608_v7 = vsel %vm8265_vm3, %v8592_v4, %v1746_v24  ;;  %11921 = vst [vmem:[#allocation12_spill] sm:$0xff] %v8610_v23  ;;  %v5837_v14 = vld [vmem:[#allocation2 + $0xb8] sm:$0x80]  ;;  %1293 = vst.msk [vmem:[#allocation2 + $0x140] sm:$0xff] %vm11807_vm8, %v8596_v27  ;;  %v795_v35 = vshrl.u32 %v8596_v27, 16  ;;  %v798_v47 = vshll.u32 %v8596_v27, 16  ;;  %v858_v24 = vsel %vm8272_vm4, %v8590_v3, %v857_v6 }
 0x12f   : > { %11920 = vst [vmem:[#allocation11_spill] sm:$0xff] %v8608_v7  ;;  %1748 = vst [vmem:[#allocation2 + $0xe8] sm:$0xff] %v8608_v7  ;;  %v5838_v39 = vsel %vm8146_vm6, 0, %v5837_v14  ;;  %v788_v56 = vshrl.u32 %v8603_v13, 16  ;;  %v791_v57 = vshll.u32 %v8603_v13, 16  ;;  %v632_v63 = vmax.f32 %v596_v30, 0.0  ;;  %1598 = vrot.lane.b32.xlu1 %v8360_v33, %s7984_s27 }
 0x130   : > { %5842 = vst [vmem:[#allocation2 + $0xd0] sm:$0x80] %v5841_v17  ;;  %862 = vst [vmem:[#allocation2 + $0x120] sm:$0xff] %v861_v43  ;;  %v599_v0 = vadd.f32 %v7621_v52, %v8212_v41  ;;  %v590_v1 = vpop.f32.mrb[31].mxu0  ;;  %v1028_v5 = vrot.slane %v798_v47, 1  ;;  %v797_v12 = vrot.slane %v795_v35, 7 }
 0x131   : > { %1292 = vst.msk [vmem:[#allocation2 + $0x128] sm:$0xff] %vm11807_vm8, %v8603_v13  ;;  %5839 = vst [vmem:[#allocation2 + $0xb8] sm:$0x80] %v5838_v39  ;;  %v1328_v14 = vld [vmem:[#allocation2 + $0xf8] sm:$0x80]  ;;  %v630_v17 = vmax.f32 %v588_v51, 0.0  ;;  %v591_v43 = vadd.f32 %v8212_v41, %v590_v1  ;;  %1042 = vrot.lane.b32.xlu0 %v8396_v9, %s7985_s17 }
 0x132   : > { %859 = vst [vmem:[#allocation2 + $0x108] sm:$0xff] %v858_v24  ;;  %v1026_v34 = vrot.slane %v791_v57, 1  ;;  %v1755_v39 = vld [vmem:[#allocation2 + $0x130] sm:$0xff]  ;;  %v790_v7 = vrot.slane %v788_v56, 7  ;;  %v633_v6 = vmax.f32 %v599_v0, 0.0  ;;  %v1752_v23 = vld [vmem:[#allocation2 + $0x118] sm:$0xff]  ;;  %v8641_v30 = vor.u32 %v1028_v5, %v795_v35 }
 0x133   : > { %v866_v2 = vld [vmem:[#allocation2 + $0x150] sm:$0xff]  ;;  %v8643_v52 = vor.u32 %v798_v47, %v797_v12  ;;  %v1332_v24 = vsel %vm8284_vm11, 0, %v1331_v62  ;;  %v631_v51 = vmax.f32 %v591_v43, 0.0  ;;  %v1329_v1 = vsel %vm8284_vm11, 0, %v1328_v14  ;;  %1506 = vrot.lane.b32.xlu1 %v8398_v10, %s7985_s17 }
 0x134   : > { %v8647_v58 = vor.u32 %v1026_v34, %v788_v56  ;;  %v8649_v41 = vor.u32 %v791_v57, %v790_v7  ;;  %1333 = vst [vmem:[#allocation2 + $0x110] sm:$0x80] %v1332_v24  ;;  %v8655_v33 = vpack.c.bf16 %v633_v6, %v632_v63  ;;  %v8660_v35 = vsel %vm8265_vm3, %v8641_v30, %v1755_v39  ;;  %v8662_v47 = vld [vmem:[#allocation2 + $0x100] sm:$0xff] }
 0x135   : > { %v5846_v56 = vld [vmem:[#allocation2 + $0x100] sm:$0x80]  ;;  %1330 = vst [vmem:[#allocation2 + $0xf8] sm:$0x80] %v1329_v1  ;;  %v867_v7 = vsel %vm8272_vm4, %v8643_v52, %v866_v2  ;;  %v8667_v57 = vpack.c.bf16 %v631_v51, %v630_v17  ;;  %1757 = vst [vmem:[#allocation2 + $0x130] sm:$0xff] %v8660_v35  ;;  %1192 = vrot.lane.b32.xlu0 %v8398_v10, %s7984_s27 }
 0x136   : > { %v8672_v9 = vsel %vm8265_vm3, %v8647_v58, %v1752_v23  ;;  %v5843_v62 = vld [vmem:[#allocation2 + $0xe8] sm:$0x80]  ;;  %v5847_v63 = vsel %vm8146_vm6, 0, %v5846_v56  ;;  %868 = vst [vmem:[#allocation2 + $0x150] sm:$0xff] %v867_v7  ;;  %v864_v0 = vsel %vm8272_vm4, %v8649_v41, %v863_v44  ;;  %v1337_v5 = vld [vmem:[#allocation2 + $0x140] sm:$0x80] }
 0x137   : > { %1295 = vst.msk [vmem:[#allocation2 + $0x170] sm:$0xff] %vm11807_vm8, %v8655_v33  ;;  %1754 = vst [vmem:[#allocation2 + $0x118] sm:$0xff] %v8672_v9  ;;  %v1176_v2 = vshrl.u32 %v8655_v33, 16  ;;  %v1179_v23 = vshll.u32 %v8655_v33, 16  ;;  %v5844_v12 = vsel %vm8146_vm6, 0, %v5843_v62  ;;  %v1338_v44 = vsel %vm8284_vm11, 0, %v1337_v5  ;;  %1504 = vrot.lane.b32.xlu1 %v8405_v18, %s7985_s17 }
 0x138   : > { %5848 = vst [vmem:[#allocation2 + $0x100] sm:$0x80] %v5847_v63  ;;  %865 = vst [vmem:[#allocation2 + $0x138] sm:$0xff] %v864_v0  ;;  %v1334_v14 = vld [vmem:[#allocation2 + $0x128] sm:$0x80]  ;;  %v802_v17 = vshrl.u32 %v8667_v57, 16 }
 0x139   : > { %1294 = vst.msk [vmem:[#allocation2 + $0x158] sm:$0xff] %vm11807_vm8, %v8667_v57  ;;  %v805_v43 = vshll.u32 %v8667_v57, 16  ;;  %5845 = vst [vmem:[#allocation2 + $0xe8] sm:$0x80] %v5844_v12  ;;  %v1335_v34 = vsel %vm8284_vm11, 0, %v1334_v14  ;;  %v1178_v39 = vrot.slane %v1176_v2, 7  ;;  %1356 = vrot.lane.b32.xlu0 %v8407_v19, %s7983_s22 }
 0x13a   : > { %1339 = vst [vmem:[#allocation2 + $0x140] sm:$0x80] %v1338_v44  ;;  %v1346_v6 = vrot.slane %v1179_v23, 1  ;;  %1336 = vst [vmem:[#allocation2 + $0x128] sm:$0x80] %v1335_v34  ;;  %v804_v51 = vrot.slane %v802_v17, 7 }
 0x13b   : > { %v1030_v24 = vrot.slane %v805_v43, 1  ;;  %v1761_v1 = vld [vmem:[#allocation2 + $0x160] sm:$0xff]  ;;  %v1758_v56 = vld [vmem:[#allocation2 + $0x148] sm:$0xff]  ;;  %v8701_v7 = vor.u32 %v1179_v23, %v1178_v39  ;;  %903 = vrot.lane.b32.xlu1 %v8416_v21, %s7983_s22  ;;  %vm8831_vm8 = vmand %vm11812_vm10, %vm11809_vm12  ;;  %vm11934_vm12 = vcmask 523520  }
 0x13c   : > { %v8703_v62 = vor.u32 %v1346_v6, %v1176_v2  ;;  %v869_v63 = vld [vmem:[#allocation2 + $0x168] sm:$0xff]  ;;  %v8707_v5 = vor.u32 %v805_v43, %v804_v51  ;;  %v5852_v12 = vld [vmem:[#allocation2 + $0x130] sm:$0x80]  ;;  %vm11935_vm5 = vmmov %vm11934_vm12 }
 0x13d   : > { %v8705_v0 = vor.u32 %v1030_v24, %v802_v17  ;;  %v5853_v14 = vsel %vm8146_vm6, 0, %v5852_v12  ;;  %1040 = vrot.lane.b32.xlu0 %v8407_v19, %s7985_s17 }
 0x13e   : > { %v8714_v10 = vsel %vm8265_vm3, %v8703_v62, %v1761_v1  ;;  %v5849_v2 = vld [vmem:[#allocation2 + $0x118] sm:$0x80]  ;;  %v870_v44 = vsel %vm8272_vm4, %v8707_v5, %v869_v63  ;;  %v1343_v17 = vld [vmem:[#allocation2 + $0x170] sm:$0x80]  ;;  %5854 = vst [vmem:[#allocation2 + $0x130] sm:$0x80] %v5853_v14 }
 0x13f   : > { %v8719_v23 = vsel %vm8265_vm3, %v8705_v0, %v1758_v56  ;;  %1763 = vst [vmem:[#allocation2 + $0x160] sm:$0xff] %v8714_v10  ;;  %v5850_v43 = vsel %vm8146_vm6, 0, %v5849_v2  ;;  %871 = vst [vmem:[#allocation2 + $0x168] sm:$0xff] %v870_v44  ;;  %v1344_v39 = vsel %vm8284_vm11, 0, %v1343_v17  ;;  %1604 = vrot.lane.b32.xlu1 %v8416_v21, %s7984_s27  ;;  %v1398_v63 = vld [vmem:[#allocation2 + $0x8] sm:$0xff]  ;;  %v11928_v2 = vmov 0 }
 0x140   : > { %1760 = vst [vmem:[#allocation2 + $0x148] sm:$0xff] %v8719_v23  ;;  %v1340_v34 = vld [vmem:[#allocation2 + $0x158] sm:$0x80]  ;;  %5851 = vst [vmem:[#allocation2 + $0x118] sm:$0x80] %v5850_v43  ;;  %v11929_v2 = vsel %vm8831_vm8, 4294967295, %v11928_v2 }
 0x141   : > { %v1341_v6 = vsel %vm8284_vm11, 0, %v1340_v34  ;;  %1345 = vst [vmem:[#allocation2 + $0x170] sm:$0x80] %v1344_v39  ;;  %1190 = vrot.lane.b32.xlu0 %v8405_v18, %s7984_s27  ;;  %11930 = vst [vmem:[#allocation15_spill] sm:$0xff] %v11929_v2 }
 0x142   : > { %1342 = vst [vmem:[#allocation2 + $0x158] sm:$0x80] %v1341_v6 }
 0x143   : > { %901 = vrot.lane.b32.xlu1 %v8424_v29, %s7983_s22 }
 0x145   : > { %1362 = vrot.lane.b32.xlu0 %v8461_v8, %s7983_s22 }
 0x146   : > { %v5858_v24 = vld [vmem:[#allocation2 + $0x160] sm:$0x80] }
 0x147   : > { %v5855_v51 = vld [vmem:[#allocation2 + $0x148] sm:$0x80]  ;;  %v5859_v1 = vsel %vm8146_vm6, 0, %v5858_v24  ;;  %1602 = vrot.lane.b32.xlu1 %v8424_v29, %s7984_s27 }
 0x148   : > { %v5856_v56 = vsel %vm8146_vm6, 0, %v5855_v51  ;;  %5860 = vst [vmem:[#allocation2 + $0x160] sm:$0x80] %v5859_v1  ;;  %v11931_v51 = vmov 0 }
 0x149   : > { %5857 = vst [vmem:[#allocation2 + $0x148] sm:$0x80] %v5856_v56  ;;  %1046 = vrot.lane.b32.xlu0 %v8461_v8, %s7985_s17  ;;  %v11922_v8 = vmov 0 }
 0x14a   : > { %v11923_v8 = vsel %vm8804_vm14, 4294967295, %v11922_v8 }
 0x14b   : > { %1510 = vrot.lane.b32.xlu1 %v8463_v11, %s7985_s17  ;;  %11924 = vst [vmem:[#allocation13_spill] sm:$0xff] %v11923_v8 }
 0x14d   : > { %1196 = vrot.lane.b32.xlu0 %v8463_v11, %s7984_s27 }
 0x14f   : > { %1508 = vrot.lane.b32.xlu1 %v8470_v20, %s7985_s17 }
 0x151   : > { %1360 = vrot.lane.b32.xlu0 %v8472_v25, %s7983_s22 }
 0x153   : > { %907 = vrot.lane.b32.xlu1 %v8478_v26, %s7983_s22 }
 0x155   : > { %1044 = vrot.lane.b32.xlu0 %v8472_v25, %s7985_s17 }
 0x157   : > { %1608 = vrot.lane.b32.xlu1 %v8478_v26, %s7984_s27 }
 0x159   : > { %1194 = vrot.lane.b32.xlu0 %v8470_v20, %s7984_s27  ;;  %v1401_v20 = vld [vmem:[#allocation2 + $0x20] sm:$0xff] }
 0x15b   : > { %905 = vrot.lane.b32.xlu1 %v8488_v40, %s7983_s22 }
 0x15d   : > { %1366 = vrot.lane.b32.xlu0 %v8526_v36, %s7983_s22 }
 0x15f   : > { %1606 = vrot.lane.b32.xlu1 %v8488_v40, %s7984_s27 }
 0x161   : > { %1050 = vrot.lane.b32.xlu0 %v8526_v36, %s7985_s17 }
 0x163   : > { %1514 = vrot.lane.b32.xlu1 %v8528_v16, %s7985_s17 }
 0x165   : > { %1200 = vrot.lane.b32.xlu0 %v8528_v16, %s7984_s27 }
 0x167   : > { %1512 = vrot.lane.b32.xlu1 %v8532_v15, %s7985_s17 }
 0x169   : > { %1364 = vrot.lane.b32.xlu0 %v8534_v42, %s7983_s22 }
 0x16b   : > { %911 = vrot.lane.b32.xlu1 %v8540_v48, %s7983_s22 }
 0x16d   : > { %v892_v18 = vpop.permute.xlu1 %891  ;;  %1048 = vrot.lane.b32.xlu0 %v8534_v42, %s7985_s17 }
 0x16e   : > { %935 = vst.msk [vmem:[#allocation2 + $0x30] sm:$0xff] %vm11808_vm9, %v892_v18  ;;  %v890_v19 = vpop.permute.xlu0 %889 }
 0x16f   : > { %934 = vst.msk [vmem:[#allocation2 + $0x18] sm:$0xff] %vm11808_vm9, %v890_v19  ;;  %909 = vrot.lane.b32.xlu1 %v8550_v55, %s7983_s22  ;;  %vm11813_vm9 = vcmask 1048320  }
 0x170   : > { %vm8847_vm1 = vmand %vm11813_vm9, %vm11811_vm0 }
 0x171   : > { %v8794_v21 = vpop.permute.xlu1 %1592  ;;  %1198 = vrot.lane.b32.xlu0 %v8532_v15, %s7984_s27  ;;  %v11932_v51 = vsel %vm8847_vm1, 4294967295, %v11931_v51 }
 0x172   : > { %11933 = vst [vmem:[#allocation16_spill] sm:$0xff] %v11932_v51 }
 0x173   : > { %v8798_v29 = vpop.permute.xlu0 %1498  ;;  %1610 = vrot.lane.b32.xlu1 %v8550_v55, %s7984_s27  ;;  %v11925_v55 = vmov 0 }
 0x174   : > { %v11926_v55 = vsel %vm8823_vm2, 4294967295, %v11925_v55 }
 0x175   : > { %v960_v11 = vld [vmem:[#allocation2 + $0x30] sm:$0x80]  ;;  %v1351_v25 = vpop.permute.xlu1 %1350  ;;  %1370 = vrot.lane.b32.xlu0 %v8584_v60, %s7983_s22  ;;  %11927 = vst [vmem:[#allocation14_spill] sm:$0xff] %v11926_v55 }
 0x176   : > { %v961_v26 = vsel %vm8221_vm13, 0, %v960_v11  ;;  %v957_v40 = vld [vmem:[#allocation2 + $0x18] sm:$0x80]  ;;  %v1402_v36 = vsel %vm8804_vm14, %v1351_v25, %v1401_v20  ;;  %v8864_v20 = vld [vmem:[#allocation3] sm:$0xff] }
 0x177   : > { %962 = vst [vmem:[#allocation2 + $0x30] sm:$0x80] %v961_v26  ;;  %v958_v16 = vsel %vm8221_vm13, 0, %v957_v40  ;;  %1403 = vst [vmem:[#allocation2 + $0x20] sm:$0xff] %v1402_v36  ;;  %v8816_v15 = vpop.permute.xlu0 %1184  ;;  %1516 = vrot.lane.b32.xlu1 %v8590_v3, %s7985_s17  ;;  %v1407_v36 = vld [vmem:[#allocation2 + $0x50] sm:$0xff] }
 0x178   : > { %959 = vst [vmem:[#allocation2 + $0x18] sm:$0x80] %v958_v16 }
 0x179   : > { %v1035_v42 = vpop.permute.xlu1 %1034  ;;  %1368 = vrot.lane.b32.xlu0 %v8592_v4, %s7983_s22 }
 0x17b   : > { %v1349_v12 = vpop.permute.xlu0 %1348  ;;  %915 = vrot.lane.b32.xlu1 %v8596_v27, %s7983_s22 }
 0x17c   : > { %v1399_v14 = vsel %vm8804_vm14, %v1349_v12, %v1398_v63 }
 0x17d   : > { %1400 = vst [vmem:[#allocation2 + $0x8] sm:$0xff] %v1399_v14  ;;  %v1033_v44 = vpop.permute.xlu1 %1032  ;;  %1054 = vrot.lane.b32.xlu0 %v8584_v60, %s7985_s17  ;;  %v1232_v60 = vld [vmem:[#allocation2] sm:$0xff] }
 0x17e   : > { %v1453_v17 = vld [vmem:[#allocation2 + $0x20] sm:$0x1]  ;;  %v1083_v43 = vld [vmem:[#allocation2 + $0x30] sm:$0xff] }
 0x17f   : > { %v1454_v34 = vsel %vm8823_vm2, 0, %v1453_v17  ;;  %v1084_v39 = vsel %vm8831_vm8, %v1035_v42, %v1083_v43  ;;  %v1080_v6 = vld [vmem:[#allocation2 + $0x18] sm:$0xff]  ;;  %v896_v24 = vpop.permute.xlu0 %895  ;;  %913 = vrot.lane.b32.xlu1 %v8603_v13, %s7983_s22 }
 0x180   : > { %1455 = vst [vmem:[#allocation2 + $0x20] sm:$0x1] %v1454_v34  ;;  %1085 = vst [vmem:[#allocation2 + $0x30] sm:$0xff] %v1084_v39  ;;  %v1081_v1 = vsel %vm8831_vm8, %v1033_v44, %v1080_v6  ;;  %v11937_v44 = vmov 0 }
 0x181   : > { %937 = vst.msk [vmem:[#allocation2 + $0x60] sm:$0xff] %vm11934_vm12, %v896_v24  ;;  %1082 = vst [vmem:[#allocation2 + $0x18] sm:$0xff] %v1081_v1  ;;  %1052 = vrot.lane.b32.xlu0 %v8592_v4, %s7985_s17  ;;  %v1183_v56 = vpop.permute.xlu1 %1182  ;;  %vm11936_vm12 = vcmask 261120  }
 0x182   : > { %v8858_v18 = vsel %vm8847_vm1, %v1183_v56, %v1232_v60 }
 0x183   : > { %1234 = vst [vmem:[#allocation2] sm:$0xff] %v8858_v18  ;;  %v894_v19 = vpop.permute.xlu0 %893  ;;  %1518 = vrot.lane.b32.xlu1 %v8586_v61, %s7985_s17 }
 0x184   : > { %v1450_v11 = vld [vmem:[#allocation2 + $0x8] sm:$0x1]  ;;  %936 = vst.msk [vmem:[#allocation2 + $0x48] sm:$0xff] %vm11935_vm5, %v894_v19  ;;  %vm8888_vm5 = vmand %vm11812_vm10, %vm11811_vm0 }
 0x185   : > { %4842 = vst.msk [vmem:[#allocation2] sm:$0xff] %vm11936_vm12, %v8864_v20  ;;  %v1451_v4 = vsel %vm8823_vm2, 0, %v1450_v11  ;;  %1202 = vrot.lane.b32.xlu0 %v8590_v3, %s7984_s27  ;;  %v8872_v25 = vpop.permute.xlu1 %1596  ;;  %v11938_v44 = vsel %vm8888_vm5, 4294967295, %v11937_v44  ;;  %vm11940_vm12 = vcmask 523520  }
 0x186   : > { %1452 = vst [vmem:[#allocation2 + $0x8] sm:$0x1] %v1451_v4  ;;  %11939 = vst [vmem:[#allocation17_spill] sm:$0xff] %v11938_v44 }
 0x187   : > { %v1133_v26 = vld [vmem:[#allocation2 + $0x30] sm:$0x1]  ;;  %v1355_v16 = vpop.permute.xlu0 %1354  ;;  %1612 = vrot.lane.b32.xlu1 %v8540_v48, %s7984_s27  ;;  %v1547_v4 = vld [vmem:[#allocation2 + $0x20] sm:$0xff] }
 0x188   : > { %v966_v40 = vld [vmem:[#allocation2 + $0x60] sm:$0x80]  ;;  %v1134_v42 = vsel %vm8232_vm15, 0, %v1133_v26  ;;  %v1130_v63 = vld [vmem:[#allocation2 + $0x18] sm:$0x1]  ;;  %v1408_v3 = vsel %vm8804_vm14, %v1355_v16, %v1407_v36 }
 0x189   : > { %v967_v12 = vsel %vm8221_vm13, 0, %v966_v40  ;;  %1135 = vst [vmem:[#allocation2 + $0x30] sm:$0x1] %v1134_v42  ;;  %v1131_v14 = vsel %vm8232_vm15, 0, %v1130_v63  ;;  %1409 = vst [vmem:[#allocation2 + $0x50] sm:$0xff] %v1408_v3  ;;  %1372 = vrot.lane.b32.xlu0 %v8647_v58, %s7983_s22  ;;  %v1595_v48 = vpop.permute.xlu1 %1594  ;;  %v1404_v36 = vld [vmem:[#allocation2 + $0x38] sm:$0xff] }
 0x18a   : > { %968 = vst [vmem:[#allocation2 + $0x60] sm:$0x80] %v967_v12  ;;  %1132 = vst [vmem:[#allocation2 + $0x18] sm:$0x1] %v1131_v14  ;;  %v7821_v14 = vld [vmem:[%s11798_s3 + $0x88] sm:$0xff]  }
 0x18b   : > { %v963_v17 = vld [vmem:[#allocation2 + $0x48] sm:$0x80]  ;;  %v1039_v43 = vpop.permute.xlu0 %1038  ;;  %1204 = vrot.lane.b32.xlu1 %v8586_v61, %s7984_s27 }
 0x18c   : > { %v4843_v34 = vld [vmem:[#allocation2] sm:$0x1]  ;;  %v964_v39 = vsel %vm8221_vm13, 0, %v963_v17 }
 0x18d   : > { %v4844_v6 = vsel %vm8153_vm7, 0, %v4843_v34  ;;  %v1544_v24 = vld [vmem:[#allocation2 + $0x8] sm:$0xff]  ;;  %965 = vst [vmem:[#allocation2 + $0x48] sm:$0x80] %v964_v39  ;;  %1374 = vrot.lane.b32.xlu0 %v8641_v30, %s7983_s22  ;;  %v8900_v60 = vpop.permute.xlu1 %1502 }
 0x18e   : > { %4845 = vst [vmem:[#allocation2] sm:$0x1] %v4844_v6  ;;  %v1545_v1 = vsel %vm8888_vm5, %v8798_v29, %v1544_v24 }
 0x18f   : > { %5056 = vst.msk [vmem:[#allocation2] sm:$0xff] %vm11940_vm12, %v8864_v20  ;;  %1546 = vst [vmem:[#allocation2 + $0x8] sm:$0xff] %v1545_v1  ;;  %v8907_v61 = vpop.permute.xlu0 %1188  ;;  %1056 = vrot.lane.b32.xlu1 %v8647_v58, %s7985_s17 }
 0x190   : > { %5132 = vst.msk [vmem:[#allocation2] sm:$0xff] %vm11812_vm10, %v8864_v20  ;;  %v1459_v56 = vld [vmem:[#allocation2 + $0x50] sm:$0x1] }
 0x191   : > { %1637 = vst.msk [vmem:[#allocation2 + $0x8] sm:$0xff] %vm11813_vm9, %v8794_v21  ;;  %v1089_v19 = vld [vmem:[#allocation2 + $0x60] sm:$0xff]  ;;  %v1460_v29 = vsel %vm8823_vm2, 0, %v1459_v56  ;;  %1520 = vrot.lane.b32.xlu0 %v8649_v41, %s7985_s17  ;;  %v1501_v26 = vpop.permute.xlu1 %1500  ;;  %v1235_v58 = vld [vmem:[#allocation2 + $0x18] sm:$0xff]  ;;  %v1238_v39 = vld [vmem:[#allocation2 + $0x30] sm:$0xff] }
 0x192   : > { %v1090_v11 = vsel %vm8831_vm8, %v1039_v43, %v1089_v19  ;;  %1461 = vst [vmem:[#allocation2 + $0x50] sm:$0x1] %v1460_v29  ;;  %v1548_v40 = vsel %vm8888_vm5, %v1501_v26, %v1547_v4  ;;  %v1236_v21 = vsel %vm8847_vm1, %v8816_v15, %v1235_v58  ;;  %v1413_v19 = vld [vmem:[#allocation2 + $0x80] sm:$0xff] }
 0x193   : > { %1091 = vst [vmem:[#allocation2 + $0x60] sm:$0xff] %v1090_v11  ;;  %1549 = vst [vmem:[#allocation2 + $0x20] sm:$0xff] %v1548_v40  ;;  %v1353_v16 = vpop.permute.xlu0 %1352  ;;  %1522 = vrot.lane.b32.xlu1 %v8643_v52, %s7985_s17 }
 0x194   : > { %1237 = vst [vmem:[#allocation2 + $0x18] sm:$0xff] %v1236_v21  ;;  %1638 = vst.msk [vmem:[#allocation2 + $0x20] sm:$0xff] %vm11813_vm9, %v1595_v48  ;;  %v1405_v42 = vsel %vm8804_vm14, %v1353_v16, %v1404_v36  ;;  %v1086_v15 = vld [vmem:[#allocation2 + $0x48] sm:$0xff]  ;;  %v1700_v16 = vld [vmem:[#allocation2 + $0x178] sm:$0x80] }
 0x195   : > { %1406 = vst [vmem:[#allocation2 + $0x38] sm:$0xff] %v1405_v42  ;;  %1614 = vrot.lane.b32.xlu0 %v8603_v13, %s7984_s27  ;;  %v900_v63 = vpop.permute.xlu1 %899 }
 0x196   : > { %939 = vst.msk [vmem:[#allocation2 + $0x90] sm:$0xff] %vm11940_vm12, %v900_v63  ;;  %vm11941_vm12 = vcmask 261120  }
 0x197   : > { %v1037_v12 = vpop.permute.xlu0 %1036  ;;  %1376 = vrot.lane.b32.xlu1 %v8705_v0, %s7983_s22 }
 0x198   : > { %v1765_v3 = vld [vmem:[#allocation2 + $0x8] sm:$0xff]  ;;  %v1087_v48 = vsel %vm8831_vm8, %v1037_v12, %v1086_v15  ;;  %v1701_v15 = vsel %vm8146_vm6, 0, %v1700_v16 }
 0x199   : > { %2043 = vmatprep.mubr.bf16.mxu0 %v1765_v3  ;;  %1088 = vst [vmem:[#allocation2 + $0x48] sm:$0xff] %v1087_v48  ;;  %1058 = vrot.lane.b32.xlu0 %v8641_v30, %s7985_s17  ;;  %v8944_v13 = vpop.permute.xlu1 %1600  ;;  %1702 = vst [vmem:[#allocation2 + $0x178] sm:$0x80] %v1701_v15  ;;  %v1553_v48 = vld [vmem:[#allocation2 + $0x50] sm:$0xff]  ;;  %v11952_v16 = vld [vmem:[#allocation12_spill] sm:$0xff] }
 0x19a   : > { %v1139_v17 = vld [vmem:[#allocation2 + $0x60] sm:$0x1]  ;;  %2044 = vmatmul.mubr.bf16.vlgmr.msra.gmra.mrb[32].mxu0 %v8858_v18 }
 0x19b   : > { %v1140_v43 = vsel %vm8232_vm15, 0, %v1139_v17  ;;  %7623 = vmatpush3.bf16.msra.mxu0 %v8496_v45  ;;  %7626 = vmatprep.mubr.msk.bf16.mxu0 %vm11941_vm12, %v8358_v31  ;;  %v4846_v34 = vld [vmem:[#allocation2 + $0x18] sm:$0x1]  ;;  %v1187_v6 = vpop.permute.xlu0 %1186  ;;  %v1768_v30 = vld [vmem:[#allocation2 + $0x20] sm:$0xff]  ;;  %vm11942_vm12 = vcmask 523520  }
 0x19c   : > { %1141 = vst [vmem:[#allocation2 + $0x60] sm:$0x1] %v1140_v43  ;;  %1616 = vrot.lane.b32.xlu1 %v8596_v27, %s7984_s27  ;;  %7624 = vmatprep.subr.bf16.mxu0 %v7821_v14  ;;  %v4847_v18 = vsel %vm8153_vm7, 0, %v4846_v34  ;;  %v1456_v24 = vld [vmem:[#allocation2 + $0x38] sm:$0x1]  ;;  %v8957_v1 = vsel %vm8847_vm1, %v1187_v6, %v1238_v39  ;;  %v1410_v34 = vld [vmem:[#allocation2 + $0x68] sm:$0xff] }
 0x19d   : > { %2051 = vmatprep.mubr.bf16.mxu1 %v1768_v30  ;;  %4848 = vst [vmem:[#allocation2 + $0x18] sm:$0x1] %v4847_v18  ;;  %v1457_v31 = vsel %vm8823_vm2, 0, %v1456_v24  ;;  %v972_v45 = vld [vmem:[#allocation2 + $0x90] sm:$0x80]  ;;  %1240 = vst [vmem:[#allocation2 + $0x30] sm:$0xff] %v8957_v1  ;;  %1206 = vrot.lane.b32.xlu0 %v8649_v41, %s7984_s27  ;;  %v898_v27 = vpop.permute.xlu1 %897 }
 0x19e   : > { %2052 = vmatmul.mubr.bf16.vlgmr.msra.gmra.mrb[0].mxu1 %v1236_v21  ;;  %1458 = vst [vmem:[#allocation2 + $0x38] sm:$0x1] %v1457_v31  ;;  %v973_v56 = vsel %vm8221_vm13, 0, %v972_v45  ;;  %938 = vst.msk [vmem:[#allocation2 + $0x78] sm:$0xff] %vm11942_vm12, %v898_v27  ;;  %vm11943_vm12 = vcmask 261120   ;;  %v11947_v24 = vld [vmem:[#allocation9_spill] sm:$0xff] }
 0x19f   : > { %7625 = vmatpush3.bf16.msra.mxu0 %v7821_v14  ;;  %974 = vst [vmem:[#allocation2 + $0x90] sm:$0x80] %v973_v56  ;;  %v1359_v29 = vpop.permute.xlu0 %1358  ;;  %vm11944_vm0 = vmmov %vm11943_vm12  ;;  %v11949_v31 = vld [vmem:[#allocation8_spill] sm:$0xff] }
 0x1a0   : > { %1208 = vrot.lane.b32.xlu1 %v8643_v52, %s7984_s27  ;;  %v1136_v11 = vld [vmem:[#allocation2 + $0x48] sm:$0x1]  ;;  %v1414_v4 = vsel %vm8804_vm14, %v1359_v29, %v1413_v19  ;;  %v9023_v39 = vld [vmem:[#allocation2 + $0x178] sm:$0xff] }
 0x1a1   : > { %v1137_v41 = vsel %vm8232_vm15, 0, %v1136_v11  ;;  %1415 = vst [vmem:[#allocation2 + $0x80] sm:$0xff] %v1414_v4  ;;  %1524 = vrot.lane.b32.xlu0 %v8707_v5, %s7985_s17  ;;  %v1599_v26 = vpop.permute.xlu1 %1598 }
 0x1a2   : > { %7627 = vmatmul.mubr.msk.bf16.vlgmr.msra.gmra.mrb[36].mxu0 %vm11943_vm12, %v8432_v38  ;;  %1138 = vst [vmem:[#allocation2 + $0x48] sm:$0x1] %v1137_v41  ;;  %vm11945_vm12 = vmmov %vm11944_vm0 }
 0x1a3   : > { %7630 = vmatprep.mubr.msk.bf16.mxu0 %vm11944_vm0, %v8443_v49  ;;  %v1043_v52 = vpop.permute.xlu0 %1042  ;;  %5815 = vst.msk [vmem:[#allocation2 + $0x178] sm:$0xff] %vm11945_vm12, %v8864_v20  ;;  %v1244_v27 = vld [vmem:[#allocation2 + $0x60] sm:$0xff] }
 0x1a4   : > { %1526 = vrot.lane.b32.xlu1 %v8701_v7, %s7985_s17  ;;  %v4849_v58 = vld [vmem:[#allocation2 + $0x30] sm:$0x1] }
 0x1a5   : > { %v1550_v40 = vld [vmem:[#allocation2 + $0x38] sm:$0xff]  ;;  %1618 = vrot.lane.b32.xlu0 %v8667_v57, %s7984_s27  ;;  %v8983_v36 = vpop.permute.xlu1 %1506  ;;  %v4850_v38 = vsel %vm8153_vm7, 0, %v4849_v58 }
 0x1a6   : > { %v969_v21 = vld [vmem:[#allocation2 + $0x78] sm:$0x80]  ;;  %v1551_v49 = vsel %vm8888_vm5, %v8900_v60, %v1550_v40  ;;  %v1095_v63 = vld [vmem:[#allocation2 + $0x90] sm:$0xff]  ;;  %4851 = vst [vmem:[#allocation2 + $0x30] sm:$0x1] %v4850_v38 }
 0x1a7   : > { %v970_v42 = vsel %vm8221_vm13, 0, %v969_v21  ;;  %1552 = vst [vmem:[#allocation2 + $0x38] sm:$0xff] %v1551_v49  ;;  %v1096_v12 = vsel %vm8831_vm8, %v1043_v52, %v1095_v63  ;;  %v8996_v3 = vpop.permute.xlu0 %1192  ;;  %v1419_v52 = vld [vmem:[#allocation2 + $0xb0] sm:$0xff] }
 0x1a8   : > { %971 = vst [vmem:[#allocation2 + $0x78] sm:$0x80] %v970_v42  ;;  %1620 = vrot.lane.b32.xlu1 %v8655_v33, %s7984_s27  ;;  %1639 = vst.msk [vmem:[#allocation2 + $0x38] sm:$0xff] %vm11813_vm9, %v8872_v25  ;;  %v1465_v60 = vld [vmem:[#allocation2 + $0x80] sm:$0x1]  ;;  %v11953_v42 = vld [vmem:[#allocation10_spill] sm:$0xff] }
 0x1a9   : > { %1097 = vst [vmem:[#allocation2 + $0x90] sm:$0xff] %v1096_v12  ;;  %v1466_v14 = vsel %vm8823_vm2, 0, %v1465_v60  ;;  %1210 = vrot.lane.b32.xlu0 %v8707_v5, %s7984_s27  ;;  %v1505_v17 = vpop.permute.xlu1 %1504  ;;  %v1241_v43 = vld [vmem:[#allocation2 + $0x48] sm:$0xff] }
 0x1aa   : > { %7631 = vmatmul.mubr.msk.bf16.gmra.mrb[40].mxu0 %vm11944_vm0, %v8498_v46  ;;  %1467 = vst [vmem:[#allocation2 + $0x80] sm:$0x1] %v1466_v14  ;;  %v1554_v33 = vsel %vm8888_vm5, %v1505_v17, %v1553_v48  ;;  %v1242_v25 = vsel %vm8847_vm1, %v8907_v61, %v1241_v43  ;;  %vm11946_vm0 = vcmask 523520  }
 0x1ab   : > { %7634 = vmatprep.mubr.msk.bf16.mxu0 %vm11945_vm12, %v8483_v32  ;;  %1555 = vst [vmem:[#allocation2 + $0x50] sm:$0xff] %v1554_v33  ;;  %v1357_v5 = vpop.permute.xlu0 %1356  ;;  %1243 = vst [vmem:[#allocation2 + $0x48] sm:$0xff] %v1242_v25 }
 0x1ac   : > { %1060 = vrot.lane.b32.xlu1 %v8705_v0, %s7985_s17  ;;  %1640 = vst.msk [vmem:[#allocation2 + $0x50] sm:$0xff] %vm11813_vm9, %v1599_v26  ;;  %v1411_v46 = vsel %vm8804_vm14, %v1357_v5, %v1410_v34 }
 0x1ad   : > { %1412 = vst [vmem:[#allocation2 + $0x68] sm:$0xff] %v1411_v46  ;;  %917 = vrot.lane.b32.xlu0 %v8667_v57, %s7983_s22  ;;  %v904_v32 = vpop.permute.xlu1 %903  ;;  %v11955_v46 = vld [vmem:[#allocation11_spill] sm:$0xff] }
 0x1ae   : > { %941 = vst.msk [vmem:[#allocation2 + $0xc0] sm:$0xff] %vm11946_vm0, %v904_v32  ;;  %vm11948_vm0 = vmmov %vm11945_vm12 }
 0x1af   : > { %v1092_v61 = vld [vmem:[#allocation2 + $0x78] sm:$0xff]  ;;  %v1041_v30 = vpop.permute.xlu0 %1040  ;;  %vm11950_vm12 = vmmov %vm11948_vm0 }
 0x1b0   : > { %v1145_v6 = vld [vmem:[#allocation2 + $0x90] sm:$0x1]  ;;  %1212 = vrot.lane.b32.xlu1 %v8701_v7, %s7984_s27  ;;  %v1771_v0 = vld [vmem:[#allocation2 + $0x38] sm:$0xff]  ;;  %v1093_v57 = vsel %vm8831_vm8, %v1041_v30, %v1092_v61  ;;  %vm11954_vm10 = vmmov %vm11950_vm12 }
 0x1b1   : > { %v1146_v18 = vsel %vm8232_vm15, 0, %v1145_v6  ;;  %2059 = vmatprep.mubr.bf16.mxu1 %v1771_v0  ;;  %1094 = vst [vmem:[#allocation2 + $0x78] sm:$0xff] %v1093_v57  ;;  %1378 = vrot.lane.b32.xlu0 %v8703_v62, %s7983_s22  ;;  %v9037_v7 = vpop.permute.xlu1 %1604  ;;  %v1559_v32 = vld [vmem:[#allocation2 + $0x80] sm:$0xff]  ;;  %v1416_v0 = vld [vmem:[#allocation2 + $0x98] sm:$0xff] }
 0x1b2   : > { %1147 = vst [vmem:[#allocation2 + $0x90] sm:$0x1] %v1146_v18  ;;  %7635 = vmatmul.mubr.msk.bf16.gmra.mrb[44].mxu0 %vm11948_vm0, %v11947_v24  ;;  %2060 = vmatmul.mubr.bf16.gmra.mrb[4].mxu1 %v8957_v1  ;;  %v4852_v45 = vld [vmem:[#allocation2 + $0x48] sm:$0x1]  ;;  %vm11951_vm0 = vcmask 523520  }
 0x1b3   : > { %7638 = vmatprep.mubr.msk.bf16.mxu0 %vm11950_vm12, %v11949_v31  ;;  %v1191_v56 = vpop.permute.xlu0 %1190  ;;  %v1774_v19 = vld [vmem:[#allocation2 + $0x50] sm:$0xff]  ;;  %v4853_v29 = vsel %vm8153_vm7, 0, %v4852_v45  ;;  %v5861_v24 = vld [vmem:[#allocation2 + $0x178] sm:$0x80] }
 0x1b4   : > { %v1462_v11 = vld [vmem:[#allocation2 + $0x68] sm:$0x1]  ;;  %v9046_v62 = vsel %vm8847_vm1, %v1191_v56, %v1244_v27  ;;  %2067 = vmatprep.mubr.bf16.mxu1 %v1774_v19  ;;  %4854 = vst [vmem:[#allocation2 + $0x48] sm:$0x1] %v4853_v29  ;;  %v5862_v45 = vsel %vm8146_vm6, 0, %v5861_v24 }
 0x1b5   : > { %v1463_v1 = vsel %vm8823_vm2, 0, %v1462_v11  ;;  %v978_v4 = vld [vmem:[#allocation2 + $0xc0] sm:$0x80]  ;;  %1246 = vst [vmem:[#allocation2 + $0x60] sm:$0xff] %v9046_v62  ;;  %v902_v41 = vpop.permute.xlu1 %901  ;;  %5863 = vst [vmem:[#allocation2 + $0x178] sm:$0x80] %v5862_v45 }
 0x1b6   : > { %1464 = vst [vmem:[#allocation2 + $0x68] sm:$0x1] %v1463_v1  ;;  %v979_v26 = vsel %vm8221_vm13, 0, %v978_v4  ;;  %940 = vst.msk [vmem:[#allocation2 + $0xa8] sm:$0xff] %vm11951_vm0, %v902_v41 }
 0x1b7   : > { %980 = vst [vmem:[#allocation2 + $0xc0] sm:$0x80] %v979_v26  ;;  %v1363_v58 = vpop.permute.xlu0 %1362  ;;  %vm11956_vm0 = vmmov %vm11954_vm10 }
 0x1b8   : > { %v1142_v40 = vld [vmem:[#allocation2 + $0x78] sm:$0x1]  ;;  %v1420_v21 = vsel %vm8804_vm14, %v1363_v58, %v1419_v52  ;;  %vm11959_vm6 = vmmov %vm11956_vm0 }
 0x1b9   : > { %v1143_v38 = vsel %vm8232_vm15, 0, %v1142_v40  ;;  %1421 = vst [vmem:[#allocation2 + $0xb0] sm:$0xff] %v1420_v21  ;;  %v1603_v49 = vpop.permute.xlu1 %1602  ;;  %v1250_v4 = vld [vmem:[#allocation2 + $0x90] sm:$0xff]  ;;  %v7822_v40 = vld [vmem:[%s11800_s5 + $0x40] sm:$0xff]  }
 0x1ba   : > { %7639 = vmatmul.mubr.msk.bf16.gmra.mrb[48].mxu0 %vm11950_vm12, %v11952_v16  ;;  %1144 = vst [vmem:[#allocation2 + $0x78] sm:$0x1] %v1143_v38  ;;  %2068 = vmatmul.mubr.bf16.gmra.mrb[8].mxu1 %v1242_v25  ;;  %vm11957_vm12 = vcmask 523520   ;;  %v7823_v21 = vld [vmem:[%s11800_s5] sm:$0xff]   ;;  %v7824_v16 = vld [vmem:[%s11800_s5 + $0x48] sm:$0xff]  }
 0x1bb   : > { %7642 = vmatprep.mubr.msk.bf16.mxu0 %vm11954_vm10, %v11953_v42  ;;  %v1047_v63 = vpop.permute.xlu0 %1046  ;;  %6986 = vmatprep.subr.bf16.mxu0 %v7822_v40 }
 0x1bc   : > { %v4855_v15 = vld [vmem:[#allocation2 + $0x60] sm:$0x1]  ;;  %6987 = vmatpush3.bf16.msra.mxu0 %v7823_v21 }
 0x1bd   : > { %v1556_v12 = vld [vmem:[#allocation2 + $0x68] sm:$0xff]  ;;  %v9062_v14 = vpop.permute.xlu1 %1510  ;;  %v4856_v48 = vsel %vm8153_vm7, 0, %v4855_v15  ;;  %6988 = vmatprep.subr.bf16.mxu0 %v7824_v16 }
 0x1be   : > { %v975_v60 = vld [vmem:[#allocation2 + $0xa8] sm:$0x80]  ;;  %v1557_v17 = vsel %vm8888_vm5, %v8983_v36, %v1556_v12  ;;  %v1101_v33 = vld [vmem:[#allocation2 + $0xc0] sm:$0xff]  ;;  %4857 = vst [vmem:[#allocation2 + $0x60] sm:$0x1] %v4856_v48 }
 0x1bf   : > { %v976_v43 = vsel %vm8221_vm13, 0, %v975_v60  ;;  %1558 = vst [vmem:[#allocation2 + $0x68] sm:$0xff] %v1557_v17  ;;  %v1102_v25 = vsel %vm8831_vm8, %v1047_v63, %v1101_v33  ;;  %v9073_v34 = vpop.permute.xlu0 %1196  ;;  %v7825_v12 = vld [vmem:[%s11800_s5 + $0x8] sm:$0xff]  }
 0x1c0   : > { %977 = vst [vmem:[#allocation2 + $0xa8] sm:$0x80] %v976_v43  ;;  %1641 = vst.msk [vmem:[#allocation2 + $0x68] sm:$0xff] %vm11813_vm9, %v8944_v13  ;;  %v1471_v5 = vld [vmem:[#allocation2 + $0xb0] sm:$0x1]  ;;  %6989 = vmatpush3.bf16.msra.mxu0 %v7825_v12 }
 0x1c1   : > { %1103 = vst [vmem:[#allocation2 + $0xc0] sm:$0xff] %v1102_v25  ;;  %v1472_v36 = vsel %vm8823_vm2, 0, %v1471_v5  ;;  %v1509_v61 = vpop.permute.xlu1 %1508  ;;  %v1247_v6 = vld [vmem:[#allocation2 + $0x78] sm:$0xff]  ;;  %v7827_v12 = vld [vmem:[%s11800_s5 + $0x10] sm:$0xff]  }
 0x1c2   : > { %7643 = vmatmul.mubr.msk.bf16.gmra.mrb[52].mxu0 %vm11954_vm10, %v11955_v46  ;;  %1473 = vst [vmem:[#allocation2 + $0xb0] sm:$0x1] %v1472_v36  ;;  %v1560_v30 = vsel %vm8888_vm5, %v1509_v61, %v1559_v32  ;;  %v1248_v13 = vsel %vm8847_vm1, %v8996_v3, %v1247_v6  ;;  %vm11958_vm10 = vmmov %vm11956_vm0 }
 0x1c3   : > { %7646 = vmatprep.mubr.msk.bf16.mxu0 %vm11956_vm0, %v8662_v47  ;;  %1561 = vst [vmem:[#allocation2 + $0x80] sm:$0xff] %v1560_v30  ;;  %v1361_v18 = vpop.permute.xlu0 %1360  ;;  %1249 = vst [vmem:[#allocation2 + $0x78] sm:$0xff] %v1248_v13 }
 0x1c4   : > { %1642 = vst.msk [vmem:[#allocation2 + $0x80] sm:$0xff] %vm11813_vm9, %v1603_v49  ;;  %v1417_v57 = vsel %vm8804_vm14, %v1361_v18, %v1416_v0  ;;  %vm11960_vm0 = vmmov %vm11957_vm12  ;;  %v1425_v49 = vld [vmem:[#allocation2 + $0xe0] sm:$0xff] }
 0x1c5   : > { %1418 = vst [vmem:[#allocation2 + $0x98] sm:$0xff] %v1417_v57  ;;  %v908_v31 = vpop.permute.xlu1 %907 }
 0x1c6   : > { %943 = vst.msk [vmem:[#allocation2 + $0xf0] sm:$0xff] %vm11957_vm12, %v908_v31  ;;  %vm11961_vm12 = vmmov %vm11959_vm6 }
 0x1c7   : > { %v1098_v47 = vld [vmem:[#allocation2 + $0xa8] sm:$0xff]  ;;  %v1045_v27 = vpop.permute.xlu0 %1044 }
 0x1c8   : > { %v1151_v3 = vld [vmem:[#allocation2 + $0xc0] sm:$0x1]  ;;  %v1777_v56 = vld [vmem:[#allocation2 + $0x68] sm:$0xff]  ;;  %v1099_v29 = vsel %vm8831_vm8, %v1045_v27, %v1098_v47 }
 0x1c9   : > { %v1152_v19 = vsel %vm8232_vm15, 0, %v1151_v3  ;;  %2075 = vmatprep.mubr.bf16.mxu1 %v1777_v56  ;;  %1100 = vst [vmem:[#allocation2 + $0xa8] sm:$0xff] %v1099_v29  ;;  %v9100_v50 = vpop.permute.xlu1 %1608  ;;  %v1565_v30 = vld [vmem:[#allocation2 + $0xb0] sm:$0xff] }
 0x1ca   : > { %1153 = vst [vmem:[#allocation2 + $0xc0] sm:$0x1] %v1152_v19  ;;  %7647 = vmatmul.mubr.msk.bf16.gmra.mrb[56].mxu0 %vm11958_vm10, %v8672_v9  ;;  %2076 = vmatmul.mubr.bf16.gmra.mrb[12].mxu1 %v9046_v62  ;;  %v4858_v11 = vld [vmem:[#allocation2 + $0x78] sm:$0x1]  ;;  %vm11962_vm10 = vmmov %vm11959_vm6 }
 0x1cb   : > { %7650 = vmatprep.mubr.msk.bf16.mxu0 %vm11959_vm6, %v8660_v35  ;;  %v1195_v1 = vpop.permute.xlu0 %1194  ;;  %v1780_v41 = vld [vmem:[#allocation2 + $0x80] sm:$0xff]  ;;  %v4859_v26 = vsel %vm8153_vm7, 0, %v4858_v11 }
 0x1cc   : > { %v1468_v52 = vld [vmem:[#allocation2 + $0x98] sm:$0x1]  ;;  %v9109_v58 = vsel %vm8847_vm1, %v1195_v1, %v1250_v4  ;;  %2083 = vmatprep.mubr.bf16.mxu1 %v1780_v41  ;;  %4860 = vst [vmem:[#allocation2 + $0x78] sm:$0x1] %v4859_v26 }
 0x1cd   : > { %v1469_v9 = vsel %vm8823_vm2, 0, %v1468_v52  ;;  %v984_v62 = vld [vmem:[#allocation2 + $0xf0] sm:$0x80]  ;;  %1252 = vst [vmem:[#allocation2 + $0x90] sm:$0xff] %v9109_v58  ;;  %v906_v35 = vpop.permute.xlu1 %905 }
 0x1ce   : > { %1470 = vst [vmem:[#allocation2 + $0x98] sm:$0x1] %v1469_v9  ;;  %v985_v38 = vsel %vm8221_vm13, 0, %v984_v62  ;;  %942 = vst.msk [vmem:[#allocation2 + $0xd8] sm:$0xff] %vm11960_vm0, %v906_v35  ;;  %v1431_v35 = vld [vmem:[#allocation2 + $0x110] sm:$0xff] }
 0x1cf   : > { %986 = vst [vmem:[#allocation2 + $0xf0] sm:$0x80] %v985_v38  ;;  %v1367_v42 = vpop.permute.xlu0 %1366 }
 0x1d0   : > { %v1148_v63 = vld [vmem:[#allocation2 + $0xa8] sm:$0x1]  ;;  %v1426_v15 = vsel %vm8804_vm14, %v1367_v42, %v1425_v49  ;;  %v7826_v49 = vld [vmem:[%s11800_s5 + $0x50] sm:$0xff]  }
 0x1d1   : > { %v1149_v60 = vsel %vm8232_vm15, 0, %v1148_v63  ;;  %1427 = vst [vmem:[#allocation2 + $0xe0] sm:$0xff] %v1426_v15  ;;  %v1607_v48 = vpop.permute.xlu1 %1606  ;;  %v1256_v11 = vld [vmem:[#allocation2 + $0xc0] sm:$0xff]  ;;  %6990 = vmatprep.subr.bf16.mxu0 %v7826_v49 }
 0x1d2   : > { %7651 = vmatmul.mubr.msk.bf16.gmra.mrb[60].mxu0 %vm11961_vm12, %v8719_v23  ;;  %2084 = vmatmul.mubr.bf16.gmra.mrb[16].mxu1 %v1248_v13  ;;  %1150 = vst [vmem:[#allocation2 + $0xa8] sm:$0x1] %v1149_v60  ;;  %vm11963_vm12 = vmmov %vm11960_vm0  ;;  %v7828_v60 = vld [vmem:[%s11800_s5 + $0xc0] sm:$0xff]  }
 0x1d3   : > { %7654 = vmatprep.mubr.msk.bf16.mxu0 %vm11962_vm10, %v8714_v10  ;;  %v1051_v17 = vpop.permute.xlu0 %1050  ;;  %6991 = vmatpush3.bf16.msra.mxu0 %v7827_v12  ;;  %vm11964_vm10 = vmmov %vm11960_vm0  ;;  %v2384_v49 = vld [vmem:[#allocation3] sm:$0x1] }
 0x1d4   : > { %v4861_v43 = vld [vmem:[#allocation2 + $0x90] sm:$0x1]  ;;  %7098 = vmatprep.subr.bf16.mxu1 %v7828_v60 }
 0x1d5   : > { %v1562_v33 = vld [vmem:[#allocation2 + $0x98] sm:$0xff]  ;;  %v9137_v5 = vpop.permute.xlu1 %1514  ;;  %v4862_v36 = vsel %vm8153_vm7, 0, %v4861_v43  ;;  %v7829_v43 = vld [vmem:[%s11800_s5 + $0x80] sm:$0xff]   ;;  %v7843_v60 = vld [vmem:[%s11800_s5 + $0x30] sm:$0xff]  }
 0x1d6   : > { %v981_v25 = vld [vmem:[#allocation2 + $0xd8] sm:$0x80]  ;;  %v1563_v23 = vsel %vm8888_vm5, %v9062_v14, %v1562_v33  ;;  %v1107_v32 = vld [vmem:[#allocation2 + $0xf0] sm:$0xff]  ;;  %4863 = vst [vmem:[#allocation2 + $0x90] sm:$0x1] %v4862_v36  ;;  %7099 = vmatpush3.bf16.msra.mxu1 %v7829_v43 }
 0x1d7   : > { %v982_v46 = vsel %vm8221_vm13, 0, %v981_v25  ;;  %1564 = vst [vmem:[#allocation2 + $0x98] sm:$0xff] %v1563_v23  ;;  %v1108_v10 = vsel %vm8831_vm8, %v1051_v17, %v1107_v32  ;;  %v9148_v61 = vpop.permute.xlu0 %1200  ;;  %v1428_v33 = vld [vmem:[#allocation2 + $0xf8] sm:$0xff] }
 0x1d8   : > { %983 = vst [vmem:[#allocation2 + $0xd8] sm:$0x80] %v982_v46  ;;  %1643 = vst.msk [vmem:[#allocation2 + $0x98] sm:$0xff] %vm11813_vm9, %v9037_v7  ;;  %v1477_v6 = vld [vmem:[#allocation2 + $0xe0] sm:$0x1]  ;;  %v1422_v7 = vld [vmem:[#allocation2 + $0xc8] sm:$0xff] }
 0x1d9   : > { %1109 = vst [vmem:[#allocation2 + $0xf0] sm:$0xff] %v1108_v10  ;;  %v1478_v14 = vsel %vm8823_vm2, 0, %v1477_v6  ;;  %v1513_v13 = vpop.permute.xlu1 %1512  ;;  %v1253_v0 = vld [vmem:[#allocation2 + $0xa8] sm:$0xff]  ;;  %v7830_v46 = vld [vmem:[%s11800_s5 + $0x58] sm:$0xff]  }
 0x1da   : > { %7655 = vmatmul.mubr.msk.bf16.gmra.mrb[64].mxu0 %vm11959_vm6, %v9023_v39  ;;  %1479 = vst [vmem:[#allocation2 + $0xe0] sm:$0x1] %v1478_v14  ;;  %v1566_v18 = vsel %vm8888_vm5, %v1513_v13, %v1565_v30  ;;  %v1254_v57 = vsel %vm8847_vm1, %v9073_v34, %v1253_v0  ;;  %v7831_v14 = vld [vmem:[%s11800_s5 + $0x18] sm:$0xff]   ;;  %v7832_v30 = vld [vmem:[%s11800_s5 + $0xc8] sm:$0xff]   ;;  %6992 = vmatprep.subr.bf16.mxu0 %v7830_v46  ;;  %vm11965_vm6 = vmmov %vm11960_vm0 }
 0x1db   : > { %3941 = vmatprep.mubr.bf16.mxu0 %v8864_v20  ;;  %1567 = vst [vmem:[#allocation2 + $0xb0] sm:$0xff] %v1566_v18  ;;  %v1365_v24 = vpop.permute.xlu0 %1364  ;;  %1255 = vst [vmem:[#allocation2 + $0xa8] sm:$0xff] %v1254_v57  ;;  %v7833_v18 = vld [vmem:[%s11800_s5 + $0x88] sm:$0xff]   ;;  %6993 = vmatpush3.bf16.msra.mxu0 %v7831_v14  ;;  %v7846_v14 = vld [vmem:[%s11800_s5 + $0x78] sm:$0xff]  }
 0x1dc   : > { %1644 = vst.msk [vmem:[#allocation2 + $0xb0] sm:$0xff] %vm11813_vm9, %v1607_v48  ;;  %v1423_v31 = vsel %vm8804_vm14, %v1365_v24, %v1422_v7  ;;  %7100 = vmatprep.subr.bf16.mxu1 %v7832_v30  ;;  %v7834_v24 = vld [vmem:[%s11800_s5 + $0x60] sm:$0xff]  }
 0x1dd   : > { %1424 = vst [vmem:[#allocation2 + $0xc8] sm:$0xff] %v1423_v31  ;;  %v912_v39 = vpop.permute.xlu1 %911  ;;  %7101 = vmatpush3.bf16.msra.mxu1 %v7833_v18  ;;  %6994 = vmatprep.subr.bf16.mxu0 %v7834_v24  ;;  %v1437_v24 = vld [vmem:[#allocation2 + $0x140] sm:$0xff] }
 0x1de   : > { %945 = vst.msk [vmem:[#allocation2 + $0x120] sm:$0xff] %vm11960_vm0, %v912_v39  ;;  %vm2382_vm0 = vcmask 1040384  }
 0x1df   : > { %v1104_v45 = vld [vmem:[#allocation2 + $0xd8] sm:$0xff]  ;;  %v1049_v3 = vpop.permute.xlu0 %1048 }
 0x1e0   : > { %v1157_v47 = vld [vmem:[#allocation2 + $0xf0] sm:$0x1]  ;;  %v1783_v27 = vld [vmem:[#allocation2 + $0x98] sm:$0xff]  ;;  %v1105_v34 = vsel %vm8831_vm8, %v1049_v3, %v1104_v45 }
 0x1e1   : > { %v1158_v20 = vsel %vm8232_vm15, 0, %v1157_v47  ;;  %2091 = vmatprep.mubr.bf16.mxu1 %v1783_v27  ;;  %1106 = vst [vmem:[#allocation2 + $0xd8] sm:$0xff] %v1105_v34  ;;  %v910_v56 = vpop.permute.xlu1 %909  ;;  %v1571_v16 = vld [vmem:[#allocation2 + $0xe0] sm:$0xff] }
 0x1e2   : > { %1159 = vst [vmem:[#allocation2 + $0xf0] sm:$0x1] %v1158_v20  ;;  %2092 = vmatmul.mubr.bf16.gmra.mrb[20].mxu1 %v9109_v58  ;;  %944 = vst.msk [vmem:[#allocation2 + $0x108] sm:$0xff] %vm11963_vm12, %v910_v56  ;;  %v4864_v19 = vld [vmem:[#allocation2 + $0xa8] sm:$0x1]  ;;  %v7835_v47 = vld [vmem:[%s11800_s5 + $0x20] sm:$0xff]  }
 0x1e3   : > { %v1199_v29 = vpop.permute.xlu0 %1198  ;;  %v1786_v1 = vld [vmem:[#allocation2 + $0xb0] sm:$0xff]  ;;  %v4865_v4 = vsel %vm8153_vm7, 0, %v4864_v19  ;;  %6995 = vmatpush3.bf16.msra.mxu0 %v7835_v47  ;;  %vm11966_vm12 = vsmask.f32 256  ;;  %v2761_v47 = vld [vmem:[#allocation3 + $0x60] sm:$0x1] }
 0x1e4   : > { %v1474_v41 = vld [vmem:[#allocation2 + $0xc8] sm:$0x1]  ;;  %v9176_v26 = vsel %vm8847_vm1, %v1199_v29, %v1256_v11  ;;  %2099 = vmatprep.mubr.bf16.mxu1 %v1786_v1  ;;  %4866 = vst [vmem:[#allocation2 + $0xa8] sm:$0x1] %v4865_v4  ;;  %v7837_v20 = vld [vmem:[%s11800_s5 + $0x90] sm:$0xff]  }
 0x1e5   : > { %v1475_v52 = vsel %vm8823_vm2, 0, %v1474_v41  ;;  %v990_v58 = vld [vmem:[#allocation2 + $0x120] sm:$0x80]  ;;  %1258 = vst [vmem:[#allocation2 + $0xc0] sm:$0xff] %v9176_v26  ;;  %v1611_v9 = vpop.permute.xlu1 %1610  ;;  %v7839_v4 = vld [vmem:[%s11800_s5 + $0x28] sm:$0xff]   ;;  %v7840_v41 = vld [vmem:[%s11800_s5 + $0xd8] sm:$0xff]  }
 0x1e6   : > { %1476 = vst [vmem:[#allocation2 + $0xc8] sm:$0x1] %v1475_v52  ;;  %v991_v62 = vsel %vm8221_vm13, 0, %v990_v58 }
 0x1e7   : > { %992 = vst [vmem:[#allocation2 + $0x120] sm:$0x80] %v991_v62  ;;  %v1371_v40 = vpop.permute.xlu0 %1370 }
 0x1e8   : > { %v1154_v21 = vld [vmem:[#allocation2 + $0xd8] sm:$0x1]  ;;  %v1432_v38 = vsel %vm8804_vm14, %v1371_v40, %v1431_v35 }
 0x1e9   : > { %v1155_v42 = vsel %vm8232_vm15, 0, %v1154_v21  ;;  %v987_v63 = vld [vmem:[#allocation2 + $0x108] sm:$0x80]  ;;  %1433 = vst [vmem:[#allocation2 + $0x110] sm:$0xff] %v1432_v38  ;;  %v1517_v15 = vpop.permute.xlu1 %1516  ;;  %v1262_v35 = vld [vmem:[#allocation2 + $0xf0] sm:$0xff] }
 0x1ea   : > { %2100 = vmatmul.mubr.bf16.gmra.mrb[24].mxu1 %v1254_v57  ;;  %1156 = vst [vmem:[#allocation2 + $0xd8] sm:$0x1] %v1155_v42  ;;  %v988_v48 = vsel %vm8221_vm13, 0, %v987_v63  ;;  %v1572_v17 = vsel %vm8888_vm5, %v1517_v15, %v1571_v16  ;;  %v7842_v16 = vld [vmem:[%s11800_s5 + $0x70] sm:$0xff]  }
 0x1eb   : > { %989 = vst [vmem:[#allocation2 + $0x108] sm:$0x80] %v988_v48  ;;  %1573 = vst [vmem:[#allocation2 + $0xe0] sm:$0xff] %v1572_v17  ;;  %v1369_v25 = vpop.permute.xlu0 %1368 }
 0x1ec   : > { %1646 = vst.msk [vmem:[#allocation2 + $0xe0] sm:$0xff] %vm11813_vm9, %v1611_v9  ;;  %v1429_v36 = vsel %vm8804_vm14, %v1369_v25, %v1428_v33  ;;  %v4867_v23 = vld [vmem:[#allocation2 + $0xc0] sm:$0x1]  ;;  %v7841_v9 = vld [vmem:[%s11800_s5 + $0x98] sm:$0xff]  }
 0x1ed   : > { %v1568_v32 = vld [vmem:[#allocation2 + $0xc8] sm:$0xff]  ;;  %1430 = vst [vmem:[#allocation2 + $0xf8] sm:$0xff] %v1429_v36  ;;  %v916_v10 = vpop.permute.xlu1 %915  ;;  %v4868_v6 = vsel %vm8153_vm7, 0, %v4867_v23  ;;  %v7844_v33 = vld [vmem:[%s11800_s5 + $0xe0] sm:$0xff]  }
 0x1ee   : > { %v1569_v13 = vsel %vm8888_vm5, %v9137_v5, %v1568_v32  ;;  %947 = vst.msk [vmem:[#allocation2 + $0x150] sm:$0xff] %vm11964_vm10, %v916_v10  ;;  %v1113_v0 = vld [vmem:[#allocation2 + $0x120] sm:$0xff]  ;;  %4869 = vst [vmem:[#allocation2 + $0xc0] sm:$0x1] %v4868_v6  ;;  %v1434_v36 = vld [vmem:[#allocation2 + $0x128] sm:$0xff] }
 0x1ef   : > { %1570 = vst [vmem:[#allocation2 + $0xc8] sm:$0xff] %v1569_v13  ;;  %v1055_v57 = vpop.permute.xlu0 %1054  ;;  %vm9266_vm10 = vmand %vm2382_vm0, %vm11966_vm12  ;;  %vm11969_vm0 = vsmask.f32 7966  ;;  %v2390_v6 = vld [vmem:[#allocation3 + $0x90] sm:$0x1] }
 0x1f0   : > { %1645 = vst.msk [vmem:[#allocation2 + $0xc8] sm:$0xff] %vm11813_vm9, %v9100_v50  ;;  %v1483_v7 = vld [vmem:[#allocation2 + $0x110] sm:$0x1]  ;;  %v1114_v5 = vsel %vm8831_vm8, %v1055_v57, %v1113_v0  ;;  %v2385_v48 = vsel %vm9266_vm10, 0, %v2384_v49  ;;  %v2391_v18 = vsel %vm9266_vm10, 0, %v2390_v6  ;;  %v7847_v57 = vld [vmem:[%s11800_s5 + $0x38] sm:$0xff]  }
 0x1f1   : > { %v1484_v31 = vsel %vm8823_vm2, 0, %v1483_v7  ;;  %1115 = vst [vmem:[#allocation2 + $0x120] sm:$0xff] %v1114_v5  ;;  %v914_v39 = vpop.permute.xlu1 %913  ;;  %v1259_v45 = vld [vmem:[#allocation2 + $0xd8] sm:$0xff]  ;;  %v7836_v50 = vld [vmem:[%s11800_s5 + $0xd0] sm:$0xff]   ;;  %2386 = vst [vmem:[#allocation3] sm:$0x1] %v2385_v48 }
 0x1f2   : > { %1485 = vst [vmem:[#allocation2 + $0x110] sm:$0x1] %v1484_v31  ;;  %946 = vst.msk [vmem:[#allocation2 + $0x138] sm:$0xff] %vm11965_vm6, %v914_v39  ;;  %v1110_v3 = vld [vmem:[#allocation2 + $0x108] sm:$0xff]  ;;  %v9243_v27 = vsel %vm8847_vm1, %v9148_v61, %v1259_v45  ;;  %7102 = vmatprep.subr.bf16.mxu1 %v7836_v50  ;;  %vm2617_vm6 = vcmask 1047559  }
 0x1f3   : > { %v1053_v34 = vpop.permute.xlu0 %1052  ;;  %1261 = vst [vmem:[#allocation2 + $0xd8] sm:$0xff] %v9243_v27  ;;  %7103 = vmatpush3.bf16.msra.mxu1 %v7837_v20  ;;  %v7838_v61 = vld [vmem:[%s11800_s5 + $0x68] sm:$0xff]   ;;  %v1792_v12 = vld [vmem:[#allocation2 + $0xe0] sm:$0xff]  ;;  %vm9301_vm12 = vmand %vm2617_vm6, %vm11969_vm0  ;;  %vm11972_vm6 = vcmask 523520   ;;  %vm11973_vm0 = vcmask 785920  }
 0x1f4   : > { %v1480_v56 = vld [vmem:[#allocation2 + $0xf8] sm:$0x1]  ;;  %v1111_v19 = vsel %vm8831_vm8, %v1053_v34, %v1110_v3  ;;  %6996 = vmatprep.subr.bf16.mxu0 %v7838_v61  ;;  %7104 = vmatprep.subr.bf16.mxu1 %v7840_v41  ;;  %v7848_v7 = vld [vmem:[%s11800_s5 + $0xe8] sm:$0xff]   ;;  %2392 = vst [vmem:[#allocation3 + $0x90] sm:$0x1] %v2391_v18 }
 0x1f5   : > { %v1481_v29 = vsel %vm8823_vm2, 0, %v1480_v56  ;;  %v996_v11 = vld [vmem:[#allocation2 + $0x150] sm:$0x80]  ;;  %1112 = vst [vmem:[#allocation2 + $0x108] sm:$0xff] %v1111_v19  ;;  %v9256_v1 = vpop.permute.xlu1 %1518  ;;  %6997 = vmatpush3.bf16.msra.mxu0 %v7839_v4  ;;  %v7849_v31 = vld [vmem:[%s11800_s5 + $0xa8] sm:$0xff]   ;;  %v2762_v56 = vsel %vm9266_vm10, 0, %v2761_v47 }
 0x1f6   : > { %1482 = vst [vmem:[#allocation2 + $0xf8] sm:$0x1] %v1481_v29  ;;  %v997_v58 = vsel %vm8221_vm13, 0, %v996_v11  ;;  %6998 = vmatprep.subr.bf16.mxu0 %v7842_v16  ;;  %v2625_v45 = vld [vmem:[#allocation3 + $0xa0] sm:$0x80]  ;;  %v1440_v18 = vld [vmem:[#allocation2 + $0x158] sm:$0xff] }
 0x1f7   : > { %998 = vst [vmem:[#allocation2 + $0x150] sm:$0x80] %v997_v58  ;;  %v1203_v62 = vpop.permute.xlu0 %1202  ;;  %v1789_v40 = vld [vmem:[#allocation2 + $0xc8] sm:$0xff]  ;;  %7105 = vmatpush3.bf16.msra.mxu1 %v7841_v9  ;;  %v2881_v50 = vld [vmem:[#allocation3 + $0x70] sm:$0x80]  ;;  %v2626_v34 = vsel %vm9301_vm12, 0, %v2625_v45 }
 0x1f8   : > { %v1163_v21 = vld [vmem:[#allocation2 + $0x120] sm:$0x1]  ;;  %v9277_v38 = vsel %vm8847_vm1, %v1203_v62, %v1262_v35  ;;  %2107 = vmatprep.mubr.bf16.mxu1 %v1789_v40  ;;  %7106 = vmatprep.subr.bf16.mxu1 %v7844_v33  ;;  %v2882_v19 = vsel %vm9301_vm12, 0, %v2881_v50  ;;  %2627 = vst [vmem:[#allocation3 + $0xa0] sm:$0x80] %v2626_v34  ;;  %v10575_v44 = vld [vmem:[#allocation2 + $0xc8] sm:$0xff] }
 0x1f9   : > { %v1164_v42 = vsel %vm8232_vm15, 0, %v1163_v21  ;;  %v993_v63 = vld [vmem:[#allocation2 + $0x138] sm:$0x80]  ;;  %1264 = vst [vmem:[#allocation2 + $0xf0] sm:$0xff] %v9277_v38  ;;  %v1613_v15 = vpop.permute.xlu1 %1612  ;;  %2108 = vmatmul.mubr.bf16.gmra.mrb[28].mxu1 %v9176_v26  ;;  %v7845_v26 = vld [vmem:[%s11800_s5 + $0xa0] sm:$0xff]   ;;  %6999 = vmatpush3.bf16.msra.mxu0 %v7843_v60  ;;  %v1577_v29 = vld [vmem:[#allocation2 + $0x110] sm:$0xff] }
 0x1fa   : > { %1165 = vst [vmem:[#allocation2 + $0x120] sm:$0x1] %v1164_v42  ;;  %v994_v17 = vsel %vm8221_vm13, 0, %v993_v63  ;;  %2115 = vmatprep.mubr.bf16.mxu1 %v1792_v12  ;;  %v4870_v43 = vld [vmem:[#allocation2 + $0xd8] sm:$0x1]  ;;  %7000 = vmatprep.subr.bf16.mxu0 %v7846_v14  ;;  %v7850_v42 = vld [vmem:[%s11800_s5 + $0xf0] sm:$0xff]  }
 0x1fb   : > { %995 = vst [vmem:[#allocation2 + $0x138] sm:$0x80] %v994_v17  ;;  %v1373_v23 = vpop.permute.xlu0 %1372  ;;  %v4871_v46 = vsel %vm8153_vm7, 0, %v4870_v43  ;;  %7107 = vmatpush3.bf16.msra.mxu1 %v7845_v26  ;;  %2763 = vst [vmem:[#allocation3 + $0x60] sm:$0x1] %v2762_v56  ;;  %v7853_v14 = vld [vmem:[%s11800_s5 + $0xb8] sm:$0xff]  }
 0x1fc   : > { %v1160_v32 = vld [vmem:[#allocation2 + $0x108] sm:$0x1]  ;;  %v1435_v10 = vsel %vm8804_vm14, %v1373_v23, %v1434_v36  ;;  %4872 = vst [vmem:[#allocation2 + $0xd8] sm:$0x1] %v4871_v46  ;;  %7108 = vmatprep.subr.bf16.mxu1 %v7848_v7  ;;  %2883 = vst [vmem:[#allocation3 + $0x70] sm:$0x80] %v2882_v19 }
 0x1fd   : > { %v1161_v30 = vsel %vm8232_vm15, 0, %v1160_v32  ;;  %v1574_v13 = vld [vmem:[#allocation2 + $0xf8] sm:$0xff]  ;;  %1436 = vst [vmem:[#allocation2 + $0x128] sm:$0xff] %v1435_v10  ;;  %v9314_v0 = vpop.permute.xlu1 %1204  ;;  %7001 = vmatpush3.bf16.msra.mxu0 %v7847_v57  ;;  %v3089_v4 = vld [vmem:[#allocation3 + $0x40] sm:$0x80]  ;;  %v7851_v36 = vld [vmem:[%s11800_s5 + $0xb0] sm:$0xff]  }
 0x1fe   : > { %1162 = vst [vmem:[#allocation2 + $0x108] sm:$0x1] %v1161_v30  ;;  %v1575_v5 = vsel %vm8888_vm5, %v9256_v1, %v1574_v13  ;;  %v2979_v1 = vld [vmem:[#allocation3 + $0x30] sm:$0x1]  ;;  %v3090_v9 = vsel %vm9301_vm12, 0, %v3089_v4  ;;  %v7852_v46 = vld [vmem:[%s11800_s5 + $0xf8] sm:$0xff]  }
 0x1ff   : > { %1576 = vst [vmem:[#allocation2 + $0xf8] sm:$0xff] %v1575_v5  ;;  %v1375_v39 = vpop.permute.xlu0 %1374  ;;  %v2980_v58 = vsel %vm9266_vm10, 0, %v2979_v1  ;;  %v2387_v62 = vld [vmem:[#allocation3 + $0x48] sm:$0x1]  ;;  %7109 = vmatpush3.bf16.msra.mxu1 %v7849_v31  ;;  %3091 = vst [vmem:[#allocation3 + $0x40] sm:$0x80] %v3090_v9 }
 0x200   : > { %1647 = vst.msk [vmem:[#allocation2 + $0xf8] sm:$0xff] %vm11813_vm9, %v1613_v15  ;;  %v1438_v3 = vsel %vm8804_vm14, %v1375_v39, %v1437_v24  ;;  %v4873_v20 = vld [vmem:[#allocation2 + $0xf0] sm:$0x1]  ;;  %2981 = vst [vmem:[#allocation3 + $0x30] sm:$0x1] %v2980_v58  ;;  %v2388_v21 = vsel %vm9266_vm10, 0, %v2387_v62  ;;  %7110 = vmatprep.subr.bf16.mxu1 %v7850_v42 }
 0x201   : > { %1439 = vst [vmem:[#allocation2 + $0x140] sm:$0xff] %v1438_v3  ;;  %v1057_v61 = vpop.permute.xlu1 %1056  ;;  %2116 = vmatmul.mubr.bf16.gmra.mrb[32].mxu1 %v9243_v27  ;;  %v4874_v11 = vsel %vm8153_vm7, 0, %v4873_v20  ;;  %v3182_v27 = vld [vmem:[#allocation3] sm:$0xff]  ;;  %v2622_v16 = vld [vmem:[#allocation3 + $0x58] sm:$0x80]  ;;  %v1119_v31 = vld [vmem:[#allocation2 + $0x150] sm:$0xff] }
 0x202   : > { %v1116_v41 = vld [vmem:[#allocation2 + $0x138] sm:$0xff]  ;;  %4875 = vst [vmem:[#allocation2 + $0xf0] sm:$0x1] %v4874_v11  ;;  %3942 = vmatmul.mubr.bf16.vlgmr.msra.gmra.mrb[68].mxu0 %v3182_v27  ;;  %2389 = vst [vmem:[#allocation3 + $0x48] sm:$0x1] %v2388_v21  ;;  %v2623_v12 = vsel %vm9301_vm12, 0, %v2622_v16 }
 0x203   : > { %v1117_v35 = vsel %vm8831_vm8, %v1057_v61, %v1116_v41  ;;  %v1521_v40 = vpop.permute.xlu0 %1520  ;;  %v2758_v49 = vld [vmem:[#allocation3 + $0x18] sm:$0x1]  ;;  %v2878_v48 = vld [vmem:[#allocation3 + $0x28] sm:$0x80]  ;;  %2624 = vst [vmem:[#allocation3 + $0x58] sm:$0x80] %v2623_v12  ;;  %7111 = vmatpush3.bf16.msra.mxu1 %v7851_v36 }
 0x204   : > { %v1486_v63 = vld [vmem:[#allocation2 + $0x128] sm:$0x1]  ;;  %1118 = vst [vmem:[#allocation2 + $0x138] sm:$0xff] %v1117_v35  ;;  %v1578_v15 = vsel %vm8888_vm5, %v1521_v40, %v1577_v29  ;;  %v2759_v60 = vsel %vm9266_vm10, 0, %v2758_v49  ;;  %v2879_v26 = vsel %vm9301_vm12, 0, %v2878_v48  ;;  %7112 = vmatprep.subr.bf16.mxu1 %v7852_v46  ;;  %v1268_v34 = vld [vmem:[#allocation2 + $0x120] sm:$0xff] }
 0x205   : > { %v1487_v17 = vsel %vm8823_vm2, 0, %v1486_v63  ;;  %v1265_v43 = vld [vmem:[#allocation2 + $0x108] sm:$0xff]  ;;  %1579 = vst [vmem:[#allocation2 + $0x110] sm:$0xff] %v1578_v15  ;;  %v1523_v33 = vpop.permute.xlu1 %1522  ;;  %2760 = vst [vmem:[#allocation3 + $0x18] sm:$0x1] %v2759_v60 }
 0x206   : > { %1488 = vst [vmem:[#allocation2 + $0x128] sm:$0x1] %v1487_v17  ;;  %v1266_v23 = vsel %vm8847_vm1, %v9314_v0, %v1265_v43  ;;  %2880 = vst [vmem:[#allocation3 + $0x28] sm:$0x80] %v2879_v26  ;;  %v2619_v32 = vld [vmem:[#allocation3 + $0x10] sm:$0x80] }
 0x207   : > { %1267 = vst [vmem:[#allocation2 + $0x108] sm:$0xff] %v1266_v23  ;;  %v1615_v10 = vpop.permute.xlu0 %1614  ;;  %v1795_v6 = vld [vmem:[#allocation2 + $0xf8] sm:$0xff]  ;;  %v2620_v30 = vsel %vm9301_vm12, 0, %v2619_v32  ;;  %7113 = vmatpush3.bf16.msra.mxu1 %v7853_v14  ;;  %v2628_v62 = vld [vmem:[#allocation3 + $0xe8] sm:$0x80] }
 0x208   : > { %v1489_v13 = vld [vmem:[#allocation2 + $0x140] sm:$0x1]  ;;  %1648 = vst.msk [vmem:[#allocation2 + $0x110] sm:$0xff] %vm11813_vm9, %v1615_v10  ;;  %2123 = vmatprep.mubr.bf16.mxu1 %v1795_v6  ;;  %2621 = vst [vmem:[#allocation3 + $0x10] sm:$0x80] %v2620_v30  ;;  %v2629_v16 = vsel %vm9301_vm12, 0, %v2628_v62 }
 0x209   : > { %v1490_v0 = vsel %vm8823_vm2, 0, %v1489_v13  ;;  %v1377_v57 = vpop.permute.xlu1 %1376  ;;  %2124 = vmatmul.mubr.bf16.gmra.mrb[36].mxu1 %v9277_v38  ;;  %v2393_v11 = vld [vmem:[#allocation3 + $0xd8] sm:$0x1]  ;;  %v2764_v27 = vld [vmem:[#allocation3 + $0xa8] sm:$0x1] }
 0x20a   : > { %1491 = vst [vmem:[#allocation2 + $0x140] sm:$0x1] %v1490_v0  ;;  %v1441_v7 = vsel %vm8804_vm14, %v1377_v57, %v1440_v18  ;;  %v2394_v4 = vsel %vm9266_vm10, 0, %v2393_v11  ;;  %v2765_v49 = vsel %vm9266_vm10, 0, %v2764_v27  ;;  %2630 = vst [vmem:[#allocation3 + $0xe8] sm:$0x80] %v2629_v16 }
 0x20b   : > { %v1166_v5 = vld [vmem:[#allocation2 + $0x138] sm:$0x1]  ;;  %1442 = vst [vmem:[#allocation2 + $0x158] sm:$0xff] %v1441_v7  ;;  %v1059_v24 = vpop.permute.xlu0 %1058  ;;  %2395 = vst [vmem:[#allocation3 + $0xd8] sm:$0x1] %v2394_v4 }
 0x20c   : > { %v1167_v39 = vsel %vm8232_vm15, 0, %v1166_v5  ;;  %v1120_v45 = vsel %vm8831_vm8, %v1059_v24, %v1119_v31  ;;  %2766 = vst [vmem:[#allocation3 + $0xa8] sm:$0x1] %v2765_v49  ;;  %v2884_v15 = vld [vmem:[#allocation3 + $0xb8] sm:$0x80] }
 0x20d   : > { %1168 = vst [vmem:[#allocation2 + $0x138] sm:$0x1] %v1167_v39  ;;  %v1580_v47 = vld [vmem:[#allocation2 + $0x128] sm:$0xff]  ;;  %1121 = vst [vmem:[#allocation2 + $0x150] sm:$0xff] %v1120_v45  ;;  %v2982_v12 = vld [vmem:[#allocation3 + $0x78] sm:$0x1] }
 0x20e   : > { %v1617_v50 = vpop.permute.xlu1 %1616  ;;  %v1581_v38 = vsel %vm8888_vm5, %v1523_v33, %v1580_v47  ;;  %v4876_v3 = vld [vmem:[#allocation2 + $0x108] sm:$0x1]  ;;  %v2885_v60 = vsel %vm9301_vm12, 0, %v2884_v15  ;;  %v2983_v48 = vsel %vm9266_vm10, 0, %v2982_v12  ;;  %v3092_v17 = vld [vmem:[#allocation3 + $0x88] sm:$0x80] }
 0x20f   : > { %1582 = vst [vmem:[#allocation2 + $0x128] sm:$0xff] %v1581_v38  ;;  %v1207_v20 = vpop.permute.xlu0 %1206  ;;  %v1798_v56 = vld [vmem:[#allocation2 + $0x110] sm:$0xff]  ;;  %v4877_v19 = vsel %vm8153_vm7, 0, %v4876_v3  ;;  %2886 = vst [vmem:[#allocation3 + $0xb8] sm:$0x80] %v2885_v60  ;;  %v3093_v36 = vsel %vm9301_vm12, 0, %v3092_v17 }
 0x210   : > { %1649 = vst.msk [vmem:[#allocation2 + $0x128] sm:$0xff] %vm11813_vm9, %v1617_v50  ;;  %v1269_v61 = vsel %vm8847_vm1, %v1207_v20, %v1268_v34  ;;  %2131 = vmatprep.mubr.bf16.mxu1 %v1798_v56  ;;  %4878 = vst [vmem:[#allocation2 + $0x108] sm:$0x1] %v4877_v19  ;;  %v2396_v6 = vld [vmem:[#allocation3 + $0x120] sm:$0x1]  ;;  %v1443_v19 = vld [vmem:[#allocation2 + $0x170] sm:$0xff] }
 0x211   : > { %1270 = vst [vmem:[#allocation2 + $0x120] sm:$0xff] %v1269_v61  ;;  %2132 = vmatmul.mubr.bf16.gmra.mrb[40].mxu1 %v1266_v23  ;;  %v1583_v58 = vld [vmem:[#allocation2 + $0x140] sm:$0xff]  ;;  %2984 = vst [vmem:[#allocation3 + $0x78] sm:$0x1] %v2983_v48  ;;  %v2631_v14 = vld [vmem:[#allocation3 + $0x130] sm:$0x80] }
 0x212   : > { %v1209_v29 = vpop.permute.xlu1 %1208  ;;  %v1492_v1 = vld [vmem:[#allocation2 + $0x158] sm:$0x1]  ;;  %3094 = vst [vmem:[#allocation3 + $0x88] sm:$0x80] %v3093_v36  ;;  %v2397_v13 = vsel %vm9266_vm10, 0, %v2396_v6  ;;  %v2632_v0 = vsel %vm9301_vm12, 0, %v2631_v14 }
 0x213   : > { %v1493_v41 = vsel %vm8823_vm2, 0, %v1492_v1  ;;  %v1525_v9 = vpop.permute.xlu0 %1524  ;;  %v2767_v18 = vld [vmem:[#allocation3 + $0xf0] sm:$0x1]  ;;  %2398 = vst [vmem:[#allocation3 + $0x120] sm:$0x1] %v2397_v13  ;;  %v7913_v1 = vld [vmem:[#allocation3 + $0x8] sm:$0xff] }
 0x214   : > { %1494 = vst [vmem:[#allocation2 + $0x158] sm:$0x1] %v1493_v41  ;;  %v1169_v35 = vld [vmem:[#allocation2 + $0x150] sm:$0x1]  ;;  %v1271_v40 = vld [vmem:[#allocation2 + $0x138] sm:$0xff]  ;;  %v1584_v21 = vsel %vm8888_vm5, %v1525_v9, %v1583_v58  ;;  %v2768_v24 = vsel %vm9266_vm10, 0, %v2767_v18 }
 0x215   : > { %v1170_v42 = vsel %vm8232_vm15, 0, %v1169_v35  ;;  %v1272_v63 = vsel %vm8847_vm1, %v1209_v29, %v1271_v40  ;;  %1585 = vst [vmem:[#allocation2 + $0x140] sm:$0xff] %v1584_v21  ;;  %2633 = vst [vmem:[#allocation3 + $0x130] sm:$0x80] %v2632_v0  ;;  %v2887_v31 = vld [vmem:[#allocation3 + $0x100] sm:$0x80] }
 0x216   : > { %1171 = vst [vmem:[#allocation2 + $0x150] sm:$0x1] %v1170_v42  ;;  %1273 = vst [vmem:[#allocation2 + $0x138] sm:$0xff] %v1272_v63  ;;  %v1527_v43 = vpop.permute.xlu1 %1526  ;;  %v2888_v47 = vsel %vm9301_vm12, 0, %v2887_v31  ;;  %v2985_v50 = vld [vmem:[#allocation3 + $0xc0] sm:$0x1] }
 0x217   : > { %v1619_v33 = vpop.permute.xlu0 %1618  ;;  %v1801_v26 = vld [vmem:[#allocation2 + $0x128] sm:$0xff]  ;;  %2769 = vst [vmem:[#allocation3 + $0xf0] sm:$0x1] %v2768_v24  ;;  %2889 = vst [vmem:[#allocation3 + $0x100] sm:$0x80] %v2888_v47  ;;  %v2986_v20 = vsel %vm9266_vm10, 0, %v2985_v50 }
 0x218   : > { %1650 = vst.msk [vmem:[#allocation2 + $0x140] sm:$0xff] %vm11813_vm9, %v1619_v33  ;;  %2139 = vmatprep.mubr.bf16.mxu1 %v1801_v26  ;;  %v4879_v23 = vld [vmem:[#allocation2 + $0x120] sm:$0x1]  ;;  %v3095_v34 = vld [vmem:[#allocation3 + $0xd0] sm:$0x80]  ;;  %v7857_v47 = vld [vmem:[%s11800_s5 + $0x108] sm:$0xff]  }
 0x219   : > { %2140 = vmatmul.mubr.bf16.gmra.mrb[44].mxu1 %v1269_v61  ;;  %v4880_v46 = vsel %vm8153_vm7, 0, %v4879_v23  ;;  %2987 = vst [vmem:[#allocation3 + $0xc0] sm:$0x1] %v2986_v20  ;;  %v3096_v56 = vsel %vm9301_vm12, 0, %v3095_v34  ;;  %v2399_v62 = vld [vmem:[#allocation3 + $0x168] sm:$0x1] }
 0x21a   : > { %4881 = vst [vmem:[#allocation2 + $0x120] sm:$0x1] %v4880_v46  ;;  %v1621_v57 = vpop.permute.xlu1 %1620  ;;  %3097 = vst [vmem:[#allocation3 + $0xd0] sm:$0x80] %v3096_v56  ;;  %v2400_v27 = vsel %vm9266_vm10, 0, %v2399_v62  ;;  %v7854_v36 = vld [vmem:[%s11800_s5 + $0x140] sm:$0xff]  }
 0x21b   : > { %v1586_v32 = vld [vmem:[#allocation2 + $0x158] sm:$0xff]  ;;  %v1211_v10 = vpop.permute.xlu0 %1210  ;;  %2401 = vst [vmem:[#allocation3 + $0x168] sm:$0x1] %v2400_v27  ;;  %v2890_v21 = vld [vmem:[#allocation3 + $0x148] sm:$0x80]  ;;  %v7855_v23 = vld [vmem:[%s11800_s5 + $0x100] sm:$0xff]   ;;  %7210 = vmatprep.subr.bf16.mxu0 %v7854_v36 }
 0x21c   : > { %v1587_v30 = vsel %vm8888_vm5, %v1527_v43, %v1586_v32  ;;  %v2634_v35 = vld [vmem:[#allocation3 + $0x178] sm:$0x80]  ;;  %v2770_v40 = vld [vmem:[#allocation3 + $0x138] sm:$0x1]  ;;  %v2891_v42 = vsel %vm9301_vm12, 0, %v2890_v21  ;;  %7211 = vmatpush3.bf16.msra.mxu0 %v7855_v23 }
 0x21d   : > { %1588 = vst [vmem:[#allocation2 + $0x158] sm:$0xff] %v1587_v30  ;;  %v1274_v7 = vld [vmem:[#allocation2 + $0x150] sm:$0xff]  ;;  %v4882_v5 = vld [vmem:[#allocation2 + $0x138] sm:$0x1]  ;;  %v2635_v16 = vsel %vm9301_vm12, 0, %v2634_v35  ;;  %v2771_v49 = vsel %vm9266_vm10, 0, %v2770_v40 }
 0x21e   : > { %1651 = vst.msk [vmem:[#allocation2 + $0x158] sm:$0xff] %vm11813_vm9, %v1621_v57  ;;  %v1275_v39 = vsel %vm8847_vm1, %v1211_v10, %v1274_v7  ;;  %v4883_v45 = vsel %vm8153_vm7, 0, %v4882_v5  ;;  %2636 = vst [vmem:[#allocation3 + $0x178] sm:$0x80] %v2635_v16  ;;  %v3098_v60 = vld [vmem:[#allocation3 + $0x118] sm:$0x80]  ;;  %v1061_v43 = vpop.permute.xlu1 %1060 }
 0x21f   : > { %1276 = vst [vmem:[#allocation2 + $0x150] sm:$0xff] %v1275_v39  ;;  %v918_v38 = vpop.permute.xlu0 %917  ;;  %v1804_v3 = vld [vmem:[#allocation2 + $0x140] sm:$0xff]  ;;  %4884 = vst [vmem:[#allocation2 + $0x138] sm:$0x1] %v4883_v45  ;;  %v3099_v17 = vsel %vm9301_vm12, 0, %v3098_v60  ;;  %v7856_v45 = vld [vmem:[%s11800_s5 + $0x148] sm:$0xff]  }
 0x220   : > { %948 = vst.msk [vmem:[#allocation2 + $0x168] sm:$0xff] %vm11972_vm6, %v918_v38  ;;  %2147 = vmatprep.mubr.bf16.mxu1 %v1804_v3  ;;  %2772 = vst [vmem:[#allocation3 + $0x138] sm:$0x1] %v2771_v49  ;;  %v2402_v46 = vld [vmem:[#allocation3 + $0x1b0] sm:$0x1]  ;;  %7212 = vmatprep.subr.bf16.mxu0 %v7856_v45  ;;  %v10584_v2 = vld [vmem:[#allocation2 + $0xf8] sm:$0xff] }
 0x221   : > { %2148 = vmatmul.mubr.bf16.gmra.mrb[48].mxu1 %v1272_v63  ;;  %v2988_v63 = vld [vmem:[#allocation3 + $0x108] sm:$0x1]  ;;  %2892 = vst [vmem:[#allocation3 + $0x148] sm:$0x80] %v2891_v42  ;;  %3100 = vst [vmem:[#allocation3 + $0x118] sm:$0x80] %v3099_v17  ;;  %7213 = vmatpush3.bf16.msra.mxu0 %v7857_v47 }
 0x222   : > { %v2989_v12 = vsel %vm9266_vm10, 0, %v2988_v63  ;;  %v2403_v32 = vsel %vm9266_vm10, 0, %v2402_v46  ;;  %v2637_v10 = vld [vmem:[#allocation3 + $0x1c0] sm:$0x80]  ;;  %v2773_v6 = vld [vmem:[#allocation3 + $0x180] sm:$0x1]  ;;  %v1213_v3 = vpop.permute.xlu1 %1212 }
 0x223   : > { %v1379_v61 = vpop.permute.xlu0 %1378  ;;  %2990 = vst [vmem:[#allocation3 + $0x108] sm:$0x1] %v2989_v12  ;;  %2404 = vst [vmem:[#allocation3 + $0x1b0] sm:$0x1] %v2403_v32  ;;  %v2638_v14 = vsel %vm9301_vm12, 0, %v2637_v10  ;;  %v2774_v30 = vsel %vm9266_vm10, 0, %v2773_v6 }
 0x224   : > { %v1444_v29 = vsel %vm8804_vm14, %v1379_v61, %v1443_v19  ;;  %v2893_v13 = vld [vmem:[#allocation3 + $0x190] sm:$0x80]  ;;  %2639 = vst [vmem:[#allocation3 + $0x1c0] sm:$0x80] %v2638_v14  ;;  %2775 = vst [vmem:[#allocation3 + $0x180] sm:$0x1] %v2774_v30 }
 0x225   : > { %1445 = vst [vmem:[#allocation2 + $0x170] sm:$0xff] %v1444_v29  ;;  %v1807_v11 = vld [vmem:[#allocation2 + $0x158] sm:$0xff]  ;;  %v2894_v18 = vsel %vm9301_vm12, 0, %v2893_v13  ;;  %v2991_v57 = vld [vmem:[#allocation3 + $0x150] sm:$0x1] }
 0x226   : > { %1447 = vst.msk [vmem:[#allocation2 + $0x170] sm:$0xff] %vm11973_vm0, %v7913_v1  ;;  %2155 = vmatprep.mubr.bf16.mxu1 %v1807_v11  ;;  %v4885_v4 = vld [vmem:[#allocation2 + $0x150] sm:$0x1]  ;;  %v3101_v7 = vld [vmem:[#allocation3 + $0x160] sm:$0x80]  ;;  %v2992_v5 = vsel %vm9266_vm10, 0, %v2991_v57 }
 0x227   : > { %v999_v41 = vld [vmem:[#allocation2 + $0x168] sm:$0x80]  ;;  %v4886_v58 = vsel %vm8153_vm7, 0, %v4885_v4  ;;  %2895 = vst [vmem:[#allocation3 + $0x190] sm:$0x80] %v2894_v18  ;;  %v3102_v24 = vsel %vm9301_vm12, 0, %v3101_v7 }
 0x228   : > { %v1000_v9 = vsel %vm8221_vm13, 0, %v999_v41  ;;  %4887 = vst [vmem:[#allocation2 + $0x150] sm:$0x1] %v4886_v58  ;;  %2993 = vst [vmem:[#allocation3 + $0x150] sm:$0x1] %v2992_v5  ;;  %v7858_v17 = vld [vmem:[%s11800_s5 + $0x150] sm:$0xff]  }
 0x229   : > { %1001 = vst [vmem:[#allocation2 + $0x168] sm:$0x80] %v1000_v9  ;;  %2156 = vmatmul.mubr.bf16.gmra.mrb[52].mxu1 %v1275_v39  ;;  %3103 = vst [vmem:[#allocation3 + $0x160] sm:$0x80] %v3102_v24  ;;  %v2405_v50 = vld [vmem:[#allocation3 + $0x1f8] sm:$0x1]  ;;  %7214 = vmatprep.subr.bf16.mxu0 %v7858_v17 }
 0x22a   : > { %v2406_v20 = vsel %vm9266_vm10, 0, %v2405_v50  ;;  %v2640_v56 = vld [vmem:[#allocation3 + $0x208] sm:$0x80]  ;;  %v2776_v19 = vld [vmem:[#allocation3 + $0x1c8] sm:$0x1]  ;;  %v7860_v18 = vld [vmem:[%s11800_s5 + $0x158] sm:$0xff]  }
 0x22b   : > { %2407 = vst [vmem:[#allocation3 + $0x1f8] sm:$0x1] %v2406_v20  ;;  %v2896_v61 = vld [vmem:[#allocation3 + $0x1d8] sm:$0x80]  ;;  %v2641_v29 = vsel %vm9301_vm12, 0, %v2640_v56  ;;  %v2777_v11 = vsel %vm9266_vm10, 0, %v2776_v19 }
 0x22c   : > { %v2994_v4 = vld [vmem:[#allocation3 + $0x198] sm:$0x1]  ;;  %2642 = vst [vmem:[#allocation3 + $0x208] sm:$0x80] %v2641_v29  ;;  %2778 = vst [vmem:[#allocation3 + $0x1c8] sm:$0x1] %v2777_v11 }
 0x22d   : > { %v1495_v15 = vld [vmem:[#allocation2 + $0x170] sm:$0x1]  ;;  %v2995_v41 = vsel %vm9266_vm10, 0, %v2994_v4  ;;  %v3104_v58 = vld [vmem:[#allocation3 + $0x1a8] sm:$0x80]  ;;  %v7861_v57 = vld [vmem:[%s11800_s5 + $0x118] sm:$0xff]  }
 0x22e   : > { %v1496_v48 = vsel %vm8823_vm2, 0, %v1495_v15  ;;  %2996 = vst [vmem:[#allocation3 + $0x198] sm:$0x1] %v2995_v41  ;;  %v3105_v9 = vsel %vm9301_vm12, 0, %v3104_v58  ;;  %v2408_v27 = vld [vmem:[#allocation3 + $0x240] sm:$0x1] }
 0x22f   : > { %1497 = vst [vmem:[#allocation2 + $0x170] sm:$0x1] %v1496_v48  ;;  %3106 = vst [vmem:[#allocation3 + $0x1a8] sm:$0x80] %v3105_v9  ;;  %v2643_v35 = vld [vmem:[#allocation3 + $0x250] sm:$0x80] }
 0x230   : > { %v1122_v33 = vld [vmem:[#allocation2 + $0x168] sm:$0xff]  ;;  %1590 = vst.msk [vmem:[#allocation2 + $0x170] sm:$0xff] %vm11813_vm9, %v7913_v1  ;;  %v2897_v1 = vsel %vm9301_vm12, 0, %v2896_v61  ;;  %v2409_v21 = vsel %vm9266_vm10, 0, %v2408_v27  ;;  %v2644_v16 = vsel %vm9301_vm12, 0, %v2643_v35  ;;  %v7862_v17 = vld [vmem:[%s11800_s5 + $0x160] sm:$0xff]  }
 0x231   : > { %v1123_v26 = vsel %vm8831_vm8, %v1061_v43, %v1122_v33  ;;  %2898 = vst [vmem:[#allocation3 + $0x1d8] sm:$0x80] %v2897_v1  ;;  %2410 = vst [vmem:[#allocation3 + $0x240] sm:$0x1] %v2409_v21  ;;  %v2779_v49 = vld [vmem:[#allocation3 + $0x210] sm:$0x1] }
 0x232   : > { %1124 = vst [vmem:[#allocation2 + $0x168] sm:$0xff] %v1123_v26  ;;  %2645 = vst [vmem:[#allocation3 + $0x250] sm:$0x80] %v2644_v16  ;;  %v2899_v42 = vld [vmem:[#allocation3 + $0x220] sm:$0x80]  ;;  %v2780_v63 = vsel %vm9266_vm10, 0, %v2779_v49 }
 0x233   : > { %v2900_v15 = vsel %vm9301_vm12, 0, %v2899_v42  ;;  %v2997_v12 = vld [vmem:[#allocation3 + $0x1e0] sm:$0x1]  ;;  %2781 = vst [vmem:[#allocation3 + $0x210] sm:$0x1] %v2780_v63  ;;  %v7859_v43 = vld [vmem:[%s11800_s5 + $0x110] sm:$0xff]  }
 0x234   : > { %2901 = vst [vmem:[#allocation3 + $0x220] sm:$0x80] %v2900_v15  ;;  %v2998_v54 = vsel %vm9266_vm10, 0, %v2997_v12  ;;  %v3107_v60 = vld [vmem:[#allocation3 + $0x1f0] sm:$0x80]  ;;  %7215 = vmatpush3.bf16.msra.mxu0 %v7859_v43  ;;  %v7863_v43 = vld [vmem:[%s11800_s5 + $0x120] sm:$0xff]  }
 0x235   : > { %2999 = vst [vmem:[#allocation3 + $0x1e0] sm:$0x1] %v2998_v54  ;;  %v3108_v48 = vsel %vm9301_vm12, 0, %v3107_v60  ;;  %v2411_v33 = vld [vmem:[#allocation3 + $0x288] sm:$0x1]  ;;  %7216 = vmatprep.subr.bf16.mxu0 %v7860_v18 }
 0x236   : > { %3109 = vst [vmem:[#allocation3 + $0x1f0] sm:$0x80] %v3108_v48  ;;  %v2412_v26 = vsel %vm9266_vm10, 0, %v2411_v33  ;;  %v2646_v36 = vld [vmem:[#allocation3 + $0x298] sm:$0x80] }
 0x237   : > { %v1810_v0 = vld [vmem:[#allocation2 + $0x170] sm:$0xff]  ;;  %2413 = vst [vmem:[#allocation3 + $0x288] sm:$0x1] %v2412_v26  ;;  %v2782_v23 = vld [vmem:[#allocation3 + $0x258] sm:$0x1]  ;;  %v2647_v32 = vsel %vm9301_vm12, 0, %v2646_v36 }
 0x238   : > { %2163 = vmatprep.mubr.bf16.mxu1 %v1810_v0  ;;  %v2902_v46 = vld [vmem:[#allocation3 + $0x268] sm:$0x80]  ;;  %v2783_v10 = vsel %vm9266_vm10, 0, %v2782_v23  ;;  %v3000_v14 = vld [vmem:[#allocation3 + $0x228] sm:$0x1]  ;;  %7217 = vmatpush3.bf16.msra.mxu0 %v7861_v57 }
 0x239   : > { %v1172_v31 = vld [vmem:[#allocation2 + $0x168] sm:$0x1]  ;;  %v2903_v6 = vsel %vm9301_vm12, 0, %v2902_v46  ;;  %2648 = vst [vmem:[#allocation3 + $0x298] sm:$0x80] %v2647_v32  ;;  %v3001_v30 = vsel %vm9266_vm10, 0, %v3000_v14  ;;  %7218 = vmatprep.subr.bf16.mxu0 %v7862_v17 }
 0x23a   : > { %v1173_v39 = vsel %vm8232_vm15, 0, %v1172_v31  ;;  %2784 = vst [vmem:[#allocation3 + $0x258] sm:$0x1] %v2783_v10  ;;  %2904 = vst [vmem:[#allocation3 + $0x268] sm:$0x80] %v2903_v6 }
 0x23b   : > { %1174 = vst [vmem:[#allocation2 + $0x168] sm:$0x1] %v1173_v39  ;;  %v3110_v13 = vld [vmem:[#allocation3 + $0x238] sm:$0x80]  ;;  %3002 = vst [vmem:[#allocation3 + $0x228] sm:$0x1] %v3001_v30 }
 0x23c   : > { %v3111_v0 = vsel %vm9301_vm12, 0, %v3110_v13  ;;  %v2414_v7 = vld [vmem:[#allocation3 + $0x2d0] sm:$0x1]  ;;  %v2649_v24 = vld [vmem:[#allocation3 + $0x2e0] sm:$0x80]  ;;  %7219 = vmatpush3.bf16.msra.mxu0 %v7863_v43 }
 0x23d   : > { %3112 = vst [vmem:[#allocation3 + $0x238] sm:$0x80] %v3111_v0  ;;  %v2415_v5 = vsel %vm9266_vm10, 0, %v2414_v7  ;;  %v2785_v31 = vld [vmem:[#allocation3 + $0x2a0] sm:$0x1]  ;;  %v2650_v39 = vsel %vm9301_vm12, 0, %v2649_v24 }
 0x23e   : > { %2416 = vst [vmem:[#allocation3 + $0x2d0] sm:$0x1] %v2415_v5  ;;  %v2786_v45 = vsel %vm9266_vm10, 0, %v2785_v31  ;;  %v2905_v47 = vld [vmem:[#allocation3 + $0x2b0] sm:$0x80] }
 0x23f   : > { %2651 = vst [vmem:[#allocation3 + $0x2e0] sm:$0x80] %v2650_v39  ;;  %2787 = vst [vmem:[#allocation3 + $0x2a0] sm:$0x1] %v2786_v45  ;;  %v2906_v50 = vsel %vm9301_vm12, 0, %v2905_v47 }
 0x240   : > { %2907 = vst [vmem:[#allocation3 + $0x2b0] sm:$0x80] %v2906_v50  ;;  %v2417_v56 = vld [vmem:[#allocation3 + $0x318] sm:$0x1]  ;;  %v2652_v61 = vld [vmem:[#allocation3 + $0x328] sm:$0x80] }
 0x241   : > { %v2418_v19 = vsel %vm9266_vm10, 0, %v2417_v56  ;;  %v2788_v29 = vld [vmem:[#allocation3 + $0x2e8] sm:$0x1]  ;;  %v2653_v1 = vsel %vm9301_vm12, 0, %v2652_v61  ;;  %v2908_v41 = vld [vmem:[#allocation3 + $0x2f8] sm:$0x80] }
 0x242   : > { %v1277_v38 = vld [vmem:[#allocation2 + $0x168] sm:$0xff]  ;;  %2419 = vst [vmem:[#allocation3 + $0x318] sm:$0x1] %v2418_v19  ;;  %v2789_v4 = vsel %vm9266_vm10, 0, %v2788_v29  ;;  %2654 = vst [vmem:[#allocation3 + $0x328] sm:$0x80] %v2653_v1 }
 0x243   : > { %v1278_v34 = vsel %vm8847_vm1, %v1213_v3, %v1277_v38  ;;  %v3003_v38 = vld [vmem:[#allocation3 + $0x270] sm:$0x1]  ;;  %v3113_v3 = vld [vmem:[#allocation3 + $0x280] sm:$0x80]  ;;  %2790 = vst [vmem:[#allocation3 + $0x2e8] sm:$0x1] %v2789_v4 }
 0x244   : > { %1279 = vst [vmem:[#allocation2 + $0x168] sm:$0xff] %v1278_v34  ;;  %2164 = vmatmul.mubr.bf16.gmra.mrb[56].mxu1 %v1278_v34  ;;  %v3004_v20 = vsel %vm9266_vm10, 0, %v3003_v38  ;;  %v3114_v34 = vsel %vm9301_vm12, 0, %v3113_v3  ;;  %v2909_v9 = vsel %vm9301_vm12, 0, %v2908_v41  ;;  %v3116_v27 = vld [vmem:[#allocation3 + $0x2c8] sm:$0x80] }
 0x245   : > { %3005 = vst [vmem:[#allocation3 + $0x270] sm:$0x1] %v3004_v20  ;;  %3115 = vst [vmem:[#allocation3 + $0x280] sm:$0x80] %v3114_v34  ;;  %v3117_v16 = vsel %vm9301_vm12, 0, %v3116_v27 }
 0x246   : > { %2910 = vst [vmem:[#allocation3 + $0x2f8] sm:$0x80] %v2909_v9  ;;  %3118 = vst [vmem:[#allocation3 + $0x2c8] sm:$0x80] %v3117_v16  ;;  %v9566_v12 = vld [vmem:[%s11799_s4] ss:$0 sm:$0xff] }
 0x247   : > { %v2420_v46 = vld [vmem:[#allocation3 + $0x360] sm:$0x1]  ;;  %v2655_v14 = vld [vmem:[#allocation3 + $0x370] sm:$0x80]  ;;  %v2791_v7 = vld [vmem:[#allocation3 + $0x330] sm:$0x1] }
 0x248   : > { %v2421_v6 = vsel %vm9266_vm10, 0, %v2420_v46  ;;  %v2656_v57 = vsel %vm9301_vm12, 0, %v2655_v14  ;;  %v2792_v24 = vsel %vm9266_vm10, 0, %v2791_v7  ;;  %v2911_v31 = vld [vmem:[#allocation3 + $0x340] sm:$0x80]  ;;  %v2932_v14 = vld [vmem:[#allocation3 + $0x70] sm:$0xff] }
 0x249   : > { %2422 = vst [vmem:[#allocation3 + $0x360] sm:$0x1] %v2421_v6  ;;  %2657 = vst [vmem:[#allocation3 + $0x370] sm:$0x80] %v2656_v57  ;;  %v3009_v39 = vld [vmem:[#allocation3 + $0x300] sm:$0x1] }
 0x24a   : > { %2793 = vst [vmem:[#allocation3 + $0x330] sm:$0x1] %v2792_v24  ;;  %v3119_v50 = vld [vmem:[#allocation3 + $0x310] sm:$0x80]  ;;  %v2912_v38 = vsel %vm9301_vm12, 0, %v2911_v31  ;;  %v3010_v3 = vsel %vm9266_vm10, 0, %v3009_v39 }
 0x24b   : > { %v4888_v62 = vld [vmem:[#allocation2 + $0x168] sm:$0x1]  ;;  %v3120_v20 = vsel %vm9301_vm12, 0, %v3119_v50  ;;  %2913 = vst [vmem:[#allocation3 + $0x340] sm:$0x80] %v2912_v38  ;;  %v2716_v46 = vld [vmem:[#allocation3 + $0xa0] sm:$0xff] }
 0x24c   : > { %v4889_v40 = vsel %vm8153_vm7, 0, %v4888_v62  ;;  %v3006_v62 = vld [vmem:[#allocation3 + $0x2b8] sm:$0x1]  ;;  %vm2553_vm7 = vcmask 1047552   ;;  %3011 = vst [vmem:[#allocation3 + $0x300] sm:$0x1] %v3010_v3 }
 0x24d   : > { %4890 = vst [vmem:[#allocation2 + $0x168] sm:$0x1] %v4889_v40  ;;  %v3007_v21 = vsel %vm9266_vm10, 0, %v3006_v62  ;;  %3121 = vst [vmem:[#allocation3 + $0x310] sm:$0x80] %v3120_v20  ;;  %v2555_v31 = vld [vmem:[#allocation3 + $0x48] sm:$0xff] }
 0x24e   : > { %3008 = vst [vmem:[#allocation3 + $0x2b8] sm:$0x1] %v3007_v21  ;;  %v2423_v29 = vld [vmem:[#allocation3 + $0x3a8] sm:$0x1]  ;;  %v2794_v1 = vld [vmem:[#allocation3 + $0x378] sm:$0x1] }
 0x24f   : > { %v2424_v9 = vsel %vm9266_vm10, 0, %v2423_v29  ;;  %v2914_v27 = vld [vmem:[#allocation3 + $0x388] sm:$0x80]  ;;  %v3012_v16 = vld [vmem:[#allocation3 + $0x348] sm:$0x1]  ;;  %v2713_v50 = vld [vmem:[#allocation3 + $0x58] sm:$0xff] }
 0x250   : > { %2425 = vst [vmem:[#allocation3 + $0x3a8] sm:$0x1] %v2424_v9  ;;  %v2915_v21 = vsel %vm9301_vm12, 0, %v2914_v27  ;;  %vm11978_vm6 = vsmask.f32 7938  ;;  %v3013_v43 = vsel %vm9266_vm10, 0, %v3012_v16 }
 0x251   : > { %2916 = vst [vmem:[#allocation3 + $0x388] sm:$0x80] %v2915_v21  ;;  %vm9632_vm0 = vmand %vm2553_vm7, %vm11978_vm6  ;;  %vm11981_vm9 = vsmask.f32 7424  ;;  %v2814_v38 = vld [vmem:[#allocation3 + $0x18] sm:$0xff]  ;;  %v2929_v3 = vld [vmem:[#allocation3 + $0x28] sm:$0xff] }
 0x252   : > { %vm9642_vm5 = vmand %vm2553_vm7, %vm11981_vm9  ;;  %3014 = vst [vmem:[#allocation3 + $0x348] sm:$0x1] %v3013_v43  ;;  %v7864_v20 = vld [vmem:[%s11800_s5 + $0x168] sm:$0xff]   ;;  %v2426_v29 = vld [vmem:[#allocation3 + $0x3f0] sm:$0x1]  ;;  %vm12020_vm9 = vcmask 261120  }
 0x253   : > { %v7865_v27 = vld [vmem:[%s11800_s5 + $0x128] sm:$0xff]   ;;  %7220 = vmatprep.subr.bf16.mxu0 %v7864_v20  ;;  %v2797_v43 = vld [vmem:[#allocation3 + $0x3c0] sm:$0x1] }
 0x254   : > { %7221 = vmatpush3.bf16.msra.mxu0 %v7865_v27  ;;  %v2800_v27 = vld [vmem:[#allocation3 + $0x408] sm:$0x1] }
 0x26d   : > { %v6872_v11 = vpop.f32.mrb[32].mxu0 }
 0x26e   : > { %v6873_v58 = vpop.f32.mrb[33].mxu0 }
 0x26f   : > { %v6874_v35 = vadd.f32 %v6873_v58, %v6872_v11  ;;  %v6875_v40 = vpop.f32.mrb[34].mxu0  ;;  %v2658_v11 = vld [vmem:[#allocation3 + $0x3b8] sm:$0x80] }
 0x270   : > { %v6876_v49 = vpop.f32.mrb[35].mxu0  ;;  %v2659_v62 = vsel %vm9301_vm12, 0, %v2658_v11 }
 0x271   : > { %v6877_v42 = vadd.f32 %v6876_v49, %v6875_v40  ;;  %v6878_v63 = vpop.f32.mrb[0].mxu1  ;;  %v2046_v23 = vadd.f32 %v6874_v35, %v9566_v12  ;;  %2660 = vst [vmem:[#allocation3 + $0x3b8] sm:$0x80] %v2659_v62  ;;  %v2795_v40 = vsel %vm9266_vm10, 0, %v2794_v1 }
 0x272   : > { %v6879_v15 = vpop.f32.mrb[1].mxu1  ;;  %2796 = vst [vmem:[#allocation3 + $0x378] sm:$0x1] %v2795_v40  ;;  %v2661_v40 = vld [vmem:[#allocation3 + $0x400] sm:$0x80] }
 0x273   : > { %v6880_v54 = vadd.f32 %v6879_v15, %v6878_v63  ;;  %v6881_v60 = vpop.f32.mrb[2].mxu1  ;;  %v2049_v10 = vadd.f32 %v6877_v42, %v9566_v12 }
 0x274   : > { %v6882_v48 = vpop.f32.mrb[3].mxu1 }
 0x275   : > { %v6883_v33 = vadd.f32 %v6882_v48, %v6881_v60  ;;  %v2054_v26 = vadd.f32 %v6880_v54, %v9566_v12  ;;  %v7628_v36 = vpop.f32.mrb[36].mxu0  ;;  %v2558_v48 = vld [vmem:[#allocation3 + $0x90] sm:$0xff] }
 0x276   : > { %v2206_v32 = vpop.f32.mrb[37].mxu0 }
 0x277   : > { %v9579_v30 = vadd.f32 %v7628_v36, %v2054_v26  ;;  %v9581_v13 = vadd.f32 %v2206_v32, %v2046_v23  ;;  %v2057_v0 = vadd.f32 %v6883_v33, %v9566_v12  ;;  %v7629_v18 = vpop.f32.mrb[38].mxu0  ;;  %v3122_v33 = vld [vmem:[#allocation3 + $0x358] sm:$0x80]  ;;  %v2817_v32 = vld [vmem:[#allocation3 + $0x60] sm:$0xff]  ;;  %v7892_v26 = vld [vmem:[%s11800_s5 + $0x230] sm:$0xff]  }
 0x278   : > { %v2209_v5 = vpop.f32.mrb[39].mxu0  ;;  %v3123_v57 = vsel %vm9301_vm12, 0, %v3122_v33 }
 0x279   : > { %11974 = vst [vmem:[#allocation9_spill] sm:$0xff] %v9579_v30  ;;  %11975 = vst [vmem:[#allocation8_spill] sm:$0xff] %v9581_v13  ;;  %v9588_v45 = vadd.f32 %v7629_v18, %v2057_v0  ;;  %v9590_v47 = vadd.f32 %v2209_v5, %v2049_v10  ;;  %v11821_v34 = vmax.f32 %v9579_v30, 0.0  ;;  %v11825_v56 = vmax.f32 %v9581_v13, 0.0  ;;  %v3027_v0 = vld [vmem:[#allocation3 + $0x30] sm:$0xff]  ;;  %v3137_v18 = vld [vmem:[#allocation3 + $0x40] sm:$0xff] }
 0x27a   : > { %3124 = vst [vmem:[#allocation3 + $0x358] sm:$0x80] %v3123_v57  ;;  %v2798_v57 = vsel %vm9266_vm10, 0, %v2797_v43 }
 0x27b   : > { %11976 = vst [vmem:[#allocation12_spill] sm:$0xff] %v9588_v45  ;;  %11977 = vst [vmem:[#allocation10_spill] sm:$0xff] %v9590_v47  ;;  %v11820_v19 = vmax.f32 %v9588_v45, 0.0  ;;  %v11824_v61 = vmax.f32 %v9590_v47, 0.0 }
 0x27c   : > { %2799 = vst [vmem:[#allocation3 + $0x3c0] sm:$0x1] %v2798_v57 }
 0x27d   : > { %v9606_v4 = vpack.c.bf16 %v11820_v19, %v11821_v34  ;;  %v2365_v41 = vpack.c.bf16 %v11824_v61, %v11825_v56  ;;  %v9612_v58 = vpop.f32.mrb[40].mxu0  ;;  %v7876_v19 = vld [vmem:[%s11800_s5 + $0x190] sm:$0xff]   ;;  %v3146_v61 = vld [vmem:[#allocation3 + $0x118] sm:$0xff] }
 0x27e   : > { %v9618_v35 = vpop.f32.mrb[41].mxu0 }
 0x27f   : > { %v2440_v49 = vshrl.u32 %v9606_v4, 16  ;;  %v2443_v42 = vshll.u32 %v9606_v4, 16  ;;  %2863 = vst [vmem:[#allocation3 + $0x68] sm:$0xff] %v9606_v4  ;;  %3073 = vst [vmem:[#allocation3 + $0x38] sm:$0xff] %v9606_v4  ;;  %v2433_v63 = vshrl.u32 %v2365_v41, 16  ;;  %v2436_v15 = vshll.u32 %v2365_v41, 16  ;;  %3949 = vmatprep.mubr.bf16.mxu0 %v2365_v41 }
 0x280   : > { %2862 = vst [vmem:[#allocation3 + $0x20] sm:$0xff] %v2365_v41  ;;  %v9628_v54 = vpop.f32.mrb[42].mxu0 }
 0x281   : > { %v9636_v17 = vpop.f32.mrb[43].mxu0  ;;  %v2442_v36 = vrot.slane %v2440_v49, 7  ;;  %v2669_v23 = vrot.slane %v2443_v42, 1  ;;  %v2435_v10 = vrot.slane %v2433_v63, 7  ;;  %v2667_v6 = vrot.slane %v2436_v15, 1 }
 0x283   : > { %v2445_v7 = vor.u32 %v2443_v42, %v2442_v36  ;;  %v2670_v5 = vor.u32 %v2669_v23, %v2440_v49  ;;  %v2438_v24 = vor.u32 %v2436_v15, %v2435_v10  ;;  %v2668_v39 = vor.u32 %v2667_v6, %v2433_v63  ;;  %v2917_v6 = vld [vmem:[#allocation3 + $0x3d0] sm:$0x80] }
 0x284   : > { %v2662_v10 = vsel %vm9301_vm12, 0, %v2661_v40 }
 0x285   : > { %v9653_v11 = vsel %vm9632_vm0, %v2445_v7, %v2558_v48  ;;  %v9657_v1 = vsel %vm9642_vm5, %v2670_v5, %v2716_v46  ;;  %v2818_v41 = vsel %vm9632_vm0, %v2445_v7, %v2817_v32  ;;  %v2933_v9 = vsel %vm9642_vm5, %v2670_v5, %v2932_v14  ;;  %v9663_v62 = vpop.f32.mrb[44].mxu0  ;;  %v6884_v63 = vpop.f32.mrb[4].mxu1  ;;  %v3184_v48 = vld [vmem:[#allocation3 + $0x10] sm:$0xff]  ;;  %2663 = vst [vmem:[#allocation3 + $0x400] sm:$0x80] %v2662_v10 }
 0x286   : > { %2560 = vst [vmem:[#allocation3 + $0x90] sm:$0xff] %v9653_v11  ;;  %2718 = vst [vmem:[#allocation3 + $0xa0] sm:$0xff] %v9657_v1  ;;  %v3028_v21 = vsel %vm9632_vm0, %v2445_v7, %v3027_v0  ;;  %v3138_v16 = vsel %vm9642_vm5, %v2670_v5, %v3137_v18  ;;  %v2556_v49 = vsel %vm9632_vm0, %v2438_v24, %v2555_v31  ;;  %v9680_v15 = vpop.f32.mrb[45].mxu0  ;;  %v6885_v23 = vpop.f32.mrb[5].mxu1  ;;  %v2427_v32 = vsel %vm9266_vm10, 0, %v2426_v29  ;;  %v3189_v60 = vld [vmem:[#allocation3 + $0x38] sm:$0xff] }
 0x287   : > { %2819 = vst [vmem:[#allocation3 + $0x60] sm:$0xff] %v2818_v41  ;;  %2934 = vst [vmem:[#allocation3 + $0x70] sm:$0xff] %v2933_v9  ;;  %v9678_v42 = vsel %vm9642_vm5, %v2668_v39, %v2713_v50  ;;  %v2815_v33 = vsel %vm9632_vm0, %v2438_v24, %v2814_v38  ;;  %v2930_v36 = vsel %vm9642_vm5, %v2668_v39, %v2929_v3  ;;  %v9687_v46 = vpop.f32.mrb[46].mxu0  ;;  %3950 = vmatmul.mubr.bf16.gmra.mrb[72].mxu0 %v2556_v49  ;;  %v6887_v0 = vpop.f32.mrb[6].mxu1  ;;  %v3015_v24 = vld [vmem:[#allocation3 + $0x390] sm:$0x1] }
 0x288   : > { %3029 = vst [vmem:[#allocation3 + $0x30] sm:$0xff] %v3028_v21  ;;  %3139 = vst [vmem:[#allocation3 + $0x40] sm:$0xff] %v3138_v16  ;;  %v6886_v14 = vadd.f32 %v6885_v23, %v6884_v63  ;;  %v9693_v18 = vpop.f32.mrb[47].mxu0  ;;  %4102 = vmatprep.mubr.bf16.mxu1 %v2815_v33  ;;  %3957 = vmatprep.mubr.bf16.mxu0 %v9606_v4  ;;  %v2918_v7 = vsel %vm9301_vm12, 0, %v2917_v6  ;;  %v6888_v5 = vpop.f32.mrb[7].mxu1  ;;  %v3016_v4 = vsel %vm9266_vm10, 0, %v3015_v24 }
 0x289   : > { %2557 = vst [vmem:[#allocation3 + $0x48] sm:$0xff] %v2556_v49  ;;  %2715 = vst [vmem:[#allocation3 + $0x58] sm:$0xff] %v9678_v42  ;;  %4103 = vmatmul.mubr.bf16.vlgmr.msra.gmra.mrb[60].mxu1 %v3184_v48  ;;  %v3125_v31 = vld [vmem:[#allocation3 + $0x3a0] sm:$0x80]  ;;  %v6889_v50 = vadd.f32 %v6888_v5, %v6887_v0  ;;  %v2429_v29 = vld [vmem:[#allocation3 + $0x438] sm:$0x1] }
 0x28a   : > { %2816 = vst [vmem:[#allocation3 + $0x18] sm:$0xff] %v2815_v33  ;;  %2931 = vst [vmem:[#allocation3 + $0x28] sm:$0xff] %v2930_v36  ;;  %v2062_v39 = vadd.f32 %v6886_v14, %v9566_v12  ;;  %4110 = vmatprep.mubr.bf16.mxu1 %v2818_v41  ;;  %v3126_v38 = vsel %vm9301_vm12, 0, %v3125_v31  ;;  %v2664_v9 = vld [vmem:[#allocation3 + $0x448] sm:$0x80]  ;;  %v2430_v41 = vsel %vm9266_vm10, 0, %v2429_v29 }
 0x28b   : > { %2428 = vst [vmem:[#allocation3 + $0x3f0] sm:$0x1] %v2427_v32  ;;  %2919 = vst [vmem:[#allocation3 + $0x3d0] sm:$0x80] %v2918_v7  ;;  %v2065_v20 = vadd.f32 %v6889_v50, %v9566_v12  ;;  %v2665_v21 = vsel %vm9301_vm12, 0, %v2664_v9  ;;  %v2801_v16 = vsel %vm9266_vm10, 0, %v2800_v27 }
 0x28c   : > { %3017 = vst [vmem:[#allocation3 + $0x390] sm:$0x1] %v3016_v4  ;;  %3127 = vst [vmem:[#allocation3 + $0x3a0] sm:$0x80] %v3126_v38  ;;  %v9706_v3 = vadd.f32 %v9618_v35, %v2062_v39  ;;  %v2920_v49 = vld [vmem:[#allocation3 + $0x418] sm:$0x80] }
 0x28d   : > { %v9709_v40 = vpop.f32.mrb[48].mxu0  ;;  %v9718_v35 = vadd.f32 %v9636_v17, %v2065_v20  ;;  %v6890_v63 = vpop.f32.mrb[8].mxu1  ;;  %2431 = vst [vmem:[#allocation3 + $0x438] sm:$0x1] %v2430_v41  ;;  %2666 = vst [vmem:[#allocation3 + $0x448] sm:$0x80] %v2665_v21 }
 0x28e   : > { %11984 = vst [vmem:[#allocation11_spill] sm:$0xff] %v9706_v3  ;;  %v9720_v48 = vpop.f32.mrb[49].mxu0  ;;  %2802 = vst [vmem:[#allocation3 + $0x408] sm:$0x1] %v2801_v16  ;;  %v2921_v43 = vsel %vm9301_vm12, 0, %v2920_v49  ;;  %v6891_v36 = vpop.f32.mrb[9].mxu1 }
 0x28f   : > { %11985 = vst [vmem:[#allocation18_spill] sm:$0xff] %v9718_v35  ;;  %v3018_v33 = vld [vmem:[#allocation3 + $0x3d8] sm:$0x1]  ;;  %v9724_v23 = vpop.f32.mrb[50].mxu0  ;;  %3958 = vmatmul.mubr.bf16.gmra.mrb[76].mxu0 %v9653_v11  ;;  %2922 = vst [vmem:[#allocation3 + $0x418] sm:$0x80] %v2921_v43  ;;  %v6892_v6 = vadd.f32 %v6891_v36, %v6890_v63 }
 0x290   : > { %v3019_v17 = vsel %vm9266_vm10, 0, %v3018_v33  ;;  %v11819_v32 = vmax.f32 %v9706_v3, 0.0  ;;  %v11818_v10 = vmax.f32 %v9718_v35, 0.0  ;;  %v6893_v14 = vpop.f32.mrb[10].mxu1  ;;  %v9731_v0 = vpop.f32.mrb[51].mxu0  ;;  %v7866_v38 = vld [vmem:[%s11800_s5 + $0x170] sm:$0xff]  }
 0x291   : > { %3020 = vst [vmem:[#allocation3 + $0x3d8] sm:$0x1] %v3019_v17  ;;  %v6894_v57 = vpop.f32.mrb[11].mxu1  ;;  %4111 = vmatmul.mubr.bf16.gmra.mrb[64].mxu1 %v9678_v42  ;;  %v3128_v7 = vld [vmem:[#allocation3 + $0x3e8] sm:$0x80]  ;;  %v2070_v5 = vadd.f32 %v6892_v6, %v9566_v12  ;;  %v7867_v20 = vld [vmem:[%s11800_s5 + $0x130] sm:$0xff]   ;;  %7222 = vmatprep.subr.bf16.mxu0 %v7866_v38 }
 0x292   : > { %v2367_v11 = vpack.c.bf16 %v11818_v10, %v11819_v32  ;;  %v6895_v24 = vadd.f32 %v6894_v57, %v6893_v14  ;;  %v3129_v31 = vsel %vm9301_vm12, 0, %v3128_v7  ;;  %v7868_v29 = vld [vmem:[%s11800_s5 + $0x178] sm:$0xff]   ;;  %v2719_v21 = vld [vmem:[#allocation3 + $0xe8] sm:$0xff]  ;;  %7223 = vmatpush3.bf16.msra.mxu0 %v7867_v20  ;;  %v7870_v36 = vld [vmem:[%s11800_s5 + $0x1c0] sm:$0xff]  }
 0x293   : > { %3130 = vst [vmem:[#allocation3 + $0x3e8] sm:$0x80] %v3129_v31  ;;  %v9742_v4 = vadd.f32 %v9612_v58, %v2070_v5  ;;  %v2561_v58 = vld [vmem:[#allocation3 + $0xd8] sm:$0xff]  ;;  %v2820_v16 = vld [vmem:[#allocation3 + $0xa8] sm:$0xff]  ;;  %v7871_v17 = vld [vmem:[%s11800_s5 + $0x180] sm:$0xff]   ;;  %7224 = vmatprep.subr.bf16.mxu0 %v7868_v29  ;;  %7322 = vmatprep.subr.bf16.mxu1 %v7870_v36 }
 0x294   : > { %v2447_v39 = vshrl.u32 %v2367_v11, 16  ;;  %v2450_v50 = vshll.u32 %v2367_v11, 16  ;;  %2864 = vst [vmem:[#allocation3 + $0xb0] sm:$0xff] %v2367_v11  ;;  %3074 = vst [vmem:[#allocation3 + $0x80] sm:$0xff] %v2367_v11  ;;  %v2073_v42 = vadd.f32 %v6895_v24, %v9566_v12  ;;  %3965 = vmatprep.mubr.bf16.mxu0 %v2367_v11  ;;  %v2935_v43 = vld [vmem:[#allocation3 + $0xb8] sm:$0xff]  ;;  %7323 = vmatpush3.bf16.msra.mxu1 %v7871_v17  ;;  %v3033_v10 = vld [vmem:[#allocation3 + $0xc0] sm:$0xff] }
 0x295   : > { %11986 = vst [vmem:[#allocation19_spill] sm:$0xff] %v9742_v4  ;;  %v9754_v9 = vpop.f32.mrb[52].mxu0  ;;  %v3030_v57 = vld [vmem:[#allocation3 + $0x78] sm:$0xff]  ;;  %v11817_v24 = vmax.f32 %v9742_v4, 0.0  ;;  %v3143_v32 = vld [vmem:[#allocation3 + $0xd0] sm:$0xff] }
 0x296   : > { %v2449_v27 = vrot.slane %v2447_v39, 7  ;;  %v2671_v41 = vrot.slane %v2450_v50, 1  ;;  %v9757_v49 = vadd.f32 %v9628_v54, %v2073_v42  ;;  %v9759_v63 = vpop.f32.mrb[53].mxu0  ;;  %v3140_v54 = vld [vmem:[#allocation3 + $0x88] sm:$0xff]  ;;  %v7869_v5 = vld [vmem:[%s11800_s5 + $0x138] sm:$0xff]  }
 0x297   : > { %v9761_v33 = vpop.f32.mrb[54].mxu0  ;;  %7225 = vmatpush3.bf16.msra.mxu0 %v7869_v5 }
 0x298   : > { %11987 = vst [vmem:[#allocation20_spill] sm:$0xff] %v9757_v49  ;;  %v2452_v6 = vor.u32 %v2450_v50, %v2449_v27  ;;  %v2672_v14 = vor.u32 %v2671_v41, %v2447_v39  ;;  %v11816_v7 = vmax.f32 %v9757_v49, 0.0  ;;  %v9770_v11 = vpop.f32.mrb[55].mxu0 }
 0x29a   : > { %v2562_v31 = vsel %vm9632_vm0, %v2452_v6, %v2561_v58  ;;  %v9780_v39 = vsel %vm9642_vm5, %v2672_v14, %v2719_v21  ;;  %v2821_v50 = vsel %vm9632_vm0, %v2452_v6, %v2820_v16  ;;  %v2936_v42 = vsel %vm9642_vm5, %v2672_v14, %v2935_v43  ;;  %v7873_v16 = vld [vmem:[%s11800_s5 + $0x1c8] sm:$0xff]  }
 0x29b   : > { %2563 = vst [vmem:[#allocation3 + $0xd8] sm:$0xff] %v2562_v31  ;;  %2721 = vst [vmem:[#allocation3 + $0xe8] sm:$0xff] %v9780_v39  ;;  %v3031_v38 = vsel %vm9632_vm0, %v2452_v6, %v3030_v57  ;;  %v3141_v20 = vsel %vm9642_vm5, %v2672_v14, %v3140_v54  ;;  %v2368_v29 = vpack.c.bf16 %v11816_v7, %v11817_v24  ;;  %3966 = vmatmul.mubr.bf16.gmra.mrb[80].mxu0 %v2562_v31  ;;  %v2564_v6 = vld [vmem:[#allocation3 + $0x120] sm:$0xff]  ;;  %v2722_v57 = vld [vmem:[#allocation3 + $0x130] sm:$0xff] }
 0x29c   : > { %2822 = vst [vmem:[#allocation3 + $0xa8] sm:$0xff] %v2821_v50  ;;  %2937 = vst [vmem:[#allocation3 + $0xb8] sm:$0xff] %v2936_v42  ;;  %4118 = vmatprep.mubr.bf16.mxu1 %v2821_v50  ;;  %7324 = vmatprep.subr.bf16.mxu1 %v7873_v16  ;;  %v2823_v50 = vld [vmem:[#allocation3 + $0xf0] sm:$0xff]  ;;  %v2938_v42 = vld [vmem:[#allocation3 + $0x100] sm:$0xff] }
 0x29d   : > { %3032 = vst [vmem:[#allocation3 + $0x78] sm:$0xff] %v3031_v38  ;;  %3142 = vst [vmem:[#allocation3 + $0x88] sm:$0xff] %v3141_v20  ;;  %4119 = vmatmul.mubr.bf16.gmra.mrb[68].mxu1 %v9657_v1  ;;  %v2454_v27 = vshrl.u32 %v2368_v29, 16  ;;  %v2457_v58 = vshll.u32 %v2368_v29, 16  ;;  %v6896_v41 = vpop.f32.mrb[12].mxu1  ;;  %v9796_v21 = vpop.f32.mrb[56].mxu0  ;;  %3973 = vmatprep.mubr.bf16.mxu0 %v2368_v29 }
 0x29e   : > { %2865 = vst [vmem:[#allocation3 + $0xf8] sm:$0xff] %v2368_v29  ;;  %3075 = vst [vmem:[#allocation3 + $0xc8] sm:$0xff] %v2368_v29  ;;  %v6897_v43 = vpop.f32.mrb[13].mxu1  ;;  %v9801_v36 = vpop.f32.mrb[57].mxu0  ;;  %v7874_v1 = vld [vmem:[%s11800_s5 + $0x188] sm:$0xff]   ;;  %v7872_v29 = vld [vmem:[%s11800_s5 + $0x200] sm:$0xff]  }
 0x29f   : > { %v2456_v17 = vrot.slane %v2454_v27, 7  ;;  %v2673_v14 = vrot.slane %v2457_v58, 1  ;;  %v6898_v54 = vadd.f32 %v6897_v43, %v6896_v41  ;;  %v6899_v5 = vpop.f32.mrb[14].mxu1  ;;  %v9806_v31 = vpop.f32.mrb[58].mxu0  ;;  %7325 = vmatpush3.bf16.msra.mxu1 %v7874_v1  ;;  %v7875_v16 = vld [vmem:[%s11800_s5 + $0x1d0] sm:$0xff]   ;;  %7658 = vmatprep.subr.bf16.mxu0 %v7872_v29 }
 0x2a0   : > { %v6900_v38 = vpop.f32.mrb[15].mxu1  ;;  %v9808_v20 = vpop.f32.mrb[59].mxu0  ;;  %7326 = vmatprep.subr.bf16.mxu1 %v7875_v16  ;;  %v2923_v29 = vld [vmem:[#allocation3 + $0x460] sm:$0x80] }
 0x2a1   : > { %v2459_v7 = vor.u32 %v2457_v58, %v2456_v17  ;;  %v2674_v24 = vor.u32 %v2673_v14, %v2454_v27  ;;  %v2078_v41 = vadd.f32 %v6898_v54, %v9566_v12  ;;  %v6901_v43 = vadd.f32 %v6900_v38, %v6899_v5  ;;  %v2803_v54 = vld [vmem:[#allocation3 + $0x450] sm:$0x1] }
 0x2a3   : > { %v2565_v34 = vsel %vm9632_vm0, %v2459_v7, %v2564_v6  ;;  %v9824_v27 = vsel %vm9642_vm5, %v2674_v24, %v2722_v57  ;;  %v2824_v58 = vsel %vm9632_vm0, %v2459_v7, %v2823_v50  ;;  %v2939_v1 = vsel %vm9642_vm5, %v2674_v24, %v2938_v42  ;;  %7327 = vmatpush3.bf16.msra.mxu1 %v7876_v19 }
 0x2a4   : > { %2566 = vst [vmem:[#allocation3 + $0x120] sm:$0xff] %v2565_v34  ;;  %2724 = vst [vmem:[#allocation3 + $0x130] sm:$0xff] %v9824_v27  ;;  %v3034_v17 = vsel %vm9632_vm0, %v2459_v7, %v3033_v10  ;;  %v3144_v6 = vsel %vm9642_vm5, %v2674_v24, %v3143_v32  ;;  %v9836_v14 = vadd.f32 %v9680_v15, %v2078_v41  ;;  %3974 = vmatmul.mubr.bf16.gmra.mrb[84].mxu0 %v2565_v34  ;;  %v7878_v32 = vld [vmem:[%s11800_s5 + $0x1d8] sm:$0xff]   ;;  %v3021_v41 = vld [vmem:[#allocation3 + $0x420] sm:$0x1] }
 0x2a5   : > { %2825 = vst [vmem:[#allocation3 + $0xf0] sm:$0xff] %v2824_v58  ;;  %2940 = vst [vmem:[#allocation3 + $0x100] sm:$0xff] %v2939_v1  ;;  %v2081_v57 = vadd.f32 %v6901_v43, %v9566_v12  ;;  %v6902_v5 = vpop.f32.mrb[16].mxu1  ;;  %v9839_v50 = vpop.f32.mrb[60].mxu0  ;;  %4126 = vmatprep.mubr.bf16.mxu1 %v2824_v58  ;;  %v2804_v42 = vsel %vm9266_vm10, 0, %v2803_v54  ;;  %v7879_v7 = vld [vmem:[%s11800_s5 + $0x198] sm:$0xff]   ;;  %7328 = vmatprep.subr.bf16.mxu1 %v7878_v32 }
 0x2a6   : > { %11988 = vst [vmem:[#allocation21_spill] sm:$0xff] %v9836_v14  ;;  %3035 = vst [vmem:[#allocation3 + $0xc0] sm:$0xff] %v3034_v17  ;;  %v6903_v10 = vpop.f32.mrb[17].mxu1  ;;  %v9849_v34 = vpop.f32.mrb[61].mxu0  ;;  %4127 = vmatmul.mubr.bf16.gmra.mrb[72].mxu1 %v9780_v39  ;;  %v2924_v39 = vsel %vm9301_vm12, 0, %v2923_v29  ;;  %v3022_v1 = vsel %vm9266_vm10, 0, %v3021_v41 }
 0x2a7   : > { %3145 = vst [vmem:[#allocation3 + $0xd0] sm:$0xff] %v3144_v6  ;;  %v9847_v15 = vadd.f32 %v9693_v18, %v2081_v57  ;;  %2805 = vst [vmem:[#allocation3 + $0x450] sm:$0x1] %v2804_v42  ;;  %v6904_v24 = vadd.f32 %v6903_v10, %v6902_v5  ;;  %v6905_v38 = vpop.f32.mrb[18].mxu1  ;;  %v9855_v19 = vpop.f32.mrb[62].mxu0  ;;  %v11823_v18 = vmax.f32 %v9836_v14, 0.0  ;;  %7329 = vmatpush3.bf16.msra.mxu1 %v7879_v7 }
 0x2a8   : > { %v6906_v16 = vpop.f32.mrb[19].mxu1  ;;  %v9859_v58 = vpop.f32.mrb[63].mxu0  ;;  %2925 = vst [vmem:[#allocation3 + $0x460] sm:$0x80] %v2924_v39  ;;  %3023 = vst [vmem:[#allocation3 + $0x420] sm:$0x1] %v3022_v1 }
 0x2a9   : > { %11989 = vst [vmem:[#allocation22_spill] sm:$0xff] %v9847_v15  ;;  %v11822_v43 = vmax.f32 %v9847_v15, 0.0  ;;  %v2086_v17 = vadd.f32 %v6904_v24, %v9566_v12  ;;  %v6907_v6 = vadd.f32 %v6906_v16, %v6905_v38  ;;  %v3131_v57 = vld [vmem:[#allocation3 + $0x430] sm:$0x80]  ;;  %v7880_v54 = vld [vmem:[%s11800_s5 + $0x1e0] sm:$0xff]   ;;  %v2567_v39 = vld [vmem:[#allocation3 + $0x168] sm:$0xff] }
 0x2aa   : > { %v3132_v42 = vsel %vm9301_vm12, 0, %v3131_v57  ;;  %v7881_v32 = vld [vmem:[%s11800_s5 + $0x1a0] sm:$0xff]   ;;  %7330 = vmatprep.subr.bf16.mxu1 %v7880_v54  ;;  %v2725_v57 = vld [vmem:[#allocation3 + $0x178] sm:$0xff]  ;;  %v7884_v14 = vld [vmem:[%s11800_s5 + $0x1f0] sm:$0xff]  }
 0x2ab   : > { %v2369_v5 = vpack.c.bf16 %v11822_v43, %v11823_v18  ;;  %v9879_v10 = vadd.f32 %v9663_v62, %v2086_v17  ;;  %v2089_v7 = vadd.f32 %v6907_v6, %v9566_v12  ;;  %3133 = vst [vmem:[#allocation3 + $0x430] sm:$0x80] %v3132_v42  ;;  %7331 = vmatpush3.bf16.msra.mxu1 %v7881_v32  ;;  %v7882_v62 = vld [vmem:[%s11800_s5 + $0x1e8] sm:$0xff]   ;;  %v2826_v54 = vld [vmem:[#allocation3 + $0x138] sm:$0xff] }
 0x2ac   : > { %v7883_v6 = vld [vmem:[%s11800_s5 + $0x1a8] sm:$0xff]   ;;  %7332 = vmatprep.subr.bf16.mxu1 %v7882_v62 }
 0x2ad   : > { %11990 = vst [vmem:[#allocation23_spill] sm:$0xff] %v9879_v10  ;;  %v2461_v24 = vshrl.u32 %v2369_v5, 16  ;;  %v2464_v38 = vshll.u32 %v2369_v5, 16  ;;  %2866 = vst [vmem:[#allocation3 + $0x140] sm:$0xff] %v2369_v5  ;;  %3981 = vmatprep.mubr.bf16.mxu0 %v2369_v5  ;;  %v9883_v29 = vadd.f32 %v9687_v46, %v2089_v7  ;;  %v9885_v41 = vpop.f32.mrb[64].mxu0  ;;  %v2941_v46 = vld [vmem:[#allocation3 + $0x148] sm:$0xff] }
 0x2ae   : > { %3076 = vst [vmem:[#allocation3 + $0x110] sm:$0xff] %v2369_v5  ;;  %v9890_v17 = vpop.f32.mrb[65].mxu0  ;;  %v11830_v5 = vmax.f32 %v9879_v10, 0.0  ;;  %v3036_v18 = vld [vmem:[#allocation3 + $0x108] sm:$0xff] }
 0x2af   : > { %11991 = vst [vmem:[#allocation24_spill] sm:$0xff] %v9883_v29  ;;  %v2463_v16 = vrot.slane %v2461_v24, 7  ;;  %v2675_v1 = vrot.slane %v2464_v38, 1  ;;  %v11829_v42 = vmax.f32 %v9883_v29, 0.0  ;;  %v9897_v32 = vpop.f32.mrb[66].mxu0  ;;  %7333 = vmatpush3.bf16.msra.mxu1 %v7883_v6 }
 0x2b0   : > { %v9899_v56 = vpop.f32.mrb[67].mxu0  ;;  %7334 = vmatprep.subr.bf16.mxu1 %v7884_v14  ;;  %v7888_v14 = vld [vmem:[%s11800_s5 + $0x1b8] sm:$0xff]  }
 0x2b1   : > { %v2466_v7 = vor.u32 %v2464_v38, %v2463_v16  ;;  %v2676_v43 = vor.u32 %v2675_v1, %v2461_v24  ;;  %v2370_v15 = vpack.c.bf16 %v11829_v42, %v11830_v5  ;;  %v7885_v16 = vld [vmem:[%s11800_s5 + $0x1b0] sm:$0xff]  }
 0x2b3   : > { %v2568_v49 = vsel %vm9632_vm0, %v2466_v7, %v2567_v39  ;;  %v2726_v24 = vsel %vm9642_vm5, %v2676_v43, %v2725_v57  ;;  %v2827_v38 = vsel %vm9632_vm0, %v2466_v7, %v2826_v54  ;;  %v2942_v62 = vsel %vm9642_vm5, %v2676_v43, %v2941_v46  ;;  %2867 = vst [vmem:[#allocation3 + $0x188] sm:$0xff] %v2370_v15  ;;  %v2570_v46 = vld [vmem:[#allocation3 + $0x1b0] sm:$0xff] }
 0x2b4   : > { %2569 = vst [vmem:[#allocation3 + $0x168] sm:$0xff] %v2568_v49  ;;  %2727 = vst [vmem:[#allocation3 + $0x178] sm:$0xff] %v2726_v24  ;;  %v3037_v39 = vsel %vm9632_vm0, %v2466_v7, %v3036_v18  ;;  %v3147_v1 = vsel %vm9642_vm5, %v2676_v43, %v3146_v61  ;;  %v2468_v6 = vshrl.u32 %v2370_v15, 16  ;;  %v2471_v57 = vshll.u32 %v2370_v15, 16  ;;  %3982 = vmatmul.mubr.bf16.gmra.mrb[88].mxu0 %v2568_v49  ;;  %v7887_v61 = vld [vmem:[%s11800_s5 + $0x1f8] sm:$0xff]   ;;  %v2728_v18 = vld [vmem:[#allocation3 + $0x1c0] sm:$0xff] }
 0x2b5   : > { %2828 = vst [vmem:[#allocation3 + $0x138] sm:$0xff] %v2827_v38  ;;  %2943 = vst [vmem:[#allocation3 + $0x148] sm:$0xff] %v2942_v62  ;;  %4134 = vmatprep.mubr.bf16.mxu1 %v2827_v38  ;;  %3989 = vmatprep.mubr.bf16.mxu0 %v2370_v15  ;;  %v6908_v42 = vpop.f32.mrb[20].mxu1  ;;  %v2829_v43 = vld [vmem:[#allocation3 + $0x180] sm:$0xff]  ;;  %v2944_v7 = vld [vmem:[#allocation3 + $0x190] sm:$0xff] }
 0x2b6   : > { %3077 = vst [vmem:[#allocation3 + $0x158] sm:$0xff] %v2370_v15  ;;  %3038 = vst [vmem:[#allocation3 + $0x108] sm:$0xff] %v3037_v39  ;;  %4135 = vmatmul.mubr.bf16.gmra.mrb[76].mxu1 %v9824_v27  ;;  %v2470_v54 = vrot.slane %v2468_v6, 7  ;;  %v2677_v62 = vrot.slane %v2471_v57, 1  ;;  %v6909_v5 = vpop.f32.mrb[21].mxu1  ;;  %v3039_v39 = vld [vmem:[#allocation3 + $0x150] sm:$0xff] }
 0x2b7   : > { %3148 = vst [vmem:[#allocation3 + $0x118] sm:$0xff] %v3147_v1  ;;  %7335 = vmatpush3.bf16.msra.mxu1 %v7885_v16  ;;  %v3149_v15 = vld [vmem:[#allocation3 + $0x160] sm:$0xff]  ;;  %v6910_v1 = vadd.f32 %v6909_v5, %v6908_v42  ;;  %v6911_v27 = vpop.f32.mrb[22].mxu1 }
 0x2b8   : > { %v2473_v49 = vor.u32 %v2471_v57, %v2470_v54  ;;  %v2678_v38 = vor.u32 %v2677_v62, %v2468_v6  ;;  %7336 = vmatprep.subr.bf16.mxu1 %v7887_v61  ;;  %v6912_v29 = vpop.f32.mrb[23].mxu1 }
 0x2b9   : > { %v2094_v57 = vadd.f32 %v6910_v1, %v9566_v12  ;;  %v6913_v54 = vadd.f32 %v6912_v29, %v6911_v27 }
 0x2ba   : > { %v2571_v10 = vsel %vm9632_vm0, %v2473_v49, %v2570_v46  ;;  %v9934_v4 = vsel %vm9642_vm5, %v2678_v38, %v2728_v18  ;;  %v2830_v16 = vsel %vm9632_vm0, %v2473_v49, %v2829_v43  ;;  %v2945_v5 = vsel %vm9642_vm5, %v2678_v38, %v2944_v7 }
 0x2bb   : > { %2572 = vst [vmem:[#allocation3 + $0x1b0] sm:$0xff] %v2571_v10  ;;  %2730 = vst [vmem:[#allocation3 + $0x1c0] sm:$0xff] %v9934_v4  ;;  %v3040_v42 = vsel %vm9632_vm0, %v2473_v49, %v3039_v39  ;;  %v3150_v6 = vsel %vm9642_vm5, %v2678_v38, %v3149_v15  ;;  %4142 = vmatprep.mubr.bf16.mxu1 %v2830_v16  ;;  %7337 = vmatpush3.bf16.msra.mxu1 %v7888_v14 }
 0x2bc   : > { %2831 = vst [vmem:[#allocation3 + $0x180] sm:$0xff] %v2830_v16  ;;  %2946 = vst [vmem:[#allocation3 + $0x190] sm:$0xff] %v2945_v5  ;;  %3990 = vmatmul.mubr.bf16.gmra.mrb[92].mxu0 %v2571_v10  ;;  %v9947_v46 = vadd.f32 %v9720_v48, %v2094_v57  ;;  %v2097_v62 = vadd.f32 %v6913_v54, %v9566_v12  ;;  %v2573_v5 = vld [vmem:[#allocation3 + $0x1f8] sm:$0xff]  ;;  %v2832_v57 = vld [vmem:[#allocation3 + $0x1c8] sm:$0xff] }
 0x2bd   : > { %3041 = vst [vmem:[#allocation3 + $0x150] sm:$0xff] %v3040_v42  ;;  %3151 = vst [vmem:[#allocation3 + $0x160] sm:$0xff] %v3150_v6  ;;  %v6914_v61 = vpop.f32.mrb[24].mxu1  ;;  %v2731_v6 = vld [vmem:[#allocation3 + $0x208] sm:$0xff]  ;;  %v2947_v54 = vld [vmem:[#allocation3 + $0x1d8] sm:$0xff] }
 0x2be   : > { %11992 = vst [vmem:[#allocation25_spill] sm:$0xff] %v9947_v46  ;;  %4143 = vmatmul.mubr.bf16.gmra.mrb[80].mxu1 %v2726_v24  ;;  %v9951_v18 = vadd.f32 %v9731_v0, %v2097_v62  ;;  %v6915_v43 = vpop.f32.mrb[25].mxu1  ;;  %v11839_v29 = vmax.f32 %v9947_v46, 0.0 }
 0x2bf   : > { %v6916_v7 = vadd.f32 %v6915_v43, %v6914_v61  ;;  %v6917_v49 = vpop.f32.mrb[26].mxu1 }
 0x2c0   : > { %11993 = vst [vmem:[#allocation26_spill] sm:$0xff] %v9951_v18  ;;  %v11836_v38 = vmax.f32 %v9951_v18, 0.0  ;;  %v6918_v39 = vpop.f32.mrb[27].mxu1 }
 0x2c1   : > { %v2102_v10 = vadd.f32 %v6916_v7, %v9566_v12  ;;  %v6919_v15 = vadd.f32 %v6918_v39, %v6917_v49  ;;  %v3042_v7 = vld [vmem:[#allocation3 + $0x198] sm:$0xff]  ;;  %v3152_v49 = vld [vmem:[#allocation3 + $0x1a8] sm:$0xff] }
 0x2c2   : > { %v2371_v48 = vpack.c.bf16 %v11836_v38, %v11839_v29  ;;  %v3158_v29 = vld [vmem:[#allocation3 + $0x238] sm:$0xff] }
 0x2c3   : > { %v9961_v24 = vadd.f32 %v9709_v40, %v2102_v10  ;;  %v2105_v0 = vadd.f32 %v6919_v15, %v9566_v12 }
 0x2c4   : > { %v2475_v1 = vshrl.u32 %v2371_v48, 16  ;;  %v2478_v27 = vshll.u32 %v2371_v48, 16  ;;  %2868 = vst [vmem:[#allocation3 + $0x1d0] sm:$0xff] %v2371_v48  ;;  %3078 = vst [vmem:[#allocation3 + $0x1a0] sm:$0xff] %v2371_v48  ;;  %3997 = vmatprep.mubr.bf16.mxu0 %v2371_v48 }
 0x2c5   : > { %11994 = vst [vmem:[#allocation27_spill] sm:$0xff] %v9961_v24  ;;  %v9965_v14 = vadd.f32 %v9724_v23, %v2105_v0  ;;  %v11835_v62 = vmax.f32 %v9961_v24, 0.0 }
 0x2c6   : > { %v2477_v16 = vrot.slane %v2475_v1, 7  ;;  %v2679_v42 = vrot.slane %v2478_v27, 1 }
 0x2c7   : > { %11995 = vst [vmem:[#allocation28_spill] sm:$0xff] %v9965_v14  ;;  %v11834_v40 = vmax.f32 %v9965_v14, 0.0 }
 0x2c8   : > { %v2480_v61 = vor.u32 %v2478_v27, %v2477_v16  ;;  %v2680_v43 = vor.u32 %v2679_v42, %v2475_v1  ;;  %v2576_v42 = vld [vmem:[#allocation3 + $0x240] sm:$0xff] }
 0x2c9   : > { %v2372_v23 = vpack.c.bf16 %v11834_v40, %v11835_v62  ;;  %v3045_v40 = vld [vmem:[#allocation3 + $0x1e0] sm:$0xff]  ;;  %v3155_v62 = vld [vmem:[#allocation3 + $0x1f0] sm:$0xff] }
 0x2ca   : > { %v2574_v39 = vsel %vm9632_vm0, %v2480_v61, %v2573_v5  ;;  %v2732_v10 = vsel %vm9642_vm5, %v2680_v43, %v2731_v6  ;;  %v2833_v15 = vsel %vm9632_vm0, %v2480_v61, %v2832_v57  ;;  %v2948_v48 = vsel %vm9642_vm5, %v2680_v43, %v2947_v54  ;;  %v2734_v54 = vld [vmem:[#allocation3 + $0x250] sm:$0xff] }
 0x2cb   : > { %2575 = vst [vmem:[#allocation3 + $0x1f8] sm:$0xff] %v2574_v39  ;;  %2733 = vst [vmem:[#allocation3 + $0x208] sm:$0xff] %v2732_v10  ;;  %v3043_v0 = vsel %vm9632_vm0, %v2480_v61, %v3042_v7  ;;  %v3153_v1 = vsel %vm9642_vm5, %v2680_v43, %v3152_v49  ;;  %v2482_v27 = vshrl.u32 %v2372_v23, 16  ;;  %v2485_v16 = vshll.u32 %v2372_v23, 16  ;;  %3998 = vmatmul.mubr.bf16.gmra.mrb[96].mxu0 %v2574_v39  ;;  %v2835_v61 = vld [vmem:[#allocation3 + $0x210] sm:$0xff]  ;;  %v2950_v7 = vld [vmem:[#allocation3 + $0x220] sm:$0xff] }
 0x2cc   : > { %2834 = vst [vmem:[#allocation3 + $0x1c8] sm:$0xff] %v2833_v15  ;;  %2949 = vst [vmem:[#allocation3 + $0x1d8] sm:$0xff] %v2948_v48  ;;  %4150 = vmatprep.mubr.bf16.mxu1 %v2833_v15  ;;  %4005 = vmatprep.mubr.bf16.mxu0 %v2372_v23  ;;  %v6920_v57 = vpop.f32.mrb[28].mxu1 }
 0x2cd   : > { %2869 = vst [vmem:[#allocation3 + $0x218] sm:$0xff] %v2372_v23  ;;  %3079 = vst [vmem:[#allocation3 + $0x1e8] sm:$0xff] %v2372_v23  ;;  %4151 = vmatmul.mubr.bf16.gmra.mrb[84].mxu1 %v9934_v4  ;;  %v2484_v5 = vrot.slane %v2482_v27, 7  ;;  %v2681_v6 = vrot.slane %v2485_v16, 1  ;;  %v6921_v48 = vpop.f32.mrb[29].mxu1 }
 0x2ce   : > { %3044 = vst [vmem:[#allocation3 + $0x198] sm:$0xff] %v3043_v0  ;;  %3154 = vst [vmem:[#allocation3 + $0x1a8] sm:$0xff] %v3153_v1  ;;  %v6922_v38 = vadd.f32 %v6921_v48, %v6920_v57  ;;  %v6923_v39 = vpop.f32.mrb[30].mxu1  ;;  %v10008_v57 = vld [vmem:[%s11799_s4] ss:$0 sm:$0xff] }
 0x2cf   : > { %v2487_v43 = vor.u32 %v2485_v16, %v2484_v5  ;;  %v2682_v49 = vor.u32 %v2681_v6, %v2482_v27  ;;  %v6924_v15 = vpop.f32.mrb[31].mxu1 }
 0x2d0   : > { %v2110_v5 = vadd.f32 %v6922_v38, %v9566_v12 }
 0x2d1   : > { %v2577_v23 = vsel %vm9632_vm0, %v2487_v43, %v2576_v42  ;;  %v9990_v4 = vsel %vm9642_vm5, %v2682_v49, %v2734_v54  ;;  %v2836_v0 = vsel %vm9632_vm0, %v2487_v43, %v2835_v61  ;;  %v2951_v1 = vsel %vm9642_vm5, %v2682_v49, %v2950_v7 }
 0x2d2   : > { %2578 = vst [vmem:[#allocation3 + $0x240] sm:$0xff] %v2577_v23  ;;  %2736 = vst [vmem:[#allocation3 + $0x250] sm:$0xff] %v9990_v4  ;;  %v3046_v27 = vsel %vm9632_vm0, %v2487_v43, %v3045_v40  ;;  %v3156_v16 = vsel %vm9642_vm5, %v2682_v49, %v3155_v62  ;;  %v6925_v42 = vadd.f32 %v6924_v15, %v6923_v39  ;;  %4158 = vmatprep.mubr.bf16.mxu1 %v2836_v0 }
 0x2d3   : > { %2837 = vst [vmem:[#allocation3 + $0x210] sm:$0xff] %v2836_v0  ;;  %2952 = vst [vmem:[#allocation3 + $0x220] sm:$0xff] %v2951_v1  ;;  %4006 = vmatmul.mubr.bf16.gmra.mrb[100].mxu0 %v2577_v23  ;;  %v10003_v6 = vadd.f32 %v9759_v63, %v2110_v5 }
 0x2d4   : > { %3047 = vst [vmem:[#allocation3 + $0x1e0] sm:$0xff] %v3046_v27  ;;  %3157 = vst [vmem:[#allocation3 + $0x1f0] sm:$0xff] %v3156_v16  ;;  %v2113_v40 = vadd.f32 %v10008_v57, %v6925_v42  ;;  %v6926_v54 = vpop.f32.mrb[32].mxu1 }
 0x2d5   : > { %11996 = vst [vmem:[#allocation29_spill] sm:$0xff] %v10003_v6  ;;  %4159 = vmatmul.mubr.bf16.gmra.mrb[88].mxu1 %v2732_v10  ;;  %v6927_v12 = vpop.f32.mrb[33].mxu1  ;;  %v7002_v7 = vpop.f32.mrb[68].mxu0  ;;  %v11838_v48 = vmax.f32 %v10003_v6, 0.0 }
 0x2d6   : > { %v10012_v62 = vadd.f32 %v9770_v11, %v2113_v40  ;;  %v6928_v38 = vadd.f32 %v6927_v12, %v6926_v54  ;;  %v6929_v61 = vpop.f32.mrb[34].mxu1  ;;  %v7003_v49 = vpop.f32.mrb[69].mxu0 }
 0x2d7   : > { %v6930_v43 = vpop.f32.mrb[35].mxu1  ;;  %v10017_v23 = vadd.f32 %v7003_v49, %v7002_v7  ;;  %v7005_v10 = vpop.f32.mrb[70].mxu0  ;;  %v2953_v49 = vld [vmem:[#allocation3 + $0x268] sm:$0xff] }
 0x2d8   : > { %11997 = vst [vmem:[#allocation30_spill] sm:$0xff] %v10012_v62  ;;  %v11837_v63 = vmax.f32 %v10012_v62, 0.0  ;;  %v2118_v39 = vadd.f32 %v10008_v57, %v6928_v38  ;;  %v6931_v15 = vadd.f32 %v6930_v43, %v6929_v61  ;;  %v7006_v0 = vpop.f32.mrb[71].mxu0  ;;  %v2579_v38 = vld [vmem:[#allocation3 + $0x288] sm:$0xff]  ;;  %v2737_v43 = vld [vmem:[#allocation3 + $0x298] sm:$0xff] }
 0x2d9   : > { %v10027_v16 = vadd.f32 %v7006_v0, %v7005_v10 }
 0x2da   : > { %v2373_v11 = vpack.c.bf16 %v11837_v63, %v11838_v48  ;;  %v10024_v1 = vadd.f32 %v9754_v9, %v2118_v39  ;;  %v2121_v27 = vadd.f32 %v10008_v57, %v6931_v15  ;;  %v2838_v9 = vld [vmem:[#allocation3 + $0x258] sm:$0xff] }
 0x2dc   : > { %11998 = vst [vmem:[#allocation31_spill] sm:$0xff] %v10024_v1  ;;  %v2489_v5 = vshrl.u32 %v2373_v11, 16  ;;  %v2492_v42 = vshll.u32 %v2373_v11, 16  ;;  %2870 = vst [vmem:[#allocation3 + $0x260] sm:$0xff] %v2373_v11  ;;  %4013 = vmatprep.mubr.bf16.mxu0 %v2373_v11  ;;  %v10030_v40 = vadd.f32 %v9761_v33, %v2121_v27  ;;  %v6932_v54 = vpop.f32.mrb[36].mxu1  ;;  %v11844_v39 = vmax.f32 %v10024_v1, 0.0 }
 0x2dd   : > { %3080 = vst [vmem:[#allocation3 + $0x230] sm:$0xff] %v2373_v11  ;;  %v6933_v7 = vpop.f32.mrb[37].mxu1  ;;  %v3048_v11 = vld [vmem:[#allocation3 + $0x228] sm:$0xff] }
 0x2de   : > { %11999 = vst [vmem:[#allocation32_spill] sm:$0xff] %v10030_v40  ;;  %v2491_v12 = vrot.slane %v2489_v5, 7  ;;  %v2683_v61 = vrot.slane %v2492_v42, 1  ;;  %v11843_v15 = vmax.f32 %v10030_v40, 0.0  ;;  %v6934_v10 = vadd.f32 %v6933_v7, %v6932_v54  ;;  %v6935_v0 = vpop.f32.mrb[38].mxu1 }
 0x2df   : > { %v6936_v33 = vpop.f32.mrb[39].mxu1 }
 0x2e0   : > { %v2494_v63 = vor.u32 %v2492_v42, %v2491_v12  ;;  %v2684_v48 = vor.u32 %v2683_v61, %v2489_v5  ;;  %v2374_v27 = vpack.c.bf16 %v11843_v15, %v11844_v39  ;;  %v2126_v62 = vadd.f32 %v10008_v57, %v6934_v10 }
 0x2e1   : > { %v6937_v6 = vadd.f32 %v6936_v33, %v6935_v0  ;;  %v2841_v0 = vld [vmem:[#allocation3 + $0x2a0] sm:$0xff] }
 0x2e2   : > { %v2580_v14 = vsel %vm9632_vm0, %v2494_v63, %v2579_v38  ;;  %v2738_v54 = vsel %vm9642_vm5, %v2684_v48, %v2737_v43  ;;  %v2839_v5 = vsel %vm9632_vm0, %v2494_v63, %v2838_v9  ;;  %v2954_v42 = vsel %vm9642_vm5, %v2684_v48, %v2953_v49  ;;  %2871 = vst [vmem:[#allocation3 + $0x2a8] sm:$0xff] %v2374_v27  ;;  %v2582_v49 = vld [vmem:[#allocation3 + $0x2d0] sm:$0xff] }
 0x2e3   : > { %2581 = vst [vmem:[#allocation3 + $0x288] sm:$0xff] %v2580_v14  ;;  %2739 = vst [vmem:[#allocation3 + $0x298] sm:$0xff] %v2738_v54  ;;  %v3049_v12 = vsel %vm9632_vm0, %v2494_v63, %v3048_v11  ;;  %v3159_v61 = vsel %vm9642_vm5, %v2684_v48, %v3158_v29  ;;  %v2496_v38 = vshrl.u32 %v2374_v27, 16  ;;  %v2499_v7 = vshll.u32 %v2374_v27, 16  ;;  %4014 = vmatmul.mubr.bf16.gmra.mrb[104].mxu0 %v2580_v14  ;;  %v2740_v48 = vld [vmem:[#allocation3 + $0x2e0] sm:$0xff]  ;;  %v2956_v11 = vld [vmem:[#allocation3 + $0x2b0] sm:$0xff] }
 0x2e4   : > { %2840 = vst [vmem:[#allocation3 + $0x258] sm:$0xff] %v2839_v5  ;;  %2955 = vst [vmem:[#allocation3 + $0x268] sm:$0xff] %v2954_v42  ;;  %4166 = vmatprep.mubr.bf16.mxu1 %v2839_v5  ;;  %v10052_v43 = vadd.f32 %v9801_v36, %v2126_v62  ;;  %v2129_v9 = vadd.f32 %v10008_v57, %v6937_v6  ;;  %4021 = vmatprep.mubr.bf16.mxu0 %v2374_v27  ;;  %v6938_v29 = vpop.f32.mrb[40].mxu1  ;;  %v3051_v36 = vld [vmem:[#allocation3 + $0x270] sm:$0xff]  ;;  %v3161_v62 = vld [vmem:[#allocation3 + $0x280] sm:$0xff] }
 0x2e5   : > { %3081 = vst [vmem:[#allocation3 + $0x278] sm:$0xff] %v2374_v27  ;;  %3050 = vst [vmem:[#allocation3 + $0x228] sm:$0xff] %v3049_v12  ;;  %4167 = vmatmul.mubr.bf16.gmra.mrb[92].mxu1 %v9990_v4  ;;  %v2498_v63 = vrot.slane %v2496_v38, 7  ;;  %v2685_v10 = vrot.slane %v2499_v7, 1  ;;  %v6939_v33 = vpop.f32.mrb[41].mxu1 }
 0x2e6   : > { %3160 = vst [vmem:[#allocation3 + $0x238] sm:$0xff] %v3159_v61  ;;  %12000 = vst [vmem:[#allocation33_spill] sm:$0xff] %v10052_v43  ;;  %v10057_v14 = vadd.f32 %v9808_v20, %v2129_v9  ;;  %v6940_v12 = vadd.f32 %v6939_v33, %v6938_v29  ;;  %v6941_v6 = vpop.f32.mrb[42].mxu1  ;;  %v11846_v27 = vmax.f32 %v10052_v43, 0.0 }
 0x2e7   : > { %v2501_v5 = vor.u32 %v2499_v7, %v2498_v63  ;;  %v2686_v42 = vor.u32 %v2685_v10, %v2496_v38  ;;  %v6942_v61 = vpop.f32.mrb[43].mxu1 }
 0x2e8   : > { %12001 = vst [vmem:[#allocation34_spill] sm:$0xff] %v10057_v14  ;;  %v11845_v4 = vmax.f32 %v10057_v14, 0.0  ;;  %v6943_v10 = vadd.f32 %v6942_v61, %v6941_v6  ;;  %v2959_v6 = vld [vmem:[#allocation3 + $0x2f8] sm:$0xff] }
 0x2e9   : > { %v2583_v15 = vsel %vm9632_vm0, %v2501_v5, %v2582_v49  ;;  %v10065_v39 = vsel %vm9642_vm5, %v2686_v42, %v2740_v48  ;;  %v2842_v20 = vsel %vm9632_vm0, %v2501_v5, %v2841_v0  ;;  %v2957_v38 = vsel %vm9642_vm5, %v2686_v42, %v2956_v11 }
 0x2ea   : > { %2584 = vst [vmem:[#allocation3 + $0x2d0] sm:$0xff] %v2583_v15  ;;  %2742 = vst [vmem:[#allocation3 + $0x2e0] sm:$0xff] %v10065_v39  ;;  %v3052_v7 = vsel %vm9632_vm0, %v2501_v5, %v3051_v36  ;;  %v3162_v9 = vsel %vm9642_vm5, %v2686_v42, %v3161_v62  ;;  %v2375_v63 = vpack.c.bf16 %v11845_v4, %v11846_v27  ;;  %4174 = vmatprep.mubr.bf16.mxu1 %v2842_v20  ;;  %v2585_v42 = vld [vmem:[#allocation3 + $0x318] sm:$0xff] }
 0x2eb   : > { %2843 = vst [vmem:[#allocation3 + $0x2a0] sm:$0xff] %v2842_v20  ;;  %2958 = vst [vmem:[#allocation3 + $0x2b0] sm:$0xff] %v2957_v38  ;;  %v2134_v49 = vadd.f32 %v10008_v57, %v6940_v12  ;;  %4022 = vmatmul.mubr.bf16.gmra.mrb[108].mxu0 %v2583_v15  ;;  %v2137_v11 = vadd.f32 %v10008_v57, %v6943_v10  ;;  %v2743_v12 = vld [vmem:[#allocation3 + $0x328] sm:$0xff] }
 0x2ec   : > { %3053 = vst [vmem:[#allocation3 + $0x270] sm:$0xff] %v3052_v7  ;;  %3163 = vst [vmem:[#allocation3 + $0x280] sm:$0xff] %v3162_v9  ;;  %v2503_v29 = vshrl.u32 %v2375_v63, 16  ;;  %v2506_v48 = vshll.u32 %v2375_v63, 16  ;;  %4029 = vmatprep.mubr.bf16.mxu0 %v2375_v63  ;;  %v6944_v33 = vpop.f32.mrb[44].mxu1  ;;  %v2844_v20 = vld [vmem:[#allocation3 + $0x2e8] sm:$0xff] }
 0x2ed   : > { %2872 = vst [vmem:[#allocation3 + $0x2f0] sm:$0xff] %v2375_v63  ;;  %3082 = vst [vmem:[#allocation3 + $0x2c0] sm:$0xff] %v2375_v63  ;;  %v10082_v0 = vadd.f32 %v9796_v21, %v2134_v49  ;;  %4175 = vmatmul.mubr.bf16.gmra.mrb[96].mxu1 %v2738_v54  ;;  %v6945_v62 = vpop.f32.mrb[45].mxu1  ;;  %v10086_v15 = vadd.f32 %v9806_v31, %v2137_v11  ;;  %v3054_v9 = vld [vmem:[#allocation3 + $0x2b8] sm:$0xff]  ;;  %v3164_v63 = vld [vmem:[#allocation3 + $0x2c8] sm:$0xff] }
 0x2ee   : > { %v2505_v5 = vrot.slane %v2503_v29, 7  ;;  %v2687_v36 = vrot.slane %v2506_v48, 1  ;;  %v6946_v61 = vadd.f32 %v6945_v62, %v6944_v33  ;;  %v6947_v38 = vpop.f32.mrb[46].mxu1 }
 0x2ef   : > { %12002 = vst [vmem:[#allocation35_spill] sm:$0xff] %v10082_v0  ;;  %12003 = vst [vmem:[#allocation36_spill] sm:$0xff] %v10086_v15  ;;  %v6948_v54 = vpop.f32.mrb[47].mxu1  ;;  %v11851_v49 = vmax.f32 %v10082_v0, 0.0  ;;  %v11850_v10 = vmax.f32 %v10086_v15, 0.0 }
 0x2f0   : > { %v2508_v7 = vor.u32 %v2506_v48, %v2505_v5  ;;  %v2688_v21 = vor.u32 %v2687_v36, %v2503_v29  ;;  %v2142_v4 = vadd.f32 %v10008_v57, %v6946_v61  ;;  %v6949_v27 = vadd.f32 %v6948_v54, %v6947_v38 }
 0x2f1   : > { %v2376_v5 = vpack.c.bf16 %v11850_v10, %v11851_v49 }
 0x2f2   : > { %v2586_v14 = vsel %vm9632_vm0, %v2508_v7, %v2585_v42  ;;  %v10095_v31 = vsel %vm9642_vm5, %v2688_v21, %v2743_v12  ;;  %v2845_v29 = vsel %vm9632_vm0, %v2508_v7, %v2844_v20  ;;  %v2960_v48 = vsel %vm9642_vm5, %v2688_v21, %v2959_v6 }
 0x2f3   : > { %2587 = vst [vmem:[#allocation3 + $0x318] sm:$0xff] %v2586_v14  ;;  %2745 = vst [vmem:[#allocation3 + $0x328] sm:$0xff] %v10095_v31  ;;  %v3055_v11 = vsel %vm9632_vm0, %v2508_v7, %v3054_v9  ;;  %v3165_v33 = vsel %vm9642_vm5, %v2688_v21, %v3164_v63  ;;  %v10111_v42 = vadd.f32 %v9849_v34, %v2142_v4  ;;  %4030 = vmatmul.mubr.bf16.gmra.mrb[112].mxu0 %v2586_v14  ;;  %v2588_v4 = vld [vmem:[#allocation3 + $0x360] sm:$0xff]  ;;  %v2746_v21 = vld [vmem:[#allocation3 + $0x370] sm:$0xff] }
 0x2f4   : > { %2846 = vst [vmem:[#allocation3 + $0x2e8] sm:$0xff] %v2845_v29  ;;  %2961 = vst [vmem:[#allocation3 + $0x2f8] sm:$0xff] %v2960_v48  ;;  %v2145_v36 = vadd.f32 %v10008_v57, %v6949_v27  ;;  %4182 = vmatprep.mubr.bf16.mxu1 %v2845_v29  ;;  %v2510_v62 = vshrl.u32 %v2376_v5, 16  ;;  %v2513_v12 = vshll.u32 %v2376_v5, 16  ;;  %v6950_v20 = vpop.f32.mrb[48].mxu1  ;;  %4037 = vmatprep.mubr.bf16.mxu0 %v2376_v5  ;;  %v2847_v27 = vld [vmem:[#allocation3 + $0x330] sm:$0xff] }
 0x2f5   : > { %12004 = vst [vmem:[#allocation37_spill] sm:$0xff] %v10111_v42  ;;  %3056 = vst [vmem:[#allocation3 + $0x2b8] sm:$0xff] %v3055_v11  ;;  %4183 = vmatmul.mubr.bf16.gmra.mrb[100].mxu1 %v10065_v39  ;;  %v6951_v61 = vpop.f32.mrb[49].mxu1  ;;  %v2962_v9 = vld [vmem:[#allocation3 + $0x340] sm:$0xff]  ;;  %v11849_v63 = vmax.f32 %v10111_v42, 0.0 }
 0x2f6   : > { %3166 = vst [vmem:[#allocation3 + $0x2c8] sm:$0xff] %v3165_v33  ;;  %2873 = vst [vmem:[#allocation3 + $0x338] sm:$0xff] %v2376_v5  ;;  %v10116_v6 = vadd.f32 %v9859_v58, %v2145_v36  ;;  %v2512_v34 = vrot.slane %v2510_v62, 7  ;;  %v2689_v14 = vrot.slane %v2513_v12, 1  ;;  %v6952_v38 = vadd.f32 %v6951_v61, %v6950_v20  ;;  %v6953_v7 = vpop.f32.mrb[50].mxu1  ;;  %v3057_v39 = vld [vmem:[#allocation3 + $0x300] sm:$0xff] }
 0x2f7   : > { %3083 = vst [vmem:[#allocation3 + $0x308] sm:$0xff] %v2376_v5  ;;  %v6954_v29 = vpop.f32.mrb[51].mxu1  ;;  %v3167_v33 = vld [vmem:[#allocation3 + $0x310] sm:$0xff] }
 0x2f8   : > { %12005 = vst [vmem:[#allocation38_spill] sm:$0xff] %v10116_v6  ;;  %v11848_v54 = vmax.f32 %v10116_v6, 0.0  ;;  %v2515_v48 = vor.u32 %v2513_v12, %v2512_v34  ;;  %v2690_v11 = vor.u32 %v2689_v14, %v2510_v62  ;;  %v2150_v58 = vadd.f32 %v10008_v57, %v6952_v38 }
 0x2f9   : > { %v6955_v5 = vadd.f32 %v6954_v29, %v6953_v7  ;;  %v2591_v29 = vld [vmem:[#allocation3 + $0x3a8] sm:$0xff] }
 0x2fa   : > { %v2377_v36 = vpack.c.bf16 %v11848_v54, %v11849_v63  ;;  %v2589_v20 = vsel %vm9632_vm0, %v2515_v48, %v2588_v4  ;;  %v2747_v61 = vsel %vm9642_vm5, %v2690_v11, %v2746_v21  ;;  %v2848_v12 = vsel %vm9632_vm0, %v2515_v48, %v2847_v27 }
 0x2fb   : > { %v2963_v62 = vsel %vm9642_vm5, %v2690_v11, %v2962_v9  ;;  %2590 = vst [vmem:[#allocation3 + $0x360] sm:$0xff] %v2589_v20  ;;  %2748 = vst [vmem:[#allocation3 + $0x370] sm:$0xff] %v2747_v61  ;;  %v3058_v34 = vsel %vm9632_vm0, %v2515_v48, %v3057_v39  ;;  %v3168_v14 = vsel %vm9642_vm5, %v2690_v11, %v3167_v33  ;;  %4038 = vmatmul.mubr.bf16.gmra.mrb[116].mxu0 %v2589_v20  ;;  %v2749_v39 = vld [vmem:[#allocation3 + $0x3b8] sm:$0xff] }
 0x2fc   : > { %2849 = vst [vmem:[#allocation3 + $0x330] sm:$0xff] %v2848_v12  ;;  %2964 = vst [vmem:[#allocation3 + $0x340] sm:$0xff] %v2963_v62  ;;  %v2517_v4 = vshrl.u32 %v2377_v36, 16  ;;  %v2520_v38 = vshll.u32 %v2377_v36, 16  ;;  %4190 = vmatprep.mubr.bf16.mxu1 %v2848_v12  ;;  %v10138_v7 = vadd.f32 %v9839_v50, %v2150_v58  ;;  %v2153_v21 = vadd.f32 %v10008_v57, %v6955_v5  ;;  %v6956_v27 = vpop.f32.mrb[52].mxu1  ;;  %v2850_v33 = vld [vmem:[#allocation3 + $0x378] sm:$0xff] }
 0x2fd   : > { %2874 = vst [vmem:[#allocation3 + $0x380] sm:$0xff] %v2377_v36  ;;  %3084 = vst [vmem:[#allocation3 + $0x350] sm:$0xff] %v2377_v36  ;;  %4045 = vmatprep.mubr.bf16.mxu0 %v2377_v36  ;;  %4191 = vmatmul.mubr.bf16.gmra.mrb[104].mxu1 %v10095_v31  ;;  %v6957_v11 = vpop.f32.mrb[53].mxu1  ;;  %v2965_v62 = vld [vmem:[#allocation3 + $0x388] sm:$0xff]  ;;  %v3170_v5 = vld [vmem:[#allocation3 + $0x358] sm:$0xff] }
 0x2fe   : > { %3059 = vst [vmem:[#allocation3 + $0x300] sm:$0xff] %v3058_v34  ;;  %3169 = vst [vmem:[#allocation3 + $0x310] sm:$0xff] %v3168_v14  ;;  %v2519_v9 = vrot.slane %v2517_v4, 7  ;;  %v2691_v48 = vrot.slane %v2520_v38, 1  ;;  %v10143_v20 = vadd.f32 %v9855_v19, %v2153_v21  ;;  %v6958_v12 = vadd.f32 %v6957_v11, %v6956_v27  ;;  %v6959_v34 = vpop.f32.mrb[54].mxu1  ;;  %v3060_v14 = vld [vmem:[#allocation3 + $0x348] sm:$0xff] }
 0x2ff   : > { %12006 = vst [vmem:[#allocation39_spill] sm:$0xff] %v10138_v7  ;;  %v6960_v54 = vpop.f32.mrb[55].mxu1  ;;  %v11857_v36 = vmax.f32 %v10138_v7, 0.0 }
 0x300   : > { %12007 = vst [vmem:[#allocation40_spill] sm:$0xff] %v10143_v20  ;;  %v2522_v50 = vor.u32 %v2520_v38, %v2519_v9  ;;  %v2692_v58 = vor.u32 %v2691_v48, %v2517_v4  ;;  %v11856_v31 = vmax.f32 %v10143_v20, 0.0  ;;  %v2158_v63 = vadd.f32 %v10008_v57, %v6958_v12  ;;  %v2853_v12 = vld [vmem:[#allocation3 + $0x3c0] sm:$0xff] }
 0x301   : > { %v6961_v10 = vadd.f32 %v6960_v54, %v6959_v34  ;;  %v2968_v34 = vld [vmem:[#allocation3 + $0x3d0] sm:$0xff] }
 0x302   : > { %v2592_v49 = vsel %vm9632_vm0, %v2522_v50, %v2591_v29  ;;  %v2750_v19 = vsel %vm9642_vm5, %v2692_v58, %v2749_v39  ;;  %v2851_v38 = vsel %vm9632_vm0, %v2522_v50, %v2850_v33  ;;  %v10156_v4 = vsel %vm9642_vm5, %v2692_v58, %v2965_v62  ;;  %v2594_v62 = vld [vmem:[#allocation3 + $0x3f0] sm:$0xff] }
 0x303   : > { %2593 = vst [vmem:[#allocation3 + $0x3a8] sm:$0xff] %v2592_v49  ;;  %2751 = vst [vmem:[#allocation3 + $0x3b8] sm:$0xff] %v2750_v19  ;;  %v3061_v54 = vsel %vm9632_vm0, %v2522_v50, %v3060_v14  ;;  %v3171_v21 = vsel %vm9642_vm5, %v2692_v58, %v3170_v5  ;;  %v10167_v27 = vpack.c.bf16 %v11856_v31, %v11857_v36  ;;  %4198 = vmatprep.mubr.bf16.mxu1 %v2851_v38  ;;  %v3063_v14 = vld [vmem:[#allocation3 + $0x390] sm:$0xff]  ;;  %v3173_v5 = vld [vmem:[#allocation3 + $0x3a0] sm:$0xff] }
 0x304   : > { %2852 = vst [vmem:[#allocation3 + $0x378] sm:$0xff] %v2851_v38  ;;  %2967 = vst [vmem:[#allocation3 + $0x388] sm:$0xff] %v10156_v4  ;;  %v10170_v9 = vadd.f32 %v9890_v17, %v2158_v63  ;;  %v2161_v29 = vadd.f32 %v10008_v57, %v6961_v10  ;;  %4046 = vmatmul.mubr.bf16.gmra.mrb[120].mxu0 %v2592_v49  ;;  %v2752_v63 = vld [vmem:[#allocation3 + $0x400] sm:$0xff]  ;;  %v7891_v31 = vld [vmem:[%s11800_s5 + $0x228] sm:$0xff]  }
 0x305   : > { %3062 = vst [vmem:[#allocation3 + $0x348] sm:$0xff] %v3061_v54  ;;  %3172 = vst [vmem:[#allocation3 + $0x358] sm:$0xff] %v3171_v21  ;;  %v2524_v48 = vshrl.u32 %v10167_v27, 16  ;;  %v2527_v11 = vshll.u32 %v10167_v27, 16  ;;  %4053 = vmatprep.mubr.bf16.mxu0 %v10167_v27  ;;  %4199 = vmatmul.mubr.bf16.gmra.mrb[108].mxu1 %v2747_v61 }
 0x306   : > { %12008 = vst [vmem:[#allocation41_spill] sm:$0xff] %v10170_v9  ;;  %v10177_v39 = vadd.f32 %v9899_v56, %v2161_v29  ;;  %v11855_v50 = vmax.f32 %v10170_v9, 0.0 }
 0x307   : > { %v2526_v33 = vrot.slane %v2524_v48, 7  ;;  %v2693_v17 = vrot.slane %v2527_v11, 1 }
 0x308   : > { %12009 = vst [vmem:[#allocation42_spill] sm:$0xff] %v10177_v39  ;;  %v11852_v49 = vmax.f32 %v10177_v39, 0.0 }
 0x309   : > { %v2529_v10 = vor.u32 %v2527_v11, %v2526_v33  ;;  %v2694_v58 = vor.u32 %v2693_v17, %v2524_v48  ;;  %v2597_v17 = vld [vmem:[#allocation3 + $0x438] sm:$0xff] }
 0x30a   : > { %v10185_v56 = vpack.c.bf16 %v11852_v49, %v11855_v50  ;;  %v3176_v49 = vld [vmem:[#allocation3 + $0x3e8] sm:$0xff]  ;;  %v3204_v50 = vld [vmem:[#allocation3 + $0xb0] sm:$0xff] }
 0x30b   : > { %v2595_v61 = vsel %vm9632_vm0, %v2529_v10, %v2594_v62  ;;  %v2753_v38 = vsel %vm9642_vm5, %v2694_v58, %v2752_v63  ;;  %v2854_v54 = vsel %vm9632_vm0, %v2529_v10, %v2853_v12  ;;  %v10195_v21 = vsel %vm9642_vm5, %v2694_v58, %v2968_v34  ;;  %v2755_v12 = vld [vmem:[#allocation3 + $0x448] sm:$0xff] }
 0x30c   : > { %2596 = vst [vmem:[#allocation3 + $0x3f0] sm:$0xff] %v2595_v61  ;;  %2754 = vst [vmem:[#allocation3 + $0x400] sm:$0xff] %v2753_v38  ;;  %v10200_v29 = vsel %vm9632_vm0, %v2529_v10, %v3063_v14  ;;  %v3174_v48 = vsel %vm9642_vm5, %v2694_v58, %v3173_v5  ;;  %v2531_v11 = vshrl.u32 %v10185_v56, 16  ;;  %v2534_v33 = vshll.u32 %v10185_v56, 16  ;;  %4054 = vmatmul.mubr.bf16.gmra.mrb[124].mxu0 %v2595_v61  ;;  %v2856_v34 = vld [vmem:[#allocation3 + $0x408] sm:$0xff]  ;;  %v2971_v10 = vld [vmem:[#allocation3 + $0x418] sm:$0xff] }
 0x30d   : > { %2855 = vst [vmem:[#allocation3 + $0x3c0] sm:$0xff] %v2854_v54  ;;  %2970 = vst [vmem:[#allocation3 + $0x3d0] sm:$0xff] %v10195_v21  ;;  %4206 = vmatprep.mubr.bf16.mxu1 %v2854_v54  ;;  %4061 = vmatprep.mubr.bf16.mxu0 %v10185_v56  ;;  %v3066_v5 = vld [vmem:[#allocation3 + $0x3d8] sm:$0xff] }
 0x30e   : > { %3065 = vst [vmem:[#allocation3 + $0x390] sm:$0xff] %v10200_v29  ;;  %3175 = vst [vmem:[#allocation3 + $0x3a0] sm:$0xff] %v3174_v48  ;;  %4207 = vmatmul.mubr.bf16.gmra.mrb[112].mxu1 %v2750_v19  ;;  %v2533_v62 = vrot.slane %v2531_v11, 7  ;;  %v2695_v63 = vrot.slane %v2534_v33, 1 }
 0x310   : > { %v2536_v14 = vor.u32 %v2534_v33, %v2533_v62  ;;  %v2696_v58 = vor.u32 %v2695_v63, %v2531_v11  ;;  %v3187_v62 = vld [vmem:[#allocation3 + $0x28] sm:$0xff] }
 0x312   : > { %v2598_v61 = vsel %vm9632_vm0, %v2536_v14, %v2597_v17  ;;  %v10212_v54 = vsel %vm9642_vm5, %v2696_v58, %v2755_v12  ;;  %v2857_v19 = vsel %vm9632_vm0, %v2536_v14, %v2856_v34  ;;  %v10218_v48 = vsel %vm9642_vm5, %v2696_v58, %v2971_v10  ;;  %v7877_v10 = vld [vmem:[%s11800_s5 + $0x208] sm:$0xff]  }
 0x313   : > { %2599 = vst [vmem:[#allocation3 + $0x438] sm:$0xff] %v2598_v61  ;;  %2757 = vst [vmem:[#allocation3 + $0x448] sm:$0xff] %v10212_v54  ;;  %v10224_v11 = vsel %vm9632_vm0, %v2536_v14, %v3066_v5  ;;  %v3177_v33 = vsel %vm9642_vm5, %v2696_v58, %v3176_v49  ;;  %4214 = vmatprep.mubr.bf16.mxu1 %v2857_v19  ;;  %v3186_v14 = vld [vmem:[#allocation3 + $0x20] sm:$0xff] }
 0x314   : > { %2858 = vst [vmem:[#allocation3 + $0x408] sm:$0xff] %v2857_v19  ;;  %2973 = vst [vmem:[#allocation3 + $0x418] sm:$0xff] %v10218_v48  ;;  %4062 = vmatmul.mubr.bf16.gmra.mrb[128].mxu0 %v2598_v61  ;;  %v3196_v19 = vld [vmem:[#allocation3 + $0x70] sm:$0xff] }
 0x315   : > { %3068 = vst [vmem:[#allocation3 + $0x3d8] sm:$0xff] %v10224_v11  ;;  %3178 = vst [vmem:[#allocation3 + $0x3e8] sm:$0xff] %v3177_v33  ;;  %4263 = vmatprep.mubr.bf16.mxu0 %v3187_v62  ;;  %v7886_v62 = vld [vmem:[%s11800_s5 + $0x210] sm:$0xff]  }
 0x316   : > { %4215 = vmatmul.mubr.bf16.gmra.mrb[116].mxu1 %v2753_v38  ;;  %v7915_v38 = vld [vmem:[%s11800_s5 + $0x200] sm:$0xff]  }
 0x317   : > { %v6962_v17 = vpop.f32.mrb[56].mxu1 }
 0x318   : > { %v6963_v63 = vpop.f32.mrb[57].mxu1 }
 0x319   : > { %v6964_v12 = vadd.f32 %v6963_v63, %v6962_v17  ;;  %v6965_v34 = vpop.f32.mrb[58].mxu1 }
 0x31a   : > { %v6966_v5 = vpop.f32.mrb[59].mxu1 }
 0x31b   : > { %v2166_v49 = vadd.f32 %v10008_v57, %v6964_v12  ;;  %v6967_v58 = vadd.f32 %v6966_v5, %v6965_v34  ;;  %v3195_v34 = vld [vmem:[#allocation3 + $0x68] sm:$0xff]  ;;  %v7890_v5 = vld [vmem:[%s11800_s5 + $0x220] sm:$0xff]  }
 0x31c   : > { %4264 = vmatmul.mubr.bf16.vlgmr.msra.gmra.mrb[132].mxu0 %v3186_v14 }
 0x31d   : > { %7659 = vmatpush3.bf16.msra.mxu0 %v7915_v38  ;;  %4271 = vmatprep.mubr.bf16.mxu0 %v3196_v19  ;;  %v10237_v61 = vadd.f32 %v9885_v41, %v2166_v49  ;;  %v2169_v33 = vadd.f32 %v10008_v57, %v6967_v58  ;;  %v7889_v41 = vld [vmem:[%s11800_s5 + $0x218] sm:$0xff]   ;;  %v2859_v58 = vld [vmem:[#allocation3 + $0x450] sm:$0xff]  ;;  %v2974_v38 = vld [vmem:[#allocation3 + $0x460] sm:$0xff] }
 0x31e   : > { %7660 = vmatprep.subr.bf16.mxu0 %v7877_v10 }
 0x31f   : > { %12010 = vst [vmem:[#allocation43_spill] sm:$0xff] %v10237_v61  ;;  %v10244_v17 = vadd.f32 %v9897_v32, %v2169_v33  ;;  %v11854_v63 = vmax.f32 %v10237_v61, 0.0  ;;  %v3205_v32 = vld [vmem:[#allocation3 + $0xb8] sm:$0xff]  ;;  %v3069_v33 = vld [vmem:[#allocation3 + $0x420] sm:$0xff] }
 0x321   : > { %12011 = vst [vmem:[#allocation44_spill] sm:$0xff] %v10244_v17  ;;  %7661 = vmatpush3.bf16.msra.mxu0 %v7877_v10  ;;  %v11853_v12 = vmax.f32 %v10244_v17, 0.0 }
 0x322   : > { %7662 = vmatprep.subr.bf16.mxu0 %v7886_v62 }
 0x323   : > { %v10255_v57 = vpack.c.bf16 %v11853_v12, %v11854_v63  ;;  %v3179_v12 = vld [vmem:[#allocation3 + $0x430] sm:$0xff] }
 0x324   : > { %4272 = vmatmul.mubr.bf16.gmra.mrb[136].mxu0 %v3195_v34  ;;  %v3024_v34 = vld [vmem:[#allocation3 + $0x468] sm:$0x1] }
 0x325   : > { %4279 = vmatprep.mubr.bf16.mxu0 %v3205_v32  ;;  %7663 = vmatpush3.bf16.msra.mxu0 %v7886_v62  ;;  %v2807_v10 = vshrl.u32 %v10255_v57, 16  ;;  %v2810_v14 = vshll.u32 %v10255_v57, 16  ;;  %v3025_v62 = vsel %vm9266_vm10, 0, %v3024_v34  ;;  %v3240_v34 = vld [vmem:[#allocation3 + $0x1d0] sm:$0xff] }
 0x326   : > { %7664 = vmatprep.subr.bf16.mxu0 %v7889_v41  ;;  %3026 = vst [vmem:[#allocation3 + $0x468] sm:$0x1] %v3025_v62  ;;  %v3215_v62 = vld [vmem:[#allocation3 + $0x108] sm:$0xff] }
 0x327   : > { %v2809_v49 = vrot.slane %v2807_v10, 7  ;;  %v2926_v19 = vrot.slane %v2810_v14, 1 }
 0x329   : > { %7665 = vmatpush3.bf16.msra.mxu0 %v7889_v41  ;;  %v2812_v63 = vor.u32 %v2810_v14, %v2809_v49  ;;  %v2927_v32 = vor.u32 %v2926_v19, %v2807_v10  ;;  %v3214_v10 = vld [vmem:[#allocation3 + $0x100] sm:$0xff]  ;;  %v3207_v49 = vld [vmem:[#allocation3 + $0xc8] sm:$0xff]  ;;  %v3241_v19 = vld [vmem:[#allocation3 + $0x1d8] sm:$0xff] }
 0x32a   : > { %7666 = vmatprep.subr.bf16.mxu0 %v7890_v5  ;;  %v3222_v14 = vld [vmem:[#allocation3 + $0x140] sm:$0xff] }
 0x32b   : > { %v2860_v36 = vsel %vm9632_vm0, %v2812_v63, %v2859_v58  ;;  %v10271_v17 = vsel %vm9642_vm5, %v2927_v32, %v2974_v38  ;;  %v10275_v41 = vsel %vm9632_vm0, %v2812_v63, %v3069_v33  ;;  %v10279_v52 = vsel %vm9642_vm5, %v2927_v32, %v3179_v12  ;;  %v7893_v63 = vld [vmem:[%s11800_s5 + $0x238] sm:$0xff]   ;;  %v3223_v12 = vld [vmem:[#allocation3 + $0x148] sm:$0xff]  ;;  %v3206_v38 = vld [vmem:[#allocation3 + $0xc0] sm:$0xff] }
 0x32c   : > { %4280 = vmatmul.mubr.bf16.gmra.mrb[140].mxu0 %v3204_v50  ;;  %2861 = vst [vmem:[#allocation3 + $0x450] sm:$0xff] %v2860_v36  ;;  %2976 = vst [vmem:[#allocation3 + $0x460] sm:$0xff] %v10271_v17  ;;  %4222 = vmatprep.mubr.bf16.mxu1 %v2860_v36  ;;  %v3213_v50 = vld [vmem:[#allocation3 + $0xf8] sm:$0xff]  ;;  %v3188_v36 = vld [vmem:[#allocation3 + $0x30] sm:$0xff] }
 0x32d   : > { %3071 = vst [vmem:[#allocation3 + $0x420] sm:$0xff] %v10275_v41  ;;  %3181 = vst [vmem:[#allocation3 + $0x430] sm:$0xff] %v10279_v52  ;;  %4287 = vmatprep.mubr.bf16.mxu0 %v3214_v10  ;;  %4223 = vmatmul.mubr.bf16.gmra.mrb[120].mxu1 %v10212_v54  ;;  %v3198_v54 = vld [vmem:[#allocation3 + $0x80] sm:$0xff]  ;;  %v3231_v58 = vld [vmem:[#allocation3 + $0x188] sm:$0xff] }
 0x32e   : > { %7667 = vmatpush3.bf16.msra.mxu0 %v7890_v5  ;;  %4424 = vmatprep.mubr.bf16.mxu1 %v3189_v60  ;;  %v3232_v5 = vld [vmem:[#allocation3 + $0x190] sm:$0xff]  ;;  %v3250_v32 = vld [vmem:[#allocation3 + $0x220] sm:$0xff]  ;;  %v3134_v10 = vld [vmem:[#allocation3 + $0x478] sm:$0x80] }
 0x32f   : > { %7668 = vmatprep.subr.bf16.mxu0 %v7891_v31  ;;  %v3216_v33 = vld [vmem:[#allocation3 + $0x110] sm:$0xff]  ;;  %v3225_v60 = vld [vmem:[#allocation3 + $0x158] sm:$0xff]  ;;  %vm12021_vm5 = vmmov %vm12020_vm9 }
 0x330   : > { %vm12026_vm10 = vmmov %vm12021_vm5 }
 0x331   : > { %vm12028_vm7 = vmmov %vm12021_vm5 }
 0x332   : > { %7669 = vmatpush3.bf16.msra.mxu0 %v7891_v31  ;;  %v3197_v31 = vld [vmem:[#allocation3 + $0x78] sm:$0xff]  ;;  %vm12033_vm6 = vmmov %vm12021_vm5 }
 0x333   : > { %7670 = vmatprep.subr.bf16.mxu0 %v7892_v26  ;;  %vm12034_vm0 = vmmov %vm12021_vm5 }
 0x334   : > { %4288 = vmatmul.mubr.bf16.gmra.mrb[144].mxu0 %v3213_v50  ;;  %v3249_v50 = vld [vmem:[#allocation3 + $0x218] sm:$0xff] }
 0x335   : > { %4295 = vmatprep.mubr.bf16.mxu0 %v3223_v12  ;;  %4425 = vmatmul.mubr.bf16.vlgmr.msra.gmra.mrb[124].mxu1 %v3188_v36  ;;  %v3224_v12 = vld [vmem:[#allocation3 + $0x150] sm:$0xff]  ;;  %v3234_v36 = vld [vmem:[#allocation3 + $0x1a0] sm:$0xff] }
 0x336   : > { %7671 = vmatpush3.bf16.msra.mxu0 %v7892_v26  ;;  %4432 = vmatprep.mubr.bf16.mxu1 %v3198_v54  ;;  %v3135_v26 = vsel %vm9301_vm12, 0, %v3134_v10  ;;  %vm12027_vm12 = vmmov %vm12021_vm5 }
 0x337   : > { %7672 = vmatprep.subr.bf16.mxu0 %v7893_v63  ;;  %3136 = vst [vmem:[#allocation3 + $0x478] sm:$0x80] %v3135_v26 }
 0x33a   : > { %7673 = vmatpush3.bf16.msra.mxu0 %v7893_v63  ;;  %v3259_v63 = vld [vmem:[#allocation3 + $0x268] sm:$0xff] }
 0x33c   : > { %4296 = vmatmul.mubr.bf16.gmra.mrb[148].mxu0 %v3222_v14  ;;  %v10296_v14 = vld [vmem:[%s11801_s6] ss:$0 sm:$0xff] }
 0x33d   : > { %4303 = vmatprep.mubr.bf16.mxu0 %v3232_v5  ;;  %4433 = vmatmul.mubr.bf16.gmra.mrb[128].mxu1 %v3197_v31  ;;  %v3258_v31 = vld [vmem:[#allocation3 + $0x260] sm:$0xff]  ;;  %v3944_v25 = vadd.f32 %v10017_v23, %v10296_v14 }
 0x33e   : > { %4440 = vmatprep.mubr.bf16.mxu1 %v3207_v49 }
 0x344   : > { %4304 = vmatmul.mubr.bf16.gmra.mrb[152].mxu0 %v3231_v58 }
 0x345   : > { %4311 = vmatprep.mubr.bf16.mxu0 %v3241_v19  ;;  %4441 = vmatmul.mubr.bf16.gmra.mrb[132].mxu1 %v3206_v38  ;;  %v3268_v19 = vld [vmem:[#allocation3 + $0x2b0] sm:$0xff] }
 0x346   : > { %4448 = vmatprep.mubr.bf16.mxu1 %v3216_v33 }
 0x34c   : > { %4312 = vmatmul.mubr.bf16.gmra.mrb[156].mxu0 %v3240_v34 }
 0x34d   : > { %4319 = vmatprep.mubr.bf16.mxu0 %v3250_v32  ;;  %4449 = vmatmul.mubr.bf16.gmra.mrb[136].mxu1 %v3215_v62  ;;  %v3233_v32 = vld [vmem:[#allocation3 + $0x198] sm:$0xff]  ;;  %v3947_v62 = vadd.f32 %v10027_v16, %v10296_v14 }
 0x34e   : > { %4456 = vmatprep.mubr.bf16.mxu1 %v3225_v60  ;;  %v3277_v16 = vld [vmem:[#allocation3 + $0x2f8] sm:$0xff] }
 0x354   : > { %4320 = vmatmul.mubr.bf16.gmra.mrb[160].mxu0 %v3249_v50  ;;  %v3243_v50 = vld [vmem:[#allocation3 + $0x1e8] sm:$0xff] }
 0x355   : > { %4327 = vmatprep.mubr.bf16.mxu0 %v3259_v63  ;;  %4457 = vmatmul.mubr.bf16.gmra.mrb[140].mxu1 %v3224_v12 }
 0x356   : > { %4464 = vmatprep.mubr.bf16.mxu1 %v3234_v36 }
 0x35a   : > { %v7008_v54 = vpop.f32.mrb[72].mxu0 }
 0x35b   : > { %v7009_v5 = vpop.f32.mrb[73].mxu0 }
 0x35c   : > { %v7010_v49 = vadd.f32 %v7009_v5, %v7008_v54  ;;  %4328 = vmatmul.mubr.bf16.gmra.mrb[164].mxu0 %v3258_v31  ;;  %v7011_v58 = vpop.f32.mrb[74].mxu0  ;;  %v7114_v38 = vpop.f32.mrb[60].mxu1  ;;  %v3267_v31 = vld [vmem:[#allocation3 + $0x2a8] sm:$0xff] }
 0x35d   : > { %4335 = vmatprep.mubr.bf16.mxu0 %v3268_v19  ;;  %v7012_v33 = vpop.f32.mrb[75].mxu0  ;;  %v7115_v34 = vpop.f32.mrb[61].mxu1  ;;  %4465 = vmatmul.mubr.bf16.gmra.mrb[144].mxu1 %v3233_v32 }
 0x35e   : > { %v7013_v10 = vadd.f32 %v7012_v33, %v7011_v58  ;;  %v7116_v60 = vadd.f32 %v7115_v34, %v7114_v38  ;;  %v7117_v26 = vpop.f32.mrb[62].mxu1  ;;  %4472 = vmatprep.mubr.bf16.mxu1 %v3243_v50  ;;  %v3242_v33 = vld [vmem:[#allocation3 + $0x1e0] sm:$0xff]  ;;  %v3952_v34 = vadd.f32 %v7010_v49, %v10296_v14 }
 0x35f   : > { %v7118_v63 = vpop.f32.mrb[63].mxu1 }
 0x360   : > { %v10302_v23 = vadd.f32 %v7116_v60, %v3944_v25  ;;  %v7119_v12 = vadd.f32 %v7118_v63, %v7117_v26  ;;  %v3252_v26 = vld [vmem:[#allocation3 + $0x230] sm:$0xff]  ;;  %v3955_v50 = vadd.f32 %v7013_v10, %v10296_v14 }
 0x362   : > { %v7014_v36 = vpop.f32.mrb[76].mxu0  ;;  %v10304_v54 = vadd.f32 %v7119_v12, %v3947_v62 }
 0x363   : > { %v7015_v5 = vpop.f32.mrb[77].mxu0 }
 0x364   : > { %v7016_v19 = vadd.f32 %v7015_v5, %v7014_v36  ;;  %v7120_v61 = vpop.f32.mrb[64].mxu1  ;;  %4336 = vmatmul.mubr.bf16.gmra.mrb[168].mxu0 %v3267_v31  ;;  %v7017_v39 = vpop.f32.mrb[78].mxu0  ;;  %v3276_v5 = vld [vmem:[#allocation3 + $0x2f0] sm:$0xff]  ;;  %v3286_v31 = vld [vmem:[#allocation3 + $0x340] sm:$0xff] }
 0x365   : > { %v7121_v58 = vpop.f32.mrb[65].mxu1  ;;  %4343 = vmatprep.mubr.bf16.mxu0 %v3277_v16  ;;  %v7018_v38 = vpop.f32.mrb[79].mxu0  ;;  %4473 = vmatmul.mubr.bf16.gmra.mrb[148].mxu1 %v3242_v33  ;;  %v3251_v16 = vld [vmem:[#allocation3 + $0x228] sm:$0xff] }
 0x366   : > { %v7122_v32 = vadd.f32 %v7121_v58, %v7120_v61  ;;  %v7019_v25 = vadd.f32 %v7018_v38, %v7017_v39  ;;  %v7123_v60 = vpop.f32.mrb[66].mxu1  ;;  %4480 = vmatprep.mubr.bf16.mxu1 %v3252_v26  ;;  %v3261_v39 = vld [vmem:[#allocation3 + $0x278] sm:$0xff]  ;;  %v3960_v10 = vadd.f32 %v7016_v19, %v10296_v14 }
 0x367   : > { %v7124_v62 = vpop.f32.mrb[67].mxu1 }
 0x368   : > { %v10308_v63 = vadd.f32 %v7122_v32, %v3952_v34  ;;  %v7125_v12 = vadd.f32 %v7124_v62, %v7123_v60 }
 0x36a   : > { %v10310_v36 = vadd.f32 %v7125_v12, %v3955_v50  ;;  %v3963_v12 = vadd.f32 %v7019_v25, %v10296_v14 }
 0x36c   : > { %4344 = vmatmul.mubr.bf16.gmra.mrb[172].mxu0 %v3276_v5 }
 0x36d   : > { %4351 = vmatprep.mubr.bf16.mxu0 %v3286_v31  ;;  %4481 = vmatmul.mubr.bf16.gmra.mrb[152].mxu1 %v3251_v16  ;;  %v3285_v16 = vld [vmem:[#allocation3 + $0x338] sm:$0xff] }
 0x36e   : > { %v7020_v49 = vpop.f32.mrb[80].mxu0  ;;  %4488 = vmatprep.mubr.bf16.mxu1 %v3261_v39  ;;  %v3270_v39 = vld [vmem:[#allocation3 + $0x2c0] sm:$0xff] }
 0x36f   : > { %v7021_v61 = vpop.f32.mrb[81].mxu0 }
 0x370   : > { %v7126_v58 = vpop.f32.mrb[68].mxu1  ;;  %v7022_v38 = vadd.f32 %v7021_v61, %v7020_v49  ;;  %v7023_v33 = vpop.f32.mrb[82].mxu0  ;;  %v3260_v49 = vld [vmem:[#allocation3 + $0x270] sm:$0xff] }
 0x371   : > { %v7127_v26 = vpop.f32.mrb[69].mxu1  ;;  %v7024_v32 = vpop.f32.mrb[83].mxu0 }
 0x372   : > { %v7128_v34 = vadd.f32 %v7127_v26, %v7126_v58  ;;  %v7129_v60 = vpop.f32.mrb[70].mxu1  ;;  %v7025_v62 = vadd.f32 %v7024_v32, %v7023_v33 }
 0x373   : > { %v7130_v50 = vpop.f32.mrb[71].mxu1 }
 0x374   : > { %v10314_v5 = vadd.f32 %v7128_v34, %v3960_v10  ;;  %v7131_v31 = vadd.f32 %v7130_v50, %v7129_v60  ;;  %4352 = vmatmul.mubr.bf16.gmra.mrb[176].mxu0 %v3285_v16  ;;  %v3968_v10 = vadd.f32 %v7022_v38, %v10296_v14  ;;  %v3278_v38 = vld [vmem:[#allocation3 + $0x300] sm:$0xff] }
 0x375   : > { %4359 = vmatprep.mubr.bf16.mxu0 %v10156_v4  ;;  %4489 = vmatmul.mubr.bf16.gmra.mrb[156].mxu1 %v3260_v49  ;;  %v3971_v4 = vadd.f32 %v7025_v62, %v10296_v14 }
 0x376   : > { %v10316_v9 = vadd.f32 %v7131_v31, %v3963_v12  ;;  %4496 = vmatprep.mubr.bf16.mxu1 %v3270_v39  ;;  %v3294_v12 = vld [vmem:[#allocation3 + $0x380] sm:$0xff]  ;;  %v3269_v39 = vld [vmem:[#allocation3 + $0x2b8] sm:$0xff] }
 0x377   : > { %v7026_v19 = vpop.f32.mrb[84].mxu0 }
 0x378   : > { %v7027_v61 = vpop.f32.mrb[85].mxu0 }
 0x379   : > { %v7028_v58 = vadd.f32 %v7027_v61, %v7026_v19  ;;  %v7132_v33 = vpop.f32.mrb[72].mxu1  ;;  %v7029_v26 = vpop.f32.mrb[86].mxu0  ;;  %v3279_v19 = vld [vmem:[#allocation3 + $0x308] sm:$0xff] }
 0x37a   : > { %v7133_v32 = vpop.f32.mrb[73].mxu1  ;;  %v7030_v25 = vpop.f32.mrb[87].mxu0 }
 0x37b   : > { %v7134_v34 = vadd.f32 %v7133_v32, %v7132_v33  ;;  %v7031_v60 = vadd.f32 %v7030_v25, %v7029_v26  ;;  %v7135_v50 = vpop.f32.mrb[74].mxu1  ;;  %v3288_v26 = vld [vmem:[#allocation3 + $0x350] sm:$0xff] }
 0x37c   : > { %v7136_v31 = vpop.f32.mrb[75].mxu1  ;;  %4360 = vmatmul.mubr.bf16.gmra.mrb[180].mxu0 %v3294_v12 }
 0x37d   : > { %v10321_v16 = vadd.f32 %v7134_v34, %v3968_v10  ;;  %v7137_v49 = vadd.f32 %v7136_v31, %v7135_v50  ;;  %4367 = vmatprep.mubr.bf16.mxu0 %v10195_v21  ;;  %4497 = vmatmul.mubr.bf16.gmra.mrb[160].mxu1 %v3269_v39  ;;  %v3976_v34 = vadd.f32 %v7028_v58, %v10296_v14 }
 0x37e   : > { %4504 = vmatprep.mubr.bf16.mxu1 %v3279_v19  ;;  %v3979_v39 = vadd.f32 %v7031_v60, %v10296_v14 }
 0x37f   : > { %v10324_v61 = vadd.f32 %v7137_v49, %v3971_v4 }
 0x384   : > { %4368 = vmatmul.mubr.bf16.gmra.mrb[184].mxu0 %v10167_v27 }
 0x385   : > { %4375 = vmatprep.mubr.bf16.mxu0 %v10218_v48  ;;  %4505 = vmatmul.mubr.bf16.gmra.mrb[164].mxu1 %v3278_v38 }
 0x386   : > { %4512 = vmatprep.mubr.bf16.mxu1 %v3288_v26 }
 0x387   : > { %v7032_v33 = vpop.f32.mrb[88].mxu0 }
 0x388   : > { %v7033_v62 = vpop.f32.mrb[89].mxu0 }
 0x389   : > { %v7138_v32 = vpop.f32.mrb[76].mxu1  ;;  %v7034_v25 = vadd.f32 %v7033_v62, %v7032_v33  ;;  %v7035_v10 = vpop.f32.mrb[90].mxu0  ;;  %v3287_v33 = vld [vmem:[#allocation3 + $0x348] sm:$0xff] }
 0x38a   : > { %v7139_v21 = vpop.f32.mrb[77].mxu1  ;;  %v7036_v12 = vpop.f32.mrb[91].mxu0 }
 0x38b   : > { %v7140_v50 = vadd.f32 %v7139_v21, %v7138_v32  ;;  %v7141_v31 = vpop.f32.mrb[78].mxu1  ;;  %v7037_v4 = vadd.f32 %v7036_v12, %v7035_v10  ;;  %v3984_v60 = vadd.f32 %v7034_v25, %v10296_v14  ;;  %v3208_v25 = vld [vmem:[#allocation3 + $0xd0] sm:$0xff] }
 0x38c   : > { %v7142_v49 = vpop.f32.mrb[79].mxu1  ;;  %4376 = vmatmul.mubr.bf16.gmra.mrb[188].mxu0 %v10185_v56 }
 0x38d   : > { %v10330_v48 = vadd.f32 %v7140_v50, %v3976_v34  ;;  %v7143_v19 = vadd.f32 %v7142_v49, %v7141_v31  ;;  %4383 = vmatprep.mubr.bf16.mxu0 %v10271_v17  ;;  %4513 = vmatmul.mubr.bf16.gmra.mrb[168].mxu1 %v3287_v33  ;;  %v3190_v33 = vld [vmem:[#allocation3 + $0x40] sm:$0xff] }
 0x38e   : > { %4520 = vmatprep.mubr.bf16.mxu1 %v10167_v27  ;;  %v3199_v27 = vld [vmem:[#allocation3 + $0x88] sm:$0xff] }
 0x38f   : > { %v10333_v38 = vadd.f32 %v7143_v19, %v3979_v39  ;;  %v7038_v26 = vpop.f32.mrb[92].mxu0  ;;  %v3987_v39 = vadd.f32 %v7037_v4, %v10296_v14 }
 0x390   : > { %v7039_v58 = vpop.f32.mrb[93].mxu0 }
 0x391   : > { %v7144_v62 = vpop.f32.mrb[80].mxu1  ;;  %v7040_v32 = vadd.f32 %v7039_v58, %v7038_v26  ;;  %v7041_v10 = vpop.f32.mrb[94].mxu0 }
 0x392   : > { %v7145_v21 = vpop.f32.mrb[81].mxu1  ;;  %v7042_v50 = vpop.f32.mrb[95].mxu0 }
 0x393   : > { %v7146_v34 = vadd.f32 %v7145_v21, %v7144_v62  ;;  %v7147_v12 = vpop.f32.mrb[82].mxu1  ;;  %v7043_v31 = vadd.f32 %v7042_v50, %v7041_v10 }
 0x394   : > { %v7148_v49 = vpop.f32.mrb[83].mxu1  ;;  %4384 = vmatmul.mubr.bf16.gmra.mrb[192].mxu0 %v10255_v57 }
 0x395   : > { %v10339_v17 = vadd.f32 %v7146_v34, %v3984_v60  ;;  %v7149_v19 = vadd.f32 %v7148_v49, %v7147_v12  ;;  %7674 = vmatprep.mubr.bf16.mxu0 %v3190_v33  ;;  %4521 = vmatmul.mubr.bf16.gmra.mrb[172].mxu1 %v10200_v29  ;;  %v3992_v60 = vadd.f32 %v7040_v32, %v10296_v14  ;;  %v3226_v33 = vld [vmem:[#allocation3 + $0x160] sm:$0xff] }
 0x396   : > { %4528 = vmatprep.mubr.bf16.mxu1 %v10185_v56  ;;  %v3995_v49 = vadd.f32 %v7043_v31, %v10296_v14 }
 0x397   : > { %v10342_v20 = vadd.f32 %v7149_v19, %v3987_v39 }
 0x39c   : > { %7675 = vmatmul.mubr.bf16.vlgmr.msra.gmra.mrb[196].mxu0 %v3199_v27 }
 0x39d   : > { %7678 = vmatprep.mubr.bf16.mxu0 %v3208_v25  ;;  %4529 = vmatmul.mubr.bf16.gmra.mrb[176].mxu1 %v10224_v11  ;;  %v3217_v11 = vld [vmem:[#allocation3 + $0x118] sm:$0xff] }
 0x39e   : > { %v7044_v26 = vpop.f32.mrb[96].mxu0  ;;  %4536 = vmatprep.mubr.bf16.mxu1 %v10255_v57 }
 0x39f   : > { %v7045_v4 = vpop.f32.mrb[97].mxu0 }
 0x3a0   : > { %v7150_v58 = vpop.f32.mrb[84].mxu1  ;;  %v7046_v62 = vadd.f32 %v7045_v4, %v7044_v26  ;;  %v7047_v10 = vpop.f32.mrb[98].mxu0  ;;  %v7916_v26 = vld [vmem:[#allocation3 + $0x8] sm:$0xff] }
 0x3a1   : > { %v7151_v21 = vpop.f32.mrb[85].mxu1  ;;  %v7048_v29 = vpop.f32.mrb[99].mxu0 }
 0x3a2   : > { %v7152_v34 = vadd.f32 %v7151_v21, %v7150_v58  ;;  %v7153_v50 = vpop.f32.mrb[86].mxu1  ;;  %v7049_v56 = vadd.f32 %v7048_v29, %v7047_v10  ;;  %v4000_v31 = vadd.f32 %v7046_v62, %v10296_v14  ;;  %v3262_v62 = vld [vmem:[#allocation3 + $0x280] sm:$0xff] }
 0x3a3   : > { %v7154_v12 = vpop.f32.mrb[87].mxu1 }
 0x3a4   : > { %v10350_v39 = vadd.f32 %v7152_v34, %v3992_v60  ;;  %v7155_v19 = vadd.f32 %v7154_v12, %v7153_v50  ;;  %7679 = vmatmul.mubr.bf16.gmra.mrb[200].mxu0 %v3217_v11  ;;  %v4003_v12 = vadd.f32 %v7049_v56, %v10296_v14  ;;  %v3323_v11 = vld [vmem:[#allocation3 + $0x468] sm:$0xff] }
 0x3a5   : > { %7682 = vmatprep.mubr.bf16.mxu0 %v3226_v33  ;;  %4537 = vmatmul.mubr.bf16.gmra.mrb[180].mxu1 %v10275_v41  ;;  %v3235_v41 = vld [vmem:[#allocation3 + $0x1a8] sm:$0xff]  ;;  %v3244_v33 = vld [vmem:[#allocation3 + $0x1f0] sm:$0xff] }
 0x3a6   : > { %v10352_v27 = vadd.f32 %v7155_v19, %v3995_v49  ;;  %v7050_v57 = vpop.f32.mrb[100].mxu0  ;;  %4544 = vmatprep.mubr.bf16.mxu1 %v7916_v26 }
 0x3a7   : > { %v7051_v32 = vpop.f32.mrb[101].mxu0 }
 0x3a8   : > { %v7156_v25 = vpop.f32.mrb[88].mxu1  ;;  %v7052_v4 = vadd.f32 %v7051_v32, %v7050_v57  ;;  %v7053_v58 = vpop.f32.mrb[102].mxu0  ;;  %v3253_v57 = vld [vmem:[#allocation3 + $0x238] sm:$0xff] }
 0x3a9   : > { %v7157_v10 = vpop.f32.mrb[89].mxu1  ;;  %v7054_v60 = vpop.f32.mrb[103].mxu0 }
 0x3aa   : > { %v7158_v21 = vadd.f32 %v7157_v10, %v7156_v25  ;;  %v7159_v34 = vpop.f32.mrb[90].mxu1  ;;  %v7055_v29 = vadd.f32 %v7054_v60, %v7053_v58 }
 0x3ab   : > { %v7160_v50 = vpop.f32.mrb[91].mxu1 }
 0x3ac   : > { %v10357_v49 = vadd.f32 %v7158_v21, %v4000_v31  ;;  %v7161_v19 = vadd.f32 %v7160_v50, %v7159_v34  ;;  %7683 = vmatmul.mubr.bf16.gmra.mrb[204].mxu0 %v3235_v41  ;;  %v4008_v21 = vadd.f32 %v7052_v4, %v10296_v14 }
 0x3ad   : > { %7686 = vmatprep.mubr.bf16.mxu0 %v3244_v33  ;;  %4545 = vmatmul.mubr.bf16.gmra.mrb[184].mxu1 %v3323_v11 }
 0x3ae   : > { %v10359_v26 = vadd.f32 %v7161_v19, %v4003_v12  ;;  %v4011_v19 = vadd.f32 %v7055_v29, %v10296_v14 }
 0x3b4   : > { %7687 = vmatmul.mubr.bf16.gmra.mrb[208].mxu0 %v3253_v57  ;;  %v3271_v57 = vld [vmem:[#allocation3 + $0x2c8] sm:$0xff] }
 0x3b5   : > { %7690 = vmatprep.mubr.bf16.mxu0 %v3262_v62  ;;  %v3280_v62 = vld [vmem:[#allocation3 + $0x310] sm:$0xff] }
 0x3b6   : > { %v7056_v32 = vpop.f32.mrb[104].mxu0 }
 0x3b7   : > { %v7057_v25 = vpop.f32.mrb[105].mxu0 }
 0x3b8   : > { %v7162_v58 = vpop.f32.mrb[92].mxu1  ;;  %v7058_v10 = vadd.f32 %v7057_v25, %v7056_v32  ;;  %v7059_v56 = vpop.f32.mrb[106].mxu0 }
 0x3b9   : > { %v7163_v31 = vpop.f32.mrb[93].mxu1  ;;  %v7060_v34 = vpop.f32.mrb[107].mxu0 }
 0x3ba   : > { %v7164_v60 = vadd.f32 %v7163_v31, %v7162_v58  ;;  %v7165_v50 = vpop.f32.mrb[94].mxu1  ;;  %v7061_v41 = vadd.f32 %v7060_v34, %v7059_v56  ;;  %v4016_v56 = vadd.f32 %v7058_v10, %v10296_v14 }
 0x3bb   : > { %v7166_v12 = vpop.f32.mrb[95].mxu1 }
 0x3bc   : > { %v10363_v11 = vadd.f32 %v7164_v60, %v4008_v21  ;;  %v7167_v33 = vadd.f32 %v7166_v12, %v7165_v50  ;;  %7691 = vmatmul.mubr.bf16.gmra.mrb[212].mxu0 %v3271_v57  ;;  %v4019_v50 = vadd.f32 %v7061_v41, %v10296_v14  ;;  %v3298_v57 = vld [vmem:[#allocation3 + $0x3a0] sm:$0xff] }
 0x3bd   : > { %7694 = vmatprep.mubr.bf16.mxu0 %v3280_v62 }
 0x3be   : > { %v10365_v7 = vadd.f32 %v7167_v33, %v4011_v19  ;;  %v7062_v32 = vpop.f32.mrb[108].mxu0  ;;  %v3289_v33 = vld [vmem:[#allocation3 + $0x358] sm:$0xff] }
 0x3bf   : > { %v7063_v25 = vpop.f32.mrb[109].mxu0 }
 0x3c0   : > { %v7168_v6 = vpop.f32.mrb[96].mxu1  ;;  %v7064_v4 = vadd.f32 %v7063_v25, %v7062_v32  ;;  %v7065_v58 = vpop.f32.mrb[110].mxu0 }
 0x3c1   : > { %v7169_v31 = vpop.f32.mrb[97].mxu1  ;;  %v7066_v42 = vpop.f32.mrb[111].mxu0 }
 0x3c2   : > { %v7170_v34 = vadd.f32 %v7169_v31, %v7168_v6  ;;  %v7171_v29 = vpop.f32.mrb[98].mxu1  ;;  %v7067_v21 = vadd.f32 %v7066_v42, %v7065_v58  ;;  %v4024_v42 = vadd.f32 %v7064_v4, %v10296_v14 }
 0x3c3   : > { %v7172_v60 = vpop.f32.mrb[99].mxu1 }
 0x3c4   : > { %v10369_v12 = vadd.f32 %v7170_v34, %v4016_v56  ;;  %v7173_v19 = vadd.f32 %v7172_v60, %v7171_v29  ;;  %7695 = vmatmul.mubr.bf16.gmra.mrb[216].mxu0 %v3289_v33  ;;  %v3307_v29 = vld [vmem:[#allocation3 + $0x3e8] sm:$0xff]  ;;  %v4027_v60 = vadd.f32 %v7067_v21, %v10296_v14 }
 0x3c5   : > { %7698 = vmatprep.mubr.bf16.mxu0 %v3298_v57 }
 0x3c6   : > { %v10371_v62 = vadd.f32 %v7173_v19, %v4019_v50  ;;  %v7068_v32 = vpop.f32.mrb[112].mxu0 }
 0x3c7   : > { %v7069_v25 = vpop.f32.mrb[113].mxu0 }
 0x3c8   : > { %v7070_v15 = vadd.f32 %v7069_v25, %v7068_v32  ;;  %v7174_v10 = vpop.f32.mrb[100].mxu1  ;;  %v7071_v6 = vpop.f32.mrb[114].mxu0 }
 0x3c9   : > { %v7175_v31 = vpop.f32.mrb[101].mxu1  ;;  %v7072_v0 = vpop.f32.mrb[115].mxu0 }
 0x3ca   : > { %v7176_v58 = vadd.f32 %v7175_v31, %v7174_v10  ;;  %v7073_v41 = vadd.f32 %v7072_v0, %v7071_v6  ;;  %v7177_v56 = vpop.f32.mrb[102].mxu1  ;;  %v3325_v0 = vld [vmem:[#allocation3 + $0x478] sm:$0xff]  ;;  %v4032_v6 = vadd.f32 %v7070_v15, %v10296_v14 }
 0x3cb   : > { %v7178_v34 = vpop.f32.mrb[103].mxu1 }
 0x3cc   : > { %v10375_v33 = vadd.f32 %v7176_v58, %v4024_v42  ;;  %v7179_v50 = vadd.f32 %v7178_v34, %v7177_v56  ;;  %7699 = vmatmul.mubr.bf16.gmra.mrb[220].mxu0 %v3307_v29  ;;  %v4035_v56 = vadd.f32 %v7073_v41, %v10296_v14 }
 0x3cd   : > { %7702 = vmatprep.mubr.bf16.mxu0 %v10279_v52 }
 0x3ce   : > { %v10378_v19 = vadd.f32 %v7179_v50, %v4027_v60  ;;  %v7074_v57 = vpop.f32.mrb[116].mxu0 }
 0x3cf   : > { %v7075_v32 = vpop.f32.mrb[117].mxu0 }
 0x3d0   : > { %v7180_v25 = vpop.f32.mrb[104].mxu1  ;;  %v7076_v43 = vadd.f32 %v7075_v32, %v7074_v57  ;;  %v7077_v4 = vpop.f32.mrb[118].mxu0 }
 0x3d1   : > { %v7181_v10 = vpop.f32.mrb[105].mxu1  ;;  %v7078_v40 = vpop.f32.mrb[119].mxu0 }
 0x3d2   : > { %v7182_v31 = vadd.f32 %v7181_v10, %v7180_v25  ;;  %v7183_v21 = vpop.f32.mrb[106].mxu1  ;;  %v7079_v42 = vadd.f32 %v7078_v40, %v7077_v4  ;;  %v4040_v15 = vadd.f32 %v7076_v43, %v10296_v14 }
 0x3d3   : > { %v7184_v58 = vpop.f32.mrb[107].mxu1 }
 0x3d4   : > { %v10382_v34 = vadd.f32 %v7182_v31, %v4032_v6  ;;  %v7185_v52 = vadd.f32 %v7184_v58, %v7183_v21  ;;  %7703 = vmatmul.mubr.bf16.gmra.mrb[224].mxu0 %v3325_v0  ;;  %v4043_v41 = vadd.f32 %v7079_v42, %v10296_v14 }
 0x3d6   : > { %v10384_v29 = vadd.f32 %v7185_v52, %v4035_v56 }
 0x3d7   : > { %v7080_v60 = vpop.f32.mrb[120].mxu0 }
 0x3d8   : > { %v7081_v50 = vpop.f32.mrb[121].mxu0  ;;  %v7186_v57 = vpop.f32.mrb[108].mxu1 }
 0x3d9   : > { %v7082_v32 = vadd.f32 %v7081_v50, %v7080_v60  ;;  %v7083_v1 = vpop.f32.mrb[122].mxu0  ;;  %v7187_v24 = vpop.f32.mrb[109].mxu1 }
 0x3da   : > { %v7188_v25 = vadd.f32 %v7187_v24, %v7186_v57  ;;  %v7084_v10 = vpop.f32.mrb[123].mxu0  ;;  %v7189_v40 = vpop.f32.mrb[110].mxu1 }
 0x3db   : > { %v7085_v4 = vadd.f32 %v7084_v10, %v7083_v1  ;;  %v7190_v18 = vpop.f32.mrb[111].mxu1  ;;  %v4048_v43 = vadd.f32 %v7082_v32, %v10296_v14 }
 0x3dc   : > { %v10388_v6 = vadd.f32 %v7188_v25, %v4040_v15  ;;  %v7191_v0 = vadd.f32 %v7190_v18, %v7189_v40 }
 0x3dd   : > { %v4051_v42 = vadd.f32 %v7085_v4, %v10296_v14 }
 0x3de   : > { %v10390_v31 = vadd.f32 %v7191_v0, %v4043_v41 }
 0x3df   : > { %v7086_v21 = vpop.f32.mrb[124].mxu0 }
 0x3e0   : > { %v7087_v58 = vpop.f32.mrb[125].mxu0 }
 0x3e1   : > { %v7192_v56 = vpop.f32.mrb[112].mxu1  ;;  %v7088_v52 = vadd.f32 %v7087_v58, %v7086_v21  ;;  %v7089_v60 = vpop.f32.mrb[126].mxu0 }
 0x3e2   : > { %v7193_v50 = vpop.f32.mrb[113].mxu1  ;;  %v7090_v57 = vpop.f32.mrb[127].mxu0 }
 0x3e3   : > { %v7194_v24 = vadd.f32 %v7193_v50, %v7192_v56  ;;  %v7195_v46 = vpop.f32.mrb[114].mxu1  ;;  %v7091_v1 = vadd.f32 %v7090_v57, %v7089_v60  ;;  %v4056_v32 = vadd.f32 %v7088_v52, %v10296_v14 }
 0x3e4   : > { %v7196_v10 = vpop.f32.mrb[115].mxu1 }
 0x3e5   : > { %v10394_v15 = vadd.f32 %v7194_v24, %v4048_v43  ;;  %v7197_v18 = vadd.f32 %v7196_v10, %v7195_v46  ;;  %v4059_v4 = vadd.f32 %v7091_v1, %v10296_v14 }
 0x3e7   : > { %v10396_v25 = vadd.f32 %v7197_v18, %v4051_v42  ;;  %v7092_v40 = vpop.f32.mrb[128].mxu0 }
 0x3e8   : > { %v7093_v41 = vpop.f32.mrb[129].mxu0 }
 0x3e9   : > { %v7198_v0 = vpop.f32.mrb[116].mxu1  ;;  %v7094_v21 = vadd.f32 %v7093_v41, %v7092_v40  ;;  %v7095_v58 = vpop.f32.mrb[130].mxu0 }
 0x3ea   : > { %v7199_v35 = vpop.f32.mrb[117].mxu1  ;;  %v7096_v50 = vpop.f32.mrb[131].mxu0 }
 0x3eb   : > { %v7200_v56 = vadd.f32 %v7199_v35, %v7198_v0  ;;  %v7201_v3 = vpop.f32.mrb[118].mxu1  ;;  %v7097_v60 = vadd.f32 %v7096_v50, %v7095_v58 }
 0x3ec   : > { %v7202_v57 = vpop.f32.mrb[119].mxu1 }
 0x3ed   : > { %v10400_v43 = vadd.f32 %v7200_v56, %v4056_v32  ;;  %v7203_v46 = vadd.f32 %v7202_v57, %v7201_v3 }
 0x3ef   : > { %v10402_v24 = vadd.f32 %v7203_v46, %v4059_v4  ;;  %v7226_v10 = vpop.f32.mrb[132].mxu0 }
 0x3f0   : > { %v7227_v42 = vpop.f32.mrb[133].mxu0 }
 0x3f1   : > { %v7228_v18 = vadd.f32 %v7227_v42, %v7226_v10  ;;  %v7229_v40 = vpop.f32.mrb[134].mxu0 }
 0x3f2   : > { %v7230_v41 = vpop.f32.mrb[135].mxu0 }
 0x3f3   : > { %v4266_v45 = vadd.f32 %v7228_v18, %v10302_v23  ;;  %v7231_v52 = vadd.f32 %v7230_v41, %v7229_v40  ;;  %v4064_v18 = vadd.f32 %v7094_v21, %v10296_v14 }
 0x3f5   : > { %v4269_v35 = vadd.f32 %v7231_v52, %v10304_v54 }
 0x3f7   : > { %v7232_v0 = vpop.f32.mrb[136].mxu0 }
 0x3f8   : > { %v7233_v58 = vpop.f32.mrb[137].mxu0 }
 0x3f9   : > { %v7234_v50 = vadd.f32 %v7233_v58, %v7232_v0  ;;  %v7235_v30 = vpop.f32.mrb[138].mxu0 }
 0x3fa   : > { %v7236_v1 = vpop.f32.mrb[139].mxu0 }
 0x3fb   : > { %v4274_v32 = vadd.f32 %v7234_v50, %v10308_v63  ;;  %v7237_v3 = vadd.f32 %v7236_v1, %v7235_v30  ;;  %v7894_v30 = vld [vmem:[%s11802_s7 + $0x80] sm:$0xff]  }
 0x3fc   : > { %7706 = vmatprep.subr.bf16.mxu0 %v7894_v30 }
 0x3fd   : > { %v4277_v56 = vadd.f32 %v7237_v3, %v10310_v36  ;;  %v4067_v36 = vadd.f32 %v7097_v60, %v10296_v14  ;;  %7707 = vmatpush3.bf16.msra.mxu0 %v7894_v30 }
 0x3ff   : > { %v7238_v57 = vpop.f32.mrb[140].mxu0 }
 0x400   : > { %v7239_v4 = vpop.f32.mrb[141].mxu0  ;;  %v7204_v42 = vpop.f32.mrb[120].mxu1 }
 0x401   : > { %v7240_v46 = vadd.f32 %v7239_v4, %v7238_v57  ;;  %v7241_v10 = vpop.f32.mrb[142].mxu0  ;;  %v7205_v23 = vpop.f32.mrb[121].mxu1 }
 0x402   : > { %v7242_v47 = vpop.f32.mrb[143].mxu0  ;;  %v7206_v41 = vadd.f32 %v7205_v23, %v7204_v42  ;;  %v7207_v52 = vpop.f32.mrb[122].mxu1 }
 0x403   : > { %v4282_v54 = vadd.f32 %v7240_v46, %v10314_v5  ;;  %v7243_v40 = vadd.f32 %v7242_v47, %v7241_v10  ;;  %v7208_v63 = vpop.f32.mrb[123].mxu1  ;;  %v7895_v47 = vld [vmem:[%s11802_s7 + $0x88] sm:$0xff]  }
 0x404   : > { %v10415_v58 = vadd.f32 %v7206_v41, %v4064_v18  ;;  %v7209_v50 = vadd.f32 %v7208_v63, %v7207_v52  ;;  %7708 = vmatprep.subr.bf16.mxu0 %v7895_v47 }
 0x405   : > { %v4285_v0 = vadd.f32 %v7243_v40, %v10316_v9  ;;  %7709 = vmatpush3.bf16.msra.mxu0 %v7895_v47 }
 0x406   : > { %v10417_v1 = vadd.f32 %v7209_v50, %v4067_v36 }
 0x407   : > { %v7244_v21 = vpop.f32.mrb[144].mxu0 }
 0x408   : > { %v7245_v5 = vpop.f32.mrb[145].mxu0  ;;  %v7338_v4 = vpop.f32.mrb[124].mxu1 }
 0x409   : > { %v7246_v3 = vadd.f32 %v7245_v5, %v7244_v21  ;;  %v7247_v57 = vpop.f32.mrb[146].mxu0  ;;  %v7339_v60 = vpop.f32.mrb[125].mxu1 }
 0x40a   : > { %v7248_v14 = vpop.f32.mrb[147].mxu0  ;;  %v7340_v10 = vadd.f32 %v7339_v60, %v7338_v4  ;;  %v7341_v42 = vpop.f32.mrb[126].mxu1 }
 0x40b   : > { %v4290_v9 = vadd.f32 %v7246_v3, %v10321_v16  ;;  %v7249_v46 = vadd.f32 %v7248_v14, %v7247_v57  ;;  %v7342_v23 = vpop.f32.mrb[127].mxu1 }
 0x40c   : > { %v7343_v40 = vadd.f32 %v7342_v23, %v7341_v42  ;;  %v10424_v41 = vadd.f32 %v7340_v10, %v4266_v45 }
 0x40d   : > { %v4293_v18 = vadd.f32 %v7249_v46, %v10324_v61 }
 0x40e   : > { %v10426_v30 = vadd.f32 %v7343_v40, %v4269_v35 }
 0x40f   : > { %v7250_v52 = vpop.f32.mrb[148].mxu0 }
 0x410   : > { %v7251_v63 = vpop.f32.mrb[149].mxu0  ;;  %v7344_v21 = vpop.f32.mrb[128].mxu1 }
 0x411   : > { %v7252_v36 = vadd.f32 %v7251_v63, %v7250_v52  ;;  %v7253_v50 = vpop.f32.mrb[150].mxu0  ;;  %v7345_v47 = vpop.f32.mrb[129].mxu1 }
 0x412   : > { %v7254_v5 = vpop.f32.mrb[151].mxu0  ;;  %v7346_v57 = vadd.f32 %v7345_v47, %v7344_v21  ;;  %v7347_v4 = vpop.f32.mrb[130].mxu1 }
 0x413   : > { %v4298_v16 = vadd.f32 %v7252_v36, %v10330_v48  ;;  %v7255_v3 = vadd.f32 %v7254_v5, %v7253_v50  ;;  %v7348_v14 = vpop.f32.mrb[131].mxu1 }
 0x414   : > { %v7349_v60 = vadd.f32 %v7348_v14, %v7347_v4  ;;  %v10430_v45 = vadd.f32 %v7346_v57, %v4274_v32 }
 0x415   : > { %v4301_v61 = vadd.f32 %v7255_v3, %v10333_v38 }
 0x416   : > { %v10432_v35 = vadd.f32 %v7349_v60, %v4277_v56 }
 0x417   : > { %v7256_v46 = vpop.f32.mrb[152].mxu0 }
 0x418   : > { %v7257_v10 = vpop.f32.mrb[153].mxu0  ;;  %v7350_v40 = vpop.f32.mrb[132].mxu1 }
 0x419   : > { %v7258_v42 = vadd.f32 %v7257_v10, %v7256_v46  ;;  %v7259_v23 = vpop.f32.mrb[154].mxu0  ;;  %v7351_v63 = vpop.f32.mrb[133].mxu1 }
 0x41a   : > { %v7260_v52 = vpop.f32.mrb[155].mxu0  ;;  %v7352_v50 = vadd.f32 %v7351_v63, %v7350_v40  ;;  %v7353_v21 = vpop.f32.mrb[134].mxu1 }
 0x41b   : > { %v4306_v48 = vadd.f32 %v7258_v42, %v10339_v17  ;;  %v7261_v36 = vadd.f32 %v7260_v52, %v7259_v23  ;;  %v7354_v5 = vpop.f32.mrb[135].mxu1 }
 0x41c   : > { %v7355_v47 = vadd.f32 %v7354_v5, %v7353_v21  ;;  %v10436_v32 = vadd.f32 %v7352_v50, %v4282_v54 }
 0x41d   : > { %v4309_v38 = vadd.f32 %v7261_v36, %v10342_v20 }
 0x41e   : > { %v10438_v56 = vadd.f32 %v7355_v47, %v4285_v0 }
 0x41f   : > { %v7262_v3 = vpop.f32.mrb[156].mxu0 }
 0x420   : > { %v7263_v57 = vpop.f32.mrb[157].mxu0  ;;  %v7356_v60 = vpop.f32.mrb[136].mxu1 }
 0x421   : > { %v7264_v4 = vadd.f32 %v7263_v57, %v7262_v3  ;;  %v7265_v14 = vpop.f32.mrb[158].mxu0  ;;  %v7357_v10 = vpop.f32.mrb[137].mxu1 }
 0x422   : > { %v7266_v46 = vpop.f32.mrb[159].mxu0  ;;  %v7358_v23 = vadd.f32 %v7357_v10, %v7356_v60  ;;  %v7359_v40 = vpop.f32.mrb[138].mxu1 }
 0x423   : > { %v4314_v17 = vadd.f32 %v7264_v4, %v10350_v39  ;;  %v7267_v42 = vadd.f32 %v7266_v46, %v7265_v14  ;;  %v7360_v52 = vpop.f32.mrb[139].mxu1 }
 0x424   : > { %v7361_v63 = vadd.f32 %v7360_v52, %v7359_v40  ;;  %v10442_v54 = vadd.f32 %v7358_v23, %v4290_v9 }
 0x425   : > { %v4317_v20 = vadd.f32 %v7267_v42, %v10352_v27 }
 0x426   : > { %v10444_v0 = vadd.f32 %v7361_v63, %v4293_v18 }
 0x427   : > { %v7268_v36 = vpop.f32.mrb[160].mxu0 }
 0x428   : > { %v7269_v50 = vpop.f32.mrb[161].mxu0  ;;  %v7362_v47 = vpop.f32.mrb[140].mxu1 }
 0x429   : > { %v7270_v21 = vadd.f32 %v7269_v50, %v7268_v36  ;;  %v7271_v5 = vpop.f32.mrb[162].mxu0  ;;  %v7363_v57 = vpop.f32.mrb[141].mxu1 }
 0x42a   : > { %v7272_v3 = vpop.f32.mrb[163].mxu0  ;;  %v7364_v14 = vadd.f32 %v7363_v57, %v7362_v47  ;;  %v7365_v60 = vpop.f32.mrb[142].mxu1 }
 0x42b   : > { %v4322_v39 = vadd.f32 %v7270_v21, %v10357_v49  ;;  %v7273_v4 = vadd.f32 %v7272_v3, %v7271_v5  ;;  %v7366_v46 = vpop.f32.mrb[143].mxu1 }
 0x42c   : > { %v7367_v10 = vadd.f32 %v7366_v46, %v7365_v60  ;;  %v10448_v9 = vadd.f32 %v7364_v14, %v4298_v16 }
 0x42d   : > { %v4325_v27 = vadd.f32 %v7273_v4, %v10359_v26 }
 0x42e   : > { %v10450_v18 = vadd.f32 %v7367_v10, %v4301_v61 }
 0x42f   : > { %v7274_v42 = vpop.f32.mrb[164].mxu0 }
 0x430   : > { %v7275_v23 = vpop.f32.mrb[165].mxu0  ;;  %v7368_v63 = vpop.f32.mrb[144].mxu1 }
 0x431   : > { %v7276_v40 = vadd.f32 %v7275_v23, %v7274_v42  ;;  %v7277_v52 = vpop.f32.mrb[166].mxu0  ;;  %v7369_v50 = vpop.f32.mrb[145].mxu1 }
 0x432   : > { %v7278_v36 = vpop.f32.mrb[167].mxu0  ;;  %v7370_v5 = vadd.f32 %v7369_v50, %v7368_v63  ;;  %v7371_v47 = vpop.f32.mrb[146].mxu1 }
 0x433   : > { %v10453_v49 = vadd.f32 %v7276_v40, %v10363_v11  ;;  %v7279_v21 = vadd.f32 %v7278_v36, %v7277_v52  ;;  %v7372_v3 = vpop.f32.mrb[147].mxu1  ;;  %v7896_v11 = vld [vmem:[%s11802_s7 + $0x40] sm:$0xff]  }
 0x434   : > { %v7373_v16 = vadd.f32 %v7372_v3, %v7371_v47  ;;  %v10456_v57 = vadd.f32 %v7370_v5, %v4306_v48  ;;  %7458 = vmatprep.subr.bf16.mxu1 %v7896_v11 }
 0x435   : > { %v4333_v26 = vadd.f32 %v7279_v21, %v10365_v7  ;;  %v7897_v7 = vld [vmem:[%s11802_s7] sm:$0xff]  }
 0x436   : > { %v10458_v4 = vadd.f32 %v7373_v16, %v4309_v38  ;;  %7459 = vmatpush3.bf16.msra.mxu1 %v7897_v7 }
 0x437   : > { %v7280_v61 = vpop.f32.mrb[168].mxu0 }
 0x438   : > { %v7281_v14 = vpop.f32.mrb[169].mxu0  ;;  %v7374_v10 = vpop.f32.mrb[148].mxu1 }
 0x439   : > { %v7282_v60 = vadd.f32 %v7281_v14, %v7280_v61  ;;  %v7283_v46 = vpop.f32.mrb[170].mxu0  ;;  %v7375_v23 = vpop.f32.mrb[149].mxu1 }
 0x43a   : > { %v7284_v42 = vpop.f32.mrb[171].mxu0  ;;  %v7376_v52 = vadd.f32 %v7375_v23, %v7374_v10  ;;  %v7377_v38 = vpop.f32.mrb[150].mxu1 }
 0x43b   : > { %v4338_v48 = vadd.f32 %v7282_v60, %v10369_v12  ;;  %v7285_v40 = vadd.f32 %v7284_v42, %v7283_v46  ;;  %v7378_v63 = vpop.f32.mrb[151].mxu1 }
 0x43c   : > { %v7379_v50 = vadd.f32 %v7378_v63, %v7377_v38  ;;  %v10468_v21 = vadd.f32 %v7376_v52, %v4314_v17  ;;  %v7898_v52 = vld [vmem:[%s11802_s7 + $0x48] sm:$0xff]  }
 0x43d   : > { %v4341_v36 = vadd.f32 %v7285_v40, %v10371_v62  ;;  %7460 = vmatprep.subr.bf16.mxu1 %v7898_v52 }
 0x43e   : > { %v10470_v47 = vadd.f32 %v7379_v50, %v4317_v20 }
 0x43f   : > { %v7286_v5 = vpop.f32.mrb[172].mxu0 }
 0x440   : > { %v7287_v3 = vpop.f32.mrb[173].mxu0  ;;  %v7380_v14 = vpop.f32.mrb[152].mxu1 }
 0x441   : > { %v7288_v16 = vadd.f32 %v7287_v3, %v7286_v5  ;;  %v7289_v61 = vpop.f32.mrb[174].mxu0  ;;  %v7381_v12 = vpop.f32.mrb[153].mxu1 }
 0x442   : > { %v7290_v13 = vpop.f32.mrb[175].mxu0  ;;  %v7382_v10 = vadd.f32 %v7381_v12, %v7380_v14  ;;  %v7383_v42 = vpop.f32.mrb[154].mxu1 }
 0x443   : > { %v10473_v60 = vadd.f32 %v7288_v16, %v10375_v33  ;;  %v7291_v46 = vadd.f32 %v7290_v13, %v7289_v61  ;;  %v7384_v62 = vpop.f32.mrb[155].mxu1  ;;  %v7899_v13 = vld [vmem:[%s11802_s7 + $0x8] sm:$0xff]  }
 0x444   : > { %v7385_v23 = vadd.f32 %v7384_v62, %v7383_v42  ;;  %v10476_v11 = vadd.f32 %v7382_v10, %v4322_v39  ;;  %7461 = vmatpush3.bf16.msra.mxu1 %v7899_v13 }
 0x445   : > { %v4349_v17 = vadd.f32 %v7291_v46, %v10378_v19 }
 0x446   : > { %v10478_v7 = vadd.f32 %v7385_v23, %v4325_v27 }
 0x447   : > { %v7292_v20 = vpop.f32.mrb[176].mxu0 }
 0x448   : > { %v7293_v40 = vpop.f32.mrb[177].mxu0  ;;  %v7386_v63 = vpop.f32.mrb[156].mxu1 }
 0x449   : > { %v7294_v33 = vadd.f32 %v7293_v40, %v7292_v20  ;;  %v7295_v38 = vpop.f32.mrb[178].mxu0  ;;  %v7387_v19 = vpop.f32.mrb[157].mxu1 }
 0x44a   : > { %v7296_v50 = vpop.f32.mrb[179].mxu0  ;;  %v7388_v27 = vadd.f32 %v7387_v19, %v7386_v63  ;;  %v7389_v3 = vpop.f32.mrb[158].mxu1 }
 0x44b   : > { %v4354_v39 = vadd.f32 %v7294_v33, %v10382_v34  ;;  %v7297_v5 = vadd.f32 %v7296_v50, %v7295_v38  ;;  %v7390_v16 = vpop.f32.mrb[159].mxu1 }
 0x44c   : > { %v7391_v14 = vadd.f32 %v7390_v16, %v7389_v3  ;;  %v10489_v12 = vadd.f32 %v7388_v27, %v10453_v49  ;;  %v7900_v27 = vld [vmem:[%s11802_s7 + $0x50] sm:$0xff]  }
 0x44d   : > { %v4357_v61 = vadd.f32 %v7297_v5, %v10384_v29  ;;  %7462 = vmatprep.subr.bf16.mxu1 %v7900_v27 }
 0x44e   : > { %v10491_v10 = vadd.f32 %v7391_v14, %v4333_v26 }
 0x44f   : > { %v7298_v46 = vpop.f32.mrb[180].mxu0 }
 0x450   : > { %v7299_v42 = vpop.f32.mrb[181].mxu0  ;;  %v7392_v20 = vpop.f32.mrb[160].mxu1 }
 0x451   : > { %v7300_v62 = vadd.f32 %v7299_v42, %v7298_v46  ;;  %v7301_v23 = vpop.f32.mrb[182].mxu0  ;;  %v7393_v34 = vpop.f32.mrb[161].mxu1 }
 0x452   : > { %v7302_v40 = vpop.f32.mrb[183].mxu0  ;;  %v7394_v33 = vadd.f32 %v7393_v34, %v7392_v20  ;;  %v7395_v38 = vpop.f32.mrb[162].mxu1 }
 0x453   : > { %v10494_v52 = vadd.f32 %v7300_v62, %v10388_v6  ;;  %v7303_v13 = vadd.f32 %v7302_v40, %v7301_v23  ;;  %v7396_v29 = vpop.f32.mrb[163].mxu1  ;;  %v7901_v6 = vld [vmem:[%s11802_s7 + $0x10] sm:$0xff]  }
 0x454   : > { %v7397_v49 = vadd.f32 %v7396_v29, %v7395_v38  ;;  %v10499_v50 = vadd.f32 %v7394_v33, %v4338_v48  ;;  %7463 = vmatpush3.bf16.msra.mxu1 %v7901_v6 }
 0x455   : > { %v10497_v63 = vadd.f32 %v7303_v13, %v10390_v31 }
 0x456   : > { %v10501_v19 = vadd.f32 %v7397_v49, %v4341_v36 }
 0x457   : > { %v7304_v26 = vpop.f32.mrb[184].mxu0 }
 0x458   : > { %v7305_v5 = vpop.f32.mrb[185].mxu0  ;;  %v7398_v14 = vpop.f32.mrb[164].mxu1 }
 0x459   : > { %v7306_v3 = vadd.f32 %v7305_v5, %v7304_v26  ;;  %v7307_v16 = vpop.f32.mrb[186].mxu0  ;;  %v7399_v46 = vpop.f32.mrb[165].mxu1 }
 0x45a   : > { %v7308_v31 = vpop.f32.mrb[187].mxu0  ;;  %v7400_v42 = vadd.f32 %v7399_v46, %v7398_v14  ;;  %v7401_v62 = vpop.f32.mrb[166].mxu1 }
 0x45b   : > { %v10510_v48 = vadd.f32 %v7306_v3, %v10394_v15  ;;  %v7309_v36 = vadd.f32 %v7308_v31, %v7307_v16  ;;  %v7402_v23 = vpop.f32.mrb[167].mxu1 }
 0x45c   : > { %v7403_v40 = vadd.f32 %v7402_v23, %v7401_v62  ;;  %v10516_v34 = vadd.f32 %v7400_v42, %v10473_v60  ;;  %v7902_v42 = vld [vmem:[%s11802_s7 + $0x58] sm:$0xff]  }
 0x45d   : > { %v10513_v20 = vadd.f32 %v7309_v36, %v10396_v25  ;;  %7464 = vmatprep.subr.bf16.mxu1 %v7902_v42 }
 0x45e   : > { %v10518_v33 = vadd.f32 %v7403_v40, %v4349_v17  ;;  %v10536_v40 = vld [vmem:[#allocation2 + $0x20] sm:$0xff] }
 0x45f   : > { %v7310_v13 = vpop.f32.mrb[188].mxu0 }
 0x460   : > { %12012 = vst [vmem:[#allocation45_spill] sm:$0xff] %v10518_v33  ;;  %v7311_v38 = vpop.f32.mrb[189].mxu0  ;;  %v7404_v15 = vpop.f32.mrb[168].mxu1 }
 0x461   : > { %v7312_v29 = vadd.f32 %v7311_v38, %v7310_v13  ;;  %v7313_v49 = vpop.f32.mrb[190].mxu0  ;;  %v7405_v5 = vpop.f32.mrb[169].mxu1 }
 0x462   : > { %v7314_v26 = vpop.f32.mrb[191].mxu0  ;;  %v7406_v3 = vadd.f32 %v7405_v5, %v7404_v15  ;;  %v7407_v25 = vpop.f32.mrb[170].mxu1  ;;  %v10545_v5 = vld [vmem:[#allocation2 + $0x50] sm:$0xff] }
 0x463   : > { %v10521_v27 = vadd.f32 %v7312_v29, %v10400_v43  ;;  %v7315_v6 = vadd.f32 %v7314_v26, %v7313_v49  ;;  %v7408_v16 = vpop.f32.mrb[171].mxu1  ;;  %v7903_v43 = vld [vmem:[%s11802_s7 + $0x18] sm:$0xff]  }
 0x464   : > { %v7409_v60 = vadd.f32 %v7408_v16, %v7407_v25  ;;  %v10526_v31 = vadd.f32 %v7406_v3, %v4354_v39  ;;  %7465 = vmatpush3.bf16.msra.mxu1 %v7903_v43  ;;  %v4764_v3 = vunpack.c.l.bf16 %v10536_v40  ;;  %v4765_v16 = vunpack.c.h.bf16 %v10536_v40  ;;  %v10561_v43 = vld [vmem:[#allocation2 + $0x98] sm:$0xff] }
 0x465   : > { %v10524_v14 = vadd.f32 %v7315_v6, %v10402_v24  ;;  %v10538_v24 = vld [vmem:[#allocation2 + $0x8] sm:$0xff] }
 0x466   : > { %v10528_v46 = vadd.f32 %v7409_v60, %v4357_v61  ;;  %v10540_v61 = vld [vmem:[#allocation2 + $0x38] sm:$0xff]  ;;  %v10547_v6 = vld [vmem:[#allocation2 + $0x68] sm:$0xff]  ;;  %v4763_v60 = vunpack.c.h.bf16 %v10538_v24 }
 0x467   : > { %v7316_v17 = vpop.f32.mrb[192].mxu0 }
 0x468   : > { %v7317_v36 = vpop.f32.mrb[193].mxu0  ;;  %v7410_v39 = vpop.f32.mrb[172].mxu1 }
 0x469   : > { %v7318_v62 = vadd.f32 %v7317_v36, %v7316_v17  ;;  %v7319_v23 = vpop.f32.mrb[194].mxu0  ;;  %v7411_v38 = vpop.f32.mrb[173].mxu1  ;;  %v10553_v36 = vld [vmem:[#allocation2 + $0x80] sm:$0xff] }
 0x46a   : > { %v7320_v13 = vpop.f32.mrb[195].mxu0  ;;  %v7412_v15 = vadd.f32 %v7411_v38, %v7410_v39  ;;  %v7413_v26 = vpop.f32.mrb[174].mxu1 }
 0x46b   : > { %v10543_v29 = vadd.f32 %v7318_v62, %v10415_v58  ;;  %v7321_v49 = vadd.f32 %v7320_v13, %v7319_v23  ;;  %v7414_v17 = vpop.f32.mrb[175].mxu1  ;;  %v10559_v23 = vld [vmem:[#allocation2 + $0xb0] sm:$0xff] }
 0x46c   : > { %v7415_v42 = vadd.f32 %v7414_v17, %v7413_v26  ;;  %v10564_v39 = vadd.f32 %v7412_v15, %v10494_v52 }
 0x46d   : > { %v10556_v58 = vadd.f32 %v7321_v49, %v10417_v1  ;;  %v10570_v1 = vld [vmem:[#allocation2 + $0xe0] sm:$0xff] }
 0x46e   : > { %12013 = vst [vmem:[#allocation46_spill] sm:$0xff] %v10564_v39  ;;  %v10578_v52 = vadd.f32 %v7415_v42, %v10497_v63  ;;  %v10599_v39 = vld [vmem:[#allocation2 + $0x140] sm:$0xff] }
 0x46f   : > { %v7676_v49 = vpop.f32.mrb[196].mxu0  ;;  %12016 = vst [vmem:[#allocation49_spill] sm:$0xff] %v10599_v39 }
 0x470   : > { %12014 = vst [vmem:[#allocation47_spill] sm:$0xff] %v10578_v52  ;;  %v4596_v15 = vadd.f32 %v7676_v49, %v10430_v45  ;;  %v4587_v13 = vpop.f32.mrb[197].mxu0  ;;  %v7416_v62 = vpop.f32.mrb[176].mxu1  ;;  %v10590_v45 = vld [vmem:[#allocation2 + $0x110] sm:$0xff] }
 0x471   : > { %v4588_v17 = vadd.f32 %v4587_v13, %v10424_v41  ;;  %v7677_v26 = vpop.f32.mrb[198].mxu0  ;;  %v7417_v55 = vpop.f32.mrb[177].mxu1  ;;  %v10595_v41 = vld [vmem:[#allocation2 + $0x128] sm:$0xff] }
 0x472   : > { %v4716_v49 = vmax.f32 %v4596_v15, 0.0  ;;  %v4599_v38 = vadd.f32 %v7677_v26, %v10432_v35  ;;  %v4590_v25 = vpop.f32.mrb[199].mxu0  ;;  %12015 = vst [vmem:[#allocation48_spill] sm:$0xff] %v10595_v41  ;;  %v7418_v52 = vadd.f32 %v7417_v55, %v7416_v62  ;;  %v7419_v63 = vpop.f32.mrb[178].mxu1  ;;  %v10612_v35 = vld [vmem:[#allocation2 + $0x170] sm:$0xff]  ;;  %v12019_v26 = vunpack.c.l.bf16 %v10538_v24 }
 0x473   : > { %v4714_v13 = vmax.f32 %v4588_v17, 0.0  ;;  %v4591_v51 = vadd.f32 %v4590_v25, %v10426_v30  ;;  %v7420_v59 = vpop.f32.mrb[179].mxu1  ;;  %v10608_v30 = vld [vmem:[#allocation2 + $0x158] sm:$0xff]  ;;  %12018 = vst [vmem:[#allocation51_spill] sm:$0xff] %v10612_v35  ;;  %v5014_v41 = vld [vmem:[#allocation2 + $0x30] sm:$0xff] }
 0x474   : > { %v4717_v15 = vmax.f32 %v4599_v38, 0.0  ;;  %v7421_v33 = vadd.f32 %v7420_v59, %v7419_v63  ;;  %v10605_v17 = vadd.f32 %v7418_v52, %v10510_v48  ;;  %12017 = vst [vmem:[#allocation50_spill] sm:$0xff] %v10608_v30  ;;  %v4796_v25 = vsub.f32 %v4716_v49, %v4764_v3 }
 0x475   : > { %v4715_v8 = vmax.f32 %v4591_v51, 0.0  ;;  %v4794_v40 = vsub.f32 %v4714_v13, %v12019_v26 }
 0x476   : > { %v4797_v62 = vsub.f32 %v4717_v15, %v4765_v16  ;;  %v10617_v48 = vadd.f32 %v7421_v33, %v10513_v20 }
 0x477   : > { %v4795_v51 = vsub.f32 %v4715_v8, %v4763_v60  ;;  %v7680_v59 = vpop.f32.mrb[200].mxu0  ;;  %v12023_v8 = vunpack.c.l.bf16 %v10540_v61 }
 0x478   : > { %v4827_v63 = vpack.c.bf16 %v4797_v62, %v4796_v25  ;;  %v4612_v3 = vadd.f32 %v7680_v59, %v10442_v54  ;;  %v4603_v16 = vpop.f32.mrb[201].mxu0  ;;  %v7422_v13 = vpop.f32.mrb[180].mxu1 }
 0x479   : > { %v4826_v42 = vpack.c.bf16 %v4795_v51, %v4794_v40  ;;  %v4604_v55 = vadd.f32 %v4603_v16, %v10436_v32  ;;  %v7681_v24 = vpop.f32.mrb[202].mxu0  ;;  %v7423_v25 = vpop.f32.mrb[181].mxu1 }
 0x47a   : > { %5453 = vst.msk [vmem:[#allocation2 + $0x20] sm:$0xff] %vm12020_vm9, %v4827_v63  ;;  %v4720_v33 = vmax.f32 %v4612_v3, 0.0  ;;  %v4615_v60 = vadd.f32 %v7681_v24, %v10444_v0  ;;  %v4606_v54 = vpop.f32.mrb[203].mxu0  ;;  %5755 = vrot.lane.b32.xlu1 %v4827_v63, %s7984_s27  ;;  %5074 = vrot.lane.b32.xlu0 %v4827_v63, %s7983_s22  ;;  %v4899_v26 = vshrl.u32 %v4827_v63, 16  ;;  %v4902_v40 = vshll.u32 %v4827_v63, 16  ;;  %v7425_v59 = vpop.f32.mrb[182].mxu1  ;;  %vm12035_vm9 = vmmov %vm12034_vm0 }
 0x47b   : > { %5452 = vst.msk [vmem:[#allocation2 + $0x8] sm:$0xff] %vm12021_vm5, %v4826_v42  ;;  %v4718_v32 = vmax.f32 %v4604_v55, 0.0  ;;  %v4607_v62 = vadd.f32 %v4606_v54, %v10438_v56  ;;  %v7424_v51 = vadd.f32 %v7423_v25, %v7422_v13  ;;  %v4892_v16 = vshrl.u32 %v4826_v42, 16  ;;  %v7426_v49 = vpop.f32.mrb[183].mxu1  ;;  %vm12038_vm5 = vmmov %vm12034_vm0 }
 0x47c   : > { %v12022_v3 = vunpack.c.l.bf16 %v10545_v5  ;;  %v4721_v0 = vmax.f32 %v4615_v60, 0.0  ;;  %v5183_v24 = vrot.slane %v4902_v40, 1  ;;  %v4901_v20 = vrot.slane %v4899_v26, 7 }
 0x47d   : > { %v4798_v52 = vsub.f32 %v4718_v32, %v12023_v8  ;;  %v4719_v63 = vmax.f32 %v4607_v62, 0.0  ;;  %v7427_v38 = vadd.f32 %v7426_v49, %v7425_v59  ;;  %v4895_v30 = vshll.u32 %v4826_v42, 16 }
 0x47e   : > { %v4800_v15 = vsub.f32 %v4720_v33, %v12022_v3  ;;  %v12024_v55 = vunpack.c.h.bf16 %v10545_v5  ;;  %5072 = vrot.lane.b32.xlu0 %v4826_v42, %s7983_s22  ;;  %v5184_v56 = vor.u32 %v5183_v24, %v4899_v26  ;;  %v4904_v13 = vor.u32 %v4902_v40, %v4901_v20  ;;  %v5879_v3 = vld [vmem:[#allocation2 + $0x10] sm:$0xff] }
 0x47f   : > { %v4894_v54 = vrot.slane %v4892_v16, 7  ;;  %v12025_v33 = vunpack.c.h.bf16 %v10540_v61  ;;  %v7684_v25 = vpop.f32.mrb[204].mxu0  ;;  %v5181_v39 = vrot.slane %v4895_v30, 1  ;;  %v10642_v8 = vadd.f32 %v7424_v51, %v10521_v27 }
 0x480   : > { %v4801_v35 = vsub.f32 %v4721_v0, %v12024_v55  ;;  %v10645_v49 = vadd.f32 %v7427_v38, %v10524_v14  ;;  %v4628_v42 = vadd.f32 %v7684_v25, %v10456_v57  ;;  %v4619_v26 = vpop.f32.mrb[205].mxu0  ;;  %5520 = vrot.lane.b32.xlu1 %v5184_v56, %s7983_s22  ;;  %v5880_v61 = vsel %vm8265_vm3, %v5184_v56, %v5879_v3  ;;  %v7428_v38 = vpop.f32.mrb[184].mxu1 }
 0x481   : > { %v4799_v60 = vsub.f32 %v4719_v63, %v12025_v33  ;;  %v5015_v20 = vsel %vm8272_vm4, %v4904_v13, %v5014_v41  ;;  %v4620_v27 = vadd.f32 %v4619_v26, %v10448_v9  ;;  %5881 = vst [vmem:[#allocation2 + $0x10] sm:$0xff] %v5880_v61  ;;  %v7685_v14 = vpop.f32.mrb[206].mxu0  ;;  %7710 = vmatprep.mubr.msk.bf16.mxu0 %vm12026_vm10, %v5880_v61  ;;  %v12029_v0 = vunpack.c.l.bf16 %v10553_v36  ;;  %vm12041_vm10 = vmmov %vm12034_vm0 }
 0x482   : > { %v10647_v5 = vpack.c.bf16 %v4801_v35, %v4800_v15  ;;  %5016 = vst [vmem:[#allocation2 + $0x30] sm:$0xff] %v5015_v20  ;;  %v10658_v35 = vor.u32 %v5181_v39, %v4892_v16  ;;  %v4897_v57 = vor.u32 %v4895_v30, %v4894_v54  ;;  %v4724_v15 = vmax.f32 %v4628_v42, 0.0  ;;  %v4622_v41 = vpop.f32.mrb[207].mxu0  ;;  %5213 = vrot.lane.b32.xlu0 %v5184_v56, %s7985_s17  ;;  %v5011_v16 = vld [vmem:[#allocation2 + $0x18] sm:$0xff] }
 0x483   : > { %v10655_v40 = vpack.c.bf16 %v4799_v60, %v4798_v52  ;;  %v4631_v32 = vadd.f32 %v7685_v14, %v10458_v4  ;;  %v7429_v52 = vpop.f32.mrb[185].mxu1  ;;  %v4722_v30 = vmax.f32 %v4620_v27, 0.0  ;;  %v4623_v59 = vadd.f32 %v4622_v41, %v10450_v18 }
 0x484   : > { %5455 = vst.msk [vmem:[#allocation2 + $0x50] sm:$0xff] %vm12027_vm12, %v10647_v5  ;;  %v4913_v9 = vshrl.u32 %v10647_v5, 16  ;;  %v4916_v62 = vshll.u32 %v10647_v5, 16  ;;  %v7431_v4 = vpop.f32.mrb[186].mxu1  ;;  %v4804_v24 = vsub.f32 %v4724_v15, %v12029_v0  ;;  %5663 = vrot.lane.b32.xlu1 %v4904_v13, %s7985_s17  ;;  %v5012_v55 = vsel %vm8272_vm4, %v4897_v57, %v5011_v16  ;;  %vm12042_vm12 = vmmov %vm12034_vm0 }
 0x485   : > { %v4906_v39 = vshrl.u32 %v10655_v40, 16  ;;  %v4909_v51 = vshll.u32 %v10655_v40, 16  ;;  %5454 = vst.msk [vmem:[#allocation2 + $0x38] sm:$0xff] %vm12028_vm7, %v10655_v40  ;;  %v4725_v63 = vmax.f32 %v4631_v32, 0.0  ;;  %v7430_v56 = vadd.f32 %v7429_v52, %v7428_v38  ;;  %v7432_v54 = vpop.f32.mrb[187].mxu1  ;;  %5013 = vst [vmem:[#allocation2 + $0x18] sm:$0xff] %v5012_v55 }
 0x486   : > { %v12030_v60 = vunpack.c.l.bf16 %v10547_v6  ;;  %v4723_v3 = vmax.f32 %v4623_v59, 0.0  ;;  %v7433_v18 = vadd.f32 %v7432_v54, %v7431_v4  ;;  %v12031_v42 = vunpack.c.h.bf16 %v10553_v36  ;;  %5358 = vrot.lane.b32.xlu0 %v4904_v13, %s7984_s27  ;;  %vm12043_vm7 = vmmov %vm12034_vm0 }
 0x487   : > { %v5185_v33 = vrot.slane %v4909_v51, 1  ;;  %v5187_v61 = vrot.slane %v4916_v62, 1  ;;  %v4915_v20 = vrot.slane %v4913_v9, 7  ;;  %v4908_v27 = vrot.slane %v4906_v39, 7  ;;  %v7688_v32 = vpop.f32.mrb[208].mxu0 }
 0x488   : > { %v4802_v25 = vsub.f32 %v4722_v30, %v12030_v60  ;;  %v4805_v26 = vsub.f32 %v4725_v63, %v12031_v42  ;;  %v12032_v38 = vunpack.c.h.bf16 %v10547_v6  ;;  %v10687_v41 = vadd.f32 %v7430_v56, %v10543_v29  ;;  %v5882_v30 = vld [vmem:[#allocation2 + $0x28] sm:$0xff]  ;;  %v4635_v59 = vpop.f32.mrb[209].mxu0  ;;  %5518 = vrot.lane.b32.xlu1 %v10658_v35, %s7983_s22  ;;  %v7904_v29 = vld [vmem:[%s11802_s7 + $0x60] sm:$0xff]  }
 0x489   : > { %v10682_v14 = vor.u32 %v5185_v33, %v4906_v39  ;;  %v10690_v52 = vadd.f32 %v7433_v18, %v10556_v58  ;;  %v4644_v13 = vadd.f32 %v7688_v32, %v10476_v11  ;;  %v10697_v39 = vor.u32 %v5187_v61, %v4913_v9  ;;  %v7905_v58 = vld [vmem:[%s11802_s7 + $0x20] sm:$0xff]   ;;  %v7689_v9 = vpop.f32.mrb[210].mxu0  ;;  %7466 = vmatprep.subr.bf16.mxu1 %v7904_v29  ;;  %v5891_v29 = vld [vmem:[#allocation2 + $0x70] sm:$0xff] }
 0x48a   : > { %v4803_v15 = vsub.f32 %v4723_v3, %v12032_v38  ;;  %v10692_v36 = vpack.c.bf16 %v4805_v26, %v4804_v24  ;;  %v10699_v6 = vor.u32 %v4916_v62, %v4915_v20  ;;  %v4636_v4 = vadd.f32 %v4635_v59, %v10468_v21  ;;  %v4638_v56 = vpop.f32.mrb[211].mxu0  ;;  %5356 = vrot.lane.b32.xlu0 %v4897_v57, %s7984_s27  ;;  %v5885_v60 = vld [vmem:[#allocation2 + $0x40] sm:$0xff] }
 0x48b   : > { %v5883_v11 = vsel %vm8265_vm3, %v10682_v14, %v5882_v30  ;;  %v10713_v0 = vor.u32 %v4909_v51, %v4908_v27  ;;  %v4728_v63 = vmax.f32 %v4644_v13, 0.0  ;;  %v4647_v55 = vadd.f32 %v7689_v9, %v10478_v7  ;;  %v5020_v42 = vld [vmem:[#allocation2 + $0x60] sm:$0xff]  ;;  %7467 = vmatpush3.bf16.msra.mxu1 %v7905_v58 }
 0x48c   : > { %v10710_v16 = vpack.c.bf16 %v4803_v15, %v4802_v25  ;;  %5884 = vst [vmem:[#allocation2 + $0x28] sm:$0xff] %v5883_v11  ;;  %v4927_v62 = vshrl.u32 %v10692_v36, 16  ;;  %v4930_v24 = vshll.u32 %v10692_v36, 16  ;;  %5457 = vst.msk [vmem:[#allocation2 + $0x80] sm:$0xff] %vm12033_vm6, %v10692_v36  ;;  %7711 = vmatmul.mubr.msk.bf16.vlgmr.msra.gmra.mrb[228].mxu0 %vm12034_vm0, %v5883_v11  ;;  %v4726_v54 = vmax.f32 %v4636_v4, 0.0  ;;  %5211 = vrot.lane.b32.xlu1 %v10658_v35, %s7985_s17  ;;  %v5017_v35 = vld [vmem:[#allocation2 + $0x48] sm:$0xff] }
 0x48d   : > { %v4639_v33 = vadd.f32 %v4638_v56, %v10470_v47  ;;  %v12036_v7 = vunpack.c.l.bf16 %v10559_v23  ;;  %v4729_v18 = vmax.f32 %v4647_v55, 0.0  ;;  %v5886_v57 = vsel %vm8265_vm3, %v10697_v39, %v5885_v60  ;;  %v5471_v26 = vld [vmem:[#allocation2 + $0x20] sm:$0x80]  ;;  %v5888_v56 = vld [vmem:[#allocation2 + $0x58] sm:$0xff]  ;;  %vm12044_vm6 = vmmov %vm12034_vm0 }
 0x48e   : > { %v4920_v21 = vshrl.u32 %v10710_v16, 16  ;;  %v4923_v51 = vshll.u32 %v10710_v16, 16  ;;  %5456 = vst.msk [vmem:[#allocation2 + $0x68] sm:$0xff] %vm12035_vm9, %v10710_v16  ;;  %v5191_v25 = vrot.slane %v4930_v24, 1  ;;  %v12037_v47 = vunpack.c.l.bf16 %v10561_v43  ;;  %5887 = vst [vmem:[#allocation2 + $0x40] sm:$0xff] %v5886_v57  ;;  %7714 = vmatprep.mubr.msk.bf16.mxu0 %vm12038_vm5, %v5886_v57  ;;  %5076 = vrot.lane.b32.xlu0 %v10655_v40, %s7983_s22 }
 0x48f   : > { %v4808_v3 = vsub.f32 %v4728_v63, %v12036_v7  ;;  %v4727_v27 = vmax.f32 %v4639_v33, 0.0  ;;  %v5021_v38 = vsel %vm8272_vm4, %v10699_v6, %v5020_v42  ;;  %v12039_v32 = vunpack.c.h.bf16 %v10559_v23  ;;  %v7692_v9 = vpop.f32.mrb[212].mxu0  ;;  %vm12049_vm9 = vmmov %vm12034_vm0 }
 0x490   : > { %v5189_v61 = vrot.slane %v4923_v51, 1  ;;  %v4806_v20 = vsub.f32 %v4726_v54, %v12037_v47  ;;  %v10740_v15 = vor.u32 %v5191_v25, %v4927_v62  ;;  %5022 = vst [vmem:[#allocation2 + $0x60] sm:$0xff] %v5021_v38  ;;  %v5018_v13 = vsel %vm8272_vm4, %v10713_v0, %v5017_v35  ;;  %v4651_v33 = vpop.f32.mrb[213].mxu0  ;;  %5078 = vrot.lane.b32.xlu1 %v10647_v5, %s7983_s22  ;;  %v5026_v47 = vld [vmem:[#allocation2 + $0x90] sm:$0xff]  ;;  %vm12050_vm5 = vmmov %vm12034_vm0 }
 0x491   : > { %v4809_v30 = vsub.f32 %v4729_v18, %v12039_v32  ;;  %v4929_v59 = vrot.slane %v4927_v62, 7  ;;  %v12040_v11 = vunpack.c.h.bf16 %v10561_v43  ;;  %5019 = vst [vmem:[#allocation2 + $0x48] sm:$0xff] %v5018_v13  ;;  %v4922_v63 = vrot.slane %v4920_v21, 7  ;;  %v7693_v7 = vpop.f32.mrb[214].mxu0  ;;  %v5133_v13 = vld [vmem:[#allocation2] sm:$0x80] }
 0x492   : > { %v10749_v58 = vor.u32 %v5189_v61, %v4920_v21  ;;  %v5472_v23 = vsel %vm8284_vm11, 0, %v5471_v26  ;;  %v5892_v55 = vsel %vm8265_vm3, %v10740_v15, %v5891_v29  ;;  %v4660_v62 = vadd.f32 %v7692_v9, %v10499_v50  ;;  %v4654_v42 = vpop.f32.mrb[215].mxu0  ;;  %5524 = vrot.lane.b32.xlu0 %v10697_v39, %s7983_s22 }
 0x493   : > { %v4807_v4 = vsub.f32 %v4727_v27, %v12040_v11  ;;  %v10758_v54 = vpack.c.bf16 %v4809_v30, %v4808_v3  ;;  %v10763_v43 = vor.u32 %v4930_v24, %v4929_v59  ;;  %5473 = vst [vmem:[#allocation2 + $0x20] sm:$0x80] %v5472_v23  ;;  %5893 = vst [vmem:[#allocation2 + $0x70] sm:$0xff] %v5892_v55  ;;  %v12045_v27 = vunpack.c.l.bf16 %v10570_v1  ;;  %v5468_v30 = vld [vmem:[#allocation2 + $0x8] sm:$0x80] }
 0x494   : > { %v5889_v21 = vsel %vm8265_vm3, %v10749_v58, %v5888_v56  ;;  %v4652_v25 = vadd.f32 %v4651_v33, %v10489_v12  ;;  %v10771_v3 = vor.u32 %v4923_v51, %v4922_v63  ;;  %v4732_v24 = vmax.f32 %v4660_v62, 0.0  ;;  %5759 = vrot.lane.b32.xlu1 %v10647_v5, %s7984_s27  ;;  %v5897_v56 = vld [vmem:[#allocation2 + $0xa0] sm:$0xff] }
 0x495   : > { %v10768_v60 = vpack.c.bf16 %v4807_v4, %v4806_v20  ;;  %5890 = vst [vmem:[#allocation2 + $0x58] sm:$0xff] %v5889_v21  ;;  %v4941_v50 = vshrl.u32 %v10758_v54, 16  ;;  %v4944_v18 = vshll.u32 %v10758_v54, 16  ;;  %5459 = vst.msk [vmem:[#allocation2 + $0xb0] sm:$0xff] %vm12041_vm10, %v10758_v54  ;;  %v4663_v57 = vadd.f32 %v7693_v7, %v10501_v19  ;;  %7715 = vmatmul.mubr.msk.bf16.gmra.mrb[232].mxu0 %vm12042_vm12, %v5889_v21  ;;  %v5023_v19 = vld [vmem:[#allocation2 + $0x78] sm:$0xff] }
 0x496   : > { %v4730_v26 = vmax.f32 %v4652_v25, 0.0  ;;  %v4655_v61 = vadd.f32 %v4654_v42, %v10491_v10  ;;  %7718 = vmatprep.mubr.msk.bf16.mxu0 %vm12044_vm6, %v5892_v55  ;;  %v4812_v38 = vsub.f32 %v4732_v24, %v12045_v27  ;;  %v5027_v32 = vsel %vm8272_vm4, %v10763_v43, %v5026_v47  ;;  %5217 = vrot.lane.b32.xlu0 %v10697_v39, %s7985_s17  ;;  %v5894_v24 = vld [vmem:[#allocation2 + $0x88] sm:$0xff]  ;;  %vm12052_vm10 = vmmov %vm12034_vm0 }
 0x497   : > { %v4934_v12 = vshrl.u32 %v10768_v60, 16  ;;  %v4937_v51 = vshll.u32 %v10768_v60, 16  ;;  %5458 = vst.msk [vmem:[#allocation2 + $0x98] sm:$0xff] %vm12043_vm7, %v10768_v60  ;;  %v5195_v20 = vrot.slane %v4944_v18, 1  ;;  %v4733_v35 = vmax.f32 %v4663_v57, 0.0  ;;  %5028 = vst [vmem:[#allocation2 + $0x90] sm:$0xff] %v5027_v32 }
 0x498   : > { %v12046_v10 = vunpack.c.l.bf16 %v10575_v44  ;;  %v4731_v11 = vmax.f32 %v4655_v61, 0.0  ;;  %v5024_v4 = vsel %vm8272_vm4, %v10771_v3, %v5023_v19  ;;  %v12047_v5 = vunpack.c.h.bf16 %v10570_v1  ;;  %v7696_v25 = vpop.f32.mrb[216].mxu0  ;;  %5757 = vrot.lane.b32.xlu1 %v10655_v40, %s7984_s27  ;;  %vm12059_vm12 = vmmov %vm12034_vm0 }
 0x499   : > { %v5193_v59 = vrot.slane %v4937_v51, 1  ;;  %v10799_v9 = vor.u32 %v5195_v20, %v4941_v50  ;;  %5025 = vst [vmem:[#allocation2 + $0x78] sm:$0xff] %v5024_v4  ;;  %v4943_v23 = vrot.slane %v4941_v50, 7  ;;  %v4936_v55 = vrot.slane %v4934_v12, 7  ;;  %v4667_v42 = vpop.f32.mrb[217].mxu0  ;;  %vm12060_vm7 = vmmov %vm12034_vm0 }
 0x49a   : > { %v4810_v29 = vsub.f32 %v4730_v26, %v12046_v10  ;;  %v4813_v63 = vsub.f32 %v4733_v35, %v12047_v5  ;;  %v12048_v33 = vunpack.c.h.bf16 %v10575_v44  ;;  %v5469_v7 = vsel %vm8284_vm11, 0, %v5468_v30  ;;  %v7697_v47 = vpop.f32.mrb[218].mxu0  ;;  %5362 = vrot.lane.b32.xlu0 %v10699_v6, %s7984_s27  ;;  %v12051_v35 = vld [vmem:[#allocation45_spill] sm:$0xff]  ;;  %v5032_v30 = vld [vmem:[#allocation2 + $0xc0] sm:$0xff]  ;;  %vm12061_vm6 = vmmov %vm12034_vm0 }
 0x49b   : > { %v10805_v62 = vor.u32 %v5193_v59, %v4934_v12  ;;  %v5134_v1 = vsel %vm8221_vm13, 0, %v5133_v13  ;;  %v5898_v39 = vsel %vm8265_vm3, %v10799_v9, %v5897_v56  ;;  %v4676_v57 = vadd.f32 %v7696_v25, %v10526_v31  ;;  %5470 = vst [vmem:[#allocation2 + $0x8] sm:$0x80] %v5469_v7  ;;  %v4670_v27 = vpop.f32.mrb[219].mxu0  ;;  %v5301_v4 = vld [vmem:[#allocation2] sm:$0x1] }
 0x49c   : > { %v4811_v21 = vsub.f32 %v4731_v11, %v12048_v33  ;;  %v10816_v50 = vpack.c.bf16 %v4813_v63, %v4812_v38  ;;  %v10821_v44 = vor.u32 %v4944_v18, %v4943_v23  ;;  %5135 = vst [vmem:[#allocation2] sm:$0x80] %v5134_v1  ;;  %5899 = vst [vmem:[#allocation2 + $0xa0] sm:$0xff] %v5898_v39  ;;  %v12053_v59 = vunpack.c.l.bf16 %v10590_v45  ;;  %v5477_v5 = vld [vmem:[#allocation2 + $0x50] sm:$0x80] }
 0x49d   : > { %v5895_v12 = vsel %vm8265_vm3, %v10805_v62, %v5894_v24  ;;  %v4668_v61 = vadd.f32 %v4667_v42, %v10516_v34  ;;  %v10829_v19 = vor.u32 %v4937_v51, %v4936_v55  ;;  %v4736_v18 = vmax.f32 %v4676_v57, 0.0  ;;  %5667 = vrot.lane.b32.xlu1 %v10699_v6, %s7985_s17  ;;  %v5903_v24 = vld [vmem:[#allocation2 + $0xd0] sm:$0xff] }
 0x49e   : > { %v10826_v26 = vpack.c.bf16 %v4811_v21, %v4810_v29  ;;  %5896 = vst [vmem:[#allocation2 + $0x88] sm:$0xff] %v5895_v12  ;;  %v4955_v31 = vshrl.u32 %v10816_v50, 16  ;;  %v4958_v40 = vshll.u32 %v10816_v50, 16  ;;  %5461 = vst.msk [vmem:[#allocation2 + $0xe0] sm:$0xff] %vm12034_vm0, %v10816_v50  ;;  %v4679_v20 = vadd.f32 %v7697_v47, %v10528_v46  ;;  %7719 = vmatmul.mubr.msk.bf16.gmra.mrb[236].mxu0 %vm12049_vm9, %v5895_v12  ;;  %v5029_v46 = vld [vmem:[#allocation2 + $0xa8] sm:$0xff] }
 0x49f   : > { %v4734_v38 = vmax.f32 %v4668_v61, 0.0  ;;  %v4671_v32 = vadd.f32 %v4670_v27, %v12051_v35  ;;  %7722 = vmatprep.mubr.msk.bf16.mxu0 %vm12052_vm10, %v5898_v39  ;;  %v4816_v10 = vsub.f32 %v4736_v18, %v12053_v59  ;;  %v5033_v11 = vsel %vm8272_vm4, %v10821_v44, %v5032_v30  ;;  %5522 = vrot.lane.b32.xlu0 %v10682_v14, %s7983_s22  ;;  %v7906_v39 = vld [vmem:[%s11802_s7 + $0x68] sm:$0xff]   ;;  %v7700_v61 = vpop.f32.mrb[220].mxu0  ;;  %v5900_v27 = vld [vmem:[#allocation2 + $0xb8] sm:$0xff]  ;;  %vm12069_vm9 = vmmov %vm12034_vm0 }
 0x4a0   : > { %v4948_v34 = vshrl.u32 %v10826_v26, 16  ;;  %v4951_v51 = vshll.u32 %v10826_v26, 16  ;;  %5460 = vst.msk [vmem:[#allocation2 + $0xc8] sm:$0xff] %vm12050_vm5, %v10826_v26  ;;  %v5199_v13 = vrot.slane %v4958_v40, 1  ;;  %v4737_v29 = vmax.f32 %v4679_v20, 0.0  ;;  %5034 = vst [vmem:[#allocation2 + $0xc0] sm:$0xff] %v5033_v11  ;;  %7468 = vmatprep.subr.bf16.mxu1 %v7906_v39 }
 0x4a1   : > { %v12054_v23 = vunpack.c.l.bf16 %v10584_v2  ;;  %v4735_v56 = vmax.f32 %v4671_v32, 0.0  ;;  %v5030_v33 = vsel %vm8272_vm4, %v10829_v19, %v5029_v46  ;;  %v12055_v6 = vunpack.c.h.bf16 %v10590_v45  ;;  %5665 = vrot.lane.b32.xlu1 %v10713_v0, %s7985_s17  ;;  %v7908_v32 = vld [vmem:[%s11802_s7 + $0x70] sm:$0xff]   ;;  %vm12070_vm5 = vmmov %vm12034_vm0 }
 0x4a2   : > { %v5197_v63 = vrot.slane %v4951_v51, 1  ;;  %v10857_v21 = vor.u32 %v5199_v13, %v4955_v31  ;;  %5031 = vst [vmem:[#allocation2 + $0xa8] sm:$0xff] %v5030_v33  ;;  %v4957_v7 = vrot.slane %v4955_v31, 7  ;;  %v4950_v1 = vrot.slane %v4948_v34, 7  ;;  %v7907_v31 = vld [vmem:[%s11802_s7 + $0x28] sm:$0xff]   ;;  %v5038_v33 = vld [vmem:[#allocation2 + $0xf0] sm:$0xff]  ;;  %vm12071_vm10 = vmmov %vm12034_vm0 }
 0x4a3   : > { %v4814_v55 = vsub.f32 %v4734_v38, %v12054_v23  ;;  %v4817_v25 = vsub.f32 %v4737_v29, %v12055_v6  ;;  %v12056_v42 = vunpack.c.h.bf16 %v10584_v2  ;;  %v5302_v45 = vsel %vm8232_vm15, 0, %v5301_v4  ;;  %v4683_v38 = vpop.f32.mrb[221].mxu0  ;;  %5215 = vrot.lane.b32.xlu0 %v10682_v14, %s7985_s17  ;;  %7469 = vmatpush3.bf16.msra.mxu1 %v7907_v31 }
 0x4a4   : > { %v10866_v57 = vor.u32 %v5197_v63, %v4948_v34  ;;  %v5478_v18 = vsel %vm8284_vm11, 0, %v5477_v5  ;;  %v5904_v20 = vsel %vm8265_vm3, %v10857_v21, %v5903_v24  ;;  %v4692_v2 = vadd.f32 %v7700_v61, %v10605_v17  ;;  %5303 = vst [vmem:[#allocation2] sm:$0x1] %v5302_v45  ;;  %v12058_v17 = vld [vmem:[#allocation46_spill] sm:$0xff]  ;;  %v7701_v59 = vpop.f32.mrb[222].mxu0  ;;  %7470 = vmatprep.subr.bf16.mxu1 %v7908_v32  ;;  %v12065_v61 = vld [vmem:[#allocation48_spill] sm:$0xff] }
 0x4a5   : > { %v4815_v12 = vsub.f32 %v4735_v56, %v12056_v42  ;;  %v10880_v34 = vpack.c.bf16 %v4817_v25, %v4816_v10  ;;  %v10885_v35 = vor.u32 %v4958_v40, %v4957_v7  ;;  %5479 = vst [vmem:[#allocation2 + $0x50] sm:$0x80] %v5478_v18  ;;  %5905 = vst [vmem:[#allocation2 + $0xd0] sm:$0xff] %v5904_v20  ;;  %v4686_v5 = vpop.f32.mrb[223].mxu0  ;;  %v12063_v25 = vld [vmem:[#allocation49_spill] sm:$0xff]  ;;  %5082 = vrot.lane.b32.xlu1 %v10692_v36, %s7983_s22 }
 0x4a6   : > { %v5901_v30 = vsel %vm8265_vm3, %v10866_v57, %v5900_v27  ;;  %v4684_v13 = vadd.f32 %v4683_v38, %v12058_v17  ;;  %v10896_v10 = vor.u32 %v4951_v51, %v4950_v1  ;;  %v4740_v11 = vmax.f32 %v4692_v2, 0.0  ;;  %v5474_v24 = vld [vmem:[#allocation2 + $0x38] sm:$0x80]  ;;  %v5483_v42 = vld [vmem:[#allocation2 + $0x80] sm:$0x80]  ;;  %v7909_v27 = vld [vmem:[%s11802_s7 + $0x30] sm:$0xff]  }
 0x4a7   : > { %v10893_v46 = vpack.c.bf16 %v4815_v12, %v4814_v55  ;;  %5902 = vst [vmem:[#allocation2 + $0xb8] sm:$0xff] %v5901_v30  ;;  %v4969_v40 = vshrl.u32 %v10880_v34, 16  ;;  %v4972_v29 = vshll.u32 %v10880_v34, 16  ;;  %5463 = vst.msk [vmem:[#allocation2 + $0x110] sm:$0xff] %vm12059_vm12, %v10880_v34  ;;  %v4695_v4 = vadd.f32 %v7701_v59, %v10617_v48  ;;  %7723 = vmatmul.mubr.msk.bf16.gmra.mrb[240].mxu0 %vm12060_vm7, %v5901_v30  ;;  %v12062_v55 = vld [vmem:[#allocation47_spill] sm:$0xff]  ;;  %v5035_v48 = vld [vmem:[#allocation2 + $0xd8] sm:$0xff] }
 0x4a8   : > { %v4738_v23 = vmax.f32 %v4684_v13, 0.0  ;;  %v4687_v56 = vadd.f32 %v4686_v5, %v12062_v55  ;;  %7726 = vmatprep.mubr.msk.bf16.mxu0 %vm12034_vm0, %v5904_v20  ;;  %v12064_v14 = vunpack.c.l.bf16 %v12063_v25  ;;  %v5039_v39 = vsel %vm8272_vm4, %v10885_v35, %v5038_v33  ;;  %v7910_v2 = vld [vmem:[%s11802_s7 + $0x78] sm:$0xff]   ;;  %5360 = vrot.lane.b32.xlu0 %v10713_v0, %s7984_s27  ;;  %v5909_v59 = vld [vmem:[#allocation2 + $0x100] sm:$0xff]  ;;  %v5906_v33 = vld [vmem:[#allocation2 + $0xe8] sm:$0xff] }
 0x4a9   : > { %v4962_v51 = vshrl.u32 %v10893_v46, 16  ;;  %v4965_v63 = vshll.u32 %v10893_v46, 16  ;;  %5462 = vst.msk [vmem:[#allocation2 + $0xf8] sm:$0xff] %vm12061_vm6, %v10893_v46  ;;  %v5203_v6 = vrot.slane %v4972_v29, 1  ;;  %v4741_v1 = vmax.f32 %v4695_v4, 0.0  ;;  %5040 = vst [vmem:[#allocation2 + $0xf0] sm:$0xff] %v5039_v39  ;;  %7471 = vmatpush3.bf16.msra.mxu1 %v7909_v27  ;;  %5763 = vrot.lane.b32.xlu1 %v10692_v36, %s7984_s27 }
 0x4aa   : > { %v4820_v7 = vsub.f32 %v4740_v11, %v12064_v14  ;;  %v12066_v45 = vunpack.c.l.bf16 %v12065_v61  ;;  %v4739_v31 = vmax.f32 %v4687_v56, 0.0  ;;  %v5036_v20 = vsel %vm8272_vm4, %v10896_v10, %v5035_v48  ;;  %7472 = vmatprep.subr.bf16.mxu1 %v7910_v2  ;;  %vm12072_vm12 = vmmov %vm12034_vm0 }
 0x4ab   : > { %v5201_v12 = vrot.slane %v4965_v63, 1  ;;  %v10930_v38 = vor.u32 %v5203_v6, %v4969_v40  ;;  %v12067_v32 = vunpack.c.h.bf16 %v12063_v25  ;;  %5037 = vst [vmem:[#allocation2 + $0xd8] sm:$0xff] %v5036_v20  ;;  %v4964_v17 = vrot.slane %v4962_v51, 7  ;;  %v7911_v25 = vld [vmem:[%s11802_s7 + $0x38] sm:$0xff]   ;;  %v12073_v20 = vld [vmem:[#allocation51_spill] sm:$0xff]  ;;  %vm12079_vm7 = vmmov %vm12034_vm0 }
 0x4ac   : > { %v4818_v18 = vsub.f32 %v4738_v23, %v12066_v45  ;;  %v4971_v13 = vrot.slane %v4969_v40, 7  ;;  %v12068_v4 = vunpack.c.h.bf16 %v12065_v61  ;;  %v7704_v23 = vpop.f32.mrb[224].mxu0  ;;  %v5475_v55 = vsel %vm8284_vm11, 0, %v5474_v24  ;;  %5528 = vrot.lane.b32.xlu0 %v10740_v15, %s7983_s22  ;;  %vm12080_vm6 = vmmov %vm12034_vm0 }
 0x4ad   : > { %v4821_v30 = vsub.f32 %v4741_v1, %v12067_v32  ;;  %v10936_v11 = vor.u32 %v5201_v12, %v4962_v51  ;;  %v5484_v56 = vsel %vm8284_vm11, 0, %v5483_v42  ;;  %v5910_v0 = vsel %vm8265_vm3, %v10930_v38, %v5909_v59  ;;  %v4699_v48 = vpop.f32.mrb[225].mxu0  ;;  %5476 = vst [vmem:[#allocation2 + $0x38] sm:$0x80] %v5475_v55  ;;  %7473 = vmatpush3.bf16.msra.mxu1 %v7911_v25  ;;  %v12075_v59 = vld [vmem:[#allocation50_spill] sm:$0xff] }
 0x4ae   : > { %v4819_v5 = vsub.f32 %v4739_v31, %v12068_v4  ;;  %v4708_v51 = vadd.f32 %v7704_v23, %v10687_v41  ;;  %v10952_v6 = vor.u32 %v4965_v63, %v4964_v17  ;;  %5485 = vst [vmem:[#allocation2 + $0x80] sm:$0x80] %v5484_v56  ;;  %5911 = vst [vmem:[#allocation2 + $0x100] sm:$0xff] %v5910_v0  ;;  %v7705_v1 = vpop.f32.mrb[226].mxu0  ;;  %v12074_v27 = vunpack.c.l.bf16 %v12073_v20  ;;  %v5480_v17 = vld [vmem:[#allocation2 + $0x68] sm:$0x80] }
 0x4af   : > { %v10947_v40 = vpack.c.bf16 %v4821_v30, %v4820_v7  ;;  %v5907_v14 = vsel %vm8265_vm3, %v10936_v11, %v5906_v33  ;;  %v4700_v41 = vadd.f32 %v4699_v48, %v10642_v8  ;;  %v10963_v39 = vor.u32 %v4972_v29, %v4971_v13  ;;  %v4702_v12 = vpop.f32.mrb[227].mxu0  ;;  %5080 = vrot.lane.b32.xlu1 %v10710_v16, %s7983_s22  ;;  %v5489_v13 = vld [vmem:[#allocation2 + $0xb0] sm:$0x80]  ;;  %v5486_v25 = vld [vmem:[#allocation2 + $0x98] sm:$0x80] }
 0x4b0   : > { %v10960_v7 = vpack.c.bf16 %v4819_v5, %v4818_v18  ;;  %5908 = vst [vmem:[#allocation2 + $0xe8] sm:$0xff] %v5907_v14  ;;  %v4744_v24 = vmax.f32 %v4708_v51, 0.0  ;;  %v4711_v42 = vadd.f32 %v7705_v1, %v10690_v52  ;;  %7727 = vmatmul.mubr.msk.bf16.gmra.mrb[244].mxu0 %vm12070_vm5, %v5907_v14  ;;  %v4703_v45 = vadd.f32 %v4702_v12, %v10645_v49  ;;  %v5041_v18 = vld [vmem:[#allocation2 + $0x108] sm:$0xff]  ;;  %v5044_v52 = vld [vmem:[#allocation2 + $0x120] sm:$0xff]  ;;  %vm12082_vm5 = vmmov %vm12034_vm0 }
 0x4b1   : > { %v4983_v36 = vshrl.u32 %v10947_v40, 16  ;;  %v4986_v63 = vshll.u32 %v10947_v40, 16  ;;  %5465 = vst.msk [vmem:[#allocation2 + $0x140] sm:$0xff] %vm12069_vm9, %v10947_v40  ;;  %v4742_v61 = vmax.f32 %v4700_v41, 0.0  ;;  %7730 = vmatprep.mubr.msk.bf16.mxu0 %vm12072_vm12, %v5910_v0  ;;  %v5042_v30 = vsel %vm8272_vm4, %v10952_v6, %v5041_v18  ;;  %5221 = vrot.lane.b32.xlu0 %v10740_v15, %s7985_s17  ;;  %v5495_v14 = vld [vmem:[#allocation2 + $0xe0] sm:$0x80]  ;;  %vm12081_vm9 = vmmov %vm12034_vm0 }
 0x4b2   : > { %v4976_v8 = vshrl.u32 %v10960_v7, 16  ;;  %v4979_v29 = vshll.u32 %v10960_v7, 16  ;;  %5464 = vst.msk [vmem:[#allocation2 + $0x128] sm:$0xff] %vm12071_vm10, %v10960_v7  ;;  %v4824_v2 = vsub.f32 %v4744_v24, %v12074_v27  ;;  %v4745_v32 = vmax.f32 %v4711_v42, 0.0  ;;  %5043 = vst [vmem:[#allocation2 + $0x108] sm:$0xff] %v5042_v30  ;;  %v5915_v41 = vld [vmem:[#allocation2 + $0x130] sm:$0xff] }
 0x4b3   : > { %v5207_v31 = vrot.slane %v4986_v63, 1  ;;  %v12076_v4 = vunpack.c.l.bf16 %v12075_v59  ;;  %v4743_v23 = vmax.f32 %v4703_v45, 0.0  ;;  %v5045_v55 = vsel %vm8272_vm4, %v10963_v39, %v5044_v52  ;;  %v5912_v24 = vld [vmem:[#allocation2 + $0x118] sm:$0xff]  ;;  %5761 = vrot.lane.b32.xlu1 %v10710_v16, %s7984_s27  ;;  %v5501_v27 = vld [vmem:[#allocation2 + $0x110] sm:$0x80]  ;;  %vm12083_vm10 = vmmov %vm12034_vm0 }
 0x4b4   : > { %v5205_v49 = vrot.slane %v4979_v29, 1  ;;  %v12077_v0 = vunpack.c.h.bf16 %v12073_v20  ;;  %5046 = vst [vmem:[#allocation2 + $0x120] sm:$0xff] %v5045_v55  ;;  %v4978_v51 = vrot.slane %v4976_v8, 7  ;;  %v4985_v48 = vrot.slane %v4983_v36, 7  ;;  %v5492_v20 = vld [vmem:[#allocation2 + $0xc8] sm:$0x80] }
 0x4b5   : > { %v4822_v5 = vsub.f32 %v4742_v61, %v12076_v4  ;;  %v10991_v56 = vor.u32 %v5207_v31, %v4983_v36  ;;  %v12078_v42 = vunpack.c.h.bf16 %v12075_v59  ;;  %v5047_v61 = vld [vmem:[#allocation2 + $0x138] sm:$0xff]  ;;  %v5481_v45 = vsel %vm8284_vm11, 0, %v5480_v17  ;;  %v5050_v31 = vld [vmem:[#allocation2 + $0x150] sm:$0xff]  ;;  %5366 = vrot.lane.b32.xlu0 %v10763_v43, %s7984_s27 }
 0x4b6   : > { %v4825_v33 = vsub.f32 %v4745_v32, %v12077_v0  ;;  %v10997_v1 = vor.u32 %v5205_v49, %v4976_v8  ;;  %v5490_v18 = vsel %vm8284_vm11, 0, %v5489_v13  ;;  %v11012_v8 = vor.u32 %v4979_v29, %v4978_v51  ;;  %5482 = vst [vmem:[#allocation2 + $0x68] sm:$0x80] %v5481_v45 }
 0x4b7   : > { %v4823_v12 = vsub.f32 %v4743_v23, %v12078_v42  ;;  %v5916_v15 = vsel %vm8265_vm3, %v10991_v56, %v5915_v41  ;;  %v11014_v52 = vor.u32 %v4986_v63, %v4985_v48  ;;  %5491 = vst [vmem:[#allocation2 + $0xb0] sm:$0x80] %v5490_v18  ;;  %v5496_v16 = vsel %vm8284_vm11, 0, %v5495_v14  ;;  %v5498_v63 = vld [vmem:[#allocation2 + $0xf8] sm:$0x80]  ;;  %5671 = vrot.lane.b32.xlu1 %v10763_v43, %s7985_s17 }
 0x4b8   : > { %v11008_v36 = vpack.c.bf16 %v4825_v33, %v4824_v2  ;;  %5917 = vst [vmem:[#allocation2 + $0x130] sm:$0xff] %v5916_v15  ;;  %v5913_v32 = vsel %vm8265_vm3, %v10997_v1, %v5912_v24  ;;  %v5487_v2 = vsel %vm8284_vm11, 0, %v5486_v25  ;;  %v5507_v29 = vld [vmem:[#allocation2 + $0x140] sm:$0x80]  ;;  %v5048_v49 = vsel %vm8272_vm4, %v11012_v8, %v5047_v61  ;;  %5497 = vst [vmem:[#allocation2 + $0xe0] sm:$0x80] %v5496_v16 }
 0x4b9   : > { %v11019_v30 = vpack.c.bf16 %v4823_v12, %v4822_v5  ;;  %5914 = vst [vmem:[#allocation2 + $0x118] sm:$0xff] %v5913_v32  ;;  %7731 = vmatmul.mubr.msk.bf16.gmra.mrb[248].mxu0 %vm12080_vm6, %v5913_v32  ;;  %v5051_v59 = vsel %vm8272_vm4, %v11014_v52, %v5050_v31  ;;  %5488 = vst [vmem:[#allocation2 + $0x98] sm:$0x80] %v5487_v2  ;;  %v5504_v4 = vld [vmem:[#allocation2 + $0x128] sm:$0x80]  ;;  %v5493_v55 = vsel %vm8284_vm11, 0, %v5492_v20  ;;  %5526 = vrot.lane.b32.xlu0 %v10749_v58, %s7983_s22 }
 0x4ba   : > { %v5350_v17 = vshrl.u32 %v11008_v36, 16  ;;  %v5353_v13 = vshll.u32 %v11008_v36, 16  ;;  %5467 = vst.msk [vmem:[#allocation2 + $0x170] sm:$0xff] %vm12079_vm7, %v11008_v36  ;;  %7734 = vmatprep.mubr.msk.bf16.mxu0 %vm12081_vm9, %v5916_v15  ;;  %5049 = vst [vmem:[#allocation2 + $0x138] sm:$0xff] %v5048_v49  ;;  %v5502_v0 = vsel %vm8284_vm11, 0, %v5501_v27  ;;  %v5499_v48 = vsel %vm8284_vm11, 0, %v5498_v63 }
 0x4bb   : > { %v4990_v5 = vshrl.u32 %v11019_v30, 16  ;;  %v4993_v23 = vshll.u32 %v11019_v30, 16  ;;  %5466 = vst.msk [vmem:[#allocation2 + $0x158] sm:$0xff] %vm12034_vm0, %v11019_v30  ;;  %5052 = vst [vmem:[#allocation2 + $0x150] sm:$0xff] %v5051_v59  ;;  %v5508_v25 = vsel %vm8284_vm11, 0, %v5507_v29  ;;  %v5505_v24 = vsel %vm8284_vm11, 0, %v5504_v4  ;;  %5669 = vrot.lane.b32.xlu1 %v10771_v3, %s7985_s17 }
 0x4bc   : > { %v5516_v33 = vrot.slane %v5353_v13, 1  ;;  %v5352_v51 = vrot.slane %v5350_v17, 7  ;;  %5494 = vst [vmem:[#allocation2 + $0xc8] sm:$0x80] %v5493_v55  ;;  %5503 = vst [vmem:[#allocation2 + $0x110] sm:$0x80] %v5502_v0 }
 0x4bd   : > { %v5209_v14 = vrot.slane %v4993_v23, 1  ;;  %v4992_v41 = vrot.slane %v4990_v5, 7  ;;  %5500 = vst [vmem:[#allocation2 + $0xf8] sm:$0x80] %v5499_v48  ;;  %5509 = vst [vmem:[#allocation2 + $0x140] sm:$0x80] %v5508_v25  ;;  %5219 = vrot.lane.b32.xlu0 %v10749_v58, %s7985_s17 }
 0x4be   : > { %v11055_v42 = vor.u32 %v5516_v33, %v5350_v17  ;;  %v11059_v43 = vor.u32 %v5353_v13, %v5352_v51  ;;  %5506 = vst [vmem:[#allocation2 + $0x128] sm:$0x80] %v5505_v24  ;;  %v5921_v12 = vld [vmem:[#allocation2 + $0x160] sm:$0xff]  ;;  %v5918_v15 = vld [vmem:[#allocation2 + $0x148] sm:$0xff]  ;;  %vm12094_vm6 = vcmask 1048320  }
 0x4bf   : > { %v11061_v61 = vor.u32 %v5209_v14, %v4990_v5  ;;  %v11063_v45 = vor.u32 %v4993_v23, %v4992_v41  ;;  %v5053_v31 = vld [vmem:[#allocation2 + $0x168] sm:$0xff]  ;;  %5086 = vrot.lane.b32.xlu1 %v10758_v54, %s7983_s22  ;;  %v5575_v14 = vld [vmem:[#allocation2 + $0x50] sm:$0xff]  ;;  %vm12095_vm0 = vmmov %vm12094_vm6 }
 0x4c0   : > { %v5922_v18 = vsel %vm8265_vm3, %v11055_v42, %v5921_v12  ;;  %v11568_v29 = vld [vmem:[%s11803_s8] ss:$0 sm:$0xff] }
 0x4c1   : > { %5923 = vst [vmem:[#allocation2 + $0x160] sm:$0xff] %v5922_v18  ;;  %v5919_v20 = vsel %vm8265_vm3, %v11061_v61, %v5918_v15  ;;  %v5054_v27 = vsel %vm8272_vm4, %v11063_v45, %v5053_v31  ;;  %v5513_v32 = vld [vmem:[#allocation2 + $0x170] sm:$0x80]  ;;  %5364 = vrot.lane.b32.xlu0 %v10771_v3, %s7984_s27  ;;  %vm12084_vm3 = vcmask 523520  }
 0x4c2   : > { %5920 = vst [vmem:[#allocation2 + $0x148] sm:$0xff] %v5919_v20  ;;  %7735 = vmatmul.mubr.msk.bf16.gmra.mrb[252].mxu0 %vm12082_vm5, %v5919_v20  ;;  %5055 = vst [vmem:[#allocation2 + $0x168] sm:$0xff] %v5054_v27  ;;  %v5510_v2 = vld [vmem:[#allocation2 + $0x158] sm:$0x80]  ;;  %v5514_v16 = vsel %vm8284_vm11, 0, %v5513_v32 }
 0x4c3   : > { %7738 = vmatprep.mubr.msk.bf16.mxu0 %vm12083_vm10, %v5922_v18  ;;  %v5511_v22 = vsel %vm8284_vm11, 0, %v5510_v2  ;;  %5515 = vst [vmem:[#allocation2 + $0x170] sm:$0x80] %v5514_v16  ;;  %5767 = vrot.lane.b32.xlu1 %v10758_v54, %s7984_s27  ;;  %vm12085_vm4 = vmmov %vm12084_vm3  ;;  %v5569_v54 = vld [vmem:[#allocation2 + $0x20] sm:$0xff] }
 0x4c4   : > { %5512 = vst [vmem:[#allocation2 + $0x158] sm:$0x80] %v5511_v22  ;;  %vm12090_vm11 = vmmov %vm12084_vm3 }
 0x4c5   : > { %5532 = vrot.lane.b32.xlu0 %v10799_v9, %s7983_s22  ;;  %vm12091_vm12 = vmmov %vm12084_vm3 }
 0x4c6   : > { %vm12096_vm9 = vmmov %vm12084_vm3 }
 0x4c7   : > { %5084 = vrot.lane.b32.xlu1 %v10768_v60, %s7983_s22  ;;  %vm12097_vm5 = vmmov %vm12084_vm3 }
 0x4c8   : > { %vm12098_vm10 = vmmov %vm12095_vm0 }
 0x4c9   : > { %5225 = vrot.lane.b32.xlu0 %v10799_v9, %s7985_s17 }
 0x4cb   : > { %5765 = vrot.lane.b32.xlu1 %v10768_v60, %s7984_s27 }
 0x4cd   : > { %5370 = vrot.lane.b32.xlu0 %v10821_v44, %s7984_s27 }
 0x4cf   : > { %5675 = vrot.lane.b32.xlu1 %v10821_v44, %s7985_s17 }
 0x4d1   : > { %5530 = vrot.lane.b32.xlu0 %v10805_v62, %s7983_s22 }
 0x4d3   : > { %5673 = vrot.lane.b32.xlu1 %v10829_v19, %s7985_s17 }
 0x4d5   : > { %5223 = vrot.lane.b32.xlu0 %v10805_v62, %s7985_s17 }
 0x4d7   : > { %5090 = vrot.lane.b32.xlu1 %v10816_v50, %s7983_s22 }
 0x4d9   : > { %5368 = vrot.lane.b32.xlu0 %v10829_v19, %s7984_s27 }
 0x4db   : > { %5771 = vrot.lane.b32.xlu1 %v10816_v50, %s7984_s27 }
 0x4dd   : > { %5536 = vrot.lane.b32.xlu0 %v10857_v21, %s7983_s22 }
 0x4df   : > { %5088 = vrot.lane.b32.xlu1 %v10826_v26, %s7983_s22 }
 0x4e1   : > { %5229 = vrot.lane.b32.xlu0 %v10857_v21, %s7985_s17 }
 0x4e3   : > { %5769 = vrot.lane.b32.xlu1 %v10826_v26, %s7984_s27 }
 0x4e5   : > { %5374 = vrot.lane.b32.xlu0 %v10885_v35, %s7984_s27 }
 0x4e7   : > { %5679 = vrot.lane.b32.xlu1 %v10885_v35, %s7985_s17  ;;  %v5566_v35 = vld [vmem:[#allocation2 + $0x8] sm:$0xff] }
 0x4e9   : > { %5534 = vrot.lane.b32.xlu0 %v10866_v57, %s7983_s22 }
 0x4eb   : > { %5677 = vrot.lane.b32.xlu1 %v10896_v10, %s7985_s17 }
 0x4ec   : > { %v5075_v28 = vpop.permute.xlu0 %5074  ;;  %v11135_v37 = vpop.permute.xlu1 %5755 }
 0x4ed   : > { %5227 = vrot.lane.b32.xlu0 %v10866_v57, %s7985_s17  ;;  %5118 = vst.msk [vmem:[#allocation2 + $0x30] sm:$0xff] %vm12084_vm3, %v5075_v28  ;;  %vm12099_vm3 = vcmask 261120  }
 0x4ef   : > { %5094 = vrot.lane.b32.xlu1 %v10880_v34, %s7983_s22 }
 0x4f0   : > { %v5073_v58 = vpop.permute.xlu0 %5072 }
 0x4f1   : > { %5372 = vrot.lane.b32.xlu0 %v10896_v10, %s7984_s27  ;;  %5117 = vst.msk [vmem:[#allocation2 + $0x18] sm:$0xff] %vm12085_vm4, %v5073_v58  ;;  %v5404_v10 = vld [vmem:[#allocation2] sm:$0xff]  ;;  %v12092_v58 = vld [vmem:[#allocation17_spill] sm:$0xff]  ;;  %vm12100_vm4 = vmmov %vm12095_vm0 }
 0x4f2   : > { %v5521_v60 = vpop.permute.xlu1 %5520  ;;  %vm12093_vm7 = vnez %v12092_v58 }
 0x4f3   : > { %5092 = vrot.lane.b32.xlu1 %v10893_v46, %s7983_s22  ;;  %v5570_v9 = vsel %vm8804_vm14, %v5521_v60, %v5569_v54 }
 0x4f4   : > { %v5139_v62 = vld [vmem:[#allocation2 + $0x30] sm:$0x80]  ;;  %5571 = vst [vmem:[#allocation2 + $0x20] sm:$0xff] %v5570_v9  ;;  %v5214_v50 = vpop.permute.xlu0 %5213 }
 0x4f5   : > { %5540 = vrot.lane.b32.xlu0 %v10930_v38, %s7983_s22  ;;  %v5140_v44 = vsel %vm8221_vm13, 0, %v5139_v62 }
 0x4f6   : > { %5141 = vst [vmem:[#allocation2 + $0x30] sm:$0x80] %v5140_v44  ;;  %v11150_v26 = vpop.permute.xlu1 %5663 }
 0x4f7   : > { %5773 = vrot.lane.b32.xlu1 %v10893_v46, %s7984_s27 }
 0x4f8   : > { %v5136_v19 = vld [vmem:[#allocation2 + $0x18] sm:$0x80]  ;;  %v11154_v21 = vpop.permute.xlu0 %5358 }
 0x4f9   : > { %5233 = vrot.lane.b32.xlu0 %v10930_v38, %s7985_s17  ;;  %v5137_v57 = vsel %vm8221_vm13, 0, %v5136_v19 }
 0x4fa   : > { %5138 = vst [vmem:[#allocation2 + $0x18] sm:$0x80] %v5137_v57  ;;  %v5519_v46 = vpop.permute.xlu1 %5518 }
 0x4fb   : > { %5681 = vrot.lane.b32.xlu1 %v10952_v6, %s7985_s17  ;;  %v5618_v63 = vld [vmem:[#allocation2 + $0x20] sm:$0x1]  ;;  %v5567_v38 = vsel %vm8804_vm14, %v5519_v46, %v5566_v35 }
 0x4fc   : > { %v5619_v17 = vsel %vm8823_vm2, 0, %v5618_v63  ;;  %5568 = vst [vmem:[#allocation2 + $0x8] sm:$0xff] %v5567_v38  ;;  %v5357_v13 = vpop.permute.xlu0 %5356 }
 0x4fd   : > { %5538 = vrot.lane.b32.xlu0 %v10936_v11, %s7983_s22  ;;  %5620 = vst [vmem:[#allocation2 + $0x20] sm:$0x1] %v5619_v17  ;;  %v5259_v49 = vld [vmem:[#allocation2 + $0x30] sm:$0xff]  ;;  %v11170_v4 = vsel %vm8847_vm1, %v5357_v13, %v5404_v10 }
 0x4fe   : > { %v5260_v23 = vsel %vm8831_vm8, %v5214_v50, %v5259_v49  ;;  %5406 = vst [vmem:[#allocation2] sm:$0xff] %v11170_v4  ;;  %v5212_v55 = vpop.permute.xlu1 %5211  ;;  %v5572_v50 = vld [vmem:[#allocation2 + $0x38] sm:$0xff] }
 0x4ff   : > { %5098 = vrot.lane.b32.xlu1 %v10947_v40, %s7983_s22  ;;  %5261 = vst [vmem:[#allocation2 + $0x30] sm:$0xff] %v5260_v23 }
 0x500   : > { %v5077_v0 = vpop.permute.xlu0 %5076 }
 0x501   : > { %5231 = vrot.lane.b32.xlu0 %v10936_v11, %s7985_s17  ;;  %v5256_v33 = vld [vmem:[#allocation2 + $0x18] sm:$0xff]  ;;  %5119 = vst.msk [vmem:[#allocation2 + $0x48] sm:$0xff] %vm12090_vm11, %v5077_v0  ;;  %vm12101_vm11 = vmmov %vm12097_vm5 }
 0x502   : > { %v5257_v51 = vsel %vm8831_vm8, %v5212_v55, %v5256_v33  ;;  %v5079_v48 = vpop.permute.xlu1 %5078  ;;  %v5581_v33 = vld [vmem:[#allocation2 + $0x80] sm:$0xff] }
 0x503   : > { %5096 = vrot.lane.b32.xlu1 %v10960_v7, %s7983_s22  ;;  %v5615_v25 = vld [vmem:[#allocation2 + $0x8] sm:$0x1]  ;;  %5258 = vst [vmem:[#allocation2 + $0x18] sm:$0xff] %v5257_v51  ;;  %5120 = vst.msk [vmem:[#allocation2 + $0x60] sm:$0xff] %vm12091_vm12, %v5079_v48 }
 0x504   : > { %v5616_v11 = vsel %vm8823_vm2, 0, %v5615_v25  ;;  %v5525_v41 = vpop.permute.xlu0 %5524  ;;  %v5711_v19 = vld [vmem:[#allocation2 + $0x20] sm:$0xff]  ;;  %vm12102_vm12 = vmmov %vm12097_vm5 }
 0x505   : > { %5376 = vrot.lane.b32.xlu0 %v10952_v6, %s7984_s27  ;;  %5617 = vst [vmem:[#allocation2 + $0x8] sm:$0x1] %v5616_v11  ;;  %v5576_v24 = vsel %vm8804_vm14, %v5525_v41, %v5575_v14 }
 0x506   : > { %v5307_v12 = vld [vmem:[#allocation2 + $0x30] sm:$0x1]  ;;  %5577 = vst [vmem:[#allocation2 + $0x50] sm:$0xff] %v5576_v24  ;;  %v11191_v18 = vpop.permute.xlu1 %5759 }
 0x507   : > { %5683 = vrot.lane.b32.xlu1 %v10963_v39, %s7985_s17  ;;  %v5308_v6 = vsel %vm8232_vm15, 0, %v5307_v12 }
 0x508   : > { %5309 = vst [vmem:[#allocation2 + $0x30] sm:$0x1] %v5308_v6  ;;  %v5142_v15 = vld [vmem:[#allocation2 + $0x48] sm:$0x80]  ;;  %v5218_v31 = vpop.permute.xlu0 %5217 }
 0x509   : > { %5544 = vrot.lane.b32.xlu0 %v10991_v56, %s7983_s22  ;;  %v5143_v20 = vsel %vm8221_vm13, 0, %v5142_v15 }
 0x50a   : > { %v5304_v27 = vld [vmem:[#allocation2 + $0x18] sm:$0x1]  ;;  %5144 = vst [vmem:[#allocation2 + $0x48] sm:$0x80] %v5143_v20  ;;  %v5145_v32 = vld [vmem:[#allocation2 + $0x60] sm:$0x80]  ;;  %v5758_v2 = vpop.permute.xlu1 %5757 }
 0x50b   : > { %5775 = vrot.lane.b32.xlu1 %v10880_v34, %s7984_s27  ;;  %v5305_v16 = vsel %vm8232_vm15, 0, %v5304_v27  ;;  %v5146_v22 = vsel %vm8221_vm13, 0, %v5145_v32 }
 0x50c   : > { %v5708_v28 = vld [vmem:[#allocation2 + $0x8] sm:$0xff]  ;;  %5306 = vst [vmem:[#allocation2 + $0x18] sm:$0x1] %v5305_v16  ;;  %5147 = vst [vmem:[#allocation2 + $0x60] sm:$0x80] %v5146_v22  ;;  %v11207_v34 = vpop.permute.xlu0 %5362 }
 0x50d   : > { %5542 = vrot.lane.b32.xlu0 %v10997_v1, %s7983_s22  ;;  %v5709_v54 = vsel %vm12093_vm7, %v11150_v26, %v5708_v28  ;;  %v5624_v60 = vld [vmem:[#allocation2 + $0x50] sm:$0x1]  ;;  %v5578_v28 = vld [vmem:[#allocation2 + $0x68] sm:$0xff] }
 0x50e   : > { %5710 = vst [vmem:[#allocation2 + $0x8] sm:$0xff] %v5709_v54  ;;  %v5625_v9 = vsel %vm8823_vm2, 0, %v5624_v60 }
 0x50f   : > { %5685 = vrot.lane.b32.xlu1 %v11012_v8, %s7985_s17  ;;  %v11216_v62 = vpop.permute.xlu1 %5667  ;;  %5800 = vst.msk [vmem:[#allocation2 + $0x8] sm:$0xff] %vm12094_vm6, %v11135_v37  ;;  %5626 = vst [vmem:[#allocation2 + $0x50] sm:$0x1] %v5625_v9  ;;  %v5410_v13 = vld [vmem:[#allocation2 + $0x30] sm:$0xff]  ;;  %v5971_v9 = vld [vmem:[#allocation2 + $0x178] sm:$0xff] }
 0x510   : > { %7739 = vmatmul.mubr.msk.bf16.gmra.mrb[0].mxu0 %vm12099_vm3, %v5971_v9  ;;  %vm12103_vm6 = vmmov %vm12095_vm0  ;;  %v5593_v9 = vld [vmem:[#allocation2 + $0xe0] sm:$0xff] }
 0x511   : > { %5378 = vrot.lane.b32.xlu0 %v10963_v39, %s7984_s27  ;;  %v5523_v44 = vpop.permute.xlu0 %5522  ;;  %v5262_v38 = vld [vmem:[#allocation2 + $0x48] sm:$0xff]  ;;  %vm12106_vm3 = vmmov %vm12095_vm0 }
 0x512   : > { %v5573_v26 = vsel %vm8804_vm14, %v5523_v44, %v5572_v50 }
 0x513   : > { %5100 = vrot.lane.b32.xlu1 %v11019_v30, %s7983_s22  ;;  %5574 = vst [vmem:[#allocation2 + $0x38] sm:$0xff] %v5573_v26  ;;  %v5666_v57 = vpop.permute.xlu1 %5665  ;;  %v5407_v35 = vld [vmem:[#allocation2 + $0x18] sm:$0xff]  ;;  %v5265_v39 = vld [vmem:[#allocation2 + $0x60] sm:$0xff] }
 0x514   : > { %v5712_v37 = vsel %vm12093_vm7, %v5666_v57, %v5711_v19  ;;  %v5408_v46 = vsel %vm8847_vm1, %v11154_v21, %v5407_v35  ;;  %v5266_v10 = vsel %vm8831_vm8, %v5218_v31, %v5265_v39 }
 0x515   : > { %5235 = vrot.lane.b32.xlu0 %v10997_v1, %s7985_s17  ;;  %5713 = vst [vmem:[#allocation2 + $0x20] sm:$0xff] %v5712_v37  ;;  %v5216_v63 = vpop.permute.xlu0 %5215  ;;  %5409 = vst [vmem:[#allocation2 + $0x18] sm:$0xff] %v5408_v46 }
 0x516   : > { %5267 = vst [vmem:[#allocation2 + $0x60] sm:$0xff] %v5266_v10  ;;  %5801 = vst.msk [vmem:[#allocation2 + $0x20] sm:$0xff] %vm12095_vm0, %v5758_v2  ;;  %v5263_v1 = vsel %vm8831_vm8, %v5216_v63, %v5262_v38  ;;  %v5925_v17 = vld [vmem:[#allocation2 + $0x8] sm:$0xff]  ;;  %v5587_v63 = vld [vmem:[#allocation2 + $0xb0] sm:$0xff] }
 0x517   : > { %5777 = vrot.lane.b32.xlu1 %v10960_v7, %s7984_s27  ;;  %5264 = vst [vmem:[#allocation2 + $0x48] sm:$0xff] %v5263_v1  ;;  %v5083_v21 = vpop.permute.xlu1 %5082  ;;  %6203 = vmatprep.mubr.bf16.mxu1 %v5925_v17 }
 0x518   : > { %5122 = vst.msk [vmem:[#allocation2 + $0x90] sm:$0xff] %vm12096_vm9, %v5083_v21  ;;  %6204 = vmatmul.mubr.bf16.vlgmr.msra.gmra.mrb[188].mxu1 %v11170_v4  ;;  %vm12104_vm9 = vmmov %vm12097_vm5 }
 0x519   : > { %5687 = vrot.lane.b32.xlu0 %v11014_v52, %s7985_s17 }
 0x51a   : > { %v5361_v7 = vpop.permute.xlu0 %5360  ;;  %v5621_v49 = vld [vmem:[#allocation2 + $0x38] sm:$0x1] }
 0x51b   : > { %5237 = vrot.lane.b32.xlu1 %v10991_v56, %s7985_s17  ;;  %v11248_v23 = vsel %vm8847_vm1, %v5361_v7, %v5410_v13  ;;  %v5622_v55 = vsel %vm8823_vm2, 0, %v5621_v49  ;;  %v11255_v0 = vpop.permute.xlu1 %5763 }
 0x51c   : > { %5412 = vst [vmem:[#allocation2 + $0x30] sm:$0xff] %v11248_v23  ;;  %5623 = vst [vmem:[#allocation2 + $0x38] sm:$0x1] %v5622_v55 }
 0x51d   : > { %5546 = vrot.lane.b32.xlu0 %v11061_v61, %s7983_s22  ;;  %v5313_v4 = vld [vmem:[#allocation2 + $0x60] sm:$0x1] }
 0x51e   : > { %v5529_v51 = vpop.permute.xlu0 %5528  ;;  %v5928_v56 = vld [vmem:[#allocation2 + $0x20] sm:$0xff]  ;;  %v5314_v48 = vsel %vm8232_vm15, 0, %v5313_v4  ;;  %v5310_v25 = vld [vmem:[#allocation2 + $0x48] sm:$0x1] }
 0x51f   : > { %5380 = vrot.lane.b32.xlu1 %v11012_v8, %s7984_s27  ;;  %v5582_v11 = vsel %vm8804_vm14, %v5529_v51, %v5581_v33  ;;  %6211 = vmatprep.mubr.bf16.mxu1 %v5928_v56  ;;  %5315 = vst [vmem:[#allocation2 + $0x60] sm:$0x1] %v5314_v48  ;;  %v5311_v14 = vsel %vm8232_vm15, 0, %v5310_v25  ;;  %v5151_v41 = vld [vmem:[#allocation2 + $0x90] sm:$0x80] }
 0x520   : > { %5583 = vst [vmem:[#allocation2 + $0x80] sm:$0xff] %v5582_v11  ;;  %5312 = vst [vmem:[#allocation2 + $0x48] sm:$0x1] %v5311_v14  ;;  %v5152_v8 = vsel %vm8221_vm13, 0, %v5151_v41  ;;  %6212 = vmatmul.mubr.bf16.gmra.mrb[192].mxu1 %v5408_v46 }
 0x521   : > { %5779 = vrot.lane.b32.xlu0 %v10947_v40, %s7984_s27  ;;  %v5081_v24 = vpop.permute.xlu1 %5080  ;;  %5153 = vst [vmem:[#allocation2 + $0x90] sm:$0x80] %v5152_v8  ;;  %v5584_v8 = vld [vmem:[#allocation2 + $0x98] sm:$0xff] }
 0x522   : > { %5121 = vst.msk [vmem:[#allocation2 + $0x78] sm:$0xff] %vm12097_vm5, %v5081_v24 }
 0x523   : > { %v5222_v12 = vpop.permute.xlu0 %5221  ;;  %5239 = vrot.lane.b32.xlu1 %v11061_v61, %s7985_s17  ;;  %v5714_v6 = vld [vmem:[#allocation2 + $0x38] sm:$0xff] }
 0x524   : > { %v5715_v40 = vsel %vm12093_vm7, %v11216_v62, %v5714_v6 }
 0x525   : > { %5689 = vrot.lane.b32.xlu0 %v11063_v45, %s7985_s17  ;;  %v5762_v15 = vpop.permute.xlu1 %5761  ;;  %5716 = vst [vmem:[#allocation2 + $0x38] sm:$0xff] %v5715_v40 }
 0x526   : > { %5802 = vst.msk [vmem:[#allocation2 + $0x38] sm:$0xff] %vm12098_vm10, %v11191_v18  ;;  %v5416_v35 = vld [vmem:[#allocation2 + $0x60] sm:$0xff]  ;;  %vm12105_vm10 = vmmov %vm12095_vm0 }
 0x527   : > { %v11277_v31 = vpop.permute.xlu0 %5366  ;;  %5382 = vrot.lane.b32.xlu1 %v11014_v52, %s7984_s27  ;;  %v5630_v61 = vld [vmem:[#allocation2 + $0x80] sm:$0x1]  ;;  %v5413_v20 = vld [vmem:[#allocation2 + $0x48] sm:$0xff] }
 0x528   : > { %v5631_v27 = vsel %vm8823_vm2, 0, %v5630_v61  ;;  %v5414_v16 = vsel %vm8847_vm1, %v11207_v34, %v5413_v20  ;;  %v5271_v18 = vld [vmem:[#allocation2 + $0x90] sm:$0xff] }
 0x529   : > { %v5148_v32 = vld [vmem:[#allocation2 + $0x78] sm:$0x80]  ;;  %5781 = vrot.lane.b32.xlu0 %v11019_v30, %s7984_s27  ;;  %v11287_v2 = vpop.permute.xlu1 %5671  ;;  %5632 = vst [vmem:[#allocation2 + $0x80] sm:$0x1] %v5631_v27  ;;  %5415 = vst [vmem:[#allocation2 + $0x48] sm:$0xff] %v5414_v16  ;;  %v5272_v22 = vsel %vm8831_vm8, %v5222_v12, %v5271_v18  ;;  %v5717_v34 = vld [vmem:[#allocation2 + $0x50] sm:$0xff] }
 0x52a   : > { %v5149_v52 = vsel %vm8221_vm13, 0, %v5148_v32  ;;  %5273 = vst [vmem:[#allocation2 + $0x90] sm:$0xff] %v5272_v22 }
 0x52b   : > { %5150 = vst [vmem:[#allocation2 + $0x78] sm:$0x80] %v5149_v52  ;;  %v5527_v54 = vpop.permute.xlu0 %5526  ;;  %5548 = vrot.lane.b32.xlu1 %v11055_v42, %s7983_s22  ;;  %s7922_s22 = sshll.u32 %s7986_s26, 4  ;;  %s7923_s22 = int_to_ptr.vmem [resolvable:$false] %s7922_s22 }
 0x52c   : > { %v5579_v30 = vsel %vm8804_vm14, %v5527_v54, %v5578_v28 }
 0x52d   : > { %5580 = vst [vmem:[#allocation2 + $0x68] sm:$0xff] %v5579_v30  ;;  %5691 = vrot.lane.b32.xlu0 %v11059_v43, %s7985_s17  ;;  %v5670_v60 = vpop.permute.xlu1 %5669  ;;  %v5931_v42 = vld [vmem:[#allocation2 + $0x38] sm:$0xff]  ;;  %s323_s17 = sand.u32 1, %s7972_s10  }
 0x52e   : > { %v5718_v62 = vsel %vm12093_vm7, %v5670_v60, %v5717_v34  ;;  %6219 = vmatprep.mubr.bf16.mxu1 %v5931_v42  ;;  %s6669_s28 = sshll.u32 %s323_s17, 8  ;;  %s11754_s13 = scalar_lea.sflag [#allocation5], %s323_s17 }
 0x52f   : > { %5719 = vst [vmem:[#allocation2 + $0x50] sm:$0xff] %v5718_v62  ;;  %v5220_v50 = vpop.permute.xlu0 %5219  ;;  %5384 = vrot.lane.b32.xlu1 %v11063_v45, %s7984_s27  ;;  %6220 = vmatmul.mubr.bf16.gmra.mrb[196].mxu1 %v11248_v23  ;;  %s11579_s29 = scalar_lea.vmem [#allocation4], %s6669_s28 }
 0x530   : > { %5803 = vst.msk [vmem:[#allocation2 + $0x50] sm:$0xff] %vm12100_vm4, %v5762_v15  ;;  %v5723_v40 = vld [vmem:[#allocation2 + $0x80] sm:$0xff]  ;;  %vm12107_vm4 = vmmov %vm12097_vm5  ;;  %s6603_s16 = sshll.u32 %s11579_s29, 4  ;;  %s11746_s16 = int_to_ptr.vmem [resolvable:$true] %s6603_s16 }
 0x531   : > { %5783 = vrot.lane.b32.xlu0 %v11008_v36, %s7984_s27  ;;  %v5087_v44 = vpop.permute.xlu1 %5086  ;;  %v5319_v19 = vld [vmem:[#allocation2 + $0x90] sm:$0x1]  ;;  %s7918_s25 = scalar_lea.vmem %s11746_s16, 4096  ;;  %p7925_p0 = scmp.lt.s32.totalorder %s11746_s16, %s7923_s22 }
 0x532   : > { %v5268_v26 = vld [vmem:[#allocation2 + $0x78] sm:$0xff]  ;;  %5124 = vst.msk [vmem:[#allocation2 + $0xc0] sm:$0xff] %vm12101_vm11, %v5087_v44  ;;  %v5320_v45 = vsel %vm8232_vm15, 0, %v5319_v19  ;;  %vm12108_vm11 = vmmov %vm12107_vm4  ;;  %p7919_p11 = scmp.ne.s32.totalorder %s11746_s16, %s7918_s25 }
 0x533   : > { %v5269_v57 = vsel %vm8831_vm8, %v5220_v50, %v5268_v26  ;;  %v5365_v39 = vpop.permute.xlu0 %5364  ;;  %5386 = vrot.lane.b32.xlu1 %v11059_v43, %s7984_s27  ;;  %5321 = vst [vmem:[#allocation2 + $0x90] sm:$0x1] %v5320_v45  ;;  %s7924_s27 = scalar_lea.vmem %s7923_s22, 8192 }
 0x534   : > { %v5627_v37 = vld [vmem:[#allocation2 + $0x68] sm:$0x1]  ;;  %5270 = vst [vmem:[#allocation2 + $0x78] sm:$0xff] %v5269_v57  ;;  %v5417_v36 = vsel %vm8847_vm1, %v5365_v39, %v5416_v35  ;;  %p7920_p12 = pnand %p7919_p11, %p8077_p5  ;;  %p7926_p1 = scmp.lt.s32.totalorder %s7924_s27, %s7918_s25 }
 0x535   : > { %v5628_v46 = vsel %vm8823_vm2, 0, %v5627_v37  ;;  %5418 = vst [vmem:[#allocation2 + $0x60] sm:$0xff] %v5417_v36  ;;  %v11322_v10 = vpop.permute.xlu1 %5767 }
 0x536   : > { %5629 = vst [vmem:[#allocation2 + $0x68] sm:$0x1] %v5628_v46  ;;  %p7921_p13 = pneg %p7920_p12  ;;  %p7927_p2 = por %p7926_p1, %p7925_p0 }
 0x537   : > { %v5533_v38 = vpop.permute.xlu0 %5532  ;;  %v5934_v1 = vld [vmem:[#allocation2 + $0x50] sm:$0xff] }
 0x538   : > { %v5588_v43 = vsel %vm8804_vm14, %v5533_v38, %v5587_v63  ;;  %6227 = vmatprep.mubr.bf16.mxu1 %v5934_v1  ;;  %p7928_p3 = pnand %p7927_p2, %p7921_p13 }
 0x539   : > { %v5157_v21 = vld [vmem:[#allocation2 + $0xc0] sm:$0x80]  ;;  %5589 = vst [vmem:[#allocation2 + $0xb0] sm:$0xff] %v5588_v43  ;;  %v5085_v17 = vpop.permute.xlu1 %5084  ;;  %6228 = vmatmul.mubr.bf16.gmra.mrb[200].mxu1 %v5414_v16 }
 0x53a   : > { %v5158_v13 = vsel %vm8221_vm13, 0, %v5157_v21  ;;  %5123 = vst.msk [vmem:[#allocation2 + $0xa8] sm:$0xff] %vm12102_vm12, %v5085_v17  ;;  %v5422_v22 = vld [vmem:[#allocation2 + $0x90] sm:$0xff]  ;;  %vm12109_vm12 = vmmov %vm12095_vm0 }
 0x53b   : > { %v5316_v7 = vld [vmem:[#allocation2 + $0x78] sm:$0x1]  ;;  %5159 = vst [vmem:[#allocation2 + $0xc0] sm:$0x80] %v5158_v13  ;;  %v5226_v49 = vpop.permute.xlu0 %5225 }
 0x53c   : > { %v5317_v23 = vsel %vm8232_vm15, 0, %v5316_v7  ;;  %v5590_v7 = vld [vmem:[#allocation2 + $0xc8] sm:$0xff] }
 0x53d   : > { %v5720_v55 = vld [vmem:[#allocation2 + $0x68] sm:$0xff]  ;;  %5318 = vst [vmem:[#allocation2 + $0x78] sm:$0x1] %v5317_v23  ;;  %v5766_v4 = vpop.permute.xlu1 %5765 }
 0x53e   : > { %v5721_v33 = vsel %vm12093_vm7, %v11287_v2, %v5720_v55 }
 0x53f   : > { %5722 = vst [vmem:[#allocation2 + $0x68] sm:$0xff] %v5721_v33  ;;  %v11334_v51 = vpop.permute.xlu0 %5370 }
 0x540   : > { %5804 = vst.msk [vmem:[#allocation2 + $0x68] sm:$0xff] %vm12103_vm6, %v11255_v0  ;;  %v5636_v56 = vld [vmem:[#allocation2 + $0xb0] sm:$0x1]  ;;  %vm12110_vm6 = vmmov %vm12095_vm0 }
 0x541   : > { %v5637_v48 = vsel %vm8823_vm2, 0, %v5636_v56  ;;  %v5154_v25 = vld [vmem:[#allocation2 + $0xa8] sm:$0x80]  ;;  %v5676_v11 = vpop.permute.xlu1 %5675 }
 0x542   : > { %5638 = vst [vmem:[#allocation2 + $0xb0] sm:$0x1] %v5637_v48  ;;  %v5155_v14 = vsel %vm8221_vm13, 0, %v5154_v25  ;;  %v5277_v41 = vld [vmem:[#allocation2 + $0xc0] sm:$0xff] }
 0x543   : > { %5156 = vst [vmem:[#allocation2 + $0xa8] sm:$0x80] %v5155_v14  ;;  %v5278_v24 = vsel %vm8831_vm8, %v5226_v49, %v5277_v41  ;;  %v5531_v12 = vpop.permute.xlu0 %5530 }
 0x544   : > { %v5419_v6 = vld [vmem:[#allocation2 + $0x78] sm:$0xff]  ;;  %5279 = vst [vmem:[#allocation2 + $0xc0] sm:$0xff] %v5278_v24  ;;  %v5585_v0 = vsel %vm8804_vm14, %v5531_v12, %v5584_v8 }
 0x545   : > { %v5420_v15 = vsel %vm8847_vm1, %v11277_v31, %v5419_v6  ;;  %5586 = vst [vmem:[#allocation2 + $0x98] sm:$0xff] %v5585_v0  ;;  %v5674_v61 = vpop.permute.xlu1 %5673 }
 0x546   : > { %5421 = vst [vmem:[#allocation2 + $0x78] sm:$0xff] %v5420_v15  ;;  %v5724_v20 = vsel %vm12093_vm7, %v5674_v61, %v5723_v40 }
 0x547   : > { %5725 = vst [vmem:[#allocation2 + $0x80] sm:$0xff] %v5724_v20  ;;  %v5224_v27 = vpop.permute.xlu0 %5223  ;;  %v5937_v32 = vld [vmem:[#allocation2 + $0x68] sm:$0xff] }
 0x548   : > { %5805 = vst.msk [vmem:[#allocation2 + $0x80] sm:$0xff] %vm12095_vm0, %v5766_v4  ;;  %6235 = vmatprep.mubr.bf16.mxu1 %v5937_v32  ;;  %vm12111_vm0 = vmmov %vm12107_vm4 }
 0x549   : > { %v5091_v2 = vpop.permute.xlu1 %5090  ;;  %6236 = vmatmul.mubr.bf16.gmra.mrb[204].mxu1 %v5417_v36  ;;  %v5729_v4 = vld [vmem:[#allocation2 + $0xb0] sm:$0xff] }
 0x54a   : > { %v5274_v16 = vld [vmem:[#allocation2 + $0xa8] sm:$0xff]  ;;  %5126 = vst.msk [vmem:[#allocation2 + $0xf0] sm:$0xff] %vm12104_vm9, %v5091_v2  ;;  %v5599_v2 = vld [vmem:[#allocation2 + $0x110] sm:$0xff]  ;;  %vm12112_vm9 = vmmov %vm12111_vm0 }
 0x54b   : > { %v5325_v52 = vld [vmem:[#allocation2 + $0xc0] sm:$0x1]  ;;  %v5275_v31 = vsel %vm8831_vm8, %v5224_v27, %v5274_v16  ;;  %v5369_v18 = vpop.permute.xlu0 %5368 }
 0x54c   : > { %v5326_v28 = vsel %vm8232_vm15, 0, %v5325_v52  ;;  %v5633_v54 = vld [vmem:[#allocation2 + $0x98] sm:$0x1]  ;;  %5276 = vst [vmem:[#allocation2 + $0xa8] sm:$0xff] %v5275_v31  ;;  %v5423_v30 = vsel %vm8847_vm1, %v5369_v18, %v5422_v22 }
 0x54d   : > { %5327 = vst [vmem:[#allocation2 + $0xc0] sm:$0x1] %v5326_v28  ;;  %v5634_v34 = vsel %vm8823_vm2, 0, %v5633_v54  ;;  %5424 = vst [vmem:[#allocation2 + $0x90] sm:$0xff] %v5423_v30  ;;  %v11361_v60 = vpop.permute.xlu1 %5771 }
 0x54e   : > { %5635 = vst [vmem:[#allocation2 + $0x98] sm:$0x1] %v5634_v34 }
 0x54f   : > { %v5537_v62 = vpop.permute.xlu0 %5536  ;;  %v5940_v50 = vld [vmem:[#allocation2 + $0x80] sm:$0xff] }
 0x550   : > { %v5594_v42 = vsel %vm8804_vm14, %v5537_v62, %v5593_v9  ;;  %6243 = vmatprep.mubr.bf16.mxu1 %v5940_v50 }
 0x551   : > { %v5163_v44 = vld [vmem:[#allocation2 + $0xf0] sm:$0x80]  ;;  %5595 = vst [vmem:[#allocation2 + $0xe0] sm:$0xff] %v5594_v42  ;;  %v5089_v26 = vpop.permute.xlu1 %5088  ;;  %6244 = vmatmul.mubr.bf16.gmra.mrb[208].mxu1 %v5420_v15 }
 0x552   : > { %v5164_v19 = vsel %vm8221_vm13, 0, %v5163_v44  ;;  %5125 = vst.msk [vmem:[#allocation2 + $0xd8] sm:$0xff] %vm12097_vm5, %v5089_v26  ;;  %vm12113_vm5 = vmmov %vm12106_vm3 }
 0x553   : > { %v5322_v57 = vld [vmem:[#allocation2 + $0xa8] sm:$0x1]  ;;  %5165 = vst [vmem:[#allocation2 + $0xf0] sm:$0x80] %v5164_v19  ;;  %v5230_v35 = vpop.permute.xlu0 %5229 }
 0x554   : > { %v5323_v39 = vsel %vm8232_vm15, 0, %v5322_v57  ;;  %v5428_v0 = vld [vmem:[#allocation2 + $0xc0] sm:$0xff] }
 0x555   : > { %v5726_v45 = vld [vmem:[#allocation2 + $0x98] sm:$0xff]  ;;  %5324 = vst [vmem:[#allocation2 + $0xa8] sm:$0x1] %v5323_v39  ;;  %v5770_v37 = vpop.permute.xlu1 %5769 }
 0x556   : > { %v5727_v36 = vsel %vm12093_vm7, %v5676_v11, %v5726_v45 }
 0x557   : > { %5728 = vst [vmem:[#allocation2 + $0x98] sm:$0xff] %v5727_v36  ;;  %v11372_v46 = vpop.permute.xlu0 %5374 }
 0x558   : > { %5806 = vst.msk [vmem:[#allocation2 + $0x98] sm:$0xff] %vm12105_vm10, %v11322_v10  ;;  %v5642_v63 = vld [vmem:[#allocation2 + $0xe0] sm:$0x1]  ;;  %vm12114_vm10 = vmmov %vm12111_vm0 }
 0x559   : > { %v5643_v38 = vsel %vm8823_vm2, 0, %v5642_v63  ;;  %v5160_v1 = vld [vmem:[#allocation2 + $0xd8] sm:$0x80]  ;;  %v11378_v43 = vpop.permute.xlu1 %5679 }
 0x55a   : > { %5644 = vst [vmem:[#allocation2 + $0xe0] sm:$0x1] %v5643_v38  ;;  %v5161_v21 = vsel %vm8221_vm13, 0, %v5160_v1  ;;  %v5283_v17 = vld [vmem:[#allocation2 + $0xf0] sm:$0xff] }
 0x55b   : > { %5162 = vst [vmem:[#allocation2 + $0xd8] sm:$0x80] %v5161_v21  ;;  %v5284_v13 = vsel %vm8831_vm8, %v5230_v35, %v5283_v17  ;;  %v5535_v49 = vpop.permute.xlu0 %5534 }
 0x55c   : > { %v5425_v23 = vld [vmem:[#allocation2 + $0xa8] sm:$0xff]  ;;  %5285 = vst [vmem:[#allocation2 + $0xf0] sm:$0xff] %v5284_v13  ;;  %v5591_v10 = vsel %vm8804_vm14, %v5535_v49, %v5590_v7 }
 0x55d   : > { %v5426_v55 = vsel %vm8847_vm1, %v11334_v51, %v5425_v23  ;;  %5592 = vst [vmem:[#allocation2 + $0xc8] sm:$0xff] %v5591_v10  ;;  %v5678_v33 = vpop.permute.xlu1 %5677 }
 0x55e   : > { %5427 = vst [vmem:[#allocation2 + $0xa8] sm:$0xff] %v5426_v55  ;;  %v5730_v56 = vsel %vm12093_vm7, %v5678_v33, %v5729_v4 }
 0x55f   : > { %5731 = vst [vmem:[#allocation2 + $0xb0] sm:$0xff] %v5730_v56  ;;  %v5228_v48 = vpop.permute.xlu0 %5227  ;;  %v5943_v25 = vld [vmem:[#allocation2 + $0x98] sm:$0xff]  ;;  %v11392_v11 = vpop.f32.mrb[228].mxu0 }
 0x560   : > { %5807 = vst.msk [vmem:[#allocation2 + $0xb0] sm:$0xff] %vm12106_vm3, %v5770_v37  ;;  %6251 = vmatprep.mubr.bf16.mxu1 %v5943_v25  ;;  %v11394_v41 = vpop.f32.mrb[229].mxu0  ;;  %v5596_v37 = vld [vmem:[#allocation2 + $0xf8] sm:$0xff] }
 0x561   : > { %v5095_v14 = vpop.permute.xlu1 %5094  ;;  %6252 = vmatmul.mubr.bf16.gmra.mrb[212].mxu1 %v5423_v30  ;;  %v11397_v24 = vpop.f32.mrb[230].mxu0  ;;  %v5735_v19 = vld [vmem:[#allocation2 + $0xe0] sm:$0xff] }
 0x562   : > { %v5280_v51 = vld [vmem:[#allocation2 + $0xd8] sm:$0xff]  ;;  %5128 = vst.msk [vmem:[#allocation2 + $0x120] sm:$0xff] %vm12107_vm4, %v5095_v14  ;;  %v11401_v15 = vpop.f32.mrb[231].mxu0  ;;  %vm12117_vm4 = vcmask 785920  }
 0x563   : > { %v5331_v8 = vld [vmem:[#allocation2 + $0xf0] sm:$0x1]  ;;  %v5281_v12 = vsel %vm8831_vm8, %v5228_v48, %v5280_v51  ;;  %v5373_v6 = vpop.permute.xlu0 %5372 }
 0x564   : > { %v5332_v40 = vsel %vm8232_vm15, 0, %v5331_v8  ;;  %v5639_v61 = vld [vmem:[#allocation2 + $0xc8] sm:$0x1]  ;;  %5282 = vst [vmem:[#allocation2 + $0xd8] sm:$0xff] %v5281_v12  ;;  %v11407_v20 = vsel %vm8847_vm1, %v5373_v6, %v5428_v0 }
 0x565   : > { %5333 = vst [vmem:[#allocation2 + $0xf0] sm:$0x1] %v5332_v40  ;;  %v5640_v27 = vsel %vm8823_vm2, 0, %v5639_v61  ;;  %5430 = vst [vmem:[#allocation2 + $0xc0] sm:$0xff] %v11407_v20  ;;  %v5093_v32 = vpop.permute.xlu1 %5092 }
 0x566   : > { %5641 = vst [vmem:[#allocation2 + $0xc8] sm:$0x1] %v5640_v27  ;;  %5127 = vst.msk [vmem:[#allocation2 + $0x108] sm:$0xff] %vm12108_vm11, %v5093_v32 }
 0x567   : > { %v5541_v16 = vpop.permute.xlu0 %5540  ;;  %v5946_v52 = vld [vmem:[#allocation2 + $0xb0] sm:$0xff] }
 0x568   : > { %v5600_v31 = vsel %vm8804_vm14, %v5541_v16, %v5599_v2  ;;  %6259 = vmatprep.mubr.bf16.mxu1 %v5946_v52  ;;  %v11415_v18 = vpop.f32.mrb[232].mxu0  ;;  %v5605_v16 = vld [vmem:[#allocation2 + $0x140] sm:$0xff] }
 0x569   : > { %v5169_v22 = vld [vmem:[#allocation2 + $0x120] sm:$0x80]  ;;  %5601 = vst [vmem:[#allocation2 + $0x110] sm:$0xff] %v5600_v31  ;;  %v5774_v28 = vpop.permute.xlu1 %5773  ;;  %6260 = vmatmul.mubr.bf16.gmra.mrb[216].mxu1 %v5426_v55  ;;  %v11417_v54 = vpop.f32.mrb[233].mxu0 }
 0x56a   : > { %v5170_v30 = vsel %vm8221_vm13, 0, %v5169_v22  ;;  %v11421_v34 = vpop.f32.mrb[234].mxu0 }
 0x56b   : > { %v5328_v9 = vld [vmem:[#allocation2 + $0xd8] sm:$0x1]  ;;  %5171 = vst [vmem:[#allocation2 + $0x120] sm:$0x80] %v5170_v30  ;;  %v5234_v62 = vpop.permute.xlu0 %5233  ;;  %v11423_v50 = vpop.f32.mrb[235].mxu0 }
 0x56c   : > { %v5329_v42 = vsel %vm8232_vm15, 0, %v5328_v9  ;;  %v5434_v25 = vld [vmem:[#allocation2 + $0xf0] sm:$0xff] }
 0x56d   : > { %v5732_v44 = vld [vmem:[#allocation2 + $0xc8] sm:$0xff]  ;;  %5330 = vst [vmem:[#allocation2 + $0xd8] sm:$0x1] %v5329_v42  ;;  %v5682_v57 = vpop.permute.xlu1 %5681 }
 0x56e   : > { %v5166_v26 = vld [vmem:[#allocation2 + $0x108] sm:$0x80]  ;;  %v5733_v35 = vsel %vm12093_vm7, %v11378_v43, %v5732_v44  ;;  %v5736_v45 = vsel %vm12093_vm7, %v5682_v57, %v5735_v19 }
 0x56f   : > { %v5167_v39 = vsel %vm8221_vm13, 0, %v5166_v26  ;;  %5734 = vst [vmem:[#allocation2 + $0xc8] sm:$0xff] %v5733_v35  ;;  %5737 = vst [vmem:[#allocation2 + $0xe0] sm:$0xff] %v5736_v45  ;;  %v5539_v36 = vpop.permute.xlu0 %5538  ;;  %v5602_v42 = vld [vmem:[#allocation2 + $0x128] sm:$0xff] }
 0x570   : > { %5168 = vst [vmem:[#allocation2 + $0x108] sm:$0x80] %v5167_v39  ;;  %5808 = vst.msk [vmem:[#allocation2 + $0xc8] sm:$0xff] %vm12109_vm12, %v11361_v60  ;;  %v5648_v63 = vld [vmem:[#allocation2 + $0x110] sm:$0x1]  ;;  %v5597_v38 = vsel %vm8804_vm14, %v5539_v36, %v5596_v37 }
 0x571   : > { %5809 = vst.msk [vmem:[#allocation2 + $0xe0] sm:$0xff] %vm12110_vm6, %v5774_v28  ;;  %v11439_v1 = vpop.f32.mrb[236].mxu0  ;;  %v5649_v43 = vsel %vm8823_vm2, 0, %v5648_v63  ;;  %5598 = vst [vmem:[#allocation2 + $0xf8] sm:$0xff] %v5597_v38  ;;  %v5099_v21 = vpop.permute.xlu1 %5098 }
 0x572   : > { %v11443_v17 = vpop.f32.mrb[237].mxu0  ;;  %5650 = vst [vmem:[#allocation2 + $0x110] sm:$0x1] %v5649_v43  ;;  %v5289_v13 = vld [vmem:[#allocation2 + $0x120] sm:$0xff]  ;;  %5130 = vst.msk [vmem:[#allocation2 + $0x150] sm:$0xff] %vm12111_vm0, %v5099_v21 }
 0x573   : > { %v11446_v60 = vpop.f32.mrb[238].mxu0  ;;  %v5290_v7 = vsel %vm8831_vm8, %v5234_v62, %v5289_v13  ;;  %v5232_v49 = vpop.permute.xlu0 %5231 }
 0x574   : > { %v11450_v23 = vpop.f32.mrb[239].mxu0  ;;  %v5431_v10 = vld [vmem:[#allocation2 + $0xd8] sm:$0xff]  ;;  %5291 = vst [vmem:[#allocation2 + $0x120] sm:$0xff] %v5290_v7 }
 0x575   : > { %v5432_v55 = vsel %vm8847_vm1, %v11372_v46, %v5431_v10  ;;  %v5097_v4 = vpop.permute.xlu1 %5096 }
 0x576   : > { %5433 = vst [vmem:[#allocation2 + $0xd8] sm:$0xff] %v5432_v55  ;;  %5129 = vst.msk [vmem:[#allocation2 + $0x138] sm:$0xff] %vm12112_vm9, %v5097_v4 }
 0x577   : > { %v5286_v33 = vld [vmem:[#allocation2 + $0x108] sm:$0xff]  ;;  %v5377_v48 = vpop.permute.xlu0 %5376 }
 0x578   : > { %v5287_v56 = vsel %vm8831_vm8, %v5232_v49, %v5286_v33  ;;  %v5949_v14 = vld [vmem:[#allocation2 + $0xc8] sm:$0xff]  ;;  %v5645_v51 = vld [vmem:[#allocation2 + $0xf8] sm:$0x1]  ;;  %v11460_v8 = vsel %vm8847_vm1, %v5377_v48, %v5434_v25  ;;  %v5952_v40 = vld [vmem:[#allocation2 + $0xe0] sm:$0xff] }
 0x579   : > { %5288 = vst [vmem:[#allocation2 + $0x108] sm:$0xff] %v5287_v56  ;;  %6267 = vmatprep.mubr.bf16.mxu1 %v5949_v14  ;;  %v5646_v46 = vsel %vm8823_vm2, 0, %v5645_v51  ;;  %v5175_v6 = vld [vmem:[#allocation2 + $0x150] sm:$0x80]  ;;  %5436 = vst [vmem:[#allocation2 + $0xf0] sm:$0xff] %v11460_v8  ;;  %v5684_v0 = vpop.permute.xlu1 %5683 }
 0x57a   : > { %v11462_v12 = vpop.f32.mrb[240].mxu0  ;;  %6268 = vmatmul.mubr.bf16.gmra.mrb[220].mxu1 %v11407_v20  ;;  %5647 = vst [vmem:[#allocation2 + $0xf8] sm:$0x1] %v5646_v46  ;;  %v5176_v27 = vsel %vm8221_vm13, 0, %v5175_v6  ;;  %v5741_v39 = vld [vmem:[#allocation2 + $0x110] sm:$0xff] }
 0x57b   : > { %v11468_v61 = vpop.f32.mrb[241].mxu0  ;;  %6275 = vmatprep.mubr.bf16.mxu1 %v5952_v40  ;;  %v5337_v2 = vld [vmem:[#allocation2 + $0x120] sm:$0x1]  ;;  %5177 = vst [vmem:[#allocation2 + $0x150] sm:$0x80] %v5176_v27  ;;  %v5545_v52 = vpop.permute.xlu0 %5544 }
 0x57c   : > { %v11472_v32 = vpop.f32.mrb[242].mxu0  ;;  %v5338_v22 = vsel %vm8232_vm15, 0, %v5337_v2  ;;  %v5606_v20 = vsel %vm8804_vm14, %v5545_v52, %v5605_v16 }
 0x57d   : > { %v11474_v31 = vpop.f32.mrb[243].mxu0  ;;  %5339 = vst [vmem:[#allocation2 + $0x120] sm:$0x1] %v5338_v22  ;;  %v5172_v28 = vld [vmem:[#allocation2 + $0x138] sm:$0x80]  ;;  %5607 = vst [vmem:[#allocation2 + $0x140] sm:$0xff] %v5606_v20  ;;  %v5776_v30 = vpop.permute.xlu1 %5775 }
 0x57e   : > { %v5173_v9 = vsel %vm8221_vm13, 0, %v5172_v28  ;;  %v5608_v28 = vld [vmem:[#allocation2 + $0x158] sm:$0xff] }
 0x57f   : > { %5174 = vst [vmem:[#allocation2 + $0x138] sm:$0x80] %v5173_v9  ;;  %v5543_v44 = vpop.permute.xlu0 %5542 }
 0x580   : > { %v5334_v62 = vld [vmem:[#allocation2 + $0x108] sm:$0x1]  ;;  %v5603_v19 = vsel %vm8804_vm14, %v5543_v44, %v5602_v42 }
 0x581   : > { %v5335_v26 = vsel %vm8232_vm15, 0, %v5334_v62  ;;  %v5738_v35 = vld [vmem:[#allocation2 + $0xf8] sm:$0xff]  ;;  %5604 = vst [vmem:[#allocation2 + $0x128] sm:$0xff] %v5603_v19  ;;  %v5686_v45 = vpop.permute.xlu1 %5685 }
 0x582   : > { %5336 = vst [vmem:[#allocation2 + $0x108] sm:$0x1] %v5335_v26  ;;  %6276 = vmatmul.mubr.bf16.gmra.mrb[224].mxu1 %v5432_v55  ;;  %v5739_v36 = vsel %vm12093_vm7, %v5684_v0, %v5738_v35  ;;  %v5742_v63 = vsel %vm12093_vm7, %v5686_v45, %v5741_v39  ;;  %v5295_v16 = vld [vmem:[#allocation2 + $0x150] sm:$0xff] }
 0x583   : > { %v11486_v57 = vpop.f32.mrb[244].mxu0  ;;  %5740 = vst [vmem:[#allocation2 + $0xf8] sm:$0xff] %v5739_v36  ;;  %5743 = vst [vmem:[#allocation2 + $0x110] sm:$0xff] %v5742_v63  ;;  %v5379_v43 = vpop.permute.xlu0 %5378 }
 0x584   : > { %v11488_v37 = vpop.f32.mrb[245].mxu0  ;;  %v5654_v13 = vld [vmem:[#allocation2 + $0x140] sm:$0x1]  ;;  %5810 = vst.msk [vmem:[#allocation2 + $0xf8] sm:$0xff] %vm12113_vm5, %v5776_v30 }
 0x585   : > { %v11494_v38 = vpop.f32.mrb[246].mxu0  ;;  %v5655_v7 = vsel %vm8823_vm2, 0, %v5654_v13  ;;  %v5101_v49 = vpop.permute.xlu1 %5100  ;;  %v5440_v53 = vld [vmem:[#allocation2 + $0x120] sm:$0xff] }
 0x586   : > { %v11496_v21 = vpop.f32.mrb[247].mxu0  ;;  %5656 = vst [vmem:[#allocation2 + $0x140] sm:$0x1] %v5655_v7  ;;  %5131 = vst.msk [vmem:[#allocation2 + $0x168] sm:$0xff] %vm12114_vm10, %v5101_v49  ;;  %v5292_v10 = vld [vmem:[#allocation2 + $0x138] sm:$0xff] }
 0x587   : > { %v5236_v55 = vpop.permute.xlu0 %5235 }
 0x588   : > { %v5651_v4 = vld [vmem:[#allocation2 + $0x128] sm:$0x1]  ;;  %v5293_v56 = vsel %vm8831_vm8, %v5236_v55, %v5292_v10 }
 0x589   : > { %v5437_v33 = vld [vmem:[#allocation2 + $0x108] sm:$0xff]  ;;  %v5652_v25 = vsel %vm8823_vm2, 0, %v5651_v4  ;;  %5294 = vst [vmem:[#allocation2 + $0x138] sm:$0xff] %v5293_v56  ;;  %v5778_v51 = vpop.permute.xlu1 %5777 }
 0x58a   : > { %v5438_v14 = vsel %vm8847_vm1, %v5379_v43, %v5437_v33  ;;  %5653 = vst [vmem:[#allocation2 + $0x128] sm:$0x1] %v5652_v25  ;;  %5811 = vst.msk [vmem:[#allocation2 + $0x110] sm:$0xff] %vm12106_vm3, %v5778_v51 }
 0x58b   : > { %5439 = vst [vmem:[#allocation2 + $0x108] sm:$0xff] %v5438_v14  ;;  %v5688_v0 = vpop.permute.xlu0 %5687  ;;  %v5955_v40 = vld [vmem:[#allocation2 + $0xf8] sm:$0xff] }
 0x58c   : > { %v11504_v48 = vpop.f32.mrb[248].mxu0  ;;  %6283 = vmatprep.mubr.bf16.mxu1 %v5955_v40 }
 0x58d   : > { %v11510_v46 = vpop.f32.mrb[249].mxu0  ;;  %v5178_v2 = vld [vmem:[#allocation2 + $0x168] sm:$0x80]  ;;  %v5238_v52 = vpop.permute.xlu1 %5237  ;;  %6284 = vmatmul.mubr.bf16.gmra.mrb[228].mxu1 %v11460_v8  ;;  %v5747_v4 = vld [vmem:[#allocation2 + $0x140] sm:$0xff] }
 0x58e   : > { %v11513_v6 = vpop.f32.mrb[250].mxu0  ;;  %v5179_v22 = vsel %vm8221_vm13, 0, %v5178_v2  ;;  %v5296_v20 = vsel %vm8831_vm8, %v5238_v52, %v5295_v16  ;;  %vm12115_vm13 = vmmov %vm12106_vm3  ;;  %v5611_v16 = vld [vmem:[#allocation2 + $0x170] sm:$0xff] }
 0x58f   : > { %v11515_v27 = vpop.f32.mrb[251].mxu0  ;;  %5180 = vst [vmem:[#allocation2 + $0x168] sm:$0x80] %v5179_v22  ;;  %5297 = vst [vmem:[#allocation2 + $0x150] sm:$0xff] %v5296_v20  ;;  %v5547_v30 = vpop.permute.xlu0 %5546 }
 0x590   : > { %v5340_v9 = vld [vmem:[#allocation2 + $0x138] sm:$0x1]  ;;  %v5609_v62 = vsel %vm8804_vm14, %v5547_v30, %v5608_v28 }
 0x591   : > { %v5341_v44 = vsel %vm8232_vm15, 0, %v5340_v9  ;;  %v5744_v8 = vld [vmem:[#allocation2 + $0x128] sm:$0xff]  ;;  %5610 = vst [vmem:[#allocation2 + $0x158] sm:$0xff] %v5609_v62  ;;  %v5381_v26 = vpop.permute.xlu1 %5380  ;;  %v5958_v19 = vld [vmem:[#allocation2 + $0x110] sm:$0xff] }
 0x592   : > { %5342 = vst [vmem:[#allocation2 + $0x138] sm:$0x1] %v5341_v44  ;;  %v5745_v39 = vsel %vm12093_vm7, %v5688_v0, %v5744_v8  ;;  %v5441_v45 = vsel %vm8847_vm1, %v5381_v26, %v5440_v53  ;;  %6291 = vmatprep.mubr.bf16.mxu1 %v5958_v19  ;;  %v7917_v9 = vld [vmem:[#allocation3 + $0x8] sm:$0xff] }
 0x593   : > { %5746 = vst [vmem:[#allocation2 + $0x128] sm:$0xff] %v5745_v39  ;;  %5442 = vst [vmem:[#allocation2 + $0x120] sm:$0xff] %v5441_v45  ;;  %v5780_v63 = vpop.permute.xlu0 %5779 }
 0x594   : > { %5812 = vst.msk [vmem:[#allocation2 + $0x128] sm:$0xff] %vm12115_vm13, %v5780_v63 }
 0x595   : > { %v11524_v42 = vpop.f32.mrb[252].mxu0  ;;  %v5240_v13 = vpop.permute.xlu1 %5239  ;;  %6292 = vmatmul.mubr.bf16.gmra.mrb[232].mxu1 %v5438_v14 }
 0x596   : > { %v11528_v35 = vpop.f32.mrb[253].mxu0  ;;  %v5343_v7 = vld [vmem:[#allocation2 + $0x150] sm:$0x1]  ;;  %v5298_v49 = vld [vmem:[#allocation2 + $0x168] sm:$0xff] }
 0x597   : > { %v11534_v36 = vpop.f32.mrb[254].mxu0  ;;  %v5344_v10 = vsel %vm8232_vm15, 0, %v5343_v7  ;;  %v5299_v55 = vsel %vm8831_vm8, %v5240_v13, %v5298_v49  ;;  %v5690_v33 = vpop.permute.xlu0 %5689  ;;  %vm12116_vm8 = vmmov %vm12106_vm3 }
 0x598   : > { %v11536_v43 = vpop.f32.mrb[255].mxu0  ;;  %5345 = vst [vmem:[#allocation2 + $0x150] sm:$0x1] %v5344_v10  ;;  %v5657_v56 = vld [vmem:[#allocation2 + $0x158] sm:$0x1]  ;;  %5300 = vst [vmem:[#allocation2 + $0x168] sm:$0xff] %v5299_v55  ;;  %v5748_v25 = vsel %vm12093_vm7, %v5690_v33, %v5747_v4 }
 0x599   : > { %v5658_v51 = vsel %vm8823_vm2, 0, %v5657_v56  ;;  %5749 = vst [vmem:[#allocation2 + $0x140] sm:$0xff] %v5748_v25  ;;  %v5443_v14 = vld [vmem:[#allocation2 + $0x138] sm:$0xff]  ;;  %v5383_v0 = vpop.permute.xlu1 %5382 }
 0x59a   : > { %5659 = vst [vmem:[#allocation2 + $0x158] sm:$0x1] %v5658_v51  ;;  %v5444_v40 = vsel %vm8847_vm1, %v5383_v0, %v5443_v14 }
 0x59b   : > { %5445 = vst [vmem:[#allocation2 + $0x138] sm:$0xff] %v5444_v40  ;;  %v5782_v5 = vpop.permute.xlu0 %5781  ;;  %v5961_v2 = vld [vmem:[#allocation2 + $0x128] sm:$0xff] }
 0x59c   : > { %5813 = vst.msk [vmem:[#allocation2 + $0x140] sm:$0xff] %vm12116_vm8, %v5782_v5  ;;  %6299 = vmatprep.mubr.bf16.mxu1 %v5961_v2  ;;  %v12120_v2 = vld [vmem:[#allocation8_spill] sm:$0xff] }
 0x59d   : > { %v5549_v52 = vpop.permute.xlu1 %5548  ;;  %6300 = vmatmul.mubr.bf16.gmra.mrb[236].mxu1 %v5441_v45 }
 0x59e   : > { %v5612_v22 = vsel %vm8804_vm14, %v5549_v52, %v5611_v16  ;;  %vm12118_vm14 = vmmov %vm12106_vm3  ;;  %v12121_v16 = vmax.f32 %v12120_v2, 0.0 }
 0x59f   : > { %v5346_v20 = vld [vmem:[#allocation2 + $0x168] sm:$0x1]  ;;  %5613 = vst [vmem:[#allocation2 + $0x170] sm:$0xff] %v5612_v22  ;;  %v5692_v28 = vpop.permute.xlu0 %5691  ;;  %v5446_v44 = vld [vmem:[#allocation2 + $0x150] sm:$0xff] }
 0x5a0   : > { %v5347_v30 = vsel %vm8232_vm15, 0, %v5346_v20  ;;  %5614 = vst.msk [vmem:[#allocation2 + $0x170] sm:$0xff] %vm12117_vm4, %v7917_v9  ;;  %vm12119_vm15 = vmmov %vm12106_vm3 }
 0x5a1   : > { %5348 = vst [vmem:[#allocation2 + $0x168] sm:$0x1] %v5347_v30  ;;  %v5750_v62 = vld [vmem:[#allocation2 + $0x158] sm:$0xff]  ;;  %v5385_v8 = vpop.permute.xlu1 %5384 }
 0x5a2   : > { %v5751_v53 = vsel %vm12093_vm7, %v5692_v28, %v5750_v62  ;;  %v5447_v3 = vsel %vm8847_vm1, %v5385_v8, %v5446_v44 }
 0x5a3   : > { %5752 = vst [vmem:[#allocation2 + $0x158] sm:$0xff] %v5751_v53  ;;  %5448 = vst [vmem:[#allocation2 + $0x150] sm:$0xff] %v5447_v3  ;;  %v5784_v26 = vpop.permute.xlu0 %5783  ;;  %v5964_v19 = vld [vmem:[#allocation2 + $0x140] sm:$0xff] }
 0x5a4   : > { %5814 = vst.msk [vmem:[#allocation2 + $0x158] sm:$0xff] %vm12118_vm14, %v5784_v26  ;;  %6307 = vmatprep.mubr.bf16.mxu1 %v5964_v19  ;;  %v12124_v19 = vld [vmem:[#allocation9_spill] sm:$0xff] }
 0x5a5   : > { %6308 = vmatmul.mubr.bf16.gmra.mrb[240].mxu1 %v5444_v40  ;;  %v5387_v63 = vpop.permute.xlu1 %5386 }
 0x5a7   : > { %v5660_v47 = vld [vmem:[#allocation2 + $0x170] sm:$0x1] }
 0x5a8   : > { %v5661_v39 = vsel %vm8823_vm2, 0, %v5660_v47  ;;  %v5449_v45 = vld [vmem:[#allocation2 + $0x168] sm:$0xff]  ;;  %v12125_v47 = vmax.f32 %v12124_v19, 0.0 }
 0x5a9   : > { %5662 = vst [vmem:[#allocation2 + $0x170] sm:$0x1] %v5661_v39  ;;  %v5450_v58 = vsel %vm8847_vm1, %v5387_v63, %v5449_v45  ;;  %v12126_v63 = vld [vmem:[#allocation12_spill] sm:$0xff] }
 0x5aa   : > { %5753 = vst.msk [vmem:[#allocation2 + $0x170] sm:$0xff] %vm12119_vm15, %v7917_v9  ;;  %5451 = vst [vmem:[#allocation2 + $0x168] sm:$0xff] %v5450_v58 }
 0x5ab   : > { %v5967_v13 = vld [vmem:[#allocation2 + $0x158] sm:$0xff] }
 0x5ac   : > { %6315 = vmatprep.mubr.bf16.mxu1 %v5967_v13 }
 0x5ad   : > { %6316 = vmatmul.mubr.bf16.gmra.mrb[244].mxu1 %v5447_v3 }
 0x5b1   : > { %v5970_v7 = vld [vmem:[#allocation2 + $0x170] sm:$0xff] }
 0x5b2   : > { %6323 = vmatprep.mubr.bf16.mxu1 %v5970_v7 }
 0x5b5   : > { %6324 = vmatmul.mubr.bf16.gmra.mrb[248].mxu1 %v5450_v58  ;;  %v12127_v58 = vmax.f32 %v12126_v63, 0.0 }
 0x5eb   : > { %v7474_v49 = vpop.f32.mrb[188].mxu1 }
 0x5ec   : > { %v7475_v10 = vpop.f32.mrb[189].mxu1 }
 0x5ed   : > { %v7476_v55 = vadd.f32 %v7475_v10, %v7474_v49  ;;  %v7477_v59 = vpop.f32.mrb[190].mxu1 }
 0x5ee   : > { %v7478_v4 = vpop.f32.mrb[191].mxu1 }
 0x5ef   : > { %v6206_v33 = vadd.f32 %v7476_v55, %v11568_v29  ;;  %v7479_v56 = vadd.f32 %v7478_v4, %v7477_v59  ;;  %v11595_v59 = vpop.f32.mrb[0].mxu0 }
 0x5f0   : > { %v11597_v4 = vpop.f32.mrb[1].mxu0 }
 0x5f1   : > { %v6367_v25 = vadd.f32 %v11394_v41, %v6206_v33  ;;  %v6209_v51 = vadd.f32 %v7479_v56, %v11568_v29  ;;  %v12122_v41 = vld [vmem:[#allocation10_spill] sm:$0xff] }
 0x5f2   : > { %v12123_v9 = vmax.f32 %v12122_v41, 0.0  ;;  %v12130_v41 = vld [vmem:[#allocation18_spill] sm:$0xff] }
 0x5f3   : > { %v6493_v14 = vmax.f32 %v6367_v25, 0.0  ;;  %v6370_v0 = vadd.f32 %v11401_v15, %v6209_v51  ;;  %v7480_v40 = vpop.f32.mrb[192].mxu1 }
 0x5f4   : > { %v7481_v5 = vpop.f32.mrb[193].mxu1 }
 0x5f5   : > { %v6525_v52 = vadd.f32 %v6493_v14, %v12121_v16  ;;  %v6494_v22 = vmax.f32 %v6370_v0, 0.0  ;;  %v7482_v20 = vadd.f32 %v7481_v5, %v7480_v40  ;;  %v7483_v28 = vpop.f32.mrb[194].mxu1  ;;  %v11603_v40 = vpop.f32.mrb[2].mxu0  ;;  %v12128_v16 = vld [vmem:[#allocation11_spill] sm:$0xff] }
 0x5f6   : > { %v7484_v30 = vpop.f32.mrb[195].mxu1  ;;  %v11605_v2 = vpop.f32.mrb[3].mxu0 }
 0x5f7   : > { %6557 = vst [vmem:[%s11579_s29] sm:$0xff] %v6525_v52  ;;  %v6526_v62 = vadd.f32 %v6494_v22, %v12123_v9  ;;  %v6214_v15 = vadd.f32 %v7482_v20, %v11568_v29  ;;  %v7485_v44 = vadd.f32 %v7484_v30, %v7483_v28  ;;  %v12129_v52 = vmax.f32 %v12128_v16, 0.0 }
 0x5f8   : > { %v12131_v9 = vmax.f32 %v12130_v41, 0.0 }
 0x5f9   : > { %6558 = vst [vmem:[%s11579_s29 + $0x8] sm:$0xff] %v6526_v62  ;;  %v6375_v8 = vadd.f32 %v11392_v11, %v6214_v15  ;;  %v6217_v53 = vadd.f32 %v7485_v44, %v11568_v29 }
 0x5fb   : > { %v6495_v3 = vmax.f32 %v6375_v8, 0.0  ;;  %v6378_v26 = vadd.f32 %v11397_v24, %v6217_v53 }
 0x5fd   : > { %v6527_v39 = vadd.f32 %v6495_v3, %v12125_v47  ;;  %v6496_v45 = vmax.f32 %v6378_v26, 0.0  ;;  %v12132_v26 = vld [vmem:[#allocation19_spill] sm:$0xff] }
 0x5fe   : > { %v12133_v19 = vmax.f32 %v12132_v26, 0.0 }
 0x5ff   : > { %6559 = vst [vmem:[%s11579_s29 + $0x10] sm:$0xff] %v6527_v39  ;;  %v6528_v13 = vadd.f32 %v6496_v45, %v12127_v58  ;;  %v12134_v45 = vld [vmem:[#allocation20_spill] sm:$0xff] }
 0x600   : > { %v12135_v63 = vmax.f32 %v12134_v45, 0.0 }
 0x601   : > { %6560 = vst [vmem:[%s11579_s29 + $0x18] sm:$0xff] %v6528_v13 }
 0x602   : > { %v7486_v7 = vpop.f32.mrb[196].mxu1 }
 0x603   : > { %v7487_v49 = vpop.f32.mrb[197].mxu1 }
 0x604   : > { %v7488_v10 = vadd.f32 %v7487_v49, %v7486_v7  ;;  %v7489_v55 = vpop.f32.mrb[198].mxu1 }
 0x605   : > { %v7490_v11 = vpop.f32.mrb[199].mxu1 }
 0x606   : > { %v6222_v24 = vadd.f32 %v7488_v10, %v11568_v29  ;;  %v7491_v33 = vadd.f32 %v7490_v11, %v7489_v55 }
 0x608   : > { %v6383_v56 = vadd.f32 %v11417_v54, %v6222_v24  ;;  %v6225_v25 = vadd.f32 %v7491_v33, %v11568_v29 }
 0x60a   : > { %v6497_v51 = vmax.f32 %v6383_v56, 0.0  ;;  %v6386_v14 = vadd.f32 %v11423_v50, %v6225_v25 }
 0x60c   : > { %v7492_v0 = vpop.f32.mrb[200].mxu1  ;;  %v6529_v22 = vadd.f32 %v6497_v51, %v12129_v52  ;;  %v6498_v20 = vmax.f32 %v6386_v14, 0.0  ;;  %v12136_v14 = vld [vmem:[#allocation21_spill] sm:$0xff] }
 0x60d   : > { %v7493_v5 = vpop.f32.mrb[201].mxu1 }
 0x60e   : > { %v7494_v28 = vadd.f32 %v7493_v5, %v7492_v0  ;;  %v7495_v54 = vpop.f32.mrb[202].mxu1  ;;  %6561 = vst [vmem:[%s11579_s29 + $0x20] sm:$0xff] %v6529_v22  ;;  %v6530_v62 = vadd.f32 %v6498_v20, %v12131_v9  ;;  %v12137_v0 = vmax.f32 %v12136_v14, 0.0  ;;  %v12146_v14 = vld [vmem:[#allocation26_spill] sm:$0xff] }
 0x60f   : > { %v7496_v30 = vpop.f32.mrb[203].mxu1 }
 0x610   : > { %v6230_v50 = vadd.f32 %v7494_v28, %v11568_v29  ;;  %v7497_v15 = vadd.f32 %v7496_v30, %v7495_v54  ;;  %6562 = vst [vmem:[%s11579_s29 + $0x28] sm:$0xff] %v6530_v62  ;;  %v12138_v28 = vld [vmem:[#allocation22_spill] sm:$0xff] }
 0x611   : > { %v12139_v54 = vmax.f32 %v12138_v28, 0.0  ;;  %v12148_v28 = vld [vmem:[#allocation27_spill] sm:$0xff] }
 0x612   : > { %v6391_v44 = vadd.f32 %v11415_v18, %v6230_v50  ;;  %v6233_v8 = vadd.f32 %v7497_v15, %v11568_v29  ;;  %v12140_v15 = vld [vmem:[#allocation23_spill] sm:$0xff] }
 0x614   : > { %v6499_v53 = vmax.f32 %v6391_v44, 0.0  ;;  %v6394_v3 = vadd.f32 %v11421_v34, %v6233_v8  ;;  %v12141_v44 = vmax.f32 %v12140_v15, 0.0 }
 0x616   : > { %v6531_v47 = vadd.f32 %v6499_v53, %v12133_v19  ;;  %v6500_v39 = vmax.f32 %v6394_v3, 0.0  ;;  %v12142_v3 = vld [vmem:[#allocation24_spill] sm:$0xff] }
 0x617   : > { %v12143_v26 = vmax.f32 %v12142_v3, 0.0 }
 0x618   : > { %6563 = vst [vmem:[%s11579_s29 + $0x30] sm:$0xff] %v6531_v47  ;;  %v6532_v58 = vadd.f32 %v6500_v39, %v12135_v63 }
 0x61a   : > { %6564 = vst [vmem:[%s11579_s29 + $0x38] sm:$0xff] %v6532_v58 }
 0x61c   : > { %v7498_v13 = vpop.f32.mrb[204].mxu1 }
 0x61d   : > { %v7499_v7 = vpop.f32.mrb[205].mxu1 }
 0x61e   : > { %v7500_v49 = vadd.f32 %v7499_v7, %v7498_v13  ;;  %v7501_v10 = vpop.f32.mrb[206].mxu1 }
 0x61f   : > { %v7502_v18 = vpop.f32.mrb[207].mxu1 }
 0x620   : > { %v6238_v55 = vadd.f32 %v7500_v49, %v11568_v29  ;;  %v7503_v11 = vadd.f32 %v7502_v18, %v7501_v10 }
 0x622   : > { %v6399_v34 = vadd.f32 %v11443_v17, %v6238_v55  ;;  %v6241_v24 = vadd.f32 %v7503_v11, %v11568_v29  ;;  %v12144_v11 = vld [vmem:[#allocation25_spill] sm:$0xff] }
 0x624   : > { %v6501_v33 = vmax.f32 %v6399_v34, 0.0  ;;  %v6402_v56 = vadd.f32 %v11450_v23, %v6241_v24  ;;  %v7504_v25 = vpop.f32.mrb[208].mxu1  ;;  %v12145_v34 = vmax.f32 %v12144_v11, 0.0 }
 0x625   : > { %v7505_v51 = vpop.f32.mrb[209].mxu1 }
 0x626   : > { %v6533_v5 = vadd.f32 %v6501_v33, %v12137_v0  ;;  %v6502_v16 = vmax.f32 %v6402_v56, 0.0  ;;  %v7506_v52 = vadd.f32 %v7505_v51, %v7504_v25  ;;  %v7507_v22 = vpop.f32.mrb[210].mxu1  ;;  %v12147_v0 = vmax.f32 %v12146_v14, 0.0  ;;  %v12158_v14 = vld [vmem:[#allocation32_spill] sm:$0xff] }
 0x627   : > { %v7508_v20 = vpop.f32.mrb[211].mxu1 }
 0x628   : > { %6565 = vst [vmem:[%s11579_s29 + $0x40] sm:$0xff] %v6533_v5  ;;  %v6534_v17 = vadd.f32 %v6502_v16, %v12139_v54  ;;  %v6246_v30 = vadd.f32 %v7506_v52, %v11568_v29  ;;  %v7509_v41 = vadd.f32 %v7508_v20, %v7507_v22  ;;  %v12149_v54 = vmax.f32 %v12148_v28, 0.0 }
 0x62a   : > { %6566 = vst [vmem:[%s11579_s29 + $0x48] sm:$0xff] %v6534_v17  ;;  %v6407_v23 = vadd.f32 %v11439_v1, %v6246_v30  ;;  %v6249_v9 = vadd.f32 %v7509_v41, %v11568_v29  ;;  %v12150_v41 = vld [vmem:[#allocation28_spill] sm:$0xff] }
 0x62c   : > { %v6503_v62 = vmax.f32 %v6407_v23, 0.0  ;;  %v6410_v50 = vadd.f32 %v11446_v60, %v6249_v9  ;;  %v12151_v23 = vmax.f32 %v12150_v41, 0.0 }
 0x62e   : > { %v6535_v8 = vadd.f32 %v6503_v62, %v12141_v44  ;;  %v6504_v53 = vmax.f32 %v6410_v50, 0.0 }
 0x630   : > { %6567 = vst [vmem:[%s11579_s29 + $0x50] sm:$0xff] %v6535_v8  ;;  %v6536_v19 = vadd.f32 %v6504_v53, %v12143_v26 }
 0x632   : > { %6568 = vst [vmem:[%s11579_s29 + $0x58] sm:$0xff] %v6536_v19 }
 0x634   : > { %v7510_v47 = vpop.f32.mrb[212].mxu1 }
 0x635   : > { %v7511_v39 = vpop.f32.mrb[213].mxu1 }
 0x636   : > { %v7512_v45 = vadd.f32 %v7511_v39, %v7510_v47  ;;  %v7513_v63 = vpop.f32.mrb[214].mxu1 }
 0x637   : > { %v7514_v1 = vpop.f32.mrb[215].mxu1 }
 0x638   : > { %v6254_v58 = vadd.f32 %v7512_v45, %v11568_v29  ;;  %v7515_v13 = vadd.f32 %v7514_v1, %v7513_v63  ;;  %v12152_v45 = vld [vmem:[#allocation29_spill] sm:$0xff] }
 0x639   : > { %v12153_v63 = vmax.f32 %v12152_v45, 0.0 }
 0x63a   : > { %v6415_v60 = vadd.f32 %v11468_v61, %v6254_v58  ;;  %v6257_v7 = vadd.f32 %v7515_v13, %v11568_v29 }
 0x63c   : > { %v6505_v49 = vmax.f32 %v6415_v60, 0.0  ;;  %v6418_v10 = vadd.f32 %v11474_v31, %v6257_v7  ;;  %v7516_v18 = vpop.f32.mrb[216].mxu1 }
 0x63d   : > { %v7517_v55 = vpop.f32.mrb[217].mxu1 }
 0x63e   : > { %v6537_v24 = vadd.f32 %v6505_v49, %v12145_v34  ;;  %v6506_v33 = vmax.f32 %v6418_v10, 0.0  ;;  %v7518_v56 = vadd.f32 %v7517_v55, %v7516_v18  ;;  %v7519_v25 = vpop.f32.mrb[218].mxu1  ;;  %v12154_v49 = vld [vmem:[#allocation30_spill] sm:$0xff] }
 0x63f   : > { %v7520_v51 = vpop.f32.mrb[219].mxu1  ;;  %v12155_v10 = vmax.f32 %v12154_v49, 0.0 }
 0x640   : > { %6569 = vst [vmem:[%s11579_s29 + $0x60] sm:$0xff] %v6537_v24  ;;  %v6538_v61 = vadd.f32 %v6506_v33, %v12147_v0  ;;  %v6262_v5 = vadd.f32 %v7518_v56, %v11568_v29  ;;  %v7521_v16 = vadd.f32 %v7520_v51, %v7519_v25  ;;  %v12156_v33 = vld [vmem:[#allocation31_spill] sm:$0xff]  ;;  %v12159_v0 = vmax.f32 %v12158_v14, 0.0 }
 0x641   : > { %v12157_v56 = vmax.f32 %v12156_v33, 0.0 }
 0x642   : > { %6570 = vst [vmem:[%s11579_s29 + $0x68] sm:$0xff] %v6538_v61  ;;  %v6423_v31 = vadd.f32 %v11462_v12, %v6262_v5  ;;  %v6265_v52 = vadd.f32 %v7521_v16, %v11568_v29 }
 0x644   : > { %v6507_v22 = vmax.f32 %v6423_v31, 0.0  ;;  %v6426_v20 = vadd.f32 %v11472_v32, %v6265_v52 }
 0x646   : > { %v6539_v17 = vadd.f32 %v6507_v22, %v12149_v54  ;;  %v6508_v30 = vmax.f32 %v6426_v20, 0.0 }
 0x648   : > { %6571 = vst [vmem:[%s11579_s29 + $0x70] sm:$0xff] %v6539_v17  ;;  %v6540_v9 = vadd.f32 %v6508_v30, %v12151_v23  ;;  %v12160_v23 = vld [vmem:[#allocation33_spill] sm:$0xff] }
 0x64a   : > { %6572 = vst [vmem:[%s11579_s29 + $0x78] sm:$0xff] %v6540_v9  ;;  %v12161_v9 = vmax.f32 %v12160_v23, 0.0 }
 0x64d   : > { %v7522_v62 = vpop.f32.mrb[220].mxu1 }
 0x64e   : > { %v7523_v50 = vpop.f32.mrb[221].mxu1 }
 0x64f   : > { %v7524_v15 = vadd.f32 %v7523_v50, %v7522_v62  ;;  %v7525_v44 = vpop.f32.mrb[222].mxu1 }
 0x650   : > { %v7526_v12 = vpop.f32.mrb[223].mxu1 }
 0x651   : > { %v6270_v8 = vadd.f32 %v7524_v15, %v11568_v29  ;;  %v7527_v53 = vadd.f32 %v7526_v12, %v7525_v44 }
 0x653   : > { %v6431_v32 = vadd.f32 %v11488_v37, %v6270_v8  ;;  %v6273_v3 = vadd.f32 %v7527_v53, %v11568_v29  ;;  %v12162_v8 = vld [vmem:[#allocation34_spill] sm:$0xff] }
 0x654   : > { %v12163_v53 = vmax.f32 %v12162_v8, 0.0 }
 0x655   : > { %v6509_v26 = vmax.f32 %v6431_v32, 0.0  ;;  %v6434_v19 = vadd.f32 %v11496_v21, %v6273_v3  ;;  %v7528_v47 = vpop.f32.mrb[224].mxu1 }
 0x656   : > { %v7529_v39 = vpop.f32.mrb[225].mxu1 }
 0x657   : > { %v6541_v1 = vadd.f32 %v6509_v26, %v12153_v63  ;;  %v6510_v58 = vmax.f32 %v6434_v19, 0.0  ;;  %v7530_v13 = vadd.f32 %v7529_v39, %v7528_v47  ;;  %v7531_v60 = vpop.f32.mrb[226].mxu1  ;;  %v12164_v63 = vld [vmem:[#allocation35_spill] sm:$0xff] }
 0x658   : > { %v7532_v7 = vpop.f32.mrb[227].mxu1 }
 0x659   : > { %6573 = vst [vmem:[%s11579_s29 + $0x80] sm:$0xff] %v6541_v1  ;;  %v6542_v37 = vadd.f32 %v6510_v58, %v12155_v10  ;;  %v6278_v18 = vadd.f32 %v7530_v13, %v11568_v29  ;;  %v7533_v55 = vadd.f32 %v7532_v7, %v7531_v60  ;;  %v12165_v1 = vmax.f32 %v12164_v63, 0.0  ;;  %v12166_v10 = vld [vmem:[#allocation36_spill] sm:$0xff] }
 0x65b   : > { %6574 = vst [vmem:[%s11579_s29 + $0x88] sm:$0xff] %v6542_v37  ;;  %v6439_v21 = vadd.f32 %v11486_v57, %v6278_v18  ;;  %v6281_v11 = vadd.f32 %v7533_v55, %v11568_v29  ;;  %v12167_v37 = vmax.f32 %v12166_v10, 0.0 }
 0x65d   : > { %v6511_v34 = vmax.f32 %v6439_v21, 0.0  ;;  %v6442_v24 = vadd.f32 %v11494_v38, %v6281_v11 }
 0x65f   : > { %v6543_v25 = vadd.f32 %v6511_v34, %v12157_v56  ;;  %v6512_v51 = vmax.f32 %v6442_v24, 0.0  ;;  %v12168_v56 = vld [vmem:[#allocation37_spill] sm:$0xff] }
 0x660   : > { %v7534_v5 = vpop.f32.mrb[228].mxu1 }
 0x661   : > { %6575 = vst [vmem:[%s11579_s29 + $0x90] sm:$0xff] %v6543_v25  ;;  %v6544_v61 = vadd.f32 %v6512_v51, %v12159_v0  ;;  %v7535_v16 = vpop.f32.mrb[229].mxu1  ;;  %v12169_v25 = vmax.f32 %v12168_v56, 0.0 }
 0x662   : > { %v7536_v31 = vadd.f32 %v7535_v16, %v7534_v5  ;;  %v7537_v52 = vpop.f32.mrb[230].mxu1  ;;  %v12170_v16 = vld [vmem:[#allocation38_spill] sm:$0xff] }
 0x663   : > { %6576 = vst [vmem:[%s11579_s29 + $0x98] sm:$0xff] %v6544_v61  ;;  %v7538_v57 = vpop.f32.mrb[231].mxu1 }
 0x664   : > { %v6286_v22 = vadd.f32 %v7536_v31, %v11568_v29  ;;  %v7539_v20 = vadd.f32 %v7538_v57, %v7537_v52  ;;  %v12171_v31 = vmax.f32 %v12170_v16, 0.0 }
 0x666   : > { %v6447_v38 = vadd.f32 %v11510_v46, %v6286_v22  ;;  %v6289_v28 = vadd.f32 %v7539_v20, %v11568_v29 }
 0x668   : > { %v6513_v54 = vmax.f32 %v6447_v38, 0.0  ;;  %v6450_v17 = vadd.f32 %v11515_v27, %v6289_v28  ;;  %v7540_v30 = vpop.f32.mrb[232].mxu1 }
 0x669   : > { %v7541_v41 = vpop.f32.mrb[233].mxu1 }
 0x66a   : > { %v6545_v62 = vadd.f32 %v6513_v54, %v12161_v9  ;;  %v6514_v50 = vmax.f32 %v6450_v17, 0.0  ;;  %v7542_v15 = vadd.f32 %v7541_v41, %v7540_v30  ;;  %v7543_v44 = vpop.f32.mrb[234].mxu1  ;;  %v12172_v17 = vld [vmem:[#allocation39_spill] sm:$0xff] }
 0x66b   : > { %v7544_v12 = vpop.f32.mrb[235].mxu1  ;;  %v12173_v30 = vmax.f32 %v12172_v17, 0.0 }
 0x66c   : > { %6577 = vst [vmem:[%s11579_s29 + $0xa0] sm:$0xff] %v6545_v62  ;;  %v6546_v32 = vadd.f32 %v6514_v50, %v12163_v53  ;;  %v6294_v46 = vadd.f32 %v7542_v15, %v11568_v29  ;;  %v7545_v3 = vadd.f32 %v7544_v12, %v7543_v44  ;;  %v12174_v15 = vld [vmem:[#allocation40_spill] sm:$0xff] }
 0x66d   : > { %v12175_v44 = vmax.f32 %v12174_v15, 0.0 }
 0x66e   : > { %6578 = vst [vmem:[%s11579_s29 + $0xa8] sm:$0xff] %v6546_v32  ;;  %v6455_v27 = vadd.f32 %v11504_v48, %v6294_v46  ;;  %v6297_v26 = vadd.f32 %v7545_v3, %v11568_v29 }
 0x670   : > { %v6515_v19 = vmax.f32 %v6455_v27, 0.0  ;;  %v6458_v47 = vadd.f32 %v11513_v6, %v6297_v26  ;;  %v7546_v39 = vpop.f32.mrb[236].mxu1  ;;  %v12176_v26 = vld [vmem:[#allocation41_spill] sm:$0xff] }
 0x671   : > { %v7547_v45 = vpop.f32.mrb[237].mxu1 }
 0x672   : > { %v6547_v58 = vadd.f32 %v6515_v19, %v12165_v1  ;;  %v6516_v13 = vmax.f32 %v6458_v47, 0.0  ;;  %v7548_v60 = vadd.f32 %v7547_v45, %v7546_v39  ;;  %v7549_v7 = vpop.f32.mrb[238].mxu1  ;;  %v12177_v19 = vmax.f32 %v12176_v26, 0.0 }
 0x673   : > { %v7550_v49 = vpop.f32.mrb[239].mxu1 }
 0x674   : > { %6579 = vst [vmem:[%s11579_s29 + $0xb0] sm:$0xff] %v6547_v58  ;;  %v6548_v18 = vadd.f32 %v6516_v13, %v12167_v37  ;;  %v6302_v48 = vadd.f32 %v7548_v60, %v11568_v29  ;;  %v7551_v55 = vadd.f32 %v7550_v49, %v7549_v7  ;;  %v12178_v58 = vld [vmem:[#allocation42_spill] sm:$0xff] }
 0x676   : > { %6580 = vst [vmem:[%s11579_s29 + $0xb8] sm:$0xff] %v6548_v18  ;;  %v6463_v6 = vadd.f32 %v11528_v35, %v6302_v48  ;;  %v6305_v21 = vadd.f32 %v7551_v55, %v11568_v29  ;;  %v12180_v18 = vld [vmem:[#allocation43_spill] sm:$0xff] }
 0x677   : > { %v12181_v48 = vmax.f32 %v12180_v18, 0.0 }
 0x678   : > { %v6517_v11 = vmax.f32 %v6463_v6, 0.0  ;;  %v6466_v34 = vadd.f32 %v11536_v43, %v6305_v21  ;;  %v7552_v24 = vpop.f32.mrb[240].mxu1 }
 0x679   : > { %v7553_v33 = vpop.f32.mrb[241].mxu1 }
 0x67a   : > { %v6549_v51 = vadd.f32 %v6517_v11, %v12169_v25  ;;  %v6518_v14 = vmax.f32 %v6466_v34, 0.0  ;;  %v7554_v0 = vadd.f32 %v7553_v33, %v7552_v24  ;;  %v7555_v61 = vpop.f32.mrb[242].mxu1 }
 0x67b   : > { %v7556_v5 = vpop.f32.mrb[243].mxu1 }
 0x67c   : > { %6581 = vst [vmem:[%s11579_s29 + $0xc0] sm:$0xff] %v6549_v51  ;;  %v6550_v52 = vadd.f32 %v6518_v14, %v12171_v31  ;;  %v6310_v35 = vadd.f32 %v7554_v0, %v11568_v29  ;;  %v7557_v57 = vadd.f32 %v7556_v5, %v7555_v61 }
 0x67e   : > { %6582 = vst [vmem:[%s11579_s29 + $0xc8] sm:$0xff] %v6550_v52  ;;  %v6471_v43 = vadd.f32 %v11524_v42, %v6310_v35  ;;  %v6313_v22 = vadd.f32 %v7557_v57, %v11568_v29 }
 0x680   : > { %v6519_v20 = vmax.f32 %v6471_v43, 0.0  ;;  %v6474_v38 = vadd.f32 %v11534_v36, %v6313_v22  ;;  %v7558_v28 = vpop.f32.mrb[244].mxu1 }
 0x681   : > { %v7559_v54 = vpop.f32.mrb[245].mxu1 }
 0x682   : > { %v6551_v41 = vadd.f32 %v6519_v20, %v12173_v30  ;;  %v6520_v23 = vmax.f32 %v6474_v38, 0.0  ;;  %v7560_v9 = vadd.f32 %v7559_v54, %v7558_v28  ;;  %v7561_v62 = vpop.f32.mrb[246].mxu1 }
 0x683   : > { %v7562_v50 = vpop.f32.mrb[247].mxu1 }
 0x684   : > { %6583 = vst [vmem:[%s11579_s29 + $0xd0] sm:$0xff] %v6551_v41  ;;  %v6552_v12 = vadd.f32 %v6520_v23, %v12175_v44  ;;  %v7563_v42 = vadd.f32 %v7562_v50, %v7561_v62  ;;  %v6318_v8 = vadd.f32 %v7560_v9, %v11568_v29 }
 0x686   : > { %6584 = vst [vmem:[%s11579_s29 + $0xd8] sm:$0xff] %v6552_v12  ;;  %v6479_v36 = vadd.f32 %v11597_v4, %v6318_v8  ;;  %v6321_v53 = vadd.f32 %v7563_v42, %v11568_v29  ;;  %v12179_v4 = vmax.f32 %v12178_v58, 0.0 }
 0x688   : > { %v6521_v32 = vmax.f32 %v6479_v36, 0.0  ;;  %v6482_v46 = vadd.f32 %v11605_v2, %v6321_v53  ;;  %v7564_v3 = vpop.f32.mrb[248].mxu1 }
 0x689   : > { %v7565_v27 = vpop.f32.mrb[249].mxu1 }
 0x68a   : > { %v6553_v47 = vadd.f32 %v6521_v32, %v12177_v19  ;;  %v6522_v39 = vmax.f32 %v6482_v46, 0.0  ;;  %v7566_v45 = vadd.f32 %v7565_v27, %v7564_v3  ;;  %v7567_v63 = vpop.f32.mrb[250].mxu1 }
 0x68b   : > { %v7568_v1 = vpop.f32.mrb[251].mxu1 }
 0x68c   : > { %6585 = vst [vmem:[%s11579_s29 + $0xe0] sm:$0xff] %v6553_v47  ;;  %v6554_v13 = vadd.f32 %v6522_v39, %v12179_v4  ;;  %v6326_v60 = vadd.f32 %v7566_v45, %v11568_v29  ;;  %v7569_v2 = vadd.f32 %v7568_v1, %v7567_v63 }
 0x68e   : > { %6586 = vst [vmem:[%s11579_s29 + $0xe8] sm:$0xff] %v6554_v13  ;;  %v6487_v7 = vadd.f32 %v11595_v59, %v6326_v60  ;;  %v6329_v49 = vadd.f32 %v7569_v2, %v11568_v29  ;;  %v12182_v29 = vld [vmem:[#allocation44_spill] sm:$0xff] }
 0x68f   : > { %v12183_v59 = vmax.f32 %v12182_v29, 0.0 }
 0x690   : > { %v6523_v10 = vmax.f32 %v6487_v7, 0.0  ;;  %v6490_v37 = vadd.f32 %v11603_v40, %v6329_v49 }
 0x692   : > { %v6555_v55 = vadd.f32 %v6523_v10, %v12181_v48  ;;  %v6524_v6 = vmax.f32 %v6490_v37, 0.0 }
 0x694   : > { %6587 = vst [vmem:[%s11579_s29 + $0xf0] sm:$0xff] %v6555_v55  ;;  %v6556_v40 = vadd.f32 %v6524_v6, %v12183_v59 }
 0x696   : > { %6588 = vst [vmem:[%s11579_s29 + $0xf8] sm:$0xff] %v6556_v40 }
 0x697   : > { %7931 = shalt.err (!%p7928_p3)
}
 0x698   : > { %s7932_s17 = scalar_lea.hbm %s11744_s24, 4096  ;;  %s7936_s14 = scalar_lea.hbm %s11804_s9, 8192 }
 0x699   : > { %p7933_p4 = scmp.ne.s32.totalorder %s11744_s24, %s7932_s17  ;;  %p7937_p9 = scmp.lt.u32.totalorder %s11744_s24, %s11804_s9 }
 0x69a   : > { %p7938_p10 = scmp.lt.u32.totalorder %s7936_s14, %s7932_s17  ;;  %p7940_p12 = scmp.lt.u32.totalorder %s7932_s17, %s11744_s24 }
 0x69b   : > { %p7934_p7 = pnand %p7933_p4, %p8077_p5 }
 0x69c   : > { %p7939_p11 = por %p7938_p10, %p7937_p9 }
 0x69d   : > { %p7935_p8 = pneg %p7934_p7 }
 0x69e   : > { %p7941_p13 = por %p7940_p12, %p7939_p11 }
 0x6a0   : > { %p7942_p0 = pnand %p7941_p13, %p7935_p8 }
 0x6a2   : > { %7945 = shalt.err (!%p7942_p0)
}
 0x6a3   : > { %s7987_s25 = smov 128   ;;  %s7988_s26 = smov 8  }
 0x6a4   : > { %7759 = dma.vmem_to_hbm [thread:$0]  (%p8077_p5), %s11746_s16, 4096, %s11744_s24, %s11754_s13, %s7987_s25, %s7987_s25, %s7988_s26  }
 0x6a5 PF: > { %p7765_p1 = scmp.ge.s32.totalorder %s7980_s12, 2  ;;  %s6618_s22 = sand.u32 1, %s7968_s30  }
 0x6a6   : > { %s6619_s27 = scalar_lea.sflag [#allocation5], %s6618_s22 }
 0x6a7   : > { %p7762_p2 = pnand %p7765_p1, %p8081_p6 }
 0x6a9   : > { %7963 = dma.done.wait (!%p7762_p2), %s6619_s27, 4096  }
 0x6aa   : > { %7965 = vsyncadd (!%p7762_p2), %s6619_s27, 4294963200  ;;  %p19_p3 = scmp.ge.s32.totalorder %s8064_s15, 4   ;;  %s12184_s30 = smov %s7972_s10 }
 0x6ab   : > { %s12185_s10 = smov %s7976_s11  ;;  %s12186_s11 = smov %s8075_s18 }
 0x6ac   : > { %s12187_s12 = smov %s8064_s15  ;;  %21 = sbr.rel (!%p19_p3) target bundleno = 3 (0x3), region = 95 }
 0x6b3   :  { %6624 = vsyncpa [#allocation5], 1 }
 0x6b4   :  { %6626 = vsyncpa [#allocation5 + $0x1], 1 }

</bundles_post_ra>
